<compile_context>
chip_gen: v6e
topology: v6e:2x2x1
jax: 0.10.0
libtpu: 0.0.40
codegen_flags: <defaults>
</compile_context>

<pallas_src>
import functools

import jax
import jax.numpy as jnp
from jax.experimental import pallas as pl
from jax.experimental.pallas import tpu as pltpu


def _round_up(x, m):
    return (x + m - 1) // m * m


def dfve_kernel(x_ref,
                w1_ref, b1_ref, w2_ref, b2_ref, w3_ref, b3_ref, w4_ref, b4_ref,
                wh_ref, bh_ref,
                out_ref, *, n_latent):
    """Fused FCEncoder forward for one batch tile.

    4x (Linear + ReLU) in bf16 (f32 accumulate) followed by a single fused
    head matmul producing [mean | sigmoid(std)] along the lane axis.
    """
    h = x_ref[...]  # bf16 (TM, K)

    def layer(h, w_ref, b_ref):
        acc = jnp.dot(h, w_ref[...], preferred_element_type=jnp.float32) + b_ref[...]
        return jnp.maximum(acc, 0.0).astype(jnp.bfloat16)

    h = layer(h, w1_ref, b1_ref)
    h = layer(h, w2_ref, b2_ref)
    h = layer(h, w3_ref, b3_ref)
    h = layer(h, w4_ref, b4_ref)

    head = jnp.dot(h, wh_ref[...], preferred_element_type=jnp.float32) + bh_ref[...]
    col = jax.lax.broadcasted_iota(jnp.int32, head.shape, 1)
    # First n_latent lanes: identity (mean). Remaining lanes: sigmoid (std).
    out_ref[...] = jnp.where(col < n_latent, head, jax.nn.sigmoid(head))


@functools.partial(jax.jit, static_argnames=("n_latent",))
def dfve_forward(x_nchw, params, *, n_latent):
    """DFVE.forward: x (B,C,H,W) -> (z_mean, z_std), each (B, n_latent)."""
    B = x_nchw.shape[0]
    x_flat = x_nchw.reshape(B, -1).astype(jnp.bfloat16)  # matches x.reshape(-1, n_dims_in)

    k_in = params["w1"].shape[0]       # padded input dim
    d_hid = params["w1"].shape[1]      # padded hidden dim (1024)
    n_head = params["wh"].shape[1]     # 2 * n_latent

    # Pad the contraction dim of x if needed (zeros -> math unchanged).
    if x_flat.shape[1] != k_in:
        x_flat = jnp.pad(x_flat, ((0, 0), (0, k_in - x_flat.shape[1])))

    # Batch tiling: amortize the resident-weight load over up to 128 rows/step.
    tm = min(128, _round_up(B, 8))
    b_pad = _round_up(B, tm)
    if b_pad != B:
        x_flat = jnp.pad(x_flat, ((0, b_pad - B), (0, 0)))
    grid = (b_pad // tm,)

    def resident(i):   # weights/biases: same block for every grid step
        return (0, 0)

    in_specs = [
        pl.BlockSpec((tm, k_in), lambda i: (i, 0)),       # x tile
        pl.BlockSpec((k_in, d_hid), resident),            # w1
        pl.BlockSpec((1, d_hid), resident),               # b1
        pl.BlockSpec((d_hid, d_hid), resident),           # w2
        pl.BlockSpec((1, d_hid), resident),               # b2
        pl.BlockSpec((d_hid, d_hid), resident),           # w3
        pl.BlockSpec((1, d_hid), resident),               # b3
        pl.BlockSpec((d_hid, d_hid), resident),           # w4
        pl.BlockSpec((1, d_hid), resident),               # b4
        pl.BlockSpec((d_hid, n_head), resident),          # fused head weight
        pl.BlockSpec((1, n_head), resident),              # fused head bias
    ]
    out_specs = pl.BlockSpec((tm, n_head), lambda i: (i, 0))

    out = pl.pallas_call(
        functools.partial(dfve_kernel, n_latent=n_latent),
        out_shape=jax.ShapeDtypeStruct((b_pad, n_head), jnp.float32),
        grid=grid,
        in_specs=in_specs,
        out_specs=out_specs,
        compiler_params=pltpu.CompilerParams(
            dimension_semantics=("parallel",),
            vmem_limit_bytes=40 * 1024 * 1024,
        ),
    )(
        x_flat,
        params["w1"], params["b1"],
        params["w2"], params["b2"],
        params["w3"], params["b3"],
        params["w4"], params["b4"],
        params["wh"], params["bh"],
    )

    mean = out[:B, :n_latent]
    std = out[:B, n_latent:2 * n_latent]
    return mean, std


def init_dfve_params(key, n_dims_in, n_dims, n_latent):
    """nn.Linear-style init (U[-1/sqrt(fan_in), 1/sqrt(fan_in)]).

    Weights stored transposed (fan_in, fan_out), zero-padded to multiples of
    128 on hidden dims, cast to bf16. Biases (1, fan_out), zero-padded, f32.
    fc_mean / fc_std are fused into a single head of width 2*n_latent.
    """
    k_pad = _round_up(n_dims_in, 128)
    d_pad = _round_up(n_dims, 128)

    def linear(key, fan_in, fan_out, pad_in, pad_out):
        kw, kb = jax.random.split(key)
        bound = 1.0 / jnp.sqrt(fan_in)
        w = jax.random.uniform(kw, (fan_in, fan_out), jnp.float32, -bound, bound)
        b = jax.random.uniform(kb, (1, fan_out), jnp.float32, -bound, bound)
        w = jnp.pad(w, ((0, pad_in - fan_in), (0, pad_out - fan_out)))
        b = jnp.pad(b, ((0, 0), (0, pad_out - fan_out)))
        return w.astype(jnp.bfloat16), b  # weights bf16, bias f32

    keys = jax.random.split(key, 6)
    p = {}
    p["w1"], p["b1"] = linear(keys[0], n_dims_in, n_dims, k_pad, d_pad)
    p["w2"], p["b2"] = linear(keys[1], n_dims, n_dims, d_pad, d_pad)
    p["w3"], p["b3"] = linear(keys[2], n_dims, n_dims, d_pad, d_pad)
    p["w4"], p["b4"] = linear(keys[3], n_dims, n_dims, d_pad, d_pad)
    wm, bm = linear(keys[4], n_dims, n_latent, d_pad, n_latent)
    ws, bs = linear(keys[5], n_dims, n_latent, d_pad, n_latent)
    p["wh"] = jnp.concatenate([wm, ws], axis=1)   # (d_pad, 2*n_latent)
    p["bh"] = jnp.concatenate([bm, bs], axis=1)   # (1, 2*n_latent)
    return p


def dfve_forward_ref(x_nchw, params, n_latent):
    """Pure-JAX reference with identical (bf16-weight, f32-accumulate) math."""
    B = x_nchw.shape[0]
    h = x_nchw.reshape(B, -1).astype(jnp.bfloat16)
    k_in = params["w1"].shape[0]
    if h.shape[1] != k_in:
        h = jnp.pad(h, ((0, 0), (0, k_in - h.shape[1])))

    def layer(h, w, b):
        acc = jnp.dot(h, w, preferred_element_type=jnp.float32) + b
        return jnp.maximum(acc, 0.0).astype(jnp.bfloat16)

    h = layer(h, params["w1"], params["b1"])
    h = layer(h, params["w2"], params["b2"])
    h = layer(h, params["w3"], params["b3"])
    h = layer(h, params["w4"], params["b4"])
    head = jnp.dot(h, params["wh"], preferred_element_type=jnp.float32) + params["bh"]
    mean = head[:, :n_latent]
    std = jax.nn.sigmoid(head[:, n_latent:2 * n_latent])
    return mean, std


if __name__ == "__main__":
    # Module config (DFVE / FCEncoder defaults: n_dims=1000).
    image_channels = 4
    image_size = 16
    n_latent = 8
    n_dims = 1000
    n_dims_in = image_channels * image_size * image_size  # 1024
    batch = 2

    key = jax.random.PRNGKey(0)
    k_params, k_x = jax.random.split(key)

    params = init_dfve_params(k_params, n_dims_in, n_dims, n_latent)
    x = jax.random.normal(k_x, (batch, image_channels, image_size, image_size), jnp.float32)

    z_mean, z_std = dfve_forward(x, params, n_latent=n_latent)
    jax.block_until_ready((z_mean, z_std))

    ref_mean, ref_std = dfve_forward_ref(x, params, n_latent)
    assert z_mean.shape == (batch, n_latent) and z_std.shape == (batch, n_latent)
    assert jnp.allclose(z_mean, ref_mean, rtol=2e-2, atol=2e-2)
    assert jnp.allclose(z_std, ref_std, rtol=2e-2, atol=2e-2)

    print("KERNEL_OK")
</pallas_src>

<mosaic_0001>
module attributes {stable_mosaic.version = 11 : i64} {
  func.func @dfve_kernel(%arg0: i32, %arg1: memref<8x1024xbf16, #tpu.memory_space<vmem>>, %arg2: memref<1024x1024xbf16, #tpu.memory_space<vmem>>, %arg3: memref<1x1024xf32, #tpu.memory_space<vmem>>, %arg4: memref<1024x1024xbf16, #tpu.memory_space<vmem>>, %arg5: memref<1x1024xf32, #tpu.memory_space<vmem>>, %arg6: memref<1024x1024xbf16, #tpu.memory_space<vmem>>, %arg7: memref<1x1024xf32, #tpu.memory_space<vmem>>, %arg8: memref<1024x1024xbf16, #tpu.memory_space<vmem>>, %arg9: memref<1x1024xf32, #tpu.memory_space<vmem>>, %arg10: memref<1024x16xbf16, #tpu.memory_space<vmem>>, %arg11: memref<1x16xf32, #tpu.memory_space<vmem>>, %arg12: memref<8x16xf32, #tpu.memory_space<vmem>>) attributes {dimension_semantics = [#tpu.dimension_semantics<parallel>], iteration_bounds = array<i64: 1>, scalar_prefetch = 0 : i64, scratch_operands = 0 : i64, tpu.core_type = #tpu.core_type<tc>, window_params = [{transform_indices = @transform_0, window_bounds = array<i64: 8, 1024>}, {pipeline_mode = #tpu.pipeline_mode<synchronous>, transform_indices = @transform_1, window_bounds = array<i64: 1024, 1024>}, {pipeline_mode = #tpu.pipeline_mode<synchronous>, transform_indices = @transform_2, window_bounds = array<i64: 1, 1024>}, {pipeline_mode = #tpu.pipeline_mode<synchronous>, transform_indices = @transform_3, window_bounds = array<i64: 1024, 1024>}, {pipeline_mode = #tpu.pipeline_mode<synchronous>, transform_indices = @transform_4, window_bounds = array<i64: 1, 1024>}, {pipeline_mode = #tpu.pipeline_mode<synchronous>, transform_indices = @transform_5, window_bounds = array<i64: 1024, 1024>}, {pipeline_mode = #tpu.pipeline_mode<synchronous>, transform_indices = @transform_6, window_bounds = array<i64: 1, 1024>}, {pipeline_mode = #tpu.pipeline_mode<synchronous>, transform_indices = @transform_7, window_bounds = array<i64: 1024, 1024>}, {pipeline_mode = #tpu.pipeline_mode<synchronous>, transform_indices = @transform_8, window_bounds = array<i64: 1, 1024>}, {pipeline_mode = #tpu.pipeline_mode<synchronous>, transform_indices = @transform_9, window_bounds = array<i64: 1024, 16>}, {pipeline_mode = #tpu.pipeline_mode<synchronous>, transform_indices = @transform_10, window_bounds = array<i64: 1, 16>}, {transform_indices = @transform_11, window_bounds = array<i64: 8, 16>}]} {
    %c0 = arith.constant 0 : index
    %c0_0 = arith.constant 0 : index
    %0 = vector.load %arg1[%c0, %c0_0] : memref<8x1024xbf16, #tpu.memory_space<vmem>>, vector<8x1024xbf16>
    %c0_1 = arith.constant 0 : index
    %c0_2 = arith.constant 0 : index
    %1 = vector.load %arg2[%c0_1, %c0_2] : memref<1024x1024xbf16, #tpu.memory_space<vmem>>, vector<1024x1024xbf16>
    %cst = arith.constant dense<0.000000e+00> : vector<8x1024xf32>
    %2 = tpu.matmul %0, %1, %cst {dimension_numbers = #tpu.dot_dimension_numbers<[1], [0], [0], [1], [0, 0, 1, 1], [], []>} : vector<8x1024xbf16>, vector<1024x1024xbf16>, vector<8x1024xf32> -> vector<8x1024xf32>
    %c0_3 = arith.constant 0 : index
    %c0_4 = arith.constant 0 : index
    %3 = vector.load %arg3[%c0_3, %c0_4] : memref<1x1024xf32, #tpu.memory_space<vmem>>, vector<1x1024xf32>
    %4 = vector.broadcast %3 : vector<1x1024xf32> to vector<8x1024xf32>
    %5 = arith.addf %2, %4 : vector<8x1024xf32>
    %cst_5 = arith.constant 0.000000e+00 : f32
    %6 = vector.broadcast %cst_5 : f32 to vector<8x1024xf32>
    %7 = arith.maximumf %5, %6 : vector<8x1024xf32>
    %8 = arith.truncf %7 : vector<8x1024xf32> to vector<8x1024xbf16>
    %c0_6 = arith.constant 0 : index
    %c0_7 = arith.constant 0 : index
    %9 = vector.load %arg4[%c0_6, %c0_7] : memref<1024x1024xbf16, #tpu.memory_space<vmem>>, vector<1024x1024xbf16>
    %cst_8 = arith.constant dense<0.000000e+00> : vector<8x1024xf32>
    %10 = tpu.matmul %8, %9, %cst_8 {dimension_numbers = #tpu.dot_dimension_numbers<[1], [0], [0], [1], [0, 0, 1, 1], [], []>} : vector<8x1024xbf16>, vector<1024x1024xbf16>, vector<8x1024xf32> -> vector<8x1024xf32>
    %c0_9 = arith.constant 0 : index
    %c0_10 = arith.constant 0 : index
    %11 = vector.load %arg5[%c0_9, %c0_10] : memref<1x1024xf32, #tpu.memory_space<vmem>>, vector<1x1024xf32>
    %12 = vector.broadcast %11 : vector<1x1024xf32> to vector<8x1024xf32>
    %13 = arith.addf %10, %12 : vector<8x1024xf32>
    %cst_11 = arith.constant 0.000000e+00 : f32
    %14 = vector.broadcast %cst_11 : f32 to vector<8x1024xf32>
    %15 = arith.maximumf %13, %14 : vector<8x1024xf32>
    %16 = arith.truncf %15 : vector<8x1024xf32> to vector<8x1024xbf16>
    %c0_12 = arith.constant 0 : index
    %c0_13 = arith.constant 0 : index
    %17 = vector.load %arg6[%c0_12, %c0_13] : memref<1024x1024xbf16, #tpu.memory_space<vmem>>, vector<1024x1024xbf16>
    %cst_14 = arith.constant dense<0.000000e+00> : vector<8x1024xf32>
    %18 = tpu.matmul %16, %17, %cst_14 {dimension_numbers = #tpu.dot_dimension_numbers<[1], [0], [0], [1], [0, 0, 1, 1], [], []>} : vector<8x1024xbf16>, vector<1024x1024xbf16>, vector<8x1024xf32> -> vector<8x1024xf32>
    %c0_15 = arith.constant 0 : index
    %c0_16 = arith.constant 0 : index
    %19 = vector.load %arg7[%c0_15, %c0_16] : memref<1x1024xf32, #tpu.memory_space<vmem>>, vector<1x1024xf32>
    %20 = vector.broadcast %19 : vector<1x1024xf32> to vector<8x1024xf32>
    %21 = arith.addf %18, %20 : vector<8x1024xf32>
    %cst_17 = arith.constant 0.000000e+00 : f32
    %22 = vector.broadcast %cst_17 : f32 to vector<8x1024xf32>
    %23 = arith.maximumf %21, %22 : vector<8x1024xf32>
    %24 = arith.truncf %23 : vector<8x1024xf32> to vector<8x1024xbf16>
    %c0_18 = arith.constant 0 : index
    %c0_19 = arith.constant 0 : index
    %25 = vector.load %arg8[%c0_18, %c0_19] : memref<1024x1024xbf16, #tpu.memory_space<vmem>>, vector<1024x1024xbf16>
    %cst_20 = arith.constant dense<0.000000e+00> : vector<8x1024xf32>
    %26 = tpu.matmul %24, %25, %cst_20 {dimension_numbers = #tpu.dot_dimension_numbers<[1], [0], [0], [1], [0, 0, 1, 1], [], []>} : vector<8x1024xbf16>, vector<1024x1024xbf16>, vector<8x1024xf32> -> vector<8x1024xf32>
    %c0_21 = arith.constant 0 : index
    %c0_22 = arith.constant 0 : index
    %27 = vector.load %arg9[%c0_21, %c0_22] : memref<1x1024xf32, #tpu.memory_space<vmem>>, vector<1x1024xf32>
    %28 = vector.broadcast %27 : vector<1x1024xf32> to vector<8x1024xf32>
    %29 = arith.addf %26, %28 : vector<8x1024xf32>
    %cst_23 = arith.constant 0.000000e+00 : f32
    %30 = vector.broadcast %cst_23 : f32 to vector<8x1024xf32>
    %31 = arith.maximumf %29, %30 : vector<8x1024xf32>
    %32 = arith.truncf %31 : vector<8x1024xf32> to vector<8x1024xbf16>
    %c0_24 = arith.constant 0 : index
    %c0_25 = arith.constant 0 : index
    %33 = vector.load %arg10[%c0_24, %c0_25] : memref<1024x16xbf16, #tpu.memory_space<vmem>>, vector<1024x16xbf16>
    %cst_26 = arith.constant dense<0.000000e+00> : vector<8x16xf32>
    %34 = tpu.matmul %32, %33, %cst_26 {dimension_numbers = #tpu.dot_dimension_numbers<[1], [0], [0], [1], [0, 0, 1, 1], [], []>} : vector<8x1024xbf16>, vector<1024x16xbf16>, vector<8x16xf32> -> vector<8x16xf32>
    %c0_27 = arith.constant 0 : index
    %c0_28 = arith.constant 0 : index
    %35 = vector.load %arg11[%c0_27, %c0_28] : memref<1x16xf32, #tpu.memory_space<vmem>>, vector<1x16xf32>
    %36 = vector.broadcast %35 : vector<1x16xf32> to vector<8x16xf32>
    %37 = arith.addf %34, %36 : vector<8x16xf32>
    %38 = tpu.iota {dimensions = array<i32: 1>} : vector<8x16xi32>
    %c8_i32 = arith.constant 8 : i32
    %39 = vector.broadcast %c8_i32 : i32 to vector<8x16xi32>
    %40 = arith.cmpi slt, %38, %39 : vector<8x16xi32>
    %41 = arith.negf %37 : vector<8x16xf32>
    %42 = math.exp %41 : vector<8x16xf32>
    %cst_29 = arith.constant 1.000000e+00 : f32
    %43 = vector.broadcast %cst_29 : f32 to vector<8x16xf32>
    %44 = arith.addf %43, %42 : vector<8x16xf32>
    %45 = arith.divf %43, %44 : vector<8x16xf32>
    %46 = arith.select %40, %37, %45 : vector<8x16xi1>, vector<8x16xf32>
    %c0_30 = arith.constant 0 : index
    %c0_31 = arith.constant 0 : index
    %47 = vector.load %arg12[%c0_30, %c0_31] : memref<8x16xf32, #tpu.memory_space<vmem>>, vector<8x16xf32>
    tpu.vector_store %arg12[%c0_30, %c0_31], %46 {strides = array<i32>} : memref<8x16xf32, #tpu.memory_space<vmem>>, vector<8x16xf32>,
    return
  }
  func.func @transform_0(%arg0: i32) -> (i32, i32) {
    %c0_i32 = arith.constant 0 : i32
    %c0_i32_0 = arith.constant 0 : i32
    return %arg0, %c0_i32 : i32, i32
  }
  func.func @transform_1(%arg0: i32) -> (i32, i32) {
    %c0_i32 = arith.constant 0 : i32
    %c0_i32_0 = arith.constant 0 : i32
    %c0_i32_1 = arith.constant 0 : i32
    return %c0_i32, %c0_i32_0 : i32, i32
  }
  func.func @transform_2(%arg0: i32) -> (i32, i32) {
    %c0_i32 = arith.constant 0 : i32
    %c0_i32_0 = arith.constant 0 : i32
    %c0_i32_1 = arith.constant 0 : i32
    return %c0_i32, %c0_i32_0 : i32, i32
  }
  func.func @transform_3(%arg0: i32) -> (i32, i32) {
    %c0_i32 = arith.constant 0 : i32
    %c0_i32_0 = arith.constant 0 : i32
    %c0_i32_1 = arith.constant 0 : i32
    return %c0_i32, %c0_i32_0 : i32, i32
  }
  func.func @transform_4(%arg0: i32) -> (i32, i32) {
    %c0_i32 = arith.constant 0 : i32
    %c0_i32_0 = arith.constant 0 : i32
    %c0_i32_1 = arith.constant 0 : i32
    return %c0_i32, %c0_i32_0 : i32, i32
  }
  func.func @transform_5(%arg0: i32) -> (i32, i32) {
    %c0_i32 = arith.constant 0 : i32
    %c0_i32_0 = arith.constant 0 : i32
    %c0_i32_1 = arith.constant 0 : i32
    return %c0_i32, %c0_i32_0 : i32, i32
  }
  func.func @transform_6(%arg0: i32) -> (i32, i32) {
    %c0_i32 = arith.constant 0 : i32
    %c0_i32_0 = arith.constant 0 : i32
    %c0_i32_1 = arith.constant 0 : i32
    return %c0_i32, %c0_i32_0 : i32, i32
  }
  func.func @transform_7(%arg0: i32) -> (i32, i32) {
    %c0_i32 = arith.constant 0 : i32
    %c0_i32_0 = arith.constant 0 : i32
    %c0_i32_1 = arith.constant 0 : i32
    return %c0_i32, %c0_i32_0 : i32, i32
  }
  func.func @transform_8(%arg0: i32) -> (i32, i32) {
    %c0_i32 = arith.constant 0 : i32
    %c0_i32_0 = arith.constant 0 : i32
    %c0_i32_1 = arith.constant 0 : i32
    return %c0_i32, %c0_i32_0 : i32, i32
  }
  func.func @transform_9(%arg0: i32) -> (i32, i32) {
    %c0_i32 = arith.constant 0 : i32
    %c0_i32_0 = arith.constant 0 : i32
    %c0_i32_1 = arith.constant 0 : i32
    return %c0_i32, %c0_i32_0 : i32, i32
  }
  func.func @transform_10(%arg0: i32) -> (i32, i32) {
    %c0_i32 = arith.constant 0 : i32
    %c0_i32_0 = arith.constant 0 : i32
    %c0_i32_1 = arith.constant 0 : i32
    return %c0_i32, %c0_i32_0 : i32, i32
  }
  func.func @transform_11(%arg0: i32) -> (i32, i32) {
    %c0_i32 = arith.constant 0 : i32
    %c0_i32_0 = arith.constant 0 : i32
    return %arg0, %c0_i32 : i32, i32
  }
}

</mosaic_0001>

<bundles_post_ra>
// kernel: dfve_forward.1
= control target key start
LH: loop header
LB: loop body
LE: loop exit
PB: predicated region body
PF: predicated region fallthrough
CT: control target
= control target key end

     0   :  { %16 = vsyncpa [#allocation3], 0  ;;  %s19454_s0 = inlined_call_operand.vmem [shape: bf16[8,1024], index: 0, kind: input, shape index: {}]   ;;  %s19455_s1 = inlined_call_operand.hbm [shape: bf16[1024,1024], index: 1, kind: input, shape index: {}]   ;;  %s19456_s2 = inlined_call_operand.hbm [shape: f32[1,1024], index: 2, kind: input, shape index: {}]   ;;  %s19457_s3 = inlined_call_operand.hbm [shape: bf16[1024,1024], index: 3, kind: input, shape index: {}]   ;;  %s19458_s4 = inlined_call_operand.hbm [shape: f32[1,1024], index: 4, kind: input, shape index: {}]   ;;  %s19459_s5 = inlined_call_operand.hbm [shape: bf16[1024,1024], index: 5, kind: input, shape index: {}]   ;;  %s19460_s6 = inlined_call_operand.hbm [shape: f32[1,1024], index: 6, kind: input, shape index: {}]   ;;  %s19461_s7 = inlined_call_operand.hbm [shape: bf16[1024,1024], index: 7, kind: input, shape index: {}]   ;;  %s19462_s8 = inlined_call_operand.hbm [shape: f32[1,1024], index: 8, kind: input, shape index: {}]   ;;  %s19463_s9 = inlined_call_operand.vmem [shape: bf16[1024,16], index: 9, kind: input, shape index: {}]   ;;  %s19464_s10 = inlined_call_operand.hbm [shape: f32[1,16], index: 10, kind: input, shape index: {}]   ;;  %s19465_s11 = inlined_call_operand.vmem [shape: f32[8,16], index: 11, kind: output, shape index: {}]  }
   0x1   :  { %17 = vsyncpa [#allocation5], 0 }
   0x2   :  { %18 = vsyncpa [#allocation8], 0 }
   0x3   :  { %19 = vsyncpa [#allocation11], 0 }
   0x4   :  { %20 = vsyncpa [#allocation14], 0  ;;  %s18521_s17 = smov [#allocation4]   ;;  %s18522_s19 = smov [#allocation7]  }
   0x5   :  { %s41_s18 = sshll.u32 %s18521_s17, 4  ;;  %s63_s20 = sshll.u32 %s18522_s19, 4  ;;  %s42_s18 = int_to_ptr.vmem [resolvable:$true] %s41_s18  ;;  %s64_s20 = int_to_ptr.vmem [resolvable:$true] %s63_s20 }
   0x6   :  { %s18339_s21 = scalar_lea.vmem %s42_s18, 128  ;;  %p18344_p1 = scmp.lt.s32.totalorder %s42_s18, %s42_s18 }
   0x7   :  { %p18340_p0 = scmp.ne.s32.totalorder %s42_s18, %s18339_s21  ;;  %p18345_p2 = scmp.lt.s32.totalorder %s18339_s21, %s18339_s21 }
   0x9   :  { %p18346_p3 = por %p18345_p2, %p18344_p1 }
   0xb   :  { %p18347_p4 = pnand %p18346_p3, %p18340_p0 }
   0xd   :  { %18350 = shalt.err (!%p18347_p4)
}
   0xe   :  { %44 = dma.hbm_to_vmem [thread:$0]  %s19456_s2, 128, %s42_s18, [#allocation5]  }
   0xf   :  { %s18359_s24 = scalar_lea.vmem %s64_s20, 128  ;;  %p18364_p6 = scmp.lt.s32.totalorder %s64_s20, %s64_s20 }
  0x10   :  { %p18360_p5 = scmp.ne.s32.totalorder %s64_s20, %s18359_s24  ;;  %p18365_p7 = scmp.lt.s32.totalorder %s18359_s24, %s18359_s24 }
  0x12   :  { %p18366_p8 = por %p18365_p7, %p18364_p6 }
  0x14   :  { %p18367_p9 = pnand %p18366_p8, %p18360_p5 }
  0x16   :  { %18370 = shalt.err (!%p18367_p9)
}
  0x17   :  { %66 = dma.hbm_to_vmem [thread:$0]  %s19458_s4, 128, %s64_s20, [#allocation8]  }
  0x18   :  { %s18523_s27 = smov [#allocation10]   ;;  %s18524_s29 = smov [#allocation13]  }
  0x19   :  { %s85_s28 = sshll.u32 %s18523_s27, 4  ;;  %s107_s30 = sshll.u32 %s18524_s29, 4  ;;  %s86_s28 = int_to_ptr.vmem [resolvable:$true] %s85_s28  ;;  %s108_s30 = int_to_ptr.vmem [resolvable:$true] %s107_s30 }
  0x1a   :  { %s18379_s12 = scalar_lea.vmem %s86_s28, 128  ;;  %p18384_p11 = scmp.lt.s32.totalorder %s86_s28, %s86_s28 }
  0x1b   :  { %p18380_p10 = scmp.ne.s32.totalorder %s86_s28, %s18379_s12  ;;  %p18385_p12 = scmp.lt.s32.totalorder %s18379_s12, %s18379_s12 }
  0x1d   :  { %p18386_p13 = por %p18385_p12, %p18384_p11 }
  0x1f   :  { %p18387_p0 = pnand %p18386_p13, %p18380_p10 }
  0x21   :  { %18390 = shalt.err (!%p18387_p0)
}
  0x22   :  { %88 = dma.hbm_to_vmem [thread:$0]  %s19460_s6, 128, %s86_s28, [#allocation11]  }
  0x23   :  { %s18399_s14 = scalar_lea.vmem %s108_s30, 128  ;;  %p18404_p2 = scmp.lt.s32.totalorder %s108_s30, %s108_s30 }
  0x24   :  { %p18400_p1 = scmp.ne.s32.totalorder %s108_s30, %s18399_s14  ;;  %p18405_p3 = scmp.lt.s32.totalorder %s18399_s14, %s18399_s14 }
  0x26   :  { %p18406_p4 = por %p18405_p3, %p18404_p2 }
  0x28   :  { %p18407_p5 = pnand %p18406_p4, %p18400_p1 }
  0x2a   :  { %18410 = shalt.err (!%p18407_p5)
}
  0x2b   :  { %110 = dma.hbm_to_vmem [thread:$0]  %s19462_s8, 128, %s108_s30, [#allocation14]  }
  0x2c   :  { %s18525_s16 = smov [#allocation2]  }
  0x2d   :  { %s28_s17 = sshll.u32 %s18525_s16, 4  ;;  %s29_s17 = int_to_ptr.vmem [resolvable:$true] %s28_s17 }
  0x2e   :  { %s18419_s18 = scalar_lea.vmem %s29_s17, 65536  ;;  %p18424_p7 = scmp.lt.s32.totalorder %s29_s17, %s29_s17 }
  0x2f   :  { %p18420_p6 = scmp.ne.s32.totalorder %s29_s17, %s18419_s18  ;;  %p18425_p8 = scmp.lt.s32.totalorder %s18419_s18, %s18419_s18 }
  0x31   :  { %p18426_p9 = por %p18425_p8, %p18424_p7 }
  0x33   :  { %p18427_p10 = pnand %p18426_p9, %p18420_p6 }
  0x35   :  { %18430 = shalt.err (!%p18427_p10)
}
  0x36   :  { %s18526_s6 = smov 512   ;;  %s18527_s19 = smov 32  }
  0x37   :  { %34 = dma.hbm_to_vmem [thread:$0]  %s19455_s1, 65536, %s29_s17, [#allocation3], %s18526_s6, %s18526_s6, %s18527_s19  }
  0x38   :  { %s18528_s8 = smov [#allocation6]   ;;  %s18529_s23 = smov [#allocation9]  }
  0x39   :  { %s50_s22 = sshll.u32 %s18528_s8, 4  ;;  %s72_s24 = sshll.u32 %s18529_s23, 4  ;;  %s51_s22 = int_to_ptr.vmem [resolvable:$true] %s50_s22  ;;  %s73_s24 = int_to_ptr.vmem [resolvable:$true] %s72_s24 }
  0x3a   :  { %s18439_s25 = scalar_lea.vmem %s51_s22, 65536  ;;  %p18444_p12 = scmp.lt.s32.totalorder %s51_s22, %s51_s22 }
  0x3b   :  { %p18440_p11 = scmp.ne.s32.totalorder %s51_s22, %s18439_s25  ;;  %p18445_p13 = scmp.lt.s32.totalorder %s18439_s25, %s18439_s25 }
  0x3d   :  { %p18446_p0 = por %p18445_p13, %p18444_p12 }
  0x3f   :  { %p18447_p1 = pnand %p18446_p0, %p18440_p11 }
  0x41   :  { %18450 = shalt.err (!%p18447_p1)
}
  0x42   :  { %56 = dma.hbm_to_vmem [thread:$0]  %s19457_s3, 65536, %s51_s22, [#allocation5], %s18526_s6, %s18526_s6, %s18527_s19  }
  0x43   :  { %s18459_s1 = scalar_lea.vmem %s73_s24, 65536  ;;  %p18464_p3 = scmp.lt.s32.totalorder %s73_s24, %s73_s24 }
  0x44   :  { %p18460_p2 = scmp.ne.s32.totalorder %s73_s24, %s18459_s1  ;;  %p18465_p4 = scmp.lt.s32.totalorder %s18459_s1, %s18459_s1 }
  0x46   :  { %p18466_p5 = por %p18465_p4, %p18464_p3 }
  0x48   :  { %p18467_p6 = pnand %p18466_p5, %p18460_p2 }
  0x4a   :  { %18470 = shalt.err (!%p18467_p6)
}
  0x4b   :  { %78 = dma.hbm_to_vmem [thread:$0]  %s19459_s5, 65536, %s73_s24, [#allocation8], %s18526_s6, %s18526_s6, %s18527_s19  }
  0x4c   :  { %s18530_s30 = smov [#allocation12]   ;;  %s18531_s2 = smov [#allocation15]  }
  0x4d   :  { %s94_s12 = sshll.u32 %s18530_s30, 4  ;;  %s119_s3 = sshll.u32 %s18531_s2, 4  ;;  %s95_s12 = int_to_ptr.vmem [resolvable:$true] %s94_s12  ;;  %s120_s3 = int_to_ptr.vmem [resolvable:$true] %s119_s3 }
  0x4e   :  { %s18479_s13 = scalar_lea.vmem %s95_s12, 65536  ;;  %p18484_p8 = scmp.lt.s32.totalorder %s95_s12, %s95_s12 }
  0x4f   :  { %p18480_p7 = scmp.ne.s32.totalorder %s95_s12, %s18479_s13  ;;  %p18485_p9 = scmp.lt.s32.totalorder %s18479_s13, %s18479_s13 }
  0x51   :  { %p18486_p10 = por %p18485_p9, %p18484_p8 }
  0x53   :  { %p18487_p11 = pnand %p18486_p10, %p18480_p7 }
  0x55   :  { %18490 = shalt.err (!%p18487_p11)
}
  0x56   :  { %100 = dma.hbm_to_vmem [thread:$0]  %s19461_s7, 65536, %s95_s12, [#allocation11], %s18526_s6, %s18526_s6, %s18527_s19  }
  0x57   :  { %s18499_s5 = scalar_lea.vmem %s120_s3, 16  ;;  %s18503_s15 = scalar_lea.vmem %s120_s3, 32 }
  0x58   :  { %p18500_p12 = scmp.ne.s32.totalorder %s120_s3, %s18499_s5  ;;  %p18504_p13 = scmp.lt.s32.totalorder %s120_s3, %s120_s3 }
  0x59   :  { %p18505_p0 = scmp.lt.s32.totalorder %s18503_s15, %s18499_s5 }
  0x5b   :  { %p18506_p1 = por %p18505_p0, %p18504_p13 }
  0x5d   :  { %p18507_p2 = pnand %p18506_p1, %p18500_p12 }
  0x5f   :  { %18510 = shalt.err (!%p18507_p2)
}
  0x60   :  { %122 = dma.hbm_to_vmem [thread:$0]  %s19464_s10, 16, %s120_s3, [#allocation14]  }
  0x61   :  { %18511 = dma.done.wait [#allocation3], 65536  }
  0x62   :  { %18512 = vsyncadd [#allocation3], 4294901760 }
  0x63   :  { %18513 = dma.done.wait [#allocation5], 65664  }
  0x64   :  { %18514 = vsyncadd [#allocation5], 4294901632 }
  0x65   :  { %18515 = dma.done.wait [#allocation8], 65664  }
  0x66   :  { %18516 = vsyncadd [#allocation8], 4294901632 }
  0x67   :  { %18517 = dma.done.wait [#allocation11], 65664  }
  0x68   :  { %18518 = vsyncadd [#allocation11], 4294901632 }
  0x69   :  { %18519 = dma.done.wait [#allocation14], 144  }
  0x6a   :  { %18520 = vsyncadd [#allocation14], 4294967152  ;;  %v211_v0 = vld [vmem:[#allocation2 + $0x1c0] sm:$0xff]  ;;  %v18639_v54 = vld [vmem:[%s19454_s0 + $0x8] sm:$0xff]  ;;  %vm16016_vm1 = vcmask 130048  }
  0x6b   :  { %v215_v1 = vld [vmem:[#allocation2 + $0x1e0] sm:$0xff]  ;;  %v18647_v59 = vcombine.high %v18639_v54, %v18639_v54 }
  0x6c   :  { %v339_v2 = vld [vmem:[#allocation2 + $0x5c0] sm:$0xff]  ;;  %v16092_v3 = vcombine.high %v211_v0, %v215_v1  ;;  %v16091_v5 = vcombine.low %v211_v0, %v215_v1 }
  0x6d   :  { %v343_v4 = vld [vmem:[#allocation2 + $0x5e0] sm:$0xff]  ;;  %3370 = vmatprep.mubr.bf16.mxu1 %v18647_v59 }
  0x6e   :  { %v203_v6 = vld [vmem:[#allocation2 + $0x180] sm:$0xff]  ;;  %v16220_v8 = vcombine.high %v339_v2, %v343_v4  ;;  %v16219_v9 = vcombine.low %v339_v2, %v343_v4  ;;  %3297 = vmatprep.subr.bf16.mxu0 %v16092_v3 }
  0x6f   :  { %v207_v7 = vld [vmem:[#allocation2 + $0x1a0] sm:$0xff]  ;;  %3298 = vmatpush1.bf16.msra.mxu0 %v16091_v5 }
  0x70   :  { %v16084_v10 = vcombine.high %v203_v6, %v207_v7  ;;  %v331_v11 = vld [vmem:[#allocation2 + $0x580] sm:$0xff]  ;;  %3338 = vmatprep.subr.bf16.mxu1 %v16220_v8  ;;  %v16083_v18 = vcombine.low %v203_v6, %v207_v7 }
  0x71   :  { %v335_v12 = vld [vmem:[#allocation2 + $0x5a0] sm:$0xff]  ;;  %3339 = vmatpush1.bf16.msra.mxu1 %v16219_v9 }
  0x72   :  { %v195_v13 = vld [vmem:[#allocation2 + $0x140] sm:$0xff]  ;;  %v16212_v14 = vcombine.high %v331_v11, %v335_v12  ;;  %3299 = vmatprep.subr.bf16.mxu0 %v16084_v10  ;;  %v16211_v19 = vcombine.low %v331_v11, %v335_v12 }
  0x73   :  { %v199_v15 = vld [vmem:[#allocation2 + $0x160] sm:$0xff]  ;;  %3300 = vmatpush1.bf16.msra.mxu0 %v16083_v18 }
  0x74   :  { %v323_v16 = vld [vmem:[#allocation2 + $0x540] sm:$0xff]  ;;  %v16076_v20 = vcombine.high %v195_v13, %v199_v15  ;;  %3340 = vmatprep.subr.bf16.mxu1 %v16212_v14  ;;  %v16075_v26 = vcombine.low %v195_v13, %v199_v15 }
  0x75   :  { %v327_v17 = vld [vmem:[#allocation2 + $0x560] sm:$0xff]  ;;  %3341 = vmatpush1.bf16.msra.mxu1 %v16211_v19 }
  0x76   :  { %v16204_v21 = vcombine.high %v323_v16, %v327_v17  ;;  %v187_v22 = vld [vmem:[#allocation2 + $0x100] sm:$0xff]  ;;  %3301 = vmatprep.subr.bf16.mxu0 %v16076_v20  ;;  %v16203_v27 = vcombine.low %v323_v16, %v327_v17 }
  0x77   :  { %v191_v23 = vld [vmem:[#allocation2 + $0x120] sm:$0xff]  ;;  %3302 = vmatpush1.bf16.msra.mxu0 %v16075_v26 }
  0x78   :  { %v315_v24 = vld [vmem:[#allocation2 + $0x500] sm:$0xff]  ;;  %v16068_v28 = vcombine.high %v187_v22, %v191_v23  ;;  %3342 = vmatprep.subr.bf16.mxu1 %v16204_v21  ;;  %v16067_v34 = vcombine.low %v187_v22, %v191_v23 }
  0x79   :  { %v319_v25 = vld [vmem:[#allocation2 + $0x520] sm:$0xff]  ;;  %3343 = vmatpush1.bf16.msra.mxu1 %v16203_v27 }
  0x7a   :  { %v16196_v29 = vcombine.high %v315_v24, %v319_v25  ;;  %v179_v30 = vld [vmem:[#allocation2 + $0xc0] sm:$0xff]  ;;  %3303 = vmatprep.subr.bf16.mxu0 %v16068_v28  ;;  %v16195_v35 = vcombine.low %v315_v24, %v319_v25 }
  0x7b   :  { %v183_v31 = vld [vmem:[#allocation2 + $0xe0] sm:$0xff]  ;;  %3304 = vmatpush1.bf16.msra.mxu0 %v16067_v34 }
  0x7c   :  { %v307_v32 = vld [vmem:[#allocation2 + $0x4c0] sm:$0xff]  ;;  %v16060_v36 = vcombine.high %v179_v30, %v183_v31  ;;  %3344 = vmatprep.subr.bf16.mxu1 %v16196_v29  ;;  %v16059_v42 = vcombine.low %v179_v30, %v183_v31 }
  0x7d   :  { %v311_v33 = vld [vmem:[#allocation2 + $0x4e0] sm:$0xff]  ;;  %3345 = vmatpush1.bf16.msra.mxu1 %v16195_v35 }
  0x7e   :  { %v16188_v37 = vcombine.high %v307_v32, %v311_v33  ;;  %v171_v38 = vld [vmem:[#allocation2 + $0x80] sm:$0xff]  ;;  %3305 = vmatprep.subr.bf16.mxu0 %v16060_v36  ;;  %v16187_v43 = vcombine.low %v307_v32, %v311_v33 }
  0x7f   :  { %v175_v39 = vld [vmem:[#allocation2 + $0xa0] sm:$0xff]  ;;  %3306 = vmatpush1.bf16.msra.mxu0 %v16059_v42 }
  0x80   :  { %v299_v40 = vld [vmem:[#allocation2 + $0x480] sm:$0xff]  ;;  %v16052_v44 = vcombine.high %v171_v38, %v175_v39  ;;  %3346 = vmatprep.subr.bf16.mxu1 %v16188_v37  ;;  %v16051_v50 = vcombine.low %v171_v38, %v175_v39 }
  0x81   :  { %v303_v41 = vld [vmem:[#allocation2 + $0x4a0] sm:$0xff]  ;;  %3347 = vmatpush1.bf16.msra.mxu1 %v16187_v43 }
  0x82   :  { %v16180_v45 = vcombine.high %v299_v40, %v303_v41  ;;  %v163_v46 = vld [vmem:[#allocation2 + $0x40] sm:$0xff]  ;;  %3307 = vmatprep.subr.bf16.mxu0 %v16052_v44  ;;  %v16179_v51 = vcombine.low %v299_v40, %v303_v41 }
  0x83   :  { %v167_v47 = vld [vmem:[#allocation2 + $0x60] sm:$0xff]  ;;  %3308 = vmatpush1.bf16.msra.mxu0 %v16051_v50 }
  0x84   :  { %v291_v48 = vld [vmem:[#allocation2 + $0x440] sm:$0xff]  ;;  %v16044_v52 = vcombine.high %v163_v46, %v167_v47  ;;  %3348 = vmatprep.subr.bf16.mxu1 %v16180_v45  ;;  %v16043_v62 = vcombine.low %v163_v46, %v167_v47 }
  0x85   :  { %v295_v49 = vld [vmem:[#allocation2 + $0x460] sm:$0xff]  ;;  %3349 = vmatpush1.bf16.msra.mxu1 %v16179_v51 }
  0x86   :  { %v18634_v53 = vld [vmem:[%s19454_s0] sm:$0xff]  ;;  %v16172_v55 = vcombine.high %v291_v48, %v295_v49  ;;  %3309 = vmatprep.subr.bf16.mxu0 %v16044_v52  ;;  %v16171_v63 = vcombine.low %v291_v48, %v295_v49 }
  0x87   :  { %v155_v56 = vld [vmem:[#allocation2] sm:$0xff]  ;;  %v18643_v58 = vcombine.high %v18634_v53, %v18634_v53  ;;  %3310 = vmatpush1.bf16.msra.mxu0 %v16043_v62 }
  0x88   :  { %v159_v57 = vld [vmem:[#allocation2 + $0x20] sm:$0xff]  ;;  %3350 = vmatprep.subr.bf16.mxu1 %v16172_v55 }
  0x89   :  { %v283_v60 = vld [vmem:[#allocation2 + $0x400] sm:$0xff]  ;;  %3329 = vmatprep.mubr.bf16.mxu0 %v18643_v58  ;;  %v16036_v0 = vcombine.high %v155_v56, %v159_v57  ;;  %v16035_v6 = vcombine.low %v155_v56, %v159_v57  ;;  %3351 = vmatpush1.bf16.msra.mxu1 %v16171_v63 }
  0x8a   :  { %v287_v61 = vld [vmem:[#allocation2 + $0x420] sm:$0xff] }
  0x8b   :  { %v16164_v1 = vcombine.high %v283_v60, %v287_v61  ;;  %v275_v2 = vld [vmem:[#allocation2 + $0x3c0] sm:$0xff]  ;;  %3311 = vmatprep.subr.bf16.mxu0 %v16036_v0  ;;  %v16163_v7 = vcombine.low %v283_v60, %v287_v61 }
  0x8c   :  { %v279_v3 = vld [vmem:[#allocation2 + $0x3e0] sm:$0xff]  ;;  %3312 = vmatpush1.bf16.msra.mxu0 %v16035_v6 }
  0x8d   :  { %v403_v4 = vld [vmem:[#allocation2 + $0x7c0] sm:$0xff]  ;;  %v16156_v8 = vcombine.high %v275_v2, %v279_v3  ;;  %3352 = vmatprep.subr.bf16.mxu1 %v16164_v1  ;;  %v16155_v14 = vcombine.low %v275_v2, %v279_v3 }
  0x8e   :  { %v407_v5 = vld [vmem:[#allocation2 + $0x7e0] sm:$0xff]  ;;  %3353 = vmatpush1.bf16.msra.mxu1 %v16163_v7 }
  0x8f   :  { %v16284_v9 = vcombine.high %v403_v4, %v407_v5  ;;  %v267_v10 = vld [vmem:[#allocation2 + $0x380] sm:$0xff]  ;;  %3313 = vmatprep.subr.bf16.mxu0 %v16156_v8  ;;  %v16283_v15 = vcombine.low %v403_v4, %v407_v5 }
  0x90   :  { %v271_v11 = vld [vmem:[#allocation2 + $0x3a0] sm:$0xff]  ;;  %3314 = vmatpush2.bf16.msra.mxu0 %v16155_v14 }
  0x91   :  { %v395_v12 = vld [vmem:[#allocation2 + $0x780] sm:$0xff]  ;;  %v16148_v16 = vcombine.high %v267_v10, %v271_v11  ;;  %3354 = vmatprep.subr.bf16.mxu1 %v16284_v9  ;;  %v16147_v22 = vcombine.low %v267_v10, %v271_v11 }
  0x92   :  { %v399_v13 = vld [vmem:[#allocation2 + $0x7a0] sm:$0xff]  ;;  %3355 = vmatpush2.bf16.msra.mxu1 %v16283_v15 }
  0x93   :  { %v16276_v17 = vcombine.high %v395_v12, %v399_v13  ;;  %v259_v18 = vld [vmem:[#allocation2 + $0x340] sm:$0xff]  ;;  %3315 = vmatprep.subr.bf16.mxu0 %v16148_v16  ;;  %v16275_v23 = vcombine.low %v395_v12, %v399_v13  ;;  %v18653_v16 = vcombine.low %v18634_v53, %v18634_v53 }
  0x94   :  { %v263_v19 = vld [vmem:[#allocation2 + $0x360] sm:$0xff]  ;;  %3316 = vmatpush2.bf16.msra.mxu0 %v16147_v22  ;;  %v18667_v22 = vld [vmem:[%s19454_s0 + $0x18] sm:$0xff] }
  0x95   :  { %v387_v20 = vld [vmem:[#allocation2 + $0x740] sm:$0xff]  ;;  %v16140_v24 = vcombine.high %v259_v18, %v263_v19  ;;  %3356 = vmatprep.subr.bf16.mxu1 %v16276_v17  ;;  %v16139_v30 = vcombine.low %v259_v18, %v263_v19  ;;  %v18658_v19 = vld [vmem:[%s19454_s0 + $0x10] sm:$0xff] }
  0x96   :  { %v391_v21 = vld [vmem:[#allocation2 + $0x760] sm:$0xff]  ;;  %3357 = vmatpush2.bf16.msra.mxu1 %v16275_v23 }
  0x97   :  { %v16268_v25 = vcombine.high %v387_v20, %v391_v21  ;;  %v251_v26 = vld [vmem:[#allocation2 + $0x300] sm:$0xff]  ;;  %3317 = vmatprep.subr.bf16.mxu0 %v16140_v24  ;;  %v16267_v31 = vcombine.low %v387_v20, %v391_v21  ;;  %v18662_v20 = vcombine.low %v18639_v54, %v18639_v54  ;;  %v18671_v54 = vcombine.high %v18658_v19, %v18658_v19 }
  0x98   :  { %v255_v27 = vld [vmem:[#allocation2 + $0x320] sm:$0xff]  ;;  %3318 = vmatpush2.bf16.msra.mxu0 %v16139_v30 }
  0x99   :  { %v379_v28 = vld [vmem:[#allocation2 + $0x700] sm:$0xff]  ;;  %v16132_v32 = vcombine.high %v251_v26, %v255_v27  ;;  %3358 = vmatprep.subr.bf16.mxu1 %v16268_v25  ;;  %v16131_v38 = vcombine.low %v251_v26, %v255_v27 }
  0x9a   :  { %v383_v29 = vld [vmem:[#allocation2 + $0x720] sm:$0xff]  ;;  %3359 = vmatpush2.bf16.msra.mxu1 %v16267_v31 }
  0x9b   :  { %v16260_v33 = vcombine.high %v379_v28, %v383_v29  ;;  %v243_v34 = vld [vmem:[#allocation2 + $0x2c0] sm:$0xff]  ;;  %3319 = vmatprep.subr.bf16.mxu0 %v16132_v32  ;;  %v16259_v39 = vcombine.low %v379_v28, %v383_v29  ;;  %v18676_v29 = vcombine.high %v18667_v22, %v18667_v22 }
  0x9c   :  { %v247_v35 = vld [vmem:[#allocation2 + $0x2e0] sm:$0xff]  ;;  %3320 = vmatpush2.bf16.msra.mxu0 %v16131_v38 }
  0x9d   :  { %v371_v36 = vld [vmem:[#allocation2 + $0x6c0] sm:$0xff]  ;;  %v16124_v40 = vcombine.high %v243_v34, %v247_v35  ;;  %3360 = vmatprep.subr.bf16.mxu1 %v16260_v33  ;;  %v16123_v46 = vcombine.low %v243_v34, %v247_v35 }
  0x9e   :  { %v375_v37 = vld [vmem:[#allocation2 + $0x6e0] sm:$0xff]  ;;  %3361 = vmatpush2.bf16.msra.mxu1 %v16259_v39 }
  0x9f   :  { %v16252_v41 = vcombine.high %v371_v36, %v375_v37  ;;  %v235_v42 = vld [vmem:[#allocation2 + $0x280] sm:$0xff]  ;;  %3321 = vmatprep.subr.bf16.mxu0 %v16124_v40  ;;  %v16251_v47 = vcombine.low %v371_v36, %v375_v37 }
  0xa0   :  { %v239_v43 = vld [vmem:[#allocation2 + $0x2a0] sm:$0xff]  ;;  %3322 = vmatpush2.bf16.msra.mxu0 %v16123_v46 }
  0xa1   :  { %v363_v44 = vld [vmem:[#allocation2 + $0x680] sm:$0xff]  ;;  %v16116_v48 = vcombine.high %v235_v42, %v239_v43  ;;  %3362 = vmatprep.subr.bf16.mxu1 %v16252_v41  ;;  %v16115_v56 = vcombine.low %v235_v42, %v239_v43 }
  0xa2   :  { %v367_v45 = vld [vmem:[#allocation2 + $0x6a0] sm:$0xff]  ;;  %3363 = vmatpush2.bf16.msra.mxu1 %v16251_v47 }
  0xa3   :  { %v16244_v49 = vcombine.high %v363_v44, %v367_v45  ;;  %v227_v50 = vld [vmem:[#allocation2 + $0x240] sm:$0xff]  ;;  %3323 = vmatprep.subr.bf16.mxu0 %v16116_v48  ;;  %v16243_v57 = vcombine.low %v363_v44, %v367_v45 }
  0xa4   :  { %v231_v51 = vld [vmem:[#allocation2 + $0x260] sm:$0xff]  ;;  %3324 = vmatpush2.bf16.msra.mxu0 %v16115_v56 }
  0xa5   :  { %v355_v52 = vld [vmem:[#allocation2 + $0x640] sm:$0xff]  ;;  %v16108_v60 = vcombine.high %v227_v50, %v231_v51  ;;  %3364 = vmatprep.subr.bf16.mxu1 %v16244_v49  ;;  %v16107_v2 = vcombine.low %v227_v50, %v231_v51 }
  0xa6   :  { %v359_v55 = vld [vmem:[#allocation2 + $0x660] sm:$0xff]  ;;  %3365 = vmatpush2.bf16.msra.mxu1 %v16243_v57 }
  0xa7   :  { %v16236_v61 = vcombine.high %v355_v52, %v359_v55  ;;  %v219_v62 = vld [vmem:[#allocation2 + $0x200] sm:$0xff]  ;;  %3325 = vmatprep.subr.bf16.mxu0 %v16108_v60  ;;  %v16235_v3 = vcombine.low %v355_v52, %v359_v55 }
  0xa8   :  { %v223_v63 = vld [vmem:[#allocation2 + $0x220] sm:$0xff]  ;;  %3326 = vmatpush2.bf16.msra.mxu0 %v16107_v2 }
  0xa9   :  { %v347_v0 = vld [vmem:[#allocation2 + $0x600] sm:$0xff]  ;;  %v16100_v4 = vcombine.high %v219_v62, %v223_v63  ;;  %3366 = vmatprep.subr.bf16.mxu1 %v16236_v61  ;;  %v16099_v10 = vcombine.low %v219_v62, %v223_v63 }
  0xaa   :  { %v351_v1 = vld [vmem:[#allocation2 + $0x620] sm:$0xff]  ;;  %3367 = vmatpush2.bf16.msra.mxu1 %v16235_v3 }
  0xab   :  { %v16228_v5 = vcombine.high %v347_v0, %v351_v1  ;;  %v467_v6 = vld [vmem:[#allocation2 + $0x9c0] sm:$0xff]  ;;  %3327 = vmatprep.subr.bf16.mxu0 %v16100_v4  ;;  %v16227_v11 = vcombine.low %v347_v0, %v351_v1 }
  0xac   :  { %v471_v7 = vld [vmem:[#allocation2 + $0x9e0] sm:$0xff]  ;;  %3328 = vmatpush2.bf16.msra.mxu0 %v16099_v10 }
  0xad   :  { %v595_v8 = vld [vmem:[#allocation2 + $0xdc0] sm:$0xff]  ;;  %v16348_v12 = vcombine.high %v467_v6, %v471_v7  ;;  %3368 = vmatprep.subr.bf16.mxu1 %v16228_v5  ;;  %v16347_v21 = vcombine.low %v467_v6, %v471_v7 }
  0xae   :  { %v599_v9 = vld [vmem:[#allocation2 + $0xde0] sm:$0xff]  ;;  %3369 = vmatpush2.bf16.msra.mxu1 %v16227_v11 }
  0xaf   :  { %v16476_v13 = vcombine.high %v595_v8, %v599_v9  ;;  %v459_v14 = vld [vmem:[#allocation2 + $0x980] sm:$0xff]  ;;  %3379 = vmatprep.subr.bf16.mxu0 %v16348_v12  ;;  %v16475_v53 = vcombine.low %v595_v8, %v599_v9  ;;  %3330 = vmatmul.mubr.bf16.vlgmr.msra.gmra.mxu0 %v18653_v16 }
  0xb0   :  { %v463_v15 = vld [vmem:[#allocation2 + $0x9a0] sm:$0xff]  ;;  %3380 = vmatpush1.bf16.msra.mxu0 %v16347_v21  ;;  %3411 = vmatprep.mubr.bf16.mxu0 %v18671_v54 }
  0xb1   :  { %v587_v17 = vld [vmem:[#allocation2 + $0xd80] sm:$0xff]  ;;  %v16340_v23 = vcombine.high %v459_v14, %v463_v15  ;;  %3420 = vmatprep.subr.bf16.mxu1 %v16476_v13  ;;  %3371 = vmatmul.mubr.bf16.vlgmr.msra.gmra.mxu1 %v18662_v20  ;;  %v16339_v30 = vcombine.low %v459_v14, %v463_v15 }
  0xb2   :  { %v591_v18 = vld [vmem:[#allocation2 + $0xda0] sm:$0xff]  ;;  %3421 = vmatpush1.bf16.msra.mxu1 %v16475_v53  ;;  %3452 = vmatprep.mubr.bf16.mxu1 %v18676_v29 }
  0xb3   :  { %v451_v24 = vld [vmem:[#allocation2 + $0x940] sm:$0xff]  ;;  %v16468_v26 = vcombine.high %v587_v17, %v591_v18  ;;  %3381 = vmatprep.subr.bf16.mxu0 %v16340_v23  ;;  %v16467_v31 = vcombine.low %v587_v17, %v591_v18 }
  0xb4   :  { %v455_v25 = vld [vmem:[#allocation2 + $0x960] sm:$0xff]  ;;  %3382 = vmatpush1.bf16.msra.mxu0 %v16339_v30 }
  0xb5   :  { %v579_v27 = vld [vmem:[#allocation2 + $0xd40] sm:$0xff]  ;;  %v16332_v32 = vcombine.high %v451_v24, %v455_v25  ;;  %3422 = vmatprep.subr.bf16.mxu1 %v16468_v26  ;;  %v16331_v38 = vcombine.low %v451_v24, %v455_v25 }
  0xb6   :  { %v583_v28 = vld [vmem:[#allocation2 + $0xd60] sm:$0xff]  ;;  %3423 = vmatpush1.bf16.msra.mxu1 %v16467_v31 }
  0xb7   :  { %v443_v33 = vld [vmem:[#allocation2 + $0x900] sm:$0xff]  ;;  %v16460_v36 = vcombine.high %v579_v27, %v583_v28  ;;  %3383 = vmatprep.subr.bf16.mxu0 %v16332_v32  ;;  %v16459_v39 = vcombine.low %v579_v27, %v583_v28 }
  0xb8   :  { %v447_v34 = vld [vmem:[#allocation2 + $0x920] sm:$0xff]  ;;  %3384 = vmatpush1.bf16.msra.mxu0 %v16331_v38 }
  0xb9   :  { %v571_v35 = vld [vmem:[#allocation2 + $0xd00] sm:$0xff]  ;;  %v16324_v40 = vcombine.high %v443_v33, %v447_v34  ;;  %3424 = vmatprep.subr.bf16.mxu1 %v16460_v36  ;;  %v16323_v46 = vcombine.low %v443_v33, %v447_v34 }
  0xba   :  { %v575_v37 = vld [vmem:[#allocation2 + $0xd20] sm:$0xff]  ;;  %3425 = vmatpush1.bf16.msra.mxu1 %v16459_v39 }
  0xbb   :  { %v435_v41 = vld [vmem:[#allocation2 + $0x8c0] sm:$0xff]  ;;  %v16452_v44 = vcombine.high %v571_v35, %v575_v37  ;;  %3385 = vmatprep.subr.bf16.mxu0 %v16324_v40  ;;  %v16451_v47 = vcombine.low %v571_v35, %v575_v37 }
  0xbc   :  { %v439_v42 = vld [vmem:[#allocation2 + $0x8e0] sm:$0xff]  ;;  %3386 = vmatpush1.bf16.msra.mxu0 %v16323_v46 }
  0xbd   :  { %v563_v43 = vld [vmem:[#allocation2 + $0xcc0] sm:$0xff]  ;;  %v16316_v48 = vcombine.high %v435_v41, %v439_v42  ;;  %3426 = vmatprep.subr.bf16.mxu1 %v16452_v44  ;;  %v16315_v56 = vcombine.low %v435_v41, %v439_v42 }
  0xbe   :  { %v567_v45 = vld [vmem:[#allocation2 + $0xce0] sm:$0xff]  ;;  %3427 = vmatpush1.bf16.msra.mxu1 %v16451_v47 }
  0xbf   :  { %v427_v49 = vld [vmem:[#allocation2 + $0x880] sm:$0xff]  ;;  %v16444_v52 = vcombine.high %v563_v43, %v567_v45  ;;  %3387 = vmatprep.subr.bf16.mxu0 %v16316_v48  ;;  %v16443_v57 = vcombine.low %v563_v43, %v567_v45 }
  0xc0   :  { %v431_v50 = vld [vmem:[#allocation2 + $0x8a0] sm:$0xff]  ;;  %3388 = vmatpush1.bf16.msra.mxu0 %v16315_v56 }
  0xc1   :  { %v555_v51 = vld [vmem:[#allocation2 + $0xc80] sm:$0xff]  ;;  %v16308_v60 = vcombine.high %v427_v49, %v431_v50  ;;  %3428 = vmatprep.subr.bf16.mxu1 %v16444_v52  ;;  %v16307_v2 = vcombine.low %v427_v49, %v431_v50 }
  0xc2   :  { %v559_v55 = vld [vmem:[#allocation2 + $0xca0] sm:$0xff]  ;;  %3429 = vmatpush1.bf16.msra.mxu1 %v16443_v57 }
  0xc3   :  { %v419_v61 = vld [vmem:[#allocation2 + $0x840] sm:$0xff]  ;;  %v16436_v0 = vcombine.high %v555_v51, %v559_v55  ;;  %3389 = vmatprep.subr.bf16.mxu0 %v16308_v60  ;;  %v16435_v3 = vcombine.low %v555_v51, %v559_v55 }
  0xc4   :  { %v423_v62 = vld [vmem:[#allocation2 + $0x860] sm:$0xff]  ;;  %3390 = vmatpush1.bf16.msra.mxu0 %v16307_v2 }
  0xc5   :  { %v547_v63 = vld [vmem:[#allocation2 + $0xc40] sm:$0xff]  ;;  %v16300_v4 = vcombine.high %v419_v61, %v423_v62  ;;  %3430 = vmatprep.subr.bf16.mxu1 %v16436_v0  ;;  %v16299_v10 = vcombine.low %v419_v61, %v423_v62 }
  0xc6   :  { %v551_v1 = vld [vmem:[#allocation2 + $0xc60] sm:$0xff]  ;;  %3431 = vmatpush1.bf16.msra.mxu1 %v16435_v3 }
  0xc7   :  { %v411_v5 = vld [vmem:[#allocation2 + $0x800] sm:$0xff]  ;;  %v16428_v8 = vcombine.high %v547_v63, %v551_v1  ;;  %3391 = vmatprep.subr.bf16.mxu0 %v16300_v4  ;;  %v16427_v11 = vcombine.low %v547_v63, %v551_v1 }
  0xc8   :  { %v415_v6 = vld [vmem:[#allocation2 + $0x820] sm:$0xff]  ;;  %3392 = vmatpush1.bf16.msra.mxu0 %v16299_v10 }
  0xc9   :  { %v539_v7 = vld [vmem:[#allocation2 + $0xc00] sm:$0xff]  ;;  %v16292_v12 = vcombine.high %v411_v5, %v415_v6  ;;  %3432 = vmatprep.subr.bf16.mxu1 %v16428_v8  ;;  %v16291_v21 = vcombine.low %v411_v5, %v415_v6 }
  0xca   :  { %v543_v9 = vld [vmem:[#allocation2 + $0xc20] sm:$0xff]  ;;  %3433 = vmatpush1.bf16.msra.mxu1 %v16427_v11 }
  0xcb   :  { %v531_v13 = vld [vmem:[#allocation2 + $0xbc0] sm:$0xff]  ;;  %v16420_v17 = vcombine.high %v539_v7, %v543_v9  ;;  %3393 = vmatprep.subr.bf16.mxu0 %v16292_v12  ;;  %v16419_v53 = vcombine.low %v539_v7, %v543_v9 }
  0xcc   :  { %v535_v14 = vld [vmem:[#allocation2 + $0xbe0] sm:$0xff]  ;;  %3394 = vmatpush1.bf16.msra.mxu0 %v16291_v21 }
  0xcd   :  { %v659_v15 = vld [vmem:[#allocation2 + $0xfc0] sm:$0xff]  ;;  %v16412_v23 = vcombine.high %v531_v13, %v535_v14  ;;  %3434 = vmatprep.subr.bf16.mxu1 %v16420_v17  ;;  %v16411_v30 = vcombine.low %v531_v13, %v535_v14 }
  0xce   :  { %v663_v18 = vld [vmem:[#allocation2 + $0xfe0] sm:$0xff]  ;;  %3435 = vmatpush1.bf16.msra.mxu1 %v16419_v53 }
  0xcf   :  { %v523_v24 = vld [vmem:[#allocation2 + $0xb80] sm:$0xff]  ;;  %v16540_v27 = vcombine.high %v659_v15, %v663_v18  ;;  %3395 = vmatprep.subr.bf16.mxu0 %v16412_v23  ;;  %v16539_v31 = vcombine.low %v659_v15, %v663_v18 }
  0xd0   :  { %v527_v25 = vld [vmem:[#allocation2 + $0xba0] sm:$0xff]  ;;  %3396 = vmatpush2.bf16.msra.mxu0 %v16411_v30 }
  0xd1   :  { %v651_v26 = vld [vmem:[#allocation2 + $0xf80] sm:$0xff]  ;;  %v16404_v32 = vcombine.high %v523_v24, %v527_v25  ;;  %3436 = vmatprep.subr.bf16.mxu1 %v16540_v27  ;;  %v16403_v38 = vcombine.low %v523_v24, %v527_v25  ;;  %v212_v24 = vld [vmem:[#allocation2 + $0x1c8] sm:$0xff] }
  0xd2   :  { %v655_v28 = vld [vmem:[#allocation2 + $0xfa0] sm:$0xff]  ;;  %3437 = vmatpush2.bf16.msra.mxu1 %v16539_v31  ;;  %v216_v25 = vld [vmem:[#allocation2 + $0x1e8] sm:$0xff] }
  0xd3   :  { %v515_v33 = vld [vmem:[#allocation2 + $0xb40] sm:$0xff]  ;;  %v16532_v36 = vcombine.high %v651_v26, %v655_v28  ;;  %3397 = vmatprep.subr.bf16.mxu0 %v16404_v32  ;;  %v16531_v39 = vcombine.low %v651_v26, %v655_v28  ;;  %v340_v26 = vld [vmem:[#allocation2 + $0x5c8] sm:$0xff]  ;;  %v16094_v32 = vcombine.high %v212_v24, %v216_v25 }
  0xd4   :  { %v519_v34 = vld [vmem:[#allocation2 + $0xb60] sm:$0xff]  ;;  %3398 = vmatpush2.bf16.msra.mxu0 %v16403_v38  ;;  %v344_v28 = vld [vmem:[#allocation2 + $0x5e8] sm:$0xff]  ;;  %v18683_v38 = vcombine.low %v18658_v19, %v18658_v19 }
  0xd5   :  { %v643_v35 = vld [vmem:[#allocation2 + $0xf40] sm:$0xff]  ;;  %v16396_v40 = vcombine.high %v515_v33, %v519_v34  ;;  %3438 = vmatprep.subr.bf16.mxu1 %v16532_v36  ;;  %v16395_v46 = vcombine.low %v515_v33, %v519_v34  ;;  %v204_v33 = vld [vmem:[#allocation2 + $0x188] sm:$0xff]  ;;  %v16222_v36 = vcombine.high %v340_v26, %v344_v28 }
  0xd6   :  { %v647_v37 = vld [vmem:[#allocation2 + $0xf60] sm:$0xff]  ;;  %3439 = vmatpush2.bf16.msra.mxu1 %v16531_v39  ;;  %v208_v34 = vld [vmem:[#allocation2 + $0x1a8] sm:$0xff]  ;;  %v18687_v39 = vcombine.low %v18667_v22, %v18667_v22 }
  0xd7   :  { %v507_v41 = vld [vmem:[#allocation2 + $0xb00] sm:$0xff]  ;;  %v16524_v44 = vcombine.high %v643_v35, %v647_v37  ;;  %3399 = vmatprep.subr.bf16.mxu0 %v16396_v40  ;;  %v16523_v47 = vcombine.low %v643_v35, %v647_v37  ;;  %v332_v35 = vld [vmem:[#allocation2 + $0x588] sm:$0xff]  ;;  %v16093_v40 = vcombine.low %v212_v24, %v216_v25  ;;  %v16085_v19 = vcombine.low %v204_v33, %v208_v34 }
  0xd8   :  { %v511_v42 = vld [vmem:[#allocation2 + $0xb20] sm:$0xff]  ;;  %3400 = vmatpush2.bf16.msra.mxu0 %v16395_v46  ;;  %v336_v37 = vld [vmem:[#allocation2 + $0x5a8] sm:$0xff] }
  0xd9   :  { %v635_v43 = vld [vmem:[#allocation2 + $0xf00] sm:$0xff]  ;;  %v16388_v48 = vcombine.high %v507_v41, %v511_v42  ;;  %3440 = vmatprep.subr.bf16.mxu1 %v16524_v44  ;;  %v16387_v56 = vcombine.low %v507_v41, %v511_v42  ;;  %v16221_v41 = vcombine.low %v340_v26, %v344_v28  ;;  %v16086_v42 = vcombine.high %v204_v33, %v208_v34  ;;  %v196_v44 = vld [vmem:[#allocation2 + $0x148] sm:$0xff] }
  0xda   :  { %v639_v45 = vld [vmem:[#allocation2 + $0xf20] sm:$0xff]  ;;  %3441 = vmatpush2.bf16.msra.mxu1 %v16523_v47  ;;  %v324_v46 = vld [vmem:[#allocation2 + $0x548] sm:$0xff]  ;;  %v16213_v22 = vcombine.low %v332_v35, %v336_v37 }
  0xdb   :  { %v499_v49 = vld [vmem:[#allocation2 + $0xac0] sm:$0xff]  ;;  %v16516_v52 = vcombine.high %v635_v43, %v639_v45  ;;  %3401 = vmatprep.subr.bf16.mxu0 %v16388_v48  ;;  %v16515_v57 = vcombine.low %v635_v43, %v639_v45  ;;  %v16214_v43 = vcombine.high %v332_v35, %v336_v37  ;;  %v200_v45 = vld [vmem:[#allocation2 + $0x168] sm:$0xff] }
  0xdc   :  { %v503_v50 = vld [vmem:[#allocation2 + $0xae0] sm:$0xff]  ;;  %3402 = vmatpush2.bf16.msra.mxu0 %v16387_v56  ;;  %v328_v47 = vld [vmem:[#allocation2 + $0x568] sm:$0xff]  ;;  %v16078_v48 = vcombine.high %v196_v44, %v200_v45  ;;  %v16077_v56 = vcombine.low %v196_v44, %v200_v45 }
  0xdd   :  { %v627_v51 = vld [vmem:[#allocation2 + $0xec0] sm:$0xff]  ;;  %v16380_v60 = vcombine.high %v499_v49, %v503_v50  ;;  %3442 = vmatprep.subr.bf16.mxu1 %v16516_v52  ;;  %v16379_v2 = vcombine.low %v499_v49, %v503_v50  ;;  %v16206_v49 = vcombine.high %v324_v46, %v328_v47  ;;  %v188_v50 = vld [vmem:[#allocation2 + $0x108] sm:$0xff] }
  0xde   :  { %v631_v55 = vld [vmem:[#allocation2 + $0xee0] sm:$0xff]  ;;  %3443 = vmatpush2.bf16.msra.mxu1 %v16515_v57  ;;  %v316_v52 = vld [vmem:[#allocation2 + $0x508] sm:$0xff]  ;;  %v16205_v57 = vcombine.low %v324_v46, %v328_v47 }
  0xdf   :  { %v491_v61 = vld [vmem:[#allocation2 + $0xa80] sm:$0xff]  ;;  %v16508_v0 = vcombine.high %v627_v51, %v631_v55  ;;  %3403 = vmatprep.subr.bf16.mxu0 %v16380_v60  ;;  %v16507_v3 = vcombine.low %v627_v51, %v631_v55  ;;  %v192_v51 = vld [vmem:[#allocation2 + $0x128] sm:$0xff] }
  0xe0   :  { %v495_v62 = vld [vmem:[#allocation2 + $0xaa0] sm:$0xff]  ;;  %3404 = vmatpush2.bf16.msra.mxu0 %v16379_v2  ;;  %v320_v55 = vld [vmem:[#allocation2 + $0x528] sm:$0xff]  ;;  %v16070_v60 = vcombine.high %v188_v50, %v192_v51  ;;  %v16069_v2 = vcombine.low %v188_v50, %v192_v51 }
  0xe1   :  { %v619_v63 = vld [vmem:[#allocation2 + $0xe80] sm:$0xff]  ;;  %v16372_v4 = vcombine.high %v491_v61, %v495_v62  ;;  %3444 = vmatprep.subr.bf16.mxu1 %v16508_v0  ;;  %v16371_v10 = vcombine.low %v491_v61, %v495_v62  ;;  %v16198_v61 = vcombine.high %v316_v52, %v320_v55  ;;  %v180_v62 = vld [vmem:[#allocation2 + $0xc8] sm:$0xff] }
  0xe2   :  { %v623_v1 = vld [vmem:[#allocation2 + $0xea0] sm:$0xff]  ;;  %3445 = vmatpush2.bf16.msra.mxu1 %v16507_v3  ;;  %v308_v0 = vld [vmem:[#allocation2 + $0x4c8] sm:$0xff]  ;;  %v16197_v3 = vcombine.low %v316_v52, %v320_v55 }
  0xe3   :  { %v483_v5 = vld [vmem:[#allocation2 + $0xa40] sm:$0xff]  ;;  %v16500_v8 = vcombine.high %v619_v63, %v623_v1  ;;  %3405 = vmatprep.subr.bf16.mxu0 %v16372_v4  ;;  %v16499_v11 = vcombine.low %v619_v63, %v623_v1  ;;  %v184_v63 = vld [vmem:[#allocation2 + $0xe8] sm:$0xff] }
  0xe4   :  { %v487_v6 = vld [vmem:[#allocation2 + $0xa60] sm:$0xff]  ;;  %3406 = vmatpush2.bf16.msra.mxu0 %v16371_v10  ;;  %v312_v1 = vld [vmem:[#allocation2 + $0x4e8] sm:$0xff]  ;;  %v16062_v4 = vcombine.high %v180_v62, %v184_v63  ;;  %v16061_v10 = vcombine.low %v180_v62, %v184_v63 }
  0xe5   :  { %v611_v7 = vld [vmem:[#allocation2 + $0xe40] sm:$0xff]  ;;  %v16364_v12 = vcombine.high %v483_v5, %v487_v6  ;;  %3446 = vmatprep.subr.bf16.mxu1 %v16500_v8  ;;  %v16363_v21 = vcombine.low %v483_v5, %v487_v6  ;;  %v16190_v5 = vcombine.high %v308_v0, %v312_v1  ;;  %v172_v6 = vld [vmem:[#allocation2 + $0x88] sm:$0xff] }
  0xe6   :  { %v615_v9 = vld [vmem:[#allocation2 + $0xe60] sm:$0xff]  ;;  %3447 = vmatpush2.bf16.msra.mxu1 %v16499_v11  ;;  %v300_v8 = vld [vmem:[#allocation2 + $0x488] sm:$0xff]  ;;  %v16189_v11 = vcombine.low %v308_v0, %v312_v1 }
  0xe7   :  { %v475_v13 = vld [vmem:[#allocation2 + $0xa00] sm:$0xff]  ;;  %v16492_v17 = vcombine.high %v611_v7, %v615_v9  ;;  %3407 = vmatprep.subr.bf16.mxu0 %v16364_v12  ;;  %v16491_v53 = vcombine.low %v611_v7, %v615_v9  ;;  %v176_v7 = vld [vmem:[#allocation2 + $0xa8] sm:$0xff] }
  0xe8   :  { %v479_v14 = vld [vmem:[#allocation2 + $0xa20] sm:$0xff]  ;;  %3408 = vmatpush2.bf16.msra.mxu0 %v16363_v21  ;;  %v304_v9 = vld [vmem:[#allocation2 + $0x4a8] sm:$0xff]  ;;  %v16054_v12 = vcombine.high %v172_v6, %v176_v7  ;;  %v16053_v21 = vcombine.low %v172_v6, %v176_v7 }
  0xe9   :  { %v603_v15 = vld [vmem:[#allocation2 + $0xe00] sm:$0xff]  ;;  %v16356_v23 = vcombine.high %v475_v13, %v479_v14  ;;  %3448 = vmatprep.subr.bf16.mxu1 %v16492_v17  ;;  %v16355_v30 = vcombine.low %v475_v13, %v479_v14  ;;  %v16182_v13 = vcombine.high %v300_v8, %v304_v9  ;;  %v164_v14 = vld [vmem:[#allocation2 + $0x48] sm:$0xff] }
  0xea   :  { %v607_v18 = vld [vmem:[#allocation2 + $0xe20] sm:$0xff]  ;;  %3449 = vmatpush2.bf16.msra.mxu1 %v16491_v53  ;;  %v292_v17 = vld [vmem:[#allocation2 + $0x448] sm:$0xff]  ;;  %v16181_v53 = vcombine.low %v300_v8, %v304_v9 }
  0xeb   :  { %v16484_v27 = vcombine.high %v603_v15, %v607_v18  ;;  %3409 = vmatprep.subr.bf16.mxu0 %v16356_v23  ;;  %v16483_v31 = vcombine.low %v603_v15, %v607_v18  ;;  %v168_v15 = vld [vmem:[#allocation2 + $0x68] sm:$0xff] }
  0xec   :  { %3410 = vmatpush2.bf16.msra.mxu0 %v16355_v30  ;;  %v296_v18 = vld [vmem:[#allocation2 + $0x468] sm:$0xff]  ;;  %v16046_v23 = vcombine.high %v164_v14, %v168_v15  ;;  %v16045_v30 = vcombine.low %v164_v14, %v168_v15 }
  0xed   :  { %3450 = vmatprep.subr.bf16.mxu1 %v16484_v27  ;;  %3461 = vmatprep.subr.bf16.mxu0 %v16094_v32  ;;  %v16174_v24 = vcombine.high %v292_v17, %v296_v18  ;;  %v156_v25 = vld [vmem:[#allocation2 + $0x8] sm:$0xff] }
  0xee   :  { %3451 = vmatpush2.bf16.msra.mxu1 %v16483_v31  ;;  %v160_v26 = vld [vmem:[#allocation2 + $0x28] sm:$0xff]  ;;  %v16173_v31 = vcombine.low %v292_v17, %v296_v18 }
  0xef   :  { %3502 = vmatprep.subr.bf16.mxu1 %v16222_v36  ;;  %3412 = vmatmul.mubr.bf16.vlgmr.msra.gmra.mxu0 %v18683_v38  ;;  %v284_v27 = vld [vmem:[#allocation2 + $0x408] sm:$0xff]  ;;  %v16038_v32 = vcombine.high %v156_v25, %v160_v26 }
  0xf0   :  { %3462 = vmatpush1.bf16.msra.mxu0 %v16093_v40  ;;  %3493 = vmatprep.mubr.bf16.mxu0 %v18643_v58  ;;  %v288_v28 = vld [vmem:[#allocation2 + $0x428] sm:$0xff]  ;;  %v16037_v40 = vcombine.low %v156_v25, %v160_v26 }
  0xf1   :  { %3453 = vmatmul.mubr.bf16.vlgmr.msra.gmra.mxu1 %v18687_v39  ;;  %3463 = vmatprep.subr.bf16.mxu0 %v16086_v42  ;;  %v16166_v33 = vcombine.high %v284_v27, %v288_v28  ;;  %v276_v34 = vld [vmem:[#allocation2 + $0x3c8] sm:$0xff] }
  0xf2   :  { %3503 = vmatpush1.bf16.msra.mxu1 %v16221_v41  ;;  %3534 = vmatprep.mubr.bf16.mxu1 %v18647_v59  ;;  %v280_v35 = vld [vmem:[#allocation2 + $0x3e8] sm:$0xff]  ;;  %v16165_v41 = vcombine.low %v284_v27, %v288_v28 }
  0xf3   :  { %3504 = vmatprep.subr.bf16.mxu1 %v16214_v43  ;;  %v404_v36 = vld [vmem:[#allocation2 + $0x7c8] sm:$0xff]  ;;  %v16158_v42 = vcombine.high %v276_v34, %v280_v35 }
  0xf4   :  { %3464 = vmatpush1.bf16.msra.mxu0 %v16085_v19  ;;  %v408_v37 = vld [vmem:[#allocation2 + $0x7e8] sm:$0xff]  ;;  %v16157_v19 = vcombine.low %v276_v34, %v280_v35 }
  0xf5   :  { %3465 = vmatprep.subr.bf16.mxu0 %v16078_v48  ;;  %v16286_v43 = vcombine.high %v404_v36, %v408_v37  ;;  %v268_v44 = vld [vmem:[#allocation2 + $0x388] sm:$0xff] }
  0xf6   :  { %3505 = vmatpush1.bf16.msra.mxu1 %v16213_v22  ;;  %v272_v45 = vld [vmem:[#allocation2 + $0x3a8] sm:$0xff]  ;;  %v16285_v22 = vcombine.low %v404_v36, %v408_v37 }
  0xf7   :  { %3506 = vmatprep.subr.bf16.mxu1 %v16206_v49  ;;  %v396_v46 = vld [vmem:[#allocation2 + $0x788] sm:$0xff]  ;;  %v16150_v48 = vcombine.high %v268_v44, %v272_v45 }
  0xf8   :  { %3466 = vmatpush1.bf16.msra.mxu0 %v16077_v56  ;;  %v400_v47 = vld [vmem:[#allocation2 + $0x7a8] sm:$0xff]  ;;  %v16149_v56 = vcombine.low %v268_v44, %v272_v45 }
  0xf9   :  { %3467 = vmatprep.subr.bf16.mxu0 %v16070_v60  ;;  %v16278_v49 = vcombine.high %v396_v46, %v400_v47  ;;  %v260_v50 = vld [vmem:[#allocation2 + $0x348] sm:$0xff] }
  0xfa   :  { %3507 = vmatpush1.bf16.msra.mxu1 %v16205_v57  ;;  %v264_v51 = vld [vmem:[#allocation2 + $0x368] sm:$0xff]  ;;  %v16277_v57 = vcombine.low %v396_v46, %v400_v47 }
  0xfb   :  { %3508 = vmatprep.subr.bf16.mxu1 %v16198_v61  ;;  %v388_v52 = vld [vmem:[#allocation2 + $0x748] sm:$0xff]  ;;  %v16142_v60 = vcombine.high %v260_v50, %v264_v51 }
  0xfc   :  { %3468 = vmatpush1.bf16.msra.mxu0 %v16069_v2  ;;  %v392_v55 = vld [vmem:[#allocation2 + $0x768] sm:$0xff]  ;;  %v16141_v2 = vcombine.low %v260_v50, %v264_v51 }
  0xfd   :  { %3469 = vmatprep.subr.bf16.mxu0 %v16062_v4  ;;  %v16270_v61 = vcombine.high %v388_v52, %v392_v55  ;;  %v252_v62 = vld [vmem:[#allocation2 + $0x308] sm:$0xff] }
  0xfe   :  { %3509 = vmatpush1.bf16.msra.mxu1 %v16197_v3  ;;  %v256_v63 = vld [vmem:[#allocation2 + $0x328] sm:$0xff]  ;;  %v16269_v3 = vcombine.low %v388_v52, %v392_v55 }
  0xff   :  { %3510 = vmatprep.subr.bf16.mxu1 %v16190_v5  ;;  %v380_v0 = vld [vmem:[#allocation2 + $0x708] sm:$0xff]  ;;  %v16134_v4 = vcombine.high %v252_v62, %v256_v63 }
 0x100   :  { %3470 = vmatpush1.bf16.msra.mxu0 %v16061_v10  ;;  %v384_v1 = vld [vmem:[#allocation2 + $0x728] sm:$0xff]  ;;  %v16133_v10 = vcombine.low %v252_v62, %v256_v63 }
 0x101   :  { %3471 = vmatprep.subr.bf16.mxu0 %v16054_v12  ;;  %v16262_v5 = vcombine.high %v380_v0, %v384_v1  ;;  %v244_v6 = vld [vmem:[#allocation2 + $0x2c8] sm:$0xff] }
 0x102   :  { %3511 = vmatpush1.bf16.msra.mxu1 %v16189_v11  ;;  %v248_v7 = vld [vmem:[#allocation2 + $0x2e8] sm:$0xff]  ;;  %v16261_v11 = vcombine.low %v380_v0, %v384_v1 }
 0x103   :  { %3512 = vmatprep.subr.bf16.mxu1 %v16182_v13  ;;  %v372_v8 = vld [vmem:[#allocation2 + $0x6c8] sm:$0xff]  ;;  %v16126_v12 = vcombine.high %v244_v6, %v248_v7 }
 0x104   :  { %3472 = vmatpush1.bf16.msra.mxu0 %v16053_v21  ;;  %v376_v9 = vld [vmem:[#allocation2 + $0x6e8] sm:$0xff]  ;;  %v16125_v21 = vcombine.low %v244_v6, %v248_v7 }
 0x105   :  { %3473 = vmatprep.subr.bf16.mxu0 %v16046_v23  ;;  %v16254_v13 = vcombine.high %v372_v8, %v376_v9  ;;  %v236_v14 = vld [vmem:[#allocation2 + $0x288] sm:$0xff] }
 0x106   :  { %3513 = vmatpush1.bf16.msra.mxu1 %v16181_v53  ;;  %v240_v15 = vld [vmem:[#allocation2 + $0x2a8] sm:$0xff]  ;;  %v16253_v53 = vcombine.low %v372_v8, %v376_v9 }
 0x107   :  { %3514 = vmatprep.subr.bf16.mxu1 %v16174_v24  ;;  %v364_v17 = vld [vmem:[#allocation2 + $0x688] sm:$0xff]  ;;  %v16118_v23 = vcombine.high %v236_v14, %v240_v15 }
 0x108   :  { %3474 = vmatpush1.bf16.msra.mxu0 %v16045_v30  ;;  %v368_v18 = vld [vmem:[#allocation2 + $0x6a8] sm:$0xff]  ;;  %v16117_v30 = vcombine.low %v236_v14, %v240_v15 }
 0x109   :  { %3475 = vmatprep.subr.bf16.mxu0 %v16038_v32  ;;  %v16246_v24 = vcombine.high %v364_v17, %v368_v18  ;;  %v228_v25 = vld [vmem:[#allocation2 + $0x248] sm:$0xff] }
 0x10a   :  { %3515 = vmatpush1.bf16.msra.mxu1 %v16173_v31  ;;  %v232_v26 = vld [vmem:[#allocation2 + $0x268] sm:$0xff]  ;;  %v16245_v31 = vcombine.low %v364_v17, %v368_v18 }
 0x10b   :  { %3516 = vmatprep.subr.bf16.mxu1 %v16166_v33  ;;  %v356_v27 = vld [vmem:[#allocation2 + $0x648] sm:$0xff]  ;;  %v16110_v32 = vcombine.high %v228_v25, %v232_v26 }
 0x10c   :  { %3476 = vmatpush1.bf16.msra.mxu0 %v16037_v40  ;;  %v360_v28 = vld [vmem:[#allocation2 + $0x668] sm:$0xff]  ;;  %v16109_v40 = vcombine.low %v228_v25, %v232_v26 }
 0x10d   :  { %3477 = vmatprep.subr.bf16.mxu0 %v16158_v42  ;;  %v16238_v33 = vcombine.high %v356_v27, %v360_v28  ;;  %v220_v34 = vld [vmem:[#allocation2 + $0x208] sm:$0xff] }
 0x10e   :  { %3517 = vmatpush1.bf16.msra.mxu1 %v16165_v41  ;;  %v224_v35 = vld [vmem:[#allocation2 + $0x228] sm:$0xff]  ;;  %v16237_v41 = vcombine.low %v356_v27, %v360_v28 }
 0x10f   :  { %3518 = vmatprep.subr.bf16.mxu1 %v16286_v43  ;;  %v348_v36 = vld [vmem:[#allocation2 + $0x608] sm:$0xff]  ;;  %v16102_v42 = vcombine.high %v220_v34, %v224_v35 }
 0x110   :  { %3478 = vmatpush2.bf16.msra.mxu0 %v16157_v19  ;;  %v352_v37 = vld [vmem:[#allocation2 + $0x628] sm:$0xff]  ;;  %v16101_v19 = vcombine.low %v220_v34, %v224_v35 }
 0x111   :  { %3479 = vmatprep.subr.bf16.mxu0 %v16150_v48  ;;  %v16230_v43 = vcombine.high %v348_v36, %v352_v37  ;;  %v468_v44 = vld [vmem:[#allocation2 + $0x9c8] sm:$0xff] }
 0x112   :  { %3519 = vmatpush2.bf16.msra.mxu1 %v16285_v22  ;;  %v472_v45 = vld [vmem:[#allocation2 + $0x9e8] sm:$0xff]  ;;  %v16229_v22 = vcombine.low %v348_v36, %v352_v37 }
 0x113   :  { %3520 = vmatprep.subr.bf16.mxu1 %v16278_v49  ;;  %v596_v46 = vld [vmem:[#allocation2 + $0xdc8] sm:$0xff]  ;;  %v16350_v48 = vcombine.high %v468_v44, %v472_v45 }
 0x114   :  { %3480 = vmatpush2.bf16.msra.mxu0 %v16149_v56  ;;  %v600_v47 = vld [vmem:[#allocation2 + $0xde8] sm:$0xff]  ;;  %v16349_v56 = vcombine.low %v468_v44, %v472_v45 }
 0x115   :  { %3481 = vmatprep.subr.bf16.mxu0 %v16142_v60  ;;  %v16478_v49 = vcombine.high %v596_v46, %v600_v47  ;;  %v460_v50 = vld [vmem:[#allocation2 + $0x988] sm:$0xff] }
 0x116   :  { %3521 = vmatpush2.bf16.msra.mxu1 %v16277_v57  ;;  %v464_v51 = vld [vmem:[#allocation2 + $0x9a8] sm:$0xff]  ;;  %v16477_v57 = vcombine.low %v596_v46, %v600_v47 }
 0x117   :  { %3522 = vmatprep.subr.bf16.mxu1 %v16270_v61  ;;  %v588_v52 = vld [vmem:[#allocation2 + $0xd88] sm:$0xff]  ;;  %v16342_v60 = vcombine.high %v460_v50, %v464_v51 }
 0x118   :  { %3482 = vmatpush2.bf16.msra.mxu0 %v16141_v2  ;;  %v592_v55 = vld [vmem:[#allocation2 + $0xda8] sm:$0xff]  ;;  %v16341_v2 = vcombine.low %v460_v50, %v464_v51 }
 0x119   :  { %3483 = vmatprep.subr.bf16.mxu0 %v16134_v4  ;;  %v16470_v61 = vcombine.high %v588_v52, %v592_v55  ;;  %v452_v62 = vld [vmem:[#allocation2 + $0x948] sm:$0xff] }
 0x11a   :  { %3523 = vmatpush2.bf16.msra.mxu1 %v16269_v3  ;;  %v456_v63 = vld [vmem:[#allocation2 + $0x968] sm:$0xff]  ;;  %v16469_v3 = vcombine.low %v588_v52, %v592_v55 }
 0x11b   :  { %3524 = vmatprep.subr.bf16.mxu1 %v16262_v5  ;;  %v580_v0 = vld [vmem:[#allocation2 + $0xd48] sm:$0xff]  ;;  %v16334_v4 = vcombine.high %v452_v62, %v456_v63 }
 0x11c   :  { %3484 = vmatpush2.bf16.msra.mxu0 %v16133_v10  ;;  %v584_v1 = vld [vmem:[#allocation2 + $0xd68] sm:$0xff]  ;;  %v16333_v10 = vcombine.low %v452_v62, %v456_v63 }
 0x11d   :  { %3485 = vmatprep.subr.bf16.mxu0 %v16126_v12  ;;  %v16462_v5 = vcombine.high %v580_v0, %v584_v1  ;;  %v444_v6 = vld [vmem:[#allocation2 + $0x908] sm:$0xff] }
 0x11e   :  { %3525 = vmatpush2.bf16.msra.mxu1 %v16261_v11  ;;  %v448_v7 = vld [vmem:[#allocation2 + $0x928] sm:$0xff]  ;;  %v16461_v11 = vcombine.low %v580_v0, %v584_v1 }
 0x11f   :  { %3526 = vmatprep.subr.bf16.mxu1 %v16254_v13  ;;  %v572_v8 = vld [vmem:[#allocation2 + $0xd08] sm:$0xff]  ;;  %v16326_v12 = vcombine.high %v444_v6, %v448_v7 }
 0x120   :  { %3486 = vmatpush2.bf16.msra.mxu0 %v16125_v21  ;;  %v576_v9 = vld [vmem:[#allocation2 + $0xd28] sm:$0xff]  ;;  %v16325_v21 = vcombine.low %v444_v6, %v448_v7 }
 0x121   :  { %3487 = vmatprep.subr.bf16.mxu0 %v16118_v23  ;;  %v16454_v13 = vcombine.high %v572_v8, %v576_v9  ;;  %v436_v14 = vld [vmem:[#allocation2 + $0x8c8] sm:$0xff] }
 0x122   :  { %3527 = vmatpush2.bf16.msra.mxu1 %v16253_v53  ;;  %v440_v15 = vld [vmem:[#allocation2 + $0x8e8] sm:$0xff]  ;;  %v16453_v53 = vcombine.low %v572_v8, %v576_v9 }
 0x123   :  { %3528 = vmatprep.subr.bf16.mxu1 %v16246_v24  ;;  %v564_v17 = vld [vmem:[#allocation2 + $0xcc8] sm:$0xff]  ;;  %v16318_v23 = vcombine.high %v436_v14, %v440_v15 }
 0x124   :  { %3488 = vmatpush2.bf16.msra.mxu0 %v16117_v30  ;;  %v568_v18 = vld [vmem:[#allocation2 + $0xce8] sm:$0xff]  ;;  %v16317_v30 = vcombine.low %v436_v14, %v440_v15 }
 0x125   :  { %3489 = vmatprep.subr.bf16.mxu0 %v16110_v32  ;;  %v16446_v24 = vcombine.high %v564_v17, %v568_v18  ;;  %v428_v25 = vld [vmem:[#allocation2 + $0x888] sm:$0xff] }
 0x126   :  { %3529 = vmatpush2.bf16.msra.mxu1 %v16245_v31  ;;  %v432_v26 = vld [vmem:[#allocation2 + $0x8a8] sm:$0xff]  ;;  %v16445_v31 = vcombine.low %v564_v17, %v568_v18 }
 0x127   :  { %3530 = vmatprep.subr.bf16.mxu1 %v16238_v33  ;;  %v556_v27 = vld [vmem:[#allocation2 + $0xc88] sm:$0xff]  ;;  %v16310_v32 = vcombine.high %v428_v25, %v432_v26 }
 0x128   :  { %3490 = vmatpush2.bf16.msra.mxu0 %v16109_v40  ;;  %v560_v28 = vld [vmem:[#allocation2 + $0xca8] sm:$0xff]  ;;  %v16309_v40 = vcombine.low %v428_v25, %v432_v26 }
 0x129   :  { %3491 = vmatprep.subr.bf16.mxu0 %v16102_v42  ;;  %v16438_v33 = vcombine.high %v556_v27, %v560_v28  ;;  %v420_v34 = vld [vmem:[#allocation2 + $0x848] sm:$0xff] }
 0x12a   :  { %3531 = vmatpush2.bf16.msra.mxu1 %v16237_v41  ;;  %v424_v35 = vld [vmem:[#allocation2 + $0x868] sm:$0xff]  ;;  %v16437_v41 = vcombine.low %v556_v27, %v560_v28 }
 0x12b   :  { %3532 = vmatprep.subr.bf16.mxu1 %v16230_v43  ;;  %v548_v36 = vld [vmem:[#allocation2 + $0xc48] sm:$0xff]  ;;  %v16302_v42 = vcombine.high %v420_v34, %v424_v35 }
 0x12c   :  { %3492 = vmatpush2.bf16.msra.mxu0 %v16101_v19  ;;  %v552_v37 = vld [vmem:[#allocation2 + $0xc68] sm:$0xff]  ;;  %v16301_v19 = vcombine.low %v420_v34, %v424_v35 }
 0x12d   :  { %3543 = vmatprep.subr.bf16.mxu0 %v16350_v48  ;;  %v16430_v43 = vcombine.high %v548_v36, %v552_v37  ;;  %v412_v44 = vld [vmem:[#allocation2 + $0x808] sm:$0xff] }
 0x12e   :  { %3533 = vmatpush2.bf16.msra.mxu1 %v16229_v22  ;;  %v416_v45 = vld [vmem:[#allocation2 + $0x828] sm:$0xff]  ;;  %v16429_v22 = vcombine.low %v548_v36, %v552_v37 }
 0x12f   :  { %3584 = vmatprep.subr.bf16.mxu1 %v16478_v49  ;;  %3494 = vmatmul.mubr.bf16.vlgmr.msra.gmra.mxu0 %v18653_v16  ;;  %v540_v46 = vld [vmem:[#allocation2 + $0xc08] sm:$0xff]  ;;  %v16294_v48 = vcombine.high %v412_v44, %v416_v45 }
 0x130   :  { %3544 = vmatpush1.bf16.msra.mxu0 %v16349_v56  ;;  %3575 = vmatprep.mubr.bf16.mxu0 %v18671_v54  ;;  %v544_v47 = vld [vmem:[#allocation2 + $0xc28] sm:$0xff]  ;;  %v16293_v56 = vcombine.low %v412_v44, %v416_v45 }
 0x131   :  { %3535 = vmatmul.mubr.bf16.vlgmr.msra.gmra.mxu1 %v18662_v20  ;;  %3545 = vmatprep.subr.bf16.mxu0 %v16342_v60  ;;  %v16422_v49 = vcombine.high %v540_v46, %v544_v47  ;;  %v532_v50 = vld [vmem:[#allocation2 + $0xbc8] sm:$0xff] }
 0x132   :  { %3585 = vmatpush1.bf16.msra.mxu1 %v16477_v57  ;;  %3616 = vmatprep.mubr.bf16.mxu1 %v18676_v29  ;;  %v536_v51 = vld [vmem:[#allocation2 + $0xbe8] sm:$0xff]  ;;  %v16421_v57 = vcombine.low %v540_v46, %v544_v47 }
 0x133   :  { %3586 = vmatprep.subr.bf16.mxu1 %v16470_v61  ;;  %v660_v52 = vld [vmem:[#allocation2 + $0xfc8] sm:$0xff]  ;;  %v16414_v60 = vcombine.high %v532_v50, %v536_v51 }
 0x134   :  { %3546 = vmatpush1.bf16.msra.mxu0 %v16341_v2  ;;  %v664_v55 = vld [vmem:[#allocation2 + $0xfe8] sm:$0xff]  ;;  %v16413_v2 = vcombine.low %v532_v50, %v536_v51 }
 0x135   :  { %3547 = vmatprep.subr.bf16.mxu0 %v16334_v4  ;;  %v16542_v61 = vcombine.high %v660_v52, %v664_v55  ;;  %v524_v62 = vld [vmem:[#allocation2 + $0xb88] sm:$0xff] }
 0x136   :  { %3587 = vmatpush1.bf16.msra.mxu1 %v16469_v3  ;;  %v528_v63 = vld [vmem:[#allocation2 + $0xba8] sm:$0xff]  ;;  %v16541_v3 = vcombine.low %v660_v52, %v664_v55 }
 0x137   :  { %3588 = vmatprep.subr.bf16.mxu1 %v16462_v5  ;;  %v652_v0 = vld [vmem:[#allocation2 + $0xf88] sm:$0xff]  ;;  %v16406_v4 = vcombine.high %v524_v62, %v528_v63 }
 0x138   :  { %3548 = vmatpush1.bf16.msra.mxu0 %v16333_v10  ;;  %v656_v1 = vld [vmem:[#allocation2 + $0xfa8] sm:$0xff]  ;;  %v16405_v10 = vcombine.low %v524_v62, %v528_v63 }
 0x139   :  { %3549 = vmatprep.subr.bf16.mxu0 %v16326_v12  ;;  %v16534_v5 = vcombine.high %v652_v0, %v656_v1  ;;  %v516_v6 = vld [vmem:[#allocation2 + $0xb48] sm:$0xff] }
 0x13a   :  { %3589 = vmatpush1.bf16.msra.mxu1 %v16461_v11  ;;  %v520_v7 = vld [vmem:[#allocation2 + $0xb68] sm:$0xff]  ;;  %v16533_v11 = vcombine.low %v652_v0, %v656_v1  ;;  %v213_v0 = vld [vmem:[#allocation2 + $0x1d0] sm:$0xff] }
 0x13b   :  { %3590 = vmatprep.subr.bf16.mxu1 %v16454_v13  ;;  %v644_v8 = vld [vmem:[#allocation2 + $0xf48] sm:$0xff]  ;;  %v16398_v12 = vcombine.high %v516_v6, %v520_v7  ;;  %v217_v1 = vld [vmem:[#allocation2 + $0x1f0] sm:$0xff] }
 0x13c   :  { %3550 = vmatpush1.bf16.msra.mxu0 %v16325_v21  ;;  %v648_v9 = vld [vmem:[#allocation2 + $0xf68] sm:$0xff]  ;;  %v16397_v21 = vcombine.low %v516_v6, %v520_v7  ;;  %v18703_v7 = vld [vmem:[#allocation4] sm:$0xff] }
 0x13d   :  { %3551 = vmatprep.subr.bf16.mxu0 %v16318_v23  ;;  %v16526_v13 = vcombine.high %v644_v8, %v648_v9  ;;  %v508_v14 = vld [vmem:[#allocation2 + $0xb08] sm:$0xff] }
 0x13e   :  { %3591 = vmatpush1.bf16.msra.mxu1 %v16453_v53  ;;  %v512_v15 = vld [vmem:[#allocation2 + $0xb28] sm:$0xff]  ;;  %v16525_v53 = vcombine.low %v644_v8, %v648_v9  ;;  %v16096_v8 = vcombine.high %v213_v0, %v217_v1 }
 0x13f   :  { %3592 = vmatprep.subr.bf16.mxu1 %v16446_v24  ;;  %v636_v17 = vld [vmem:[#allocation2 + $0xf08] sm:$0xff]  ;;  %v16390_v23 = vcombine.high %v508_v14, %v512_v15 }
 0x140   :  { %3552 = vmatpush1.bf16.msra.mxu0 %v16317_v30  ;;  %v640_v18 = vld [vmem:[#allocation2 + $0xf28] sm:$0xff]  ;;  %v16389_v30 = vcombine.low %v508_v14, %v512_v15  ;;  %v337_v14 = vld [vmem:[#allocation2 + $0x5b0] sm:$0xff] }
 0x141   :  { %3553 = vmatprep.subr.bf16.mxu0 %v16310_v32  ;;  %v16518_v24 = vcombine.high %v636_v17, %v640_v18  ;;  %v500_v25 = vld [vmem:[#allocation2 + $0xac8] sm:$0xff] }
 0x142   :  { %3593 = vmatpush1.bf16.msra.mxu1 %v16445_v31  ;;  %v504_v26 = vld [vmem:[#allocation2 + $0xae8] sm:$0xff]  ;;  %v16517_v31 = vcombine.low %v636_v17, %v640_v18  ;;  %v16095_v17 = vcombine.low %v213_v0, %v217_v1 }
 0x143   :  { %3594 = vmatprep.subr.bf16.mxu1 %v16438_v33  ;;  %v628_v27 = vld [vmem:[#allocation2 + $0xec8] sm:$0xff]  ;;  %v16382_v32 = vcombine.high %v500_v25, %v504_v26 }
 0x144   :  { %3554 = vmatpush1.bf16.msra.mxu0 %v16309_v40  ;;  %v632_v28 = vld [vmem:[#allocation2 + $0xee8] sm:$0xff]  ;;  %v16381_v40 = vcombine.low %v500_v25, %v504_v26  ;;  %v201_v25 = vld [vmem:[#allocation2 + $0x170] sm:$0xff] }
 0x145   :  { %3555 = vmatprep.subr.bf16.mxu0 %v16302_v42  ;;  %v16510_v33 = vcombine.high %v628_v27, %v632_v28  ;;  %v492_v34 = vld [vmem:[#allocation2 + $0xa88] sm:$0xff] }
 0x146   :  { %3595 = vmatpush1.bf16.msra.mxu1 %v16437_v41  ;;  %v496_v35 = vld [vmem:[#allocation2 + $0xaa8] sm:$0xff]  ;;  %v16509_v41 = vcombine.low %v628_v27, %v632_v28  ;;  %v325_v27 = vld [vmem:[#allocation2 + $0x550] sm:$0xff] }
 0x147   :  { %3596 = vmatprep.subr.bf16.mxu1 %v16430_v43  ;;  %v620_v36 = vld [vmem:[#allocation2 + $0xe88] sm:$0xff]  ;;  %v16374_v42 = vcombine.high %v492_v34, %v496_v35  ;;  %v329_v28 = vld [vmem:[#allocation2 + $0x570] sm:$0xff] }
 0x148   :  { %3556 = vmatpush1.bf16.msra.mxu0 %v16301_v19  ;;  %v624_v37 = vld [vmem:[#allocation2 + $0xea8] sm:$0xff]  ;;  %v16373_v19 = vcombine.low %v492_v34, %v496_v35 }
 0x149   :  { %3557 = vmatprep.subr.bf16.mxu0 %v16294_v48  ;;  %v16502_v43 = vcombine.high %v620_v36, %v624_v37  ;;  %v484_v44 = vld [vmem:[#allocation2 + $0xa48] sm:$0xff]  ;;  %v16501_v48 = vcombine.low %v620_v36, %v624_v37 }
 0x14a   :  { %3597 = vmatpush1.bf16.msra.mxu1 %v16429_v22  ;;  %v488_v45 = vld [vmem:[#allocation2 + $0xa68] sm:$0xff]  ;;  %v669_v22 = vlaneseq }
 0x14b   :  { %3598 = vmatprep.subr.bf16.mxu1 %v16422_v49  ;;  %v612_v46 = vld [vmem:[#allocation2 + $0xe48] sm:$0xff]  ;;  %v16366_v49 = vcombine.high %v484_v44, %v488_v45 }
 0x14c   :  { %3558 = vmatpush1.bf16.msra.mxu0 %v16293_v56  ;;  %v616_v47 = vld [vmem:[#allocation2 + $0xe68] sm:$0xff] }
 0x14d   :  { %3559 = vmatprep.subr.bf16.mxu0 %v16414_v60  ;;  %v16494_v50 = vcombine.high %v612_v46, %v616_v47  ;;  %v476_v51 = vld [vmem:[#allocation2 + $0xa08] sm:$0xff]  ;;  %v18698_v60 = vshrl.u32 %v669_v22, 7 }
 0x14e   :  { %3599 = vmatpush1.bf16.msra.mxu1 %v16421_v57  ;;  %v480_v52 = vld [vmem:[#allocation2 + $0xa28] sm:$0xff]  ;;  %v16365_v57 = vcombine.low %v484_v44, %v488_v45  ;;  %v317_v45 = vld [vmem:[#allocation2 + $0x510] sm:$0xff] }
 0x14f   :  { %3600 = vmatprep.subr.bf16.mxu1 %v16542_v61  ;;  %v604_v55 = vld [vmem:[#allocation2 + $0xe08] sm:$0xff]  ;;  %v16493_v61 = vcombine.low %v612_v46, %v616_v47  ;;  %v16358_v62 = vcombine.high %v476_v51, %v480_v52  ;;  %v321_v46 = vld [vmem:[#allocation2 + $0x530] sm:$0xff] }
 0x150   :  { %3560 = vmatpush2.bf16.msra.mxu0 %v16413_v2  ;;  %v608_v56 = vld [vmem:[#allocation2 + $0xe28] sm:$0xff]  ;;  %v341_v2 = vld [vmem:[#allocation2 + $0x5d0] sm:$0xff]  ;;  %v16199_v0 = vcombine.low %v317_v45, %v321_v46 }
 0x151   :  { %3561 = vmatprep.subr.bf16.mxu0 %v16406_v4  ;;  %v16486_v63 = vcombine.high %v604_v55, %v608_v56  ;;  %v16357_v4 = vcombine.low %v476_v51, %v480_v52  ;;  %v16485_v6 = vcombine.low %v604_v55, %v608_v56  ;;  %v16200_v55 = vcombine.high %v317_v45, %v321_v46  ;;  %v181_v56 = vld [vmem:[#allocation2 + $0xd0] sm:$0xff] }
 0x152   :  { %3601 = vmatpush2.bf16.msra.mxu1 %v16541_v3  ;;  %v345_v3 = vld [vmem:[#allocation2 + $0x5f0] sm:$0xff] }
 0x153   :  { %3602 = vmatprep.subr.bf16.mxu1 %v16534_v5  ;;  %v18701_v5 = vsub.s32 0, %v18698_v60  ;;  %v16224_v9 = vcombine.high %v341_v2, %v345_v3  ;;  %v16223_v18 = vcombine.low %v341_v2, %v345_v3  ;;  %v173_v3 = vld [vmem:[#allocation2 + $0x90] sm:$0xff] }
 0x154   :  { %3562 = vmatpush2.bf16.msra.mxu0 %v16405_v10  ;;  %v18706_v10 = vsub.s32 1, %v18698_v60  ;;  %v269_v45 = vld [vmem:[#allocation2 + $0x390] sm:$0xff] }
 0x155   :  { %3563 = vmatprep.subr.bf16.mxu0 %v16398_v12  ;;  %v209_v12 = vld [vmem:[#allocation2 + $0x1b0] sm:$0xff]  ;;  %v672_v15 = vrot.slane %v18703_v7, %v18701_v5 }
 0x156   :  { %3603 = vmatpush2.bf16.msra.mxu1 %v16533_v11  ;;  %v205_v11 = vld [vmem:[#allocation2 + $0x190] sm:$0xff] }
 0x157   :  { %3604 = vmatprep.subr.bf16.mxu1 %v16526_v13  ;;  %v333_v13 = vld [vmem:[#allocation2 + $0x590] sm:$0xff] }
 0x158   :  { %3564 = vmatpush2.bf16.msra.mxu0 %v16397_v21  ;;  %v16088_v21 = vcombine.high %v205_v11, %v209_v12  ;;  %v16215_v34 = vcombine.low %v333_v13, %v337_v14  ;;  %v273_v46 = vld [vmem:[#allocation2 + $0x3b0] sm:$0xff] }
 0x159   :  { %3565 = vmatprep.subr.bf16.mxu0 %v16390_v23  ;;  %v16216_v23 = vcombine.high %v333_v13, %v337_v14  ;;  %v165_v14 = vld [vmem:[#allocation2 + $0x50] sm:$0xff] }
 0x15a   :  { %3605 = vmatpush2.bf16.msra.mxu1 %v16525_v53  ;;  %v676_v53 = vrot.slane %v18703_v7, %v18706_v10 }
 0x15b   :  { %3606 = vmatprep.subr.bf16.mxu1 %v16518_v24  ;;  %v197_v24 = vld [vmem:[#allocation2 + $0x150] sm:$0xff] }
 0x15c   :  { %3566 = vmatpush2.bf16.msra.mxu0 %v16389_v30  ;;  %v16080_v35 = vcombine.high %v197_v24, %v201_v25 }
 0x15d   :  { %3567 = vmatprep.subr.bf16.mxu0 %v16382_v32  ;;  %v16087_v32 = vcombine.low %v205_v11, %v209_v12 }
 0x15e   :  { %3607 = vmatpush2.bf16.msra.mxu1 %v16517_v31 }
 0x15f   :  { %3608 = vmatprep.subr.bf16.mxu1 %v16510_v33 }
 0x160   :  { %3568 = vmatpush2.bf16.msra.mxu0 %v16381_v40 }
 0x161   :  { %3569 = vmatprep.subr.bf16.mxu0 %v16374_v42  ;;  %v189_v42 = vld [vmem:[#allocation2 + $0x110] sm:$0xff] }
 0x162   :  { %3609 = vmatpush2.bf16.msra.mxu1 %v16509_v41  ;;  %v16208_v41 = vcombine.high %v325_v27, %v329_v28 }
 0x163   :  { %3610 = vmatprep.subr.bf16.mxu1 %v16502_v43  ;;  %v193_v43 = vld [vmem:[#allocation2 + $0x130] sm:$0xff] }
 0x164   :  { %3570 = vmatpush2.bf16.msra.mxu0 %v16373_v19  ;;  %v16072_v51 = vcombine.high %v189_v42, %v193_v43 }
 0x165   :  { %3571 = vmatprep.subr.bf16.mxu0 %v16366_v49 }
 0x166   :  { %3611 = vmatpush2.bf16.msra.mxu1 %v16501_v48  ;;  %v16079_v48 = vcombine.low %v197_v24, %v201_v25  ;;  %v157_v25 = vld [vmem:[#allocation2 + $0x10] sm:$0xff] }
 0x167   :  { %3612 = vmatprep.subr.bf16.mxu1 %v16494_v50  ;;  %v16207_v50 = vcombine.low %v325_v27, %v329_v28  ;;  %v285_v27 = vld [vmem:[#allocation2 + $0x410] sm:$0xff] }
 0x168   :  { %3572 = vmatpush2.bf16.msra.mxu0 %v16365_v57  ;;  %v185_v57 = vld [vmem:[#allocation2 + $0xf0] sm:$0xff] }
 0x169   :  { %3573 = vmatprep.subr.bf16.mxu0 %v16358_v62  ;;  %v313_v62 = vld [vmem:[#allocation2 + $0x4f0] sm:$0xff]  ;;  %v16064_v1 = vcombine.high %v181_v56, %v185_v57 }
 0x16a   :  { %3613 = vmatpush2.bf16.msra.mxu1 %v16493_v61  ;;  %v309_v61 = vld [vmem:[#allocation2 + $0x4d0] sm:$0xff] }
 0x16b   :  { %3614 = vmatprep.subr.bf16.mxu1 %v16486_v63  ;;  %v16071_v63 = vcombine.low %v189_v42, %v193_v43  ;;  %v16192_v2 = vcombine.high %v309_v61, %v313_v62  ;;  %v16191_v11 = vcombine.low %v309_v61, %v313_v62  ;;  %v289_v28 = vld [vmem:[#allocation2 + $0x430] sm:$0xff]  ;;  %v16151_v62 = vcombine.low %v269_v45, %v273_v46 }
 0x16c   :  { %3574 = vmatpush2.bf16.msra.mxu0 %v16357_v4  ;;  %v177_v4 = vld [vmem:[#allocation2 + $0xb0] sm:$0xff]  ;;  %v16167_v42 = vcombine.low %v285_v27, %v289_v28 }
 0x16d   :  { %3625 = vmatprep.subr.bf16.mxu0 %v16096_v8  ;;  %v305_v8 = vld [vmem:[#allocation2 + $0x4b0] sm:$0xff]  ;;  %v16056_v12 = vcombine.high %v173_v3, %v177_v4 }
 0x16e   :  { %3615 = vmatpush2.bf16.msra.mxu1 %v16485_v6  ;;  %v301_v6 = vld [vmem:[#allocation2 + $0x490] sm:$0xff] }
 0x16f   :  { %3666 = vmatprep.subr.bf16.mxu1 %v16224_v9  ;;  %v3331_v26 = vpop.f32.mrf.mxu0  ;;  %3576 = vmatmul.mubr.bf16.vlgmr.msra.gmra.mxu0 %v18683_v38  ;;  %v16063_v9 = vcombine.low %v181_v56, %v185_v57  ;;  %v16184_v13 = vcombine.high %v301_v6, %v305_v8  ;;  %v265_v56 = vld [vmem:[#allocation2 + $0x370] sm:$0xff] }
 0x170   :  { %v3332_v30 = vadd.f32 %v3331_v26, %v672_v15  ;;  %3626 = vmatpush1.bf16.msra.mxu0 %v16095_v17  ;;  %3657 = vmatprep.mubr.bf16.mxu0 %v18643_v58  ;;  %v169_v15 = vld [vmem:[#allocation2 + $0x70] sm:$0xff] }
 0x171   :  { %v3372_v31 = vpop.f32.mrf.mxu1  ;;  %3617 = vmatmul.mubr.bf16.vlgmr.msra.gmra.mxu1 %v18687_v39  ;;  %v3333_v33 = vpop.f32.mrf.mxu0  ;;  %3627 = vmatprep.subr.bf16.mxu0 %v16088_v21  ;;  %v293_v17 = vld [vmem:[#allocation2 + $0x450] sm:$0xff]  ;;  %v16055_v21 = vcombine.low %v173_v3, %v177_v4 }
 0x172   :  { %3667 = vmatpush1.bf16.msra.mxu1 %v16223_v18  ;;  %v18714_v36 = vadd.f32 %v3372_v31, %v3332_v30  ;;  %v3334_v37 = vadd.f32 %v3333_v33, %v676_v53  ;;  %3698 = vmatprep.mubr.bf16.mxu1 %v18647_v59  ;;  %v297_v18 = vld [vmem:[#allocation2 + $0x470] sm:$0xff]  ;;  %v16183_v53 = vcombine.low %v301_v6, %v305_v8 }
 0x173   :  { %v3374_v40 = vpop.f32.mrf.mxu1  ;;  %3668 = vmatprep.subr.bf16.mxu1 %v16216_v23  ;;  %v3335_v44 = vpop.f32.mrf.mxu0  ;;  %v16048_v23 = vcombine.high %v165_v14, %v169_v15  ;;  %v16176_v24 = vcombine.high %v293_v17, %v297_v18  ;;  %v161_v26 = vld [vmem:[#allocation2 + $0x30] sm:$0xff]  ;;  %v16047_v30 = vcombine.low %v165_v14, %v169_v15  ;;  %v16175_v31 = vcombine.low %v293_v17, %v297_v18 }
 0x174   :  { %v18718_v47 = vadd.f32 %v3374_v40, %v3334_v37  ;;  %3628 = vmatpush1.bf16.msra.mxu0 %v16087_v32  ;;  %v16040_v32 = vcombine.high %v157_v25, %v161_v26  ;;  %v16168_v33 = vcombine.high %v285_v27, %v289_v28  ;;  %v405_v37 = vld [vmem:[#allocation2 + $0x7d0] sm:$0xff] }
 0x175   :  { %v3376_v19 = vpop.f32.mrf.mxu1  ;;  %v3336_v49 = vpop.f32.mrf.mxu0  ;;  %3629 = vmatprep.subr.bf16.mxu0 %v16080_v35  ;;  %v281_v35 = vld [vmem:[#allocation2 + $0x3f0] sm:$0xff] }
 0x176   :  { %3669 = vmatpush1.bf16.msra.mxu1 %v16215_v34  ;;  %v277_v34 = vld [vmem:[#allocation2 + $0x3d0] sm:$0xff] }
 0x177   :  { %v3377_v52 = vpop.f32.mrf.mxu1  ;;  %3670 = vmatprep.subr.bf16.mxu1 %v16208_v41  ;;  %v409_v40 = vld [vmem:[#allocation2 + $0x7f0] sm:$0xff]  ;;  %v16039_v41 = vcombine.low %v157_v25, %v161_v26  ;;  %v16160_v43 = vcombine.high %v277_v34, %v281_v35  ;;  %v16159_v49 = vcombine.low %v277_v34, %v281_v35 }
 0x178   :  { %3630 = vmatpush1.bf16.msra.mxu0 %v16079_v48  ;;  %v16288_v44 = vcombine.high %v405_v37, %v409_v40  ;;  %v397_v19 = vld [vmem:[#allocation2 + $0x790] sm:$0xff] }
 0x179   :  { %3631 = vmatprep.subr.bf16.mxu0 %v16072_v51  ;;  %v401_v48 = vld [vmem:[#allocation2 + $0x7b0] sm:$0xff]  ;;  %v16152_v51 = vcombine.high %v269_v45, %v273_v46 }
 0x17a   :  { %3671 = vmatpush1.bf16.msra.mxu1 %v16207_v50  ;;  %v16287_v50 = vcombine.low %v405_v37, %v409_v40  ;;  %v16280_v52 = vcombine.high %v397_v19, %v401_v48  ;;  %v389_v57 = vld [vmem:[#allocation2 + $0x750] sm:$0xff] }
 0x17b   :  { %3672 = vmatprep.subr.bf16.mxu1 %v16200_v55  ;;  %v261_v55 = vld [vmem:[#allocation2 + $0x350] sm:$0xff] }
 0x17c   :  { %3632 = vmatpush1.bf16.msra.mxu0 %v16071_v63  ;;  %v393_v61 = vld [vmem:[#allocation2 + $0x770] sm:$0xff]  ;;  %v16279_v63 = vcombine.low %v397_v19, %v401_v48  ;;  %v16143_v8 = vcombine.low %v261_v55, %v265_v56 }
 0x17d   :  { %3633 = vmatprep.subr.bf16.mxu0 %v16064_v1  ;;  %v16272_v1 = vcombine.high %v389_v57, %v393_v61  ;;  %v257_v3 = vld [vmem:[#allocation2 + $0x330] sm:$0xff] }
 0x17e   :  { %3673 = vmatpush1.bf16.msra.mxu1 %v16199_v0  ;;  %v16144_v0 = vcombine.high %v261_v55, %v265_v56  ;;  %v381_v4 = vld [vmem:[#allocation2 + $0x710] sm:$0xff] }
 0x17f   :  { %3674 = vmatprep.subr.bf16.mxu1 %v16192_v2  ;;  %v253_v2 = vld [vmem:[#allocation2 + $0x310] sm:$0xff] }
 0x180   :  { %3634 = vmatpush1.bf16.msra.mxu0 %v16063_v9  ;;  %v385_v6 = vld [vmem:[#allocation2 + $0x730] sm:$0xff]  ;;  %v16271_v9 = vcombine.low %v389_v57, %v393_v61  ;;  %v16135_v18 = vcombine.low %v253_v2, %v257_v3 }
 0x181   :  { %3635 = vmatprep.subr.bf16.mxu0 %v16056_v12  ;;  %v16264_v12 = vcombine.high %v381_v4, %v385_v6  ;;  %v249_v14 = vld [vmem:[#allocation2 + $0x2f0] sm:$0xff] }
 0x182   :  { %3675 = vmatpush1.bf16.msra.mxu1 %v16191_v11  ;;  %v16136_v11 = vcombine.high %v253_v2, %v257_v3  ;;  %v373_v15 = vld [vmem:[#allocation2 + $0x6d0] sm:$0xff] }
 0x183   :  { %3676 = vmatprep.subr.bf16.mxu1 %v16184_v13  ;;  %v245_v13 = vld [vmem:[#allocation2 + $0x2d0] sm:$0xff] }
 0x184   :  { %3636 = vmatpush1.bf16.msra.mxu0 %v16055_v21  ;;  %v377_v17 = vld [vmem:[#allocation2 + $0x6f0] sm:$0xff]  ;;  %v16263_v21 = vcombine.low %v381_v4, %v385_v6  ;;  %v16127_v28 = vcombine.low %v245_v13, %v249_v14 }
 0x185   :  { %3637 = vmatprep.subr.bf16.mxu0 %v16048_v23  ;;  %v16256_v23 = vcombine.high %v373_v15, %v377_v17  ;;  %v241_v25 = vld [vmem:[#allocation2 + $0x2b0] sm:$0xff] }
 0x186   :  { %3677 = vmatpush1.bf16.msra.mxu1 %v16183_v53  ;;  %v16128_v53 = vcombine.high %v245_v13, %v249_v14  ;;  %v365_v26 = vld [vmem:[#allocation2 + $0x690] sm:$0xff] }
 0x187   :  { %3678 = vmatprep.subr.bf16.mxu1 %v16176_v24  ;;  %v237_v24 = vld [vmem:[#allocation2 + $0x290] sm:$0xff] }
 0x188   :  { %3638 = vmatpush1.bf16.msra.mxu0 %v16047_v30  ;;  %v369_v27 = vld [vmem:[#allocation2 + $0x6b0] sm:$0xff]  ;;  %v16255_v30 = vcombine.low %v373_v15, %v377_v17  ;;  %v16119_v40 = vcombine.low %v237_v24, %v241_v25 }
 0x189   :  { %3639 = vmatprep.subr.bf16.mxu0 %v16040_v32  ;;  %v16248_v32 = vcombine.high %v365_v26, %v369_v27  ;;  %v233_v34 = vld [vmem:[#allocation2 + $0x270] sm:$0xff] }
 0x18a   :  { %3679 = vmatpush1.bf16.msra.mxu1 %v16175_v31  ;;  %v16120_v31 = vcombine.high %v237_v24, %v241_v25  ;;  %v357_v35 = vld [vmem:[#allocation2 + $0x650] sm:$0xff] }
 0x18b   :  { %3680 = vmatprep.subr.bf16.mxu1 %v16168_v33  ;;  %v229_v33 = vld [vmem:[#allocation2 + $0x250] sm:$0xff] }
 0x18c   :  { %3640 = vmatpush1.bf16.msra.mxu0 %v16039_v41  ;;  %v361_v37 = vld [vmem:[#allocation2 + $0x670] sm:$0xff]  ;;  %v16247_v41 = vcombine.low %v365_v26, %v369_v27  ;;  %v16111_v48 = vcombine.low %v229_v33, %v233_v34 }
 0x18d   :  { %3641 = vmatprep.subr.bf16.mxu0 %v16160_v43  ;;  %v16240_v43 = vcombine.high %v357_v35, %v361_v37  ;;  %v225_v45 = vld [vmem:[#allocation2 + $0x230] sm:$0xff] }
 0x18e   :  { %3681 = vmatpush1.bf16.msra.mxu1 %v16167_v42  ;;  %v16112_v42 = vcombine.high %v229_v33, %v233_v34  ;;  %v349_v46 = vld [vmem:[#allocation2 + $0x610] sm:$0xff] }
 0x18f   :  { %3682 = vmatprep.subr.bf16.mxu1 %v16288_v44  ;;  %v221_v44 = vld [vmem:[#allocation2 + $0x210] sm:$0xff] }
 0x190   :  { %3642 = vmatpush2.bf16.msra.mxu0 %v16159_v49  ;;  %v353_v19 = vld [vmem:[#allocation2 + $0x630] sm:$0xff]  ;;  %v16239_v49 = vcombine.low %v357_v35, %v361_v37  ;;  %v16103_v61 = vcombine.low %v221_v44, %v225_v45 }
 0x191   :  { %3643 = vmatprep.subr.bf16.mxu0 %v16152_v51  ;;  %v16232_v51 = vcombine.high %v349_v46, %v353_v19  ;;  %v473_v55 = vld [vmem:[#allocation2 + $0x9f0] sm:$0xff] }
 0x192   :  { %3683 = vmatpush2.bf16.msra.mxu1 %v16287_v50  ;;  %v16104_v50 = vcombine.high %v221_v44, %v225_v45  ;;  %v597_v56 = vld [vmem:[#allocation2 + $0xdd0] sm:$0xff] }
 0x193   :  { %3684 = vmatprep.subr.bf16.mxu1 %v16280_v52  ;;  %v469_v52 = vld [vmem:[#allocation2 + $0x9d0] sm:$0xff] }
 0x194   :  { %3644 = vmatpush2.bf16.msra.mxu0 %v16151_v62  ;;  %v601_v57 = vld [vmem:[#allocation2 + $0xdf0] sm:$0xff]  ;;  %v16231_v62 = vcombine.low %v349_v46, %v353_v19  ;;  %v16351_v6 = vcombine.low %v469_v52, %v473_v55 }
 0x195   :  { %3645 = vmatprep.subr.bf16.mxu0 %v16144_v0  ;;  %v16480_v0 = vcombine.high %v597_v56, %v601_v57  ;;  %v465_v2 = vld [vmem:[#allocation2 + $0x9b0] sm:$0xff] }
 0x196   :  { %3685 = vmatpush2.bf16.msra.mxu1 %v16279_v63  ;;  %v16352_v63 = vcombine.high %v469_v52, %v473_v55  ;;  %v589_v3 = vld [vmem:[#allocation2 + $0xd90] sm:$0xff] }
 0x197   :  { %3686 = vmatprep.subr.bf16.mxu1 %v16272_v1  ;;  %v461_v1 = vld [vmem:[#allocation2 + $0x990] sm:$0xff] }
 0x198   :  { %3646 = vmatpush2.bf16.msra.mxu0 %v16143_v8  ;;  %v593_v4 = vld [vmem:[#allocation2 + $0xdb0] sm:$0xff]  ;;  %v16479_v8 = vcombine.low %v597_v56, %v601_v57 }
 0x199   :  { %3647 = vmatprep.subr.bf16.mxu0 %v16136_v11  ;;  %v16472_v11 = vcombine.high %v589_v3, %v593_v4  ;;  %v457_v13 = vld [vmem:[#allocation2 + $0x970] sm:$0xff]  ;;  %v16471_v24 = vcombine.low %v589_v3, %v593_v4 }
 0x19a   :  { %3687 = vmatpush2.bf16.msra.mxu1 %v16271_v9  ;;  %v16344_v9 = vcombine.high %v461_v1, %v465_v2  ;;  %v581_v15 = vld [vmem:[#allocation2 + $0xd50] sm:$0xff] }
 0x19b   :  { %3688 = vmatprep.subr.bf16.mxu1 %v16264_v12  ;;  %v453_v12 = vld [vmem:[#allocation2 + $0x950] sm:$0xff] }
 0x19c   :  { %3648 = vmatpush2.bf16.msra.mxu0 %v16135_v18  ;;  %v585_v17 = vld [vmem:[#allocation2 + $0xd70] sm:$0xff]  ;;  %v16336_v25 = vcombine.high %v453_v12, %v457_v13 }
 0x19d   :  { %3649 = vmatprep.subr.bf16.mxu0 %v16128_v53  ;;  %v16343_v53 = vcombine.low %v461_v1, %v465_v2  ;;  %v573_v33 = vld [vmem:[#allocation2 + $0xd10] sm:$0xff] }
 0x19e   :  { %3689 = vmatpush2.bf16.msra.mxu1 %v16263_v21  ;;  %v577_v34 = vld [vmem:[#allocation2 + $0xd30] sm:$0xff] }
 0x19f   :  { %3690 = vmatprep.subr.bf16.mxu1 %v16256_v23  ;;  %v16456_v44 = vcombine.high %v573_v33, %v577_v34  ;;  %v437_v45 = vld [vmem:[#allocation2 + $0x8d0] sm:$0xff] }
 0x1a0   :  { %3650 = vmatpush2.bf16.msra.mxu0 %v16127_v28  ;;  %v441_v46 = vld [vmem:[#allocation2 + $0x8f0] sm:$0xff] }
 0x1a1   :  { %3651 = vmatprep.subr.bf16.mxu0 %v16120_v31  ;;  %v445_v31 = vld [vmem:[#allocation2 + $0x910] sm:$0xff] }
 0x1a2   :  { %3691 = vmatpush2.bf16.msra.mxu1 %v16255_v30  ;;  %v16464_v30 = vcombine.high %v581_v15, %v585_v17  ;;  %v565_v19 = vld [vmem:[#allocation2 + $0xcd0] sm:$0xff] }
 0x1a3   :  { %3692 = vmatprep.subr.bf16.mxu1 %v16248_v32  ;;  %v449_v32 = vld [vmem:[#allocation2 + $0x930] sm:$0xff] }
 0x1a4   :  { %3652 = vmatpush2.bf16.msra.mxu0 %v16119_v40  ;;  %v16335_v40 = vcombine.low %v453_v12, %v457_v13  ;;  %v429_v55 = vld [vmem:[#allocation2 + $0x890] sm:$0xff] }
 0x1a5   :  { %3653 = vmatprep.subr.bf16.mxu0 %v16112_v42  ;;  %v16328_v42 = vcombine.high %v445_v31, %v449_v32  ;;  %v433_v56 = vld [vmem:[#allocation2 + $0x8b0] sm:$0xff] }
 0x1a6   :  { %3693 = vmatpush2.bf16.msra.mxu1 %v16247_v41  ;;  %v557_v57 = vld [vmem:[#allocation2 + $0xc90] sm:$0xff] }
 0x1a7   :  { %3694 = vmatprep.subr.bf16.mxu1 %v16240_v43  ;;  %v421_v2 = vld [vmem:[#allocation2 + $0x850] sm:$0xff] }
 0x1a8   :  { %3654 = vmatpush2.bf16.msra.mxu0 %v16111_v48  ;;  %v569_v48 = vld [vmem:[#allocation2 + $0xcf0] sm:$0xff] }
 0x1a9   :  { %3655 = vmatprep.subr.bf16.mxu0 %v16104_v50  ;;  %v16455_v50 = vcombine.low %v573_v33, %v577_v34  ;;  %v16448_v52 = vcombine.high %v565_v19, %v569_v48  ;;  %v425_v3 = vld [vmem:[#allocation2 + $0x870] sm:$0xff] }
 0x1aa   :  { %3695 = vmatpush2.bf16.msra.mxu1 %v16239_v49  ;;  %v16327_v49 = vcombine.low %v445_v31, %v449_v32  ;;  %v549_v4 = vld [vmem:[#allocation2 + $0xc50] sm:$0xff] }
 0x1ab   :  { %3696 = vmatprep.subr.bf16.mxu1 %v16232_v51  ;;  %v16320_v51 = vcombine.high %v437_v45, %v441_v46  ;;  %v413_v13 = vld [vmem:[#allocation2 + $0x810] sm:$0xff] }
 0x1ac   :  { %3656 = vmatpush2.bf16.msra.mxu0 %v16103_v61  ;;  %v561_v61 = vld [vmem:[#allocation2 + $0xcb0] sm:$0xff] }
 0x1ad   :  { %3707 = vmatprep.subr.bf16.mxu0 %v16352_v63  ;;  %v16447_v63 = vcombine.low %v565_v19, %v569_v48  ;;  %v16440_v1 = vcombine.high %v557_v57, %v561_v61  ;;  %v525_v33 = vld [vmem:[#allocation2 + $0xb90] sm:$0xff] }
 0x1ae   :  { %3697 = vmatpush2.bf16.msra.mxu1 %v16231_v62  ;;  %v16319_v62 = vcombine.low %v437_v45, %v441_v46  ;;  %v529_v34 = vld [vmem:[#allocation2 + $0xbb0] sm:$0xff] }
 0x1af   :  { %3748 = vmatprep.subr.bf16.mxu1 %v16480_v0  ;;  %v3413_v14 = vpop.f32.mrf.mxu0  ;;  %3658 = vmatmul.mubr.bf16.vlgmr.msra.gmra.mxu0 %v18653_v16  ;;  %v16312_v0 = vcombine.high %v429_v55, %v433_v56  ;;  %v521_v45 = vld [vmem:[#allocation2 + $0xb70] sm:$0xff]  ;;  %v16407_v48 = vcombine.low %v525_v33, %v529_v34 }
 0x1b0   :  { %v3414_v18 = vadd.f32 %v3413_v14, %v18714_v36  ;;  %3708 = vmatpush1.bf16.msra.mxu0 %v16351_v6  ;;  %3739 = vmatprep.mubr.bf16.mxu0 %v18671_v54  ;;  %v553_v6 = vld [vmem:[#allocation2 + $0xc70] sm:$0xff] }
 0x1b1   :  { %v3454_v21 = vpop.f32.mrf.mxu1  ;;  %3699 = vmatmul.mubr.bf16.vlgmr.msra.gmra.mxu1 %v18662_v20  ;;  %v3415_v23 = vpop.f32.mrf.mxu0  ;;  %3709 = vmatprep.subr.bf16.mxu0 %v16344_v9  ;;  %v16439_v9 = vcombine.low %v557_v57, %v561_v61  ;;  %v16432_v12 = vcombine.high %v549_v4, %v553_v6  ;;  %v417_v14 = vld [vmem:[#allocation2 + $0x830] sm:$0xff] }
 0x1b2   :  { %3749 = vmatpush1.bf16.msra.mxu1 %v16479_v8  ;;  %v18723_v26 = vadd.f32 %v3454_v21, %v3414_v18  ;;  %v3416_v27 = vadd.f32 %v3415_v23, %v18718_v47  ;;  %3780 = vmatprep.mubr.bf16.mxu1 %v18676_v29  ;;  %v16463_v47 = vcombine.low %v581_v15, %v585_v17  ;;  %v541_v15 = vld [vmem:[#allocation2 + $0xc10] sm:$0xff] }
 0x1b3   :  { %v3456_v28 = vpop.f32.mrf.mxu1  ;;  %3750 = vmatprep.subr.bf16.mxu1 %v16472_v11  ;;  %v3417_v36 = vpop.f32.mrf.mxu0  ;;  %v16311_v8 = vcombine.low %v429_v55, %v433_v56  ;;  %v16304_v11 = vcombine.high %v421_v2, %v425_v3  ;;  %v545_v17 = vld [vmem:[#allocation2 + $0xc30] sm:$0xff]  ;;  %v16303_v18 = vcombine.low %v421_v2, %v425_v3  ;;  %v16431_v21 = vcombine.low %v549_v4, %v553_v6 }
 0x1b4   :  { %v18728_v35 = vadd.f32 %v3456_v28, %v3416_v27  ;;  %3710 = vmatpush1.bf16.msra.mxu0 %v16343_v53  ;;  %v16296_v53 = vcombine.high %v413_v13, %v417_v14  ;;  %v16424_v23 = vcombine.high %v541_v15, %v545_v17  ;;  %v661_v27 = vld [vmem:[#allocation2 + $0xfd0] sm:$0xff]  ;;  %v16423_v31 = vcombine.low %v541_v15, %v545_v17 }
 0x1b5   :  { %v3458_v37 = vpop.f32.mrf.mxu1  ;;  %v3418_v41 = vpop.f32.mrf.mxu0  ;;  %3711 = vmatprep.subr.bf16.mxu0 %v16336_v25  ;;  %v537_v25 = vld [vmem:[#allocation2 + $0xbf0] sm:$0xff] }
 0x1b6   :  { %3751 = vmatpush1.bf16.msra.mxu1 %v16471_v24  ;;  %v533_v24 = vld [vmem:[#allocation2 + $0xbd0] sm:$0xff] }
 0x1b7   :  { %v3459_v43 = vpop.f32.mrf.mxu1  ;;  %3752 = vmatprep.subr.bf16.mxu1 %v16464_v30  ;;  %v665_v28 = vld [vmem:[#allocation2 + $0xff0] sm:$0xff]  ;;  %v16295_v30 = vcombine.low %v413_v13, %v417_v14  ;;  %v16416_v32 = vcombine.high %v533_v24, %v537_v25  ;;  %v16415_v41 = vcombine.low %v533_v24, %v537_v25 }
 0x1b8   :  { %3712 = vmatpush1.bf16.msra.mxu0 %v16335_v40  ;;  %v16544_v36 = vcombine.high %v661_v27, %v665_v28  ;;  %v653_v37 = vld [vmem:[#allocation2 + $0xf90] sm:$0xff] }
 0x1b9   :  { %3713 = vmatprep.subr.bf16.mxu0 %v16328_v42  ;;  %v657_v40 = vld [vmem:[#allocation2 + $0xfb0] sm:$0xff]  ;;  %v16408_v42 = vcombine.high %v525_v33, %v529_v34 }
 0x1ba   :  { %3753 = vmatpush1.bf16.msra.mxu1 %v16463_v47  ;;  %v16543_v47 = vcombine.low %v661_v27, %v665_v28  ;;  %v16536_v43 = vcombine.high %v653_v37, %v657_v40  ;;  %v645_v46 = vld [vmem:[#allocation2 + $0xf50] sm:$0xff] }
 0x1bb   :  { %3754 = vmatprep.subr.bf16.mxu1 %v16456_v44  ;;  %v517_v44 = vld [vmem:[#allocation2 + $0xb50] sm:$0xff] }
 0x1bc   :  { %3714 = vmatpush1.bf16.msra.mxu0 %v16327_v49  ;;  %v649_v19 = vld [vmem:[#allocation2 + $0xf70] sm:$0xff]  ;;  %v16535_v49 = vcombine.low %v653_v37, %v657_v40  ;;  %v16399_v61 = vcombine.low %v517_v44, %v521_v45 }
 0x1bd   :  { %3715 = vmatprep.subr.bf16.mxu0 %v16320_v51  ;;  %v16528_v51 = vcombine.high %v645_v46, %v649_v19  ;;  %v513_v55 = vld [vmem:[#allocation2 + $0xb30] sm:$0xff] }
 0x1be   :  { %3755 = vmatpush1.bf16.msra.mxu1 %v16455_v50  ;;  %v16400_v50 = vcombine.high %v517_v44, %v521_v45  ;;  %v637_v56 = vld [vmem:[#allocation2 + $0xf10] sm:$0xff]  ;;  %v218_v44 = vld [vmem:[#allocation2 + $0x1f8] sm:$0xff] }
 0x1bf   :  { %3756 = vmatprep.subr.bf16.mxu1 %v16448_v52  ;;  %v509_v52 = vld [vmem:[#allocation2 + $0xb10] sm:$0xff]  ;;  %v342_v45 = vld [vmem:[#allocation2 + $0x5d8] sm:$0xff] }
 0x1c0   :  { %3716 = vmatpush1.bf16.msra.mxu0 %v16319_v62  ;;  %v641_v57 = vld [vmem:[#allocation2 + $0xf30] sm:$0xff]  ;;  %v16527_v62 = vcombine.low %v645_v46, %v649_v19  ;;  %v16391_v6 = vcombine.low %v509_v52, %v513_v55  ;;  %v346_v46 = vld [vmem:[#allocation2 + $0x5f8] sm:$0xff] }
 0x1c1   :  { %3717 = vmatprep.subr.bf16.mxu0 %v16312_v0  ;;  %v16520_v0 = vcombine.high %v637_v56, %v641_v57  ;;  %v505_v2 = vld [vmem:[#allocation2 + $0xaf0] sm:$0xff] }
 0x1c2   :  { %3757 = vmatpush1.bf16.msra.mxu1 %v16447_v63  ;;  %v16392_v63 = vcombine.high %v509_v52, %v513_v55  ;;  %v629_v3 = vld [vmem:[#allocation2 + $0xed0] sm:$0xff]  ;;  %v18734_v52 = vsub.s32 3, %v18698_v60  ;;  %v206_v55 = vld [vmem:[#allocation2 + $0x198] sm:$0xff] }
 0x1c3   :  { %3758 = vmatprep.subr.bf16.mxu1 %v16440_v1  ;;  %v501_v1 = vld [vmem:[#allocation2 + $0xad0] sm:$0xff] }
 0x1c4   :  { %3718 = vmatpush1.bf16.msra.mxu0 %v16311_v8  ;;  %v633_v4 = vld [vmem:[#allocation2 + $0xef0] sm:$0xff]  ;;  %v16519_v8 = vcombine.low %v637_v56, %v641_v57  ;;  %v16383_v17 = vcombine.low %v501_v1, %v505_v2  ;;  %v210_v56 = vld [vmem:[#allocation2 + $0x1b8] sm:$0xff] }
 0x1c5   :  { %3719 = vmatprep.subr.bf16.mxu0 %v16304_v11  ;;  %v16512_v11 = vcombine.high %v629_v3, %v633_v4  ;;  %v497_v13 = vld [vmem:[#allocation2 + $0xab0] sm:$0xff]  ;;  %v334_v57 = vld [vmem:[#allocation2 + $0x598] sm:$0xff] }
 0x1c6   :  { %3759 = vmatpush1.bf16.msra.mxu1 %v16439_v9  ;;  %v16384_v9 = vcombine.high %v501_v1, %v505_v2  ;;  %v621_v14 = vld [vmem:[#allocation2 + $0xe90] sm:$0xff]  ;;  %v16090_v1 = vcombine.high %v206_v55, %v210_v56  ;;  %v684_v2 = vrot.slane %v18703_v7, %v18734_v52 }
 0x1c7   :  { %3760 = vmatprep.subr.bf16.mxu1 %v16432_v12  ;;  %v493_v12 = vld [vmem:[#allocation2 + $0xa90] sm:$0xff] }
 0x1c8   :  { %3720 = vmatpush1.bf16.msra.mxu0 %v16303_v18  ;;  %v625_v15 = vld [vmem:[#allocation2 + $0xeb0] sm:$0xff]  ;;  %v16511_v18 = vcombine.low %v629_v3, %v633_v4  ;;  %v16375_v28 = vcombine.low %v493_v12, %v497_v13  ;;  %v198_v4 = vld [vmem:[#allocation2 + $0x158] sm:$0xff] }
 0x1c9   :  { %3721 = vmatprep.subr.bf16.mxu0 %v16296_v53  ;;  %v16504_v53 = vcombine.high %v621_v14, %v625_v15  ;;  %v489_v24 = vld [vmem:[#allocation2 + $0xa70] sm:$0xff] }
 0x1ca   :  { %3761 = vmatpush1.bf16.msra.mxu1 %v16431_v21  ;;  %v16376_v21 = vcombine.high %v493_v12, %v497_v13  ;;  %v613_v25 = vld [vmem:[#allocation2 + $0xe50] sm:$0xff] }
 0x1cb   :  { %3762 = vmatprep.subr.bf16.mxu1 %v16424_v23  ;;  %v485_v23 = vld [vmem:[#allocation2 + $0xa50] sm:$0xff] }
 0x1cc   :  { %3722 = vmatpush1.bf16.msra.mxu0 %v16295_v30  ;;  %v617_v27 = vld [vmem:[#allocation2 + $0xe70] sm:$0xff]  ;;  %v16503_v30 = vcombine.low %v621_v14, %v625_v15  ;;  %v16367_v40 = vcombine.low %v485_v23, %v489_v24  ;;  %v16089_v14 = vcombine.low %v206_v55, %v210_v56 }
 0x1cd   :  { %3723 = vmatprep.subr.bf16.mxu0 %v16416_v32  ;;  %v16496_v32 = vcombine.high %v613_v25, %v617_v27  ;;  %v481_v33 = vld [vmem:[#allocation2 + $0xa30] sm:$0xff] }
 0x1ce   :  { %3763 = vmatpush1.bf16.msra.mxu1 %v16423_v31  ;;  %v16368_v31 = vcombine.high %v485_v23, %v489_v24  ;;  %v605_v34 = vld [vmem:[#allocation2 + $0xe10] sm:$0xff]  ;;  %v190_v24 = vld [vmem:[#allocation2 + $0x118] sm:$0xff] }
 0x1cf   :  { %3764 = vmatprep.subr.bf16.mxu1 %v16544_v36  ;;  %v477_v36 = vld [vmem:[#allocation2 + $0xa10] sm:$0xff] }
 0x1d0   :  { %3724 = vmatpush2.bf16.msra.mxu0 %v16415_v41  ;;  %v609_v37 = vld [vmem:[#allocation2 + $0xe30] sm:$0xff]  ;;  %v16495_v41 = vcombine.low %v613_v25, %v617_v27  ;;  %v16359_v19 = vcombine.low %v477_v36, %v481_v33  ;;  %v194_v25 = vld [vmem:[#allocation2 + $0x138] sm:$0xff] }
 0x1d1   :  { %3725 = vmatprep.subr.bf16.mxu0 %v16408_v42  ;;  %v16488_v42 = vcombine.high %v605_v34, %v609_v37 }
 0x1d2   :  { %3765 = vmatpush2.bf16.msra.mxu1 %v16543_v47  ;;  %v16360_v47 = vcombine.high %v477_v36, %v481_v33 }
 0x1d3   :  { %3766 = vmatprep.subr.bf16.mxu1 %v16536_v43  ;;  %v214_v43 = vld [vmem:[#allocation2 + $0x1d8] sm:$0xff] }
 0x1d4   :  { %3726 = vmatpush2.bf16.msra.mxu0 %v16407_v48  ;;  %v18731_v48 = vsub.s32 2, %v18698_v60 }
 0x1d5   :  { %3727 = vmatprep.subr.bf16.mxu0 %v16400_v50  ;;  %v16098_v50 = vcombine.high %v214_v43, %v218_v44 }
 0x1d6   :  { %3767 = vmatpush2.bf16.msra.mxu1 %v16535_v49  ;;  %v16487_v49 = vcombine.low %v605_v34, %v609_v37  ;;  %v16074_v37 = vcombine.high %v190_v24, %v194_v25 }
 0x1d7   :  { %3768 = vmatprep.subr.bf16.mxu1 %v16528_v51  ;;  %v16226_v51 = vcombine.high %v342_v45, %v346_v46 }
 0x1d8   :  { %3728 = vmatpush2.bf16.msra.mxu0 %v16399_v61  ;;  %v338_v61 = vld [vmem:[#allocation2 + $0x5b8] sm:$0xff] }
 0x1d9   :  { %3729 = vmatprep.subr.bf16.mxu0 %v16392_v63  ;;  %v16097_v63 = vcombine.low %v214_v43, %v218_v44  ;;  %v16218_v3 = vcombine.high %v334_v57, %v338_v61  ;;  %v314_v43 = vld [vmem:[#allocation2 + $0x4f8] sm:$0xff]  ;;  %v16073_v44 = vcombine.low %v190_v24, %v194_v25 }
 0x1da   :  { %3769 = vmatpush2.bf16.msra.mxu1 %v16527_v62  ;;  %v680_v62 = vrot.slane %v18703_v7, %v18731_v48 }
 0x1db   :  { %3770 = vmatprep.subr.bf16.mxu1 %v16520_v0  ;;  %v16225_v0 = vcombine.low %v342_v45, %v346_v46 }
 0x1dc   :  { %3730 = vmatpush2.bf16.msra.mxu0 %v16391_v6  ;;  %v202_v6 = vld [vmem:[#allocation2 + $0x178] sm:$0xff] }
 0x1dd   :  { %3731 = vmatprep.subr.bf16.mxu0 %v16384_v9  ;;  %v326_v9 = vld [vmem:[#allocation2 + $0x558] sm:$0xff]  ;;  %v16081_v36 = vcombine.low %v198_v4, %v202_v6 }
 0x1de   :  { %3771 = vmatpush2.bf16.msra.mxu1 %v16519_v8 }
 0x1df   :  { %3772 = vmatprep.subr.bf16.mxu1 %v16512_v11  ;;  %v330_v11 = vld [vmem:[#allocation2 + $0x578] sm:$0xff] }
 0x1e0   :  { %3732 = vmatpush2.bf16.msra.mxu0 %v16383_v17  ;;  %v16217_v17 = vcombine.low %v334_v57, %v338_v61  ;;  %v16210_v23 = vcombine.high %v326_v9, %v330_v11  ;;  %v16209_v34 = vcombine.low %v326_v9, %v330_v11  ;;  %v162_v9 = vld [vmem:[#allocation2 + $0x38] sm:$0xff] }
 0x1e1   :  { %3733 = vmatprep.subr.bf16.mxu0 %v16376_v21  ;;  %v286_v11 = vld [vmem:[#allocation2 + $0x418] sm:$0xff] }
 0x1e2   :  { %3773 = vmatpush2.bf16.msra.mxu1 %v16511_v18  ;;  %v16082_v18 = vcombine.high %v198_v4, %v202_v6 }
 0x1e3   :  { %3774 = vmatprep.subr.bf16.mxu1 %v16504_v53 }
 0x1e4   :  { %3734 = vmatpush2.bf16.msra.mxu0 %v16375_v28  ;;  %v318_v28 = vld [vmem:[#allocation2 + $0x518] sm:$0xff] }
 0x1e5   :  { %3735 = vmatprep.subr.bf16.mxu0 %v16368_v31 }
 0x1e6   :  { %3775 = vmatpush2.bf16.msra.mxu1 %v16503_v30  ;;  %v322_v30 = vld [vmem:[#allocation2 + $0x538] sm:$0xff] }
 0x1e7   :  { %3776 = vmatprep.subr.bf16.mxu1 %v16496_v32 }
 0x1e8   :  { %3736 = vmatpush2.bf16.msra.mxu0 %v16367_v40 }
 0x1e9   :  { %3737 = vmatprep.subr.bf16.mxu0 %v16360_v47  ;;  %v182_v47 = vld [vmem:[#allocation2 + $0xd8] sm:$0xff] }
 0x1ea   :  { %3777 = vmatpush2.bf16.msra.mxu1 %v16495_v41  ;;  %v16202_v41 = vcombine.high %v318_v28, %v322_v30 }
 0x1eb   :  { %3778 = vmatprep.subr.bf16.mxu1 %v16488_v42  ;;  %v310_v42 = vld [vmem:[#allocation2 + $0x4d8] sm:$0xff] }
 0x1ec   :  { %3738 = vmatpush2.bf16.msra.mxu0 %v16359_v19  ;;  %v16194_v46 = vcombine.high %v310_v42, %v314_v43  ;;  %v174_v19 = vld [vmem:[#allocation2 + $0x98] sm:$0xff]  ;;  %v16193_v56 = vcombine.low %v310_v42, %v314_v43 }
 0x1ed   :  { %3789 = vmatprep.subr.bf16.mxu0 %v16098_v50  ;;  %v302_v50 = vld [vmem:[#allocation2 + $0x498] sm:$0xff] }
 0x1ee   :  { %3779 = vmatpush2.bf16.msra.mxu1 %v16487_v49  ;;  %v178_v49 = vld [vmem:[#allocation2 + $0xb8] sm:$0xff] }
 0x1ef   :  { %3830 = vmatprep.subr.bf16.mxu1 %v16226_v51  ;;  %v3495_v8 = vpop.f32.mrf.mxu0  ;;  %3740 = vmatmul.mubr.bf16.vlgmr.msra.gmra.mxu0 %v18683_v38  ;;  %v306_v51 = vld [vmem:[#allocation2 + $0x4b8] sm:$0xff]  ;;  %v16058_v57 = vcombine.high %v174_v19, %v178_v49 }
 0x1f0   :  { %v3496_v12 = vadd.f32 %v3495_v8, %v680_v62  ;;  %3790 = vmatpush1.bf16.msra.mxu0 %v16097_v63  ;;  %3821 = vmatprep.mubr.bf16.mxu0 %v18643_v58  ;;  %v186_v58 = vld [vmem:[#allocation2 + $0xf8] sm:$0xff]  ;;  %v16186_v61 = vcombine.high %v302_v50, %v306_v51 }
 0x1f1   :  { %v3536_v13 = vpop.f32.mrf.mxu1  ;;  %3781 = vmatmul.mubr.bf16.vlgmr.msra.gmra.mxu1 %v18687_v39  ;;  %v3497_v15 = vpop.f32.mrf.mxu0  ;;  %3791 = vmatprep.subr.bf16.mxu0 %v16090_v1  ;;  %v16066_v45 = vcombine.high %v182_v47, %v186_v58  ;;  %v16065_v55 = vcombine.low %v182_v47, %v186_v58  ;;  %v166_v62 = vld [vmem:[#allocation2 + $0x58] sm:$0xff] }
 0x1f2   :  { %3831 = vmatpush1.bf16.msra.mxu1 %v16225_v0  ;;  %v18742_v7 = vadd.f32 %v3536_v13, %v3496_v12  ;;  %v3498_v21 = vadd.f32 %v3497_v15, %v684_v2  ;;  %3862 = vmatprep.mubr.bf16.mxu1 %v18647_v59  ;;  %v16201_v59 = vcombine.low %v318_v28, %v322_v30  ;;  %v170_v63 = vld [vmem:[#allocation2 + $0x78] sm:$0xff] }
 0x1f3   :  { %v3538_v53 = vpop.f32.mrf.mxu1  ;;  %3832 = vmatprep.subr.bf16.mxu1 %v16218_v3  ;;  %v3499_v27 = vpop.f32.mrf.mxu0  ;;  %v294_v0 = vld [vmem:[#allocation2 + $0x458] sm:$0xff]  ;;  %v16057_v2 = vcombine.low %v174_v19, %v178_v49  ;;  %v16185_v3 = vcombine.low %v302_v50, %v306_v51  ;;  %v16050_v4 = vcombine.high %v166_v62, %v170_v63  ;;  %v16049_v13 = vcombine.low %v166_v62, %v170_v63 }
 0x1f4   :  { %v18746_v31 = vadd.f32 %v3538_v53, %v3498_v21  ;;  %3792 = vmatpush1.bf16.msra.mxu0 %v16089_v14  ;;  %v298_v1 = vld [vmem:[#allocation2 + $0x478] sm:$0xff] }
 0x1f5   :  { %v3540_v32 = vpop.f32.mrf.mxu1  ;;  %v3500_v33 = vpop.f32.mrf.mxu0  ;;  %3793 = vmatprep.subr.bf16.mxu0 %v16082_v18  ;;  %v16178_v6 = vcombine.high %v294_v0, %v298_v1  ;;  %v158_v8 = vld [vmem:[#allocation2 + $0x18] sm:$0xff]  ;;  %v16177_v14 = vcombine.low %v294_v0, %v298_v1 }
 0x1f6   :  { %3833 = vmatpush1.bf16.msra.mxu1 %v16217_v17  ;;  %v290_v12 = vld [vmem:[#allocation2 + $0x438] sm:$0xff]  ;;  %v16042_v15 = vcombine.high %v158_v8, %v162_v9  ;;  %v16041_v24 = vcombine.low %v158_v8, %v162_v9 }
 0x1f7   :  { %v3541_v40 = vpop.f32.mrf.mxu1  ;;  %3834 = vmatprep.subr.bf16.mxu1 %v16210_v23  ;;  %v16170_v17 = vcombine.high %v286_v11, %v290_v12  ;;  %v278_v18 = vld [vmem:[#allocation2 + $0x3d8] sm:$0xff]  ;;  %v16169_v25 = vcombine.low %v286_v11, %v290_v12 }
 0x1f8   :  { %3794 = vmatpush1.bf16.msra.mxu0 %v16081_v36  ;;  %v282_v21 = vld [vmem:[#allocation2 + $0x3f8] sm:$0xff] }
 0x1f9   :  { %3795 = vmatprep.subr.bf16.mxu0 %v16074_v37  ;;  %v406_v53 = vld [vmem:[#allocation2 + $0x7d8] sm:$0xff]  ;;  %v16162_v27 = vcombine.high %v278_v18, %v282_v21 }
 0x1fa   :  { %3835 = vmatpush1.bf16.msra.mxu1 %v16209_v34  ;;  %v410_v23 = vld [vmem:[#allocation2 + $0x7f8] sm:$0xff]  ;;  %v16161_v34 = vcombine.low %v278_v18, %v282_v21 }
 0x1fb   :  { %3836 = vmatprep.subr.bf16.mxu1 %v16202_v41  ;;  %v16290_v28 = vcombine.high %v406_v53, %v410_v23  ;;  %v270_v30 = vld [vmem:[#allocation2 + $0x398] sm:$0xff]  ;;  %v16289_v37 = vcombine.low %v406_v53, %v410_v23 }
 0x1fc   :  { %3796 = vmatpush1.bf16.msra.mxu0 %v16073_v44  ;;  %v274_v32 = vld [vmem:[#allocation2 + $0x3b8] sm:$0xff] }
 0x1fd   :  { %3797 = vmatprep.subr.bf16.mxu0 %v16066_v45  ;;  %v398_v36 = vld [vmem:[#allocation2 + $0x798] sm:$0xff]  ;;  %v16154_v40 = vcombine.high %v270_v30, %v274_v32  ;;  %v16153_v44 = vcombine.low %v270_v30, %v274_v32 }
 0x1fe   :  { %3837 = vmatpush1.bf16.msra.mxu1 %v16201_v59  ;;  %v402_v33 = vld [vmem:[#allocation2 + $0x7b8] sm:$0xff] }
 0x1ff   :  { %3838 = vmatprep.subr.bf16.mxu1 %v16194_v46  ;;  %v16282_v41 = vcombine.high %v398_v36, %v402_v33  ;;  %v262_v47 = vld [vmem:[#allocation2 + $0x358] sm:$0xff]  ;;  %v16281_v59 = vcombine.low %v398_v36, %v402_v33 }
 0x200   :  { %3798 = vmatpush1.bf16.msra.mxu0 %v16065_v55  ;;  %v266_v58 = vld [vmem:[#allocation2 + $0x378] sm:$0xff] }
 0x201   :  { %3799 = vmatprep.subr.bf16.mxu0 %v16058_v57  ;;  %v390_v42 = vld [vmem:[#allocation2 + $0x758] sm:$0xff]  ;;  %v16146_v45 = vcombine.high %v262_v47, %v266_v58  ;;  %v16145_v55 = vcombine.low %v262_v47, %v266_v58 }
 0x202   :  { %3839 = vmatpush1.bf16.msra.mxu1 %v16193_v56  ;;  %v394_v43 = vld [vmem:[#allocation2 + $0x778] sm:$0xff] }
 0x203   :  { %3840 = vmatprep.subr.bf16.mxu1 %v16186_v61  ;;  %v16274_v46 = vcombine.high %v390_v42, %v394_v43  ;;  %v254_v19 = vld [vmem:[#allocation2 + $0x318] sm:$0xff]  ;;  %v16273_v56 = vcombine.low %v390_v42, %v394_v43 }
 0x204   :  { %3800 = vmatpush1.bf16.msra.mxu0 %v16057_v2  ;;  %v258_v49 = vld [vmem:[#allocation2 + $0x338] sm:$0xff] }
 0x205   :  { %3801 = vmatprep.subr.bf16.mxu0 %v16050_v4  ;;  %v382_v50 = vld [vmem:[#allocation2 + $0x718] sm:$0xff]  ;;  %v16138_v57 = vcombine.high %v254_v19, %v258_v49  ;;  %v16137_v2 = vcombine.low %v254_v19, %v258_v49 }
 0x206   :  { %3841 = vmatpush1.bf16.msra.mxu1 %v16185_v3  ;;  %v386_v51 = vld [vmem:[#allocation2 + $0x738] sm:$0xff] }
 0x207   :  { %3842 = vmatprep.subr.bf16.mxu1 %v16178_v6  ;;  %v16266_v61 = vcombine.high %v382_v50, %v386_v51  ;;  %v246_v62 = vld [vmem:[#allocation2 + $0x2d8] sm:$0xff]  ;;  %v16265_v3 = vcombine.low %v382_v50, %v386_v51 }
 0x208   :  { %3802 = vmatpush1.bf16.msra.mxu0 %v16049_v13  ;;  %v250_v63 = vld [vmem:[#allocation2 + $0x2f8] sm:$0xff] }
 0x209   :  { %3803 = vmatprep.subr.bf16.mxu0 %v16042_v15  ;;  %v374_v0 = vld [vmem:[#allocation2 + $0x6d8] sm:$0xff]  ;;  %v16130_v4 = vcombine.high %v246_v62, %v250_v63  ;;  %v16129_v13 = vcombine.low %v246_v62, %v250_v63 }
 0x20a   :  { %3843 = vmatpush1.bf16.msra.mxu1 %v16177_v14  ;;  %v378_v1 = vld [vmem:[#allocation2 + $0x6f8] sm:$0xff] }
 0x20b   :  { %3844 = vmatprep.subr.bf16.mxu1 %v16170_v17  ;;  %v16258_v6 = vcombine.high %v374_v0, %v378_v1  ;;  %v238_v8 = vld [vmem:[#allocation2 + $0x298] sm:$0xff]  ;;  %v16257_v14 = vcombine.low %v374_v0, %v378_v1 }
 0x20c   :  { %3804 = vmatpush1.bf16.msra.mxu0 %v16041_v24  ;;  %v242_v9 = vld [vmem:[#allocation2 + $0x2b8] sm:$0xff] }
 0x20d   :  { %3805 = vmatprep.subr.bf16.mxu0 %v16162_v27  ;;  %v366_v11 = vld [vmem:[#allocation2 + $0x698] sm:$0xff]  ;;  %v16122_v15 = vcombine.high %v238_v8, %v242_v9  ;;  %v16121_v24 = vcombine.low %v238_v8, %v242_v9 }
 0x20e   :  { %3845 = vmatpush1.bf16.msra.mxu1 %v16169_v25  ;;  %v370_v12 = vld [vmem:[#allocation2 + $0x6b8] sm:$0xff] }
 0x20f   :  { %3846 = vmatprep.subr.bf16.mxu1 %v16290_v28  ;;  %v16250_v17 = vcombine.high %v366_v11, %v370_v12  ;;  %v230_v18 = vld [vmem:[#allocation2 + $0x258] sm:$0xff]  ;;  %v16249_v25 = vcombine.low %v366_v11, %v370_v12 }
 0x210   :  { %3806 = vmatpush2.bf16.msra.mxu0 %v16161_v34  ;;  %v234_v21 = vld [vmem:[#allocation2 + $0x278] sm:$0xff] }
 0x211   :  { %3807 = vmatprep.subr.bf16.mxu0 %v16154_v40  ;;  %v358_v53 = vld [vmem:[#allocation2 + $0x658] sm:$0xff]  ;;  %v16114_v27 = vcombine.high %v230_v18, %v234_v21  ;;  %v16113_v34 = vcombine.low %v230_v18, %v234_v21 }
 0x212   :  { %3847 = vmatpush2.bf16.msra.mxu1 %v16289_v37  ;;  %v362_v23 = vld [vmem:[#allocation2 + $0x678] sm:$0xff] }
 0x213   :  { %3848 = vmatprep.subr.bf16.mxu1 %v16282_v41  ;;  %v16242_v28 = vcombine.high %v358_v53, %v362_v23  ;;  %v222_v30 = vld [vmem:[#allocation2 + $0x218] sm:$0xff]  ;;  %v16241_v37 = vcombine.low %v358_v53, %v362_v23 }
 0x214   :  { %3808 = vmatpush2.bf16.msra.mxu0 %v16153_v44  ;;  %v226_v32 = vld [vmem:[#allocation2 + $0x238] sm:$0xff] }
 0x215   :  { %3809 = vmatprep.subr.bf16.mxu0 %v16146_v45  ;;  %v350_v36 = vld [vmem:[#allocation2 + $0x618] sm:$0xff]  ;;  %v16106_v40 = vcombine.high %v222_v30, %v226_v32  ;;  %v16105_v44 = vcombine.low %v222_v30, %v226_v32 }
 0x216   :  { %3849 = vmatpush2.bf16.msra.mxu1 %v16281_v59  ;;  %v354_v33 = vld [vmem:[#allocation2 + $0x638] sm:$0xff] }
 0x217   :  { %3850 = vmatprep.subr.bf16.mxu1 %v16274_v46  ;;  %v16234_v41 = vcombine.high %v350_v36, %v354_v33  ;;  %v470_v47 = vld [vmem:[#allocation2 + $0x9d8] sm:$0xff]  ;;  %v16233_v59 = vcombine.low %v350_v36, %v354_v33 }
 0x218   :  { %3810 = vmatpush2.bf16.msra.mxu0 %v16145_v55  ;;  %v474_v58 = vld [vmem:[#allocation2 + $0x9f8] sm:$0xff] }
 0x219   :  { %3811 = vmatprep.subr.bf16.mxu0 %v16138_v57  ;;  %v598_v42 = vld [vmem:[#allocation2 + $0xdd8] sm:$0xff]  ;;  %v16354_v45 = vcombine.high %v470_v47, %v474_v58  ;;  %v16353_v55 = vcombine.low %v470_v47, %v474_v58 }
 0x21a   :  { %3851 = vmatpush2.bf16.msra.mxu1 %v16273_v56  ;;  %v602_v43 = vld [vmem:[#allocation2 + $0xdf8] sm:$0xff] }
 0x21b   :  { %3852 = vmatprep.subr.bf16.mxu1 %v16266_v61  ;;  %v16482_v46 = vcombine.high %v598_v42, %v602_v43  ;;  %v462_v19 = vld [vmem:[#allocation2 + $0x998] sm:$0xff]  ;;  %v16481_v56 = vcombine.low %v598_v42, %v602_v43 }
 0x21c   :  { %3812 = vmatpush2.bf16.msra.mxu0 %v16137_v2  ;;  %v466_v49 = vld [vmem:[#allocation2 + $0x9b8] sm:$0xff] }
 0x21d   :  { %3813 = vmatprep.subr.bf16.mxu0 %v16130_v4  ;;  %v590_v50 = vld [vmem:[#allocation2 + $0xd98] sm:$0xff]  ;;  %v16346_v57 = vcombine.high %v462_v19, %v466_v49 }
 0x21e   :  { %3853 = vmatpush2.bf16.msra.mxu1 %v16265_v3  ;;  %v594_v51 = vld [vmem:[#allocation2 + $0xdb8] sm:$0xff] }
 0x21f   :  { %3854 = vmatprep.subr.bf16.mxu1 %v16258_v6  ;;  %v16474_v61 = vcombine.high %v590_v50, %v594_v51  ;;  %v454_v62 = vld [vmem:[#allocation2 + $0x958] sm:$0xff]  ;;  %v16345_v6 = vcombine.low %v462_v19, %v466_v49  ;;  %v16473_v9 = vcombine.low %v590_v50, %v594_v51 }
 0x220   :  { %3814 = vmatpush2.bf16.msra.mxu0 %v16129_v13  ;;  %v458_v63 = vld [vmem:[#allocation2 + $0x978] sm:$0xff] }
 0x221   :  { %3815 = vmatprep.subr.bf16.mxu0 %v16122_v15  ;;  %v582_v1 = vld [vmem:[#allocation2 + $0xd58] sm:$0xff]  ;;  %v16338_v11 = vcombine.high %v454_v62, %v458_v63  ;;  %v16337_v21 = vcombine.low %v454_v62, %v458_v63 }
 0x222   :  { %3855 = vmatpush2.bf16.msra.mxu1 %v16257_v14  ;;  %v586_v2 = vld [vmem:[#allocation2 + $0xd78] sm:$0xff] }
 0x223   :  { %3856 = vmatprep.subr.bf16.mxu1 %v16250_v17  ;;  %v446_v14 = vld [vmem:[#allocation2 + $0x918] sm:$0xff]  ;;  %v16465_v23 = vcombine.low %v582_v1, %v586_v2 }
 0x224   :  { %3816 = vmatpush2.bf16.msra.mxu0 %v16121_v24  ;;  %v450_v15 = vld [vmem:[#allocation2 + $0x938] sm:$0xff] }
 0x225   :  { %3817 = vmatprep.subr.bf16.mxu0 %v16114_v27  ;;  %v578_v17 = vld [vmem:[#allocation2 + $0xd38] sm:$0xff]  ;;  %v16330_v24 = vcombine.high %v446_v14, %v450_v15  ;;  %v16329_v36 = vcombine.low %v446_v14, %v450_v15 }
 0x226   :  { %3857 = vmatpush2.bf16.msra.mxu1 %v16249_v25  ;;  %v442_v30 = vld [vmem:[#allocation2 + $0x8f8] sm:$0xff] }
 0x227   :  { %3858 = vmatprep.subr.bf16.mxu1 %v16242_v28  ;;  %v438_v28 = vld [vmem:[#allocation2 + $0x8d8] sm:$0xff] }
 0x228   :  { %3818 = vmatpush2.bf16.msra.mxu0 %v16113_v34  ;;  %v566_v32 = vld [vmem:[#allocation2 + $0xcd8] sm:$0xff]  ;;  %v16322_v33 = vcombine.high %v438_v28, %v442_v30  ;;  %v16321_v58 = vcombine.low %v438_v28, %v442_v30 }
 0x229   :  { %3819 = vmatprep.subr.bf16.mxu0 %v16106_v40  ;;  %v434_v40 = vld [vmem:[#allocation2 + $0x8b8] sm:$0xff] }
 0x22a   :  { %3859 = vmatpush2.bf16.msra.mxu1 %v16241_v37  ;;  %v430_v37 = vld [vmem:[#allocation2 + $0x898] sm:$0xff] }
 0x22b   :  { %3860 = vmatprep.subr.bf16.mxu1 %v16234_v41  ;;  %v558_v41 = vld [vmem:[#allocation2 + $0xc98] sm:$0xff]  ;;  %v16314_v43 = vcombine.high %v430_v37, %v434_v40  ;;  %v16313_v49 = vcombine.low %v430_v37, %v434_v40 }
 0x22c   :  { %3820 = vmatpush2.bf16.msra.mxu0 %v16105_v44  ;;  %v562_v47 = vld [vmem:[#allocation2 + $0xcb8] sm:$0xff] }
 0x22d   :  { %3871 = vmatprep.subr.bf16.mxu0 %v16354_v45  ;;  %v16442_v44 = vcombine.high %v558_v41, %v562_v47  ;;  %v426_v45 = vld [vmem:[#allocation2 + $0x878] sm:$0xff]  ;;  %v16441_v50 = vcombine.low %v558_v41, %v562_v47 }
 0x22e   :  { %3861 = vmatpush2.bf16.msra.mxu1 %v16233_v59  ;;  %v422_v59 = vld [vmem:[#allocation2 + $0x858] sm:$0xff] }
 0x22f   :  { %3912 = vmatprep.subr.bf16.mxu1 %v16482_v46  ;;  %v3577_v0 = vpop.f32.mrf.mxu0  ;;  %3822 = vmatmul.mubr.bf16.vlgmr.msra.gmra.mxu0 %v18653_v16  ;;  %v16466_v16 = vcombine.high %v582_v1, %v586_v2  ;;  %v550_v46 = vld [vmem:[#allocation2 + $0xc58] sm:$0xff]  ;;  %v16306_v51 = vcombine.high %v422_v59, %v426_v45  ;;  %v16305_v63 = vcombine.low %v422_v59, %v426_v45 }
 0x230   :  { %v3578_v3 = vadd.f32 %v3577_v0, %v18742_v7  ;;  %3872 = vmatpush1.bf16.msra.mxu0 %v16353_v55  ;;  %3903 = vmatprep.mubr.bf16.mxu0 %v18671_v54  ;;  %v570_v54 = vld [vmem:[#allocation2 + $0xcf8] sm:$0xff] }
 0x231   :  { %v3618_v4 = vpop.f32.mrf.mxu1  ;;  %3863 = vmatmul.mubr.bf16.vlgmr.msra.gmra.mxu1 %v18662_v20  ;;  %v18751_v8 = vpop.f32.mrf.mxu0  ;;  %3873 = vmatprep.subr.bf16.mxu0 %v16346_v57  ;;  %v574_v20 = vld [vmem:[#allocation2 + $0xd18] sm:$0xff]  ;;  %v16450_v34 = vcombine.high %v566_v32, %v570_v54  ;;  %v16449_v42 = vcombine.low %v566_v32, %v570_v54 }
 0x232   :  { %3913 = vmatpush1.bf16.msra.mxu1 %v16481_v56  ;;  %v18753_v12 = vadd.f32 %v3618_v4, %v3578_v3  ;;  %3944 = vmatprep.mubr.bf16.mxu1 %v18676_v29  ;;  %v16458_v27 = vcombine.high %v574_v20, %v578_v17  ;;  %v16457_v29 = vcombine.low %v574_v20, %v578_v17  ;;  %v554_v19 = vld [vmem:[#allocation2 + $0xc78] sm:$0xff] }
 0x233   :  { %v18755_v13 = vpop.f32.mrf.mxu1  ;;  %3914 = vmatprep.subr.bf16.mxu1 %v16474_v61  ;;  %v3581_v7 = vpop.f32.mrf.mxu0  ;;  %v16434_v55 = vcombine.high %v550_v46, %v554_v19  ;;  %v414_v56 = vld [vmem:[#allocation2 + $0x818] sm:$0xff]  ;;  %v16433_v0 = vcombine.low %v550_v46, %v554_v19 }
 0x234   :  { %3874 = vmatpush1.bf16.msra.mxu0 %v16345_v6  ;;  %v418_v57 = vld [vmem:[#allocation2 + $0x838] sm:$0xff] }
 0x235   :  { %v3622_v18 = vpop.f32.mrf.mxu1  ;;  %v3582_v53 = vpop.f32.mrf.mxu0  ;;  %3875 = vmatprep.subr.bf16.mxu0 %v16338_v11  ;;  %v542_v61 = vld [vmem:[#allocation2 + $0xc18] sm:$0xff]  ;;  %v16298_v1 = vcombine.high %v414_v56, %v418_v57  ;;  %v16297_v11 = vcombine.low %v414_v56, %v418_v57 }
 0x236   :  { %3915 = vmatpush1.bf16.msra.mxu1 %v16473_v9  ;;  %v546_v62 = vld [vmem:[#allocation2 + $0xc38] sm:$0xff] }
 0x237   :  { %v3623_v25 = vpop.f32.mrf.mxu1  ;;  %3916 = vmatprep.subr.bf16.mxu1 %v16466_v16  ;;  %v16426_v2 = vcombine.high %v542_v61, %v546_v62  ;;  %v534_v3 = vld [vmem:[#allocation2 + $0xbd8] sm:$0xff]  ;;  %v16425_v16 = vcombine.low %v542_v61, %v546_v62 }
 0x238   :  { %3876 = vmatpush1.bf16.msra.mxu0 %v16337_v21  ;;  %v538_v4 = vld [vmem:[#allocation2 + $0xbf8] sm:$0xff] }
 0x239   :  { %3877 = vmatprep.subr.bf16.mxu0 %v16330_v24  ;;  %v662_v6 = vld [vmem:[#allocation2 + $0xfd8] sm:$0xff]  ;;  %v16418_v14 = vcombine.high %v534_v3, %v538_v4  ;;  %v16417_v21 = vcombine.low %v534_v3, %v538_v4 }
 0x23a   :  { %3917 = vmatpush1.bf16.msra.mxu1 %v16465_v23  ;;  %v666_v9 = vld [vmem:[#allocation2 + $0xff8] sm:$0xff] }
 0x23b   :  { %3918 = vmatprep.subr.bf16.mxu1 %v16458_v27  ;;  %v16546_v15 = vcombine.high %v662_v6, %v666_v9  ;;  %v526_v7 = vld [vmem:[#allocation2 + $0xb98] sm:$0xff]  ;;  %v16545_v53 = vcombine.low %v662_v6, %v666_v9 }
 0x23c   :  { %3878 = vmatpush1.bf16.msra.mxu0 %v16329_v36  ;;  %v530_v20 = vld [vmem:[#allocation2 + $0xbb8] sm:$0xff] }
 0x23d   :  { %3879 = vmatprep.subr.bf16.mxu0 %v16322_v33  ;;  %v654_v17 = vld [vmem:[#allocation2 + $0xf98] sm:$0xff]  ;;  %v16410_v23 = vcombine.high %v526_v7, %v530_v20  ;;  %v16409_v32 = vcombine.low %v526_v7, %v530_v20 }
 0x23e   :  { %3919 = vmatpush1.bf16.msra.mxu1 %v16457_v29  ;;  %v658_v18 = vld [vmem:[#allocation2 + $0xfb8] sm:$0xff] }
 0x23f   :  { %3920 = vmatprep.subr.bf16.mxu1 %v16450_v34  ;;  %v16538_v24 = vcombine.high %v654_v17, %v658_v18  ;;  %v518_v25 = vld [vmem:[#allocation2 + $0xb58] sm:$0xff]  ;;  %v16537_v54 = vcombine.low %v654_v17, %v658_v18  ;;  %v3580_v17 = vadd.f32 %v18751_v8, %v18746_v31 }
 0x240   :  { %3880 = vmatpush1.bf16.msra.mxu0 %v16321_v58  ;;  %v522_v27 = vld [vmem:[#allocation2 + $0xb78] sm:$0xff] }
 0x241   :  { %3881 = vmatprep.subr.bf16.mxu0 %v16314_v43  ;;  %v646_v28 = vld [vmem:[#allocation2 + $0xf58] sm:$0xff]  ;;  %v16402_v36 = vcombine.high %v518_v25, %v522_v27  ;;  %v16401_v41 = vcombine.low %v518_v25, %v522_v27  ;;  %v4029_v25 = vld [vmem:[#allocation6 + $0x1e0] sm:$0xff] }
 0x242   :  { %3921 = vmatpush1.bf16.msra.mxu1 %v16449_v42  ;;  %v650_v30 = vld [vmem:[#allocation2 + $0xf78] sm:$0xff]  ;;  %v4153_v27 = vld [vmem:[#allocation6 + $0x5c0] sm:$0xff] }
 0x243   :  { %3922 = vmatprep.subr.bf16.mxu1 %v16442_v44  ;;  %v16530_v29 = vcombine.high %v646_v28, %v650_v30  ;;  %v510_v33 = vld [vmem:[#allocation2 + $0xb18] sm:$0xff]  ;;  %v16529_v47 = vcombine.low %v646_v28, %v650_v30  ;;  %v4157_v28 = vld [vmem:[#allocation6 + $0x5e0] sm:$0xff]  ;;  %v3621_v30 = vadd.f32 %v18755_v13, %v3580_v17 }
 0x244   :  { %3882 = vmatpush1.bf16.msra.mxu0 %v16313_v49  ;;  %v514_v34 = vld [vmem:[#allocation2 + $0xb38] sm:$0xff]  ;;  %v3997_v17 = vld [vmem:[#allocation6 + $0xe0] sm:$0xff] }
 0x245   :  { %3883 = vmatprep.subr.bf16.mxu0 %v16306_v51  ;;  %v638_v37 = vld [vmem:[#allocation2 + $0xf18] sm:$0xff]  ;;  %v16394_v58 = vcombine.high %v510_v33, %v514_v34  ;;  %v16393_v46 = vcombine.low %v510_v33, %v514_v34  ;;  %v4017_v33 = vld [vmem:[#allocation6 + $0x180] sm:$0xff] }
 0x246   :  { %3923 = vmatpush1.bf16.msra.mxu1 %v16441_v50  ;;  %v642_v40 = vld [vmem:[#allocation2 + $0xf38] sm:$0xff]  ;;  %v4021_v34 = vld [vmem:[#allocation6 + $0x1a0] sm:$0xff] }
 0x247   :  { %3924 = vmatprep.subr.bf16.mxu1 %v16434_v55  ;;  %v16522_v42 = vcombine.high %v638_v37, %v642_v40  ;;  %v502_v43 = vld [vmem:[#allocation2 + $0xad8] sm:$0xff]  ;;  %v16521_v19 = vcombine.low %v638_v37, %v642_v40  ;;  %v3956_v37 = vmax.f32 %v3621_v30, 0.0  ;;  %v18766_v40 = vld [vmem:[#allocation4] sm:$0xff]  ;;  %v4113_v30 = vld [vmem:[#allocation6 + $0x480] sm:$0xff] }
 0x248   :  { %3884 = vmatpush1.bf16.msra.mxu0 %v16305_v63  ;;  %v506_v44 = vld [vmem:[#allocation2 + $0xaf8] sm:$0xff] }
 0x249   :  { %3885 = vmatprep.subr.bf16.mxu0 %v16298_v1  ;;  %v630_v59 = vld [vmem:[#allocation2 + $0xed8] sm:$0xff]  ;;  %v16386_v49 = vcombine.high %v502_v43, %v506_v44  ;;  %v16385_v61 = vcombine.low %v502_v43, %v506_v44  ;;  %v16596_v43 = vcombine.high %v4017_v33, %v4021_v34  ;;  %v4009_v44 = vld [vmem:[#allocation6 + $0x140] sm:$0xff] }
 0x24a   :  { %3925 = vmatpush1.bf16.msra.mxu1 %v16433_v0  ;;  %v634_v45 = vld [vmem:[#allocation2 + $0xef8] sm:$0xff] }
 0x24b   :  { %3926 = vmatprep.subr.bf16.mxu1 %v16426_v2  ;;  %v16514_v50 = vcombine.high %v630_v59, %v634_v45  ;;  %v494_v51 = vld [vmem:[#allocation2 + $0xa98] sm:$0xff]  ;;  %v16513_v62 = vcombine.low %v630_v59, %v634_v45  ;;  %v4013_v59 = vld [vmem:[#allocation6 + $0x160] sm:$0xff] }
 0x24c   :  { %3886 = vmatpush1.bf16.msra.mxu0 %v16297_v11  ;;  %v498_v55 = vld [vmem:[#allocation2 + $0xab8] sm:$0xff] }
 0x24d   :  { %3887 = vmatprep.subr.bf16.mxu0 %v16418_v14  ;;  %v622_v56 = vld [vmem:[#allocation2 + $0xe98] sm:$0xff]  ;;  %v16378_v63 = vcombine.high %v494_v51, %v498_v55  ;;  %v16377_v6 = vcombine.low %v494_v51, %v498_v55 }
 0x24e   :  { %3927 = vmatpush1.bf16.msra.mxu1 %v16425_v16  ;;  %v626_v57 = vld [vmem:[#allocation2 + $0xeb8] sm:$0xff] }
 0x24f   :  { %3928 = vmatprep.subr.bf16.mxu1 %v16546_v15  ;;  %v16506_v0 = vcombine.high %v622_v56, %v626_v57  ;;  %v486_v1 = vld [vmem:[#allocation2 + $0xa58] sm:$0xff]  ;;  %v16505_v9 = vcombine.low %v622_v56, %v626_v57  ;;  %v16595_v56 = vcombine.low %v4017_v33, %v4021_v34  ;;  %v3977_v33 = vld [vmem:[#allocation6 + $0x40] sm:$0xff] }
 0x250   :  { %3888 = vmatpush2.bf16.msra.mxu0 %v16417_v21  ;;  %v490_v2 = vld [vmem:[#allocation2 + $0xa78] sm:$0xff]  ;;  %v3981_v34 = vld [vmem:[#allocation6 + $0x60] sm:$0xff] }
 0x251   :  { %3889 = vmatprep.subr.bf16.mxu0 %v16410_v23  ;;  %v614_v3 = vld [vmem:[#allocation2 + $0xe58] sm:$0xff]  ;;  %v16370_v11 = vcombine.high %v486_v1, %v490_v2  ;;  %v16369_v18 = vcombine.low %v486_v1, %v490_v2  ;;  %v4001_v1 = vld [vmem:[#allocation6 + $0x100] sm:$0xff] }
 0x252   :  { %3929 = vmatpush2.bf16.msra.mxu1 %v16545_v53  ;;  %v618_v4 = vld [vmem:[#allocation2 + $0xe78] sm:$0xff]  ;;  %v4005_v2 = vld [vmem:[#allocation6 + $0x120] sm:$0xff] }
 0x253   :  { %3930 = vmatprep.subr.bf16.mxu1 %v16538_v24  ;;  %v16498_v16 = vcombine.high %v614_v3, %v618_v4  ;;  %v478_v14 = vld [vmem:[#allocation2 + $0xa18] sm:$0xff]  ;;  %v16497_v21 = vcombine.low %v614_v3, %v618_v4  ;;  %v4025_v24 = vld [vmem:[#allocation6 + $0x1c0] sm:$0xff] }
 0x254   :  { %3890 = vmatpush2.bf16.msra.mxu0 %v16409_v32  ;;  %v482_v15 = vld [vmem:[#allocation2 + $0xa38] sm:$0xff]  ;;  %v16604_v8 = vcombine.high %v4025_v24, %v4029_v25  ;;  %v4129_v3 = vld [vmem:[#allocation6 + $0x500] sm:$0xff] }
 0x255   :  { %3891 = vmatprep.subr.bf16.mxu0 %v16402_v36  ;;  %v606_v7 = vld [vmem:[#allocation2 + $0xe18] sm:$0xff]  ;;  %v16362_v53 = vcombine.high %v478_v14, %v482_v15  ;;  %v16361_v32 = vcombine.low %v478_v14, %v482_v15  ;;  %v16732_v36 = vcombine.high %v4153_v27, %v4157_v28  ;;  %v4133_v4 = vld [vmem:[#allocation6 + $0x520] sm:$0xff]  ;;  %v16580_v14 = vcombine.high %v4001_v1, %v4005_v2 }
 0x256   :  { %3931 = vmatpush2.bf16.msra.mxu1 %v16537_v54  ;;  %v610_v20 = vld [vmem:[#allocation2 + $0xe38] sm:$0xff]  ;;  %v18763_v54 = vsub.s32 4, %v18698_v60 }
 0x257   :  { %3932 = vmatprep.subr.bf16.mxu1 %v16530_v29  ;;  %v16490_v23 = vcombine.high %v606_v7, %v610_v20  ;;  %v16489_v31 = vcombine.low %v606_v7, %v610_v20  ;;  %v3954_v29 = vmax.f32 %v18728_v35, 0.0  ;;  %v16708_v7 = vcombine.high %v4129_v3, %v4133_v4  ;;  %v3993_v20 = vld [vmem:[#allocation6 + $0xc0] sm:$0xff] }
 0x258   :  { %3892 = vmatpush2.bf16.msra.mxu0 %v16401_v41  ;;  %v688_v13 = vrot.slane %v18766_v40, %v18763_v54  ;;  %v16603_v41 = vcombine.low %v4025_v24, %v4029_v25  ;;  %v16572_v24 = vcombine.high %v3993_v20, %v3997_v17 }
 0x259   :  { %3893 = vmatprep.subr.bf16.mxu0 %v16394_v58  ;;  %v4149_v58 = vld [vmem:[#allocation6 + $0x5a0] sm:$0xff]  ;;  %v18770_v35 = vpack.c.bf16 %v3954_v29, %v3954_v29 }
 0x25a   :  { %3933 = vmatpush2.bf16.msra.mxu1 %v16529_v47  ;;  %v4145_v47 = vld [vmem:[#allocation6 + $0x580] sm:$0xff] }
 0x25b   :  { %3934 = vmatprep.subr.bf16.mxu1 %v16522_v42  ;;  %v16731_v42 = vcombine.low %v4153_v27, %v4157_v28  ;;  %v3985_v27 = vld [vmem:[#allocation6 + $0x80] sm:$0xff] }
 0x25c   :  { %3894 = vmatpush2.bf16.msra.mxu0 %v16393_v46  ;;  %v16724_v46 = vcombine.high %v4145_v47, %v4149_v58  ;;  %v3989_v28 = vld [vmem:[#allocation6 + $0xa0] sm:$0xff] }
 0x25d   :  { %3895 = vmatprep.subr.bf16.mxu0 %v16386_v49  ;;  %v4141_v49 = vld [vmem:[#allocation6 + $0x560] sm:$0xff] }
 0x25e   :  { %3935 = vmatpush2.bf16.msra.mxu1 %v16521_v19  ;;  %v4137_v19 = vld [vmem:[#allocation6 + $0x540] sm:$0xff] }
 0x25f   :  { %3936 = vmatprep.subr.bf16.mxu1 %v16514_v50  ;;  %v18773_v50 = vpack.c.bf16 %v3956_v37, %v3956_v37  ;;  %v4105_v37 = vld [vmem:[#allocation6 + $0x440] sm:$0xff] }
 0x260   :  { %3896 = vmatpush2.bf16.msra.mxu0 %v16385_v61  ;;  %v16723_v61 = vcombine.low %v4145_v47, %v4149_v58  ;;  %v16556_v58 = vcombine.high %v3977_v33, %v3981_v34 }
 0x261   :  { %3897 = vmatprep.subr.bf16.mxu0 %v16378_v63 }
 0x262   :  { %3937 = vmatpush2.bf16.msra.mxu1 %v16513_v62  ;;  %v16588_v62 = vcombine.high %v4009_v44, %v4013_v59 }
 0x263   :  { %3938 = vmatprep.subr.bf16.mxu1 %v16506_v0  ;;  %v16716_v0 = vcombine.high %v4137_v19, %v4141_v49 }
 0x264   :  { %3898 = vmatpush2.bf16.msra.mxu0 %v16377_v6 }
 0x265   :  { %3899 = vmatprep.subr.bf16.mxu0 %v16370_v11 }
 0x266   :  { %3939 = vmatpush2.bf16.msra.mxu1 %v16505_v9  ;;  %v16587_v9 = vcombine.low %v4009_v44, %v4013_v59  ;;  %v3973_v44 = vld [vmem:[#allocation6 + $0x20] sm:$0xff] }
 0x267   :  { %3940 = vmatprep.subr.bf16.mxu1 %v16498_v16  ;;  %v16715_v16 = vcombine.low %v4137_v19, %v4141_v49  ;;  %v4097_v59 = vld [vmem:[#allocation6 + $0x400] sm:$0xff] }
 0x268   :  { %3900 = vmatpush2.bf16.msra.mxu0 %v16369_v18  ;;  %v4121_v18 = vld [vmem:[#allocation6 + $0x4c0] sm:$0xff] }
 0x269   :  { %3901 = vmatprep.subr.bf16.mxu0 %v16362_v53  ;;  %v16579_v53 = vcombine.low %v4001_v1, %v4005_v2 }
 0x26a   :  { %3941 = vmatpush2.bf16.msra.mxu1 %v16497_v21  ;;  %v4125_v21 = vld [vmem:[#allocation6 + $0x4e0] sm:$0xff] }
 0x26b   :  { %3942 = vmatprep.subr.bf16.mxu1 %v16490_v23  ;;  %v16707_v23 = vcombine.low %v4129_v3, %v4133_v4  ;;  %v16700_v25 = vcombine.high %v4121_v18, %v4125_v21  ;;  %v4081_v3 = vld [vmem:[#allocation6 + $0x380] sm:$0xff] }
 0x26c   :  { %3902 = vmatpush2.bf16.msra.mxu0 %v16361_v32  ;;  %v4117_v32 = vld [vmem:[#allocation6 + $0x4a0] sm:$0xff] }
 0x26d   :  { %7083 = vmatprep.subr.bf16.mxu0 %v16604_v8  ;;  %v16699_v8 = vcombine.low %v4121_v18, %v4125_v21  ;;  %v16692_v29 = vcombine.high %v4113_v30, %v4117_v32  ;;  %v16691_v47 = vcombine.low %v4113_v30, %v4117_v32  ;;  %v4085_v4 = vld [vmem:[#allocation6 + $0x3a0] sm:$0xff] }
 0x26e   :  { %3943 = vmatpush2.bf16.msra.mxu1 %v16489_v31  ;;  %v16571_v31 = vcombine.low %v3993_v20, %v3997_v17  ;;  %v4077_v20 = vld [vmem:[#allocation6 + $0x360] sm:$0xff]  ;;  %v16659_v21 = vcombine.low %v4081_v3, %v4085_v4 }
 0x26f   :  { %7124 = vmatprep.subr.bf16.mxu1 %v16732_v36  ;;  %v3659_v45 = vpop.f32.mrf.mxu0  ;;  %3904 = vmatmul.mubr.bf16.vlgmr.msra.gmra.mxu0 %v18683_v38  ;;  %v16564_v36 = vcombine.high %v3985_v27, %v3989_v28  ;;  %v4201_v17 = vld [vmem:[#allocation6 + $0x740] sm:$0xff] }
 0x270   :  { %v3660_v51 = vadd.f32 %v3659_v45, %v688_v13  ;;  %7084 = vmatpush1.bf16.msra.mxu0 %v16603_v41  ;;  %7115 = vmatprep.mubr.bf16.mxu0 %v18770_v35  ;;  %v4109_v13 = vld [vmem:[#allocation6 + $0x460] sm:$0xff]  ;;  %v16563_v41 = vcombine.low %v3985_v27, %v3989_v28 }
 0x271   :  { %v3700_v55 = vpop.f32.mrf.mxu1  ;;  %3945 = vmatmul.mubr.bf16.vlgmr.msra.gmra.mxu1 %v18687_v39  ;;  %v18777_v57 = vpop.f32.mrf.mxu0  ;;  %7085 = vmatprep.subr.bf16.mxu0 %v16596_v43  ;;  %v3969_v43 = vld [vmem:[#allocation6] sm:$0xff]  ;;  %v16683_v19 = vcombine.low %v4105_v37, %v4109_v13 }
 0x272   :  { %7125 = vmatpush1.bf16.msra.mxu1 %v16731_v42  ;;  %v18779_v63 = vadd.f32 %v3700_v55, %v3660_v51  ;;  %7156 = vmatprep.mubr.bf16.mxu1 %v18773_v50  ;;  %v16684_v42 = vcombine.high %v4105_v37, %v4109_v13  ;;  %v4101_v45 = vld [vmem:[#allocation6 + $0x420] sm:$0xff]  ;;  %v16548_v49 = vcombine.high %v3969_v43, %v3973_v44 }
 0x273   :  { %v18782_v38 = vpop.f32.mrf.mxu1  ;;  %v3663_v39 = vpop.f32.mrf.mxu0  ;;  %7126 = vmatprep.subr.bf16.mxu1 %v16724_v46  ;;  %v16555_v46 = vcombine.low %v3977_v33, %v3981_v34  ;;  %v16676_v51 = vcombine.high %v4097_v59, %v4101_v45  ;;  %v4089_v55 = vld [vmem:[#allocation6 + $0x3c0] sm:$0xff]  ;;  %v16675_v1 = vcombine.low %v4097_v59, %v4101_v45 }
 0x274   :  { %7086 = vmatpush1.bf16.msra.mxu0 %v16595_v56  ;;  %v4093_v56 = vld [vmem:[#allocation6 + $0x3e0] sm:$0xff] }
 0x275   :  { %v3704_v6 = vpop.f32.mrf.mxu1  ;;  %v3664_v11 = vpop.f32.mrf.mxu0  ;;  %7087 = vmatprep.subr.bf16.mxu0 %v16588_v62  ;;  %v4221_v62 = vld [vmem:[#allocation6 + $0x7e0] sm:$0xff]  ;;  %v16668_v2 = vcombine.high %v4089_v55, %v4093_v56 }
 0x276   :  { %7127 = vmatpush1.bf16.msra.mxu1 %v16723_v61  ;;  %v4217_v61 = vld [vmem:[#allocation6 + $0x7c0] sm:$0xff]  ;;  %v16667_v11 = vcombine.low %v4089_v55, %v4093_v56 }
 0x277   :  { %v3705_v15 = vpop.f32.mrf.mxu1  ;;  %7128 = vmatprep.subr.bf16.mxu1 %v16716_v0  ;;  %v16547_v0 = vcombine.low %v3969_v43, %v3973_v44  ;;  %v16796_v39 = vcombine.high %v4217_v61, %v4221_v62  ;;  %v4209_v6 = vld [vmem:[#allocation6 + $0x780] sm:$0xff] }
 0x278   :  { %7088 = vmatpush1.bf16.msra.mxu0 %v16587_v9  ;;  %v4213_v9 = vld [vmem:[#allocation6 + $0x7a0] sm:$0xff] }
 0x279   :  { %7089 = vmatprep.subr.bf16.mxu0 %v16580_v14  ;;  %v16660_v14 = vcombine.high %v4081_v3, %v4085_v4  ;;  %v16788_v15 = vcombine.high %v4209_v6, %v4213_v9  ;;  %v4205_v18 = vld [vmem:[#allocation6 + $0x760] sm:$0xff] }
 0x27a   :  { %7129 = vmatpush1.bf16.msra.mxu1 %v16715_v16  ;;  %v16795_v16 = vcombine.low %v4217_v61, %v4221_v62  ;;  %v4069_v27 = vld [vmem:[#allocation6 + $0x320] sm:$0xff] }
 0x27b   :  { %7130 = vmatprep.subr.bf16.mxu1 %v16708_v7  ;;  %v4073_v7 = vld [vmem:[#allocation6 + $0x340] sm:$0xff] }
 0x27c   :  { %7090 = vmatpush1.bf16.msra.mxu0 %v16579_v53  ;;  %v16787_v53 = vcombine.low %v4209_v6, %v4213_v9  ;;  %v4193_v28 = vld [vmem:[#allocation6 + $0x700] sm:$0xff]  ;;  %v16651_v32 = vcombine.low %v4073_v7, %v4077_v20  ;;  %v18785_v9 = vsub.s32 5, %v18698_v60 }
 0x27d   :  { %7091 = vmatprep.subr.bf16.mxu0 %v16572_v24  ;;  %v16780_v24 = vcombine.high %v4201_v17, %v4205_v18  ;;  %v4197_v30 = vld [vmem:[#allocation6 + $0x720] sm:$0xff] }
 0x27e   :  { %7131 = vmatpush1.bf16.msra.mxu1 %v16707_v23  ;;  %v16652_v23 = vcombine.high %v4073_v7, %v4077_v20  ;;  %v4061_v33 = vld [vmem:[#allocation6 + $0x2e0] sm:$0xff] }
 0x27f   :  { %7132 = vmatprep.subr.bf16.mxu1 %v16700_v25  ;;  %v4065_v25 = vld [vmem:[#allocation6 + $0x300] sm:$0xff] }
 0x280   :  { %7092 = vmatpush1.bf16.msra.mxu0 %v16571_v31  ;;  %v16779_v31 = vcombine.low %v4201_v17, %v4205_v18  ;;  %v4185_v34 = vld [vmem:[#allocation6 + $0x6c0] sm:$0xff]  ;;  %v16643_v13 = vcombine.low %v4065_v25, %v4069_v27 }
 0x281   :  { %7093 = vmatprep.subr.bf16.mxu0 %v16564_v36  ;;  %v16772_v36 = vcombine.high %v4193_v28, %v4197_v30  ;;  %v4189_v37 = vld [vmem:[#allocation6 + $0x6e0] sm:$0xff] }
 0x282   :  { %7133 = vmatpush1.bf16.msra.mxu1 %v16699_v8  ;;  %v16644_v8 = vcombine.high %v4065_v25, %v4069_v27  ;;  %v4053_v43 = vld [vmem:[#allocation6 + $0x2a0] sm:$0xff]  ;;  %v3955_v27 = vmax.f32 %v18753_v12, 0.0 }
 0x283   :  { %7134 = vmatprep.subr.bf16.mxu1 %v16692_v29  ;;  %v4057_v29 = vld [vmem:[#allocation6 + $0x2c0] sm:$0xff] }
 0x284   :  { %7094 = vmatpush1.bf16.msra.mxu0 %v16563_v41  ;;  %v16771_v41 = vcombine.low %v4193_v28, %v4197_v30  ;;  %v4177_v44 = vld [vmem:[#allocation6 + $0x680] sm:$0xff]  ;;  %v16635_v45 = vcombine.low %v4057_v29, %v4061_v33 }
 0x285   :  { %7095 = vmatprep.subr.bf16.mxu0 %v16556_v58  ;;  %v16764_v58 = vcombine.high %v4185_v34, %v4189_v37  ;;  %v4181_v59 = vld [vmem:[#allocation6 + $0x6a0] sm:$0xff] }
 0x286   :  { %7135 = vmatpush1.bf16.msra.mxu1 %v16691_v47  ;;  %v16636_v47 = vcombine.high %v4057_v29, %v4061_v33  ;;  %v4045_v55 = vld [vmem:[#allocation6 + $0x260] sm:$0xff] }
 0x287   :  { %7136 = vmatprep.subr.bf16.mxu1 %v16684_v42  ;;  %v4049_v42 = vld [vmem:[#allocation6 + $0x280] sm:$0xff] }
 0x288   :  { %7096 = vmatpush1.bf16.msra.mxu0 %v16555_v46  ;;  %v16763_v46 = vcombine.low %v4185_v34, %v4189_v37  ;;  %v4169_v56 = vld [vmem:[#allocation6 + $0x640] sm:$0xff]  ;;  %v16627_v62 = vcombine.low %v4049_v42, %v4053_v43  ;;  %v18794_v34 = vpack.c.bf16 %v3955_v27, %v3955_v27 }
 0x289   :  { %7097 = vmatprep.subr.bf16.mxu0 %v16548_v49  ;;  %v16756_v49 = vcombine.high %v4177_v44, %v4181_v59  ;;  %v4173_v61 = vld [vmem:[#allocation6 + $0x660] sm:$0xff] }
 0x28a   :  { %7137 = vmatpush1.bf16.msra.mxu1 %v16683_v19  ;;  %v16628_v19 = vcombine.high %v4049_v42, %v4053_v43  ;;  %v4037_v3 = vld [vmem:[#allocation6 + $0x220] sm:$0xff] }
 0x28b   :  { %7138 = vmatprep.subr.bf16.mxu1 %v16676_v51  ;;  %v4041_v51 = vld [vmem:[#allocation6 + $0x240] sm:$0xff] }
 0x28c   :  { %7098 = vmatpush1.bf16.msra.mxu0 %v16547_v0  ;;  %v16755_v0 = vcombine.low %v4177_v44, %v4181_v59  ;;  %v4161_v4 = vld [vmem:[#allocation6 + $0x600] sm:$0xff] }
 0x28d   :  { %7099 = vmatprep.subr.bf16.mxu0 %v16668_v2  ;;  %v16748_v2 = vcombine.high %v4169_v56, %v4173_v61  ;;  %v4165_v6 = vld [vmem:[#allocation6 + $0x620] sm:$0xff] }
 0x28e   :  { %7139 = vmatpush1.bf16.msra.mxu1 %v16675_v1  ;;  %v16620_v1 = vcombine.high %v4041_v51, %v4045_v55  ;;  %v4281_v7 = vld [vmem:[#allocation6 + $0x9c0] sm:$0xff] }
 0x28f   :  { %7140 = vmatprep.subr.bf16.mxu1 %v16796_v39  ;;  %v4033_v39 = vld [vmem:[#allocation6 + $0x200] sm:$0xff] }
 0x290   :  { %7100 = vmatpush2.bf16.msra.mxu0 %v16667_v11  ;;  %v16619_v11 = vcombine.low %v4041_v51, %v4045_v55  ;;  %v4285_v20 = vld [vmem:[#allocation6 + $0x9e0] sm:$0xff] }
 0x291   :  { %7101 = vmatprep.subr.bf16.mxu0 %v16660_v14  ;;  %v16612_v14 = vcombine.high %v4033_v39, %v4037_v3  ;;  %v4409_v17 = vld [vmem:[#allocation6 + $0xdc0] sm:$0xff]  ;;  %v16860_v25 = vcombine.high %v4281_v7, %v4285_v20 }
 0x292   :  { %7141 = vmatpush2.bf16.msra.mxu1 %v16795_v16  ;;  %v16747_v16 = vcombine.low %v4169_v56, %v4173_v61  ;;  %v4413_v18 = vld [vmem:[#allocation6 + $0xde0] sm:$0xff] }
 0x293   :  { %7142 = vmatprep.subr.bf16.mxu1 %v16788_v15  ;;  %v16740_v15 = vcombine.high %v4161_v4, %v4165_v6  ;;  %v4273_v28 = vld [vmem:[#allocation6 + $0x980] sm:$0xff]  ;;  %v16987_v33 = vcombine.low %v4409_v17, %v4413_v18 }
 0x294   :  { %7102 = vmatpush2.bf16.msra.mxu0 %v16659_v21  ;;  %v692_v21 = vrot.slane %v18766_v40, %v18785_v9  ;;  %v4277_v30 = vld [vmem:[#allocation6 + $0x9a0] sm:$0xff]  ;;  %v16859_v40 = vcombine.low %v4281_v7, %v4285_v20 }
 0x295   :  { %7103 = vmatprep.subr.bf16.mxu0 %v16652_v23  ;;  %v3953_v23 = vmax.f32 %v18723_v26, 0.0  ;;  %v16852_v26 = vcombine.high %v4273_v28, %v4277_v30  ;;  %v4265_v37 = vld [vmem:[#allocation6 + $0x940] sm:$0xff]  ;;  %v16851_v43 = vcombine.low %v4273_v28, %v4277_v30 }
 0x296   :  { %7143 = vmatpush2.bf16.msra.mxu1 %v16787_v53  ;;  %v16611_v53 = vcombine.low %v4033_v39, %v4037_v3  ;;  %v4269_v12 = vld [vmem:[#allocation6 + $0x960] sm:$0xff] }
 0x297   :  { %7144 = vmatprep.subr.bf16.mxu1 %v16780_v24  ;;  %v16739_v24 = vcombine.low %v4161_v4, %v4165_v6  ;;  %v18792_v29 = vpack.c.bf16 %v3953_v23, %v3953_v23  ;;  %v16844_v59 = vcombine.high %v4265_v37, %v4269_v12  ;;  %v4261_v51 = vld [vmem:[#allocation6 + $0x920] sm:$0xff]  ;;  %v18807_v23 = vld [vmem:[#allocation6 + $0x5e8] sm:$0xff] }
 0x298   :  { %7104 = vmatpush2.bf16.msra.mxu0 %v16651_v32  ;;  %v16988_v32 = vcombine.high %v4409_v17, %v4413_v18  ;;  %v4385_v61 = vld [vmem:[#allocation6 + $0xd00] sm:$0xff] }
 0x299   :  { %7105 = vmatprep.subr.bf16.mxu0 %v16644_v8  ;;  %v4405_v8 = vld [vmem:[#allocation6 + $0xda0] sm:$0xff] }
 0x29a   :  { %7145 = vmatpush2.bf16.msra.mxu1 %v16779_v31  ;;  %v4401_v31 = vld [vmem:[#allocation6 + $0xd80] sm:$0xff] }
 0x29b   :  { %7146 = vmatprep.subr.bf16.mxu1 %v16772_v36  ;;  %v3662_v36 = vadd.f32 %v18777_v57, %v692_v21  ;;  %v4397_v57 = vld [vmem:[#allocation6 + $0xd60] sm:$0xff] }
 0x29c   :  { %7106 = vmatpush2.bf16.msra.mxu0 %v16643_v13  ;;  %v16980_v13 = vcombine.high %v4401_v31, %v4405_v8  ;;  %v4381_v7 = vld [vmem:[#allocation6 + $0xce0] sm:$0xff] }
 0x29d   :  { %7107 = vmatprep.subr.bf16.mxu0 %v16636_v47  ;;  %v4393_v47 = vld [vmem:[#allocation6 + $0xd40] sm:$0xff] }
 0x29e   :  { %7147 = vmatpush2.bf16.msra.mxu1 %v16771_v41  ;;  %v16972_v55 = vcombine.high %v4393_v47, %v4397_v57  ;;  %v16971_v3 = vcombine.low %v4393_v47, %v4397_v57  ;;  %v4369_v30 = vld [vmem:[#allocation6 + $0xc80] sm:$0xff] }
 0x29f   :  { %7148 = vmatprep.subr.bf16.mxu1 %v16764_v58  ;;  %v3703_v58 = vadd.f32 %v18782_v38, %v3662_v36  ;;  %v4389_v38 = vld [vmem:[#allocation6 + $0xd20] sm:$0xff] }
 0x2a0   :  { %7108 = vmatpush2.bf16.msra.mxu0 %v16635_v45  ;;  %v16979_v45 = vcombine.low %v4401_v31, %v4405_v8  ;;  %v16963_v21 = vcombine.low %v4385_v61, %v4389_v38 }
 0x2a1   :  { %7109 = vmatprep.subr.bf16.mxu0 %v16628_v19 }
 0x2a2   :  { %7149 = vmatpush2.bf16.msra.mxu1 %v16763_v46 }
 0x2a3   :  { %7150 = vmatprep.subr.bf16.mxu1 %v16756_v49  ;;  %v4257_v49 = vld [vmem:[#allocation6 + $0x900] sm:$0xff] }
 0x2a4   :  { %7110 = vmatpush2.bf16.msra.mxu0 %v16627_v62  ;;  %v16836_v39 = vcombine.high %v4257_v49, %v4261_v51  ;;  %v16835_v17 = vcombine.low %v4257_v49, %v4261_v51  ;;  %v4345_v51 = vld [vmem:[#allocation6 + $0xbc0] sm:$0xff] }
 0x2a5   :  { %7111 = vmatprep.subr.bf16.mxu0 %v16620_v1  ;;  %v16843_v1 = vcombine.low %v4265_v37, %v4269_v12  ;;  %v4361_v37 = vld [vmem:[#allocation6 + $0xc40] sm:$0xff] }
 0x2a6   :  { %7151 = vmatpush2.bf16.msra.mxu1 %v16755_v0  ;;  %v4365_v12 = vld [vmem:[#allocation6 + $0xc60] sm:$0xff] }
 0x2a7   :  { %7152 = vmatprep.subr.bf16.mxu1 %v16748_v2  ;;  %v16939_v49 = vcombine.low %v4361_v37, %v4365_v12 }
 0x2a8   :  { %7112 = vmatpush2.bf16.msra.mxu0 %v16619_v11  ;;  %v4249_v11 = vld [vmem:[#allocation6 + $0x8c0] sm:$0xff] }
 0x2a9   :  { %7113 = vmatprep.subr.bf16.mxu0 %v16612_v14  ;;  %v16964_v14 = vcombine.high %v4385_v61, %v4389_v38  ;;  %v4473_v61 = vld [vmem:[#allocation6 + $0xfc0] sm:$0xff] }
 0x2aa   :  { %7153 = vmatpush2.bf16.msra.mxu1 %v16747_v16  ;;  %v4253_v16 = vld [vmem:[#allocation6 + $0x8e0] sm:$0xff] }
 0x2ab   :  { %7154 = vmatprep.subr.bf16.mxu1 %v16740_v15  ;;  %v4377_v15 = vld [vmem:[#allocation6 + $0xcc0] sm:$0xff]  ;;  %v16828_v18 = vcombine.high %v4249_v11, %v4253_v16  ;;  %v16827_v31 = vcombine.low %v4249_v11, %v4253_v16 }
 0x2ac   :  { %7114 = vmatpush2.bf16.msra.mxu0 %v16611_v53  ;;  %v18805_v53 = vld [vmem:[#allocation6 + $0x5c8] sm:$0xff]  ;;  %v16956_v27 = vcombine.high %v4377_v15, %v4381_v7  ;;  %v16955_v36 = vcombine.low %v4377_v15, %v4381_v7  ;;  %v4477_v38 = vld [vmem:[#allocation6 + $0xfe0] sm:$0xff] }
 0x2ad   :  { %7165 = vmatprep.subr.bf16.mxu0 %v16860_v25  ;;  %v4245_v25 = vld [vmem:[#allocation6 + $0x8a0] sm:$0xff]  ;;  %v16733_v28 = vcombine.low %v18805_v53, %v18807_v23 }
 0x2ae   :  { %7155 = vmatpush2.bf16.msra.mxu1 %v16739_v24  ;;  %v4241_v24 = vld [vmem:[#allocation6 + $0x880] sm:$0xff] }
 0x2af   :  { %7206 = vmatprep.subr.bf16.mxu1 %v16988_v32  ;;  %v18796_v41 = vpop.f32.mrf.mxu0  ;;  %7116 = vmatmul.mubr.bf16.vlgmr.msra.gmra.mxu0 %v18792_v29  ;;  %v4373_v32 = vld [vmem:[#allocation6 + $0xca0] sm:$0xff]  ;;  %v16820_v8 = vcombine.high %v4241_v24, %v4245_v25 }
 0x2b0   :  { %7166 = vmatpush1.bf16.msra.mxu0 %v16859_v40  ;;  %v4233_v40 = vld [vmem:[#allocation6 + $0x840] sm:$0xff]  ;;  %v16947_v57 = vcombine.low %v4369_v30, %v4373_v32 }
 0x2b1   :  { %v18800_v42 = vpop.f32.mrf.mxu1  ;;  %7157 = vmatmul.mubr.bf16.vlgmr.msra.gmra.mxu1 %v18794_v34  ;;  %v3743_v44 = vpop.f32.mrf.mxu0  ;;  %7167 = vmatprep.subr.bf16.mxu0 %v16852_v26  ;;  %v4237_v26 = vld [vmem:[#allocation6 + $0x860] sm:$0xff] }
 0x2b2   :  { %7207 = vmatpush1.bf16.msra.mxu1 %v16987_v33  ;;  %v3744_v46 = vadd.f32 %v3743_v44, %v3703_v58  ;;  %v16948_v33 = vcombine.high %v4369_v30, %v4373_v32  ;;  %v16812_v47 = vcombine.high %v4233_v40, %v4237_v26  ;;  %v4225_v58 = vld [vmem:[#allocation6 + $0x800] sm:$0xff]  ;;  %v16940_v44 = vcombine.high %v4361_v37, %v4365_v12 }
 0x2b3   :  { %v3784_v19 = vpop.f32.mrf.mxu1  ;;  %7208 = vmatprep.subr.bf16.mxu1 %v16980_v13  ;;  %v3745_v56 = vpop.f32.mrf.mxu0  ;;  %v16819_v13 = vcombine.low %v4241_v24, %v4245_v25  ;;  %v4329_v15 = vld [vmem:[#allocation6 + $0xb40] sm:$0xff] }
 0x2b4   :  { %v3785_v62 = vadd.f32 %v3784_v19, %v3744_v46  ;;  %7168 = vmatpush1.bf16.msra.mxu0 %v16851_v43  ;;  %v4229_v43 = vld [vmem:[#allocation6 + $0x820] sm:$0xff]  ;;  %v16811_v46 = vcombine.low %v4233_v40, %v4237_v26 }
 0x2b5   :  { %v3786_v0 = vpop.f32.mrf.mxu1  ;;  %v3746_v2 = vpop.f32.mrf.mxu0  ;;  %7169 = vmatprep.subr.bf16.mxu0 %v16844_v59  ;;  %v4353_v59 = vld [vmem:[#allocation6 + $0xc00] sm:$0xff]  ;;  %v16804_v19 = vcombine.high %v4225_v58, %v4229_v43 }
 0x2b6   :  { %7209 = vmatpush1.bf16.msra.mxu1 %v16979_v45  ;;  %v3958_v4 = vmax.f32 %v3785_v62, 0.0  ;;  %v4357_v45 = vld [vmem:[#allocation6 + $0xc20] sm:$0xff]  ;;  %v16803_v62 = vcombine.low %v4225_v58, %v4229_v43 }
 0x2b7   :  { %v3787_v6 = vpop.f32.mrf.mxu1  ;;  %7210 = vmatprep.subr.bf16.mxu1 %v16972_v55  ;;  %v4349_v55 = vld [vmem:[#allocation6 + $0xbe0] sm:$0xff]  ;;  %v16932_v56 = vcombine.high %v4353_v59, %v4357_v45 }
 0x2b8   :  { %v18803_v20 = vpack.c.bf16 %v3958_v4, %v3958_v4  ;;  %7170 = vmatpush1.bf16.msra.mxu0 %v16843_v1  ;;  %v16924_v0 = vcombine.high %v4345_v51, %v4349_v55  ;;  %v16931_v1 = vcombine.low %v4353_v59, %v4357_v45  ;;  %v4337_v2 = vld [vmem:[#allocation6 + $0xb80] sm:$0xff]  ;;  %v16923_v11 = vcombine.low %v4345_v51, %v4349_v55 }
 0x2b9   :  { %7171 = vmatprep.subr.bf16.mxu0 %v16836_v39  ;;  %v4341_v39 = vld [vmem:[#allocation6 + $0xba0] sm:$0xff] }
 0x2ba   :  { %7211 = vmatpush1.bf16.msra.mxu1 %v16971_v3  ;;  %7197 = vmatprep.mubr.bf16.mxu0 %v18803_v20  ;;  %v17052_v3 = vcombine.high %v4473_v61, %v4477_v38  ;;  %v4465_v4 = vld [vmem:[#allocation6 + $0xf80] sm:$0xff]  ;;  %v16916_v16 = vcombine.high %v4337_v2, %v4341_v39  ;;  %v16915_v24 = vcombine.low %v4337_v2, %v4341_v39 }
 0x2bb   :  { %7212 = vmatprep.subr.bf16.mxu1 %v16964_v14  ;;  %v4469_v6 = vld [vmem:[#allocation6 + $0xfa0] sm:$0xff]  ;;  %v17051_v14 = vcombine.low %v4473_v61, %v4477_v38  ;;  %v3742_v39 = vadd.f32 %v18796_v41, %v18779_v63  ;;  %v4030_v63 = vld [vmem:[#allocation6 + $0x1e8] sm:$0xff] }
 0x2bc   :  { %7172 = vmatpush1.bf16.msra.mxu0 %v16835_v17  ;;  %v4333_v7 = vld [vmem:[#allocation6 + $0xb60] sm:$0xff]  ;;  %v17044_v17 = vcombine.high %v4465_v4, %v4469_v6 }
 0x2bd   :  { %7173 = vmatprep.subr.bf16.mxu0 %v16828_v18  ;;  %v4457_v18 = vld [vmem:[#allocation6 + $0xf40] sm:$0xff]  ;;  %v16908_v25 = vcombine.high %v4329_v15, %v4333_v7  ;;  %v16907_v40 = vcombine.low %v4329_v15, %v4333_v7 }
 0x2be   :  { %7213 = vmatpush1.bf16.msra.mxu1 %v16963_v21  ;;  %v4461_v21 = vld [vmem:[#allocation6 + $0xf60] sm:$0xff] }
 0x2bf   :  { %7214 = vmatprep.subr.bf16.mxu1 %v16956_v27  ;;  %v17043_v27 = vcombine.low %v4465_v4, %v4469_v6  ;;  %v4321_v30 = vld [vmem:[#allocation6 + $0xb00] sm:$0xff] }
 0x2c0   :  { %7174 = vmatpush1.bf16.msra.mxu0 %v16827_v31  ;;  %v4325_v32 = vld [vmem:[#allocation6 + $0xb20] sm:$0xff]  ;;  %v17036_v31 = vcombine.high %v4457_v18, %v4461_v21 }
 0x2c1   :  { %7175 = vmatprep.subr.bf16.mxu0 %v16820_v8  ;;  %v4449_v8 = vld [vmem:[#allocation6 + $0xf00] sm:$0xff]  ;;  %v16900_v26 = vcombine.high %v4321_v30, %v4325_v32  ;;  %v16899_v58 = vcombine.low %v4321_v30, %v4325_v32 }
 0x2c2   :  { %7215 = vmatpush1.bf16.msra.mxu1 %v16955_v36  ;;  %v4453_v36 = vld [vmem:[#allocation6 + $0xf20] sm:$0xff] }
 0x2c3   :  { %7216 = vmatprep.subr.bf16.mxu1 %v16948_v33  ;;  %v17035_v33 = vcombine.low %v4457_v18, %v4461_v21  ;;  %v4313_v37 = vld [vmem:[#allocation6 + $0xac0] sm:$0xff] }
 0x2c4   :  { %7176 = vmatpush1.bf16.msra.mxu0 %v16819_v13  ;;  %v4317_v12 = vld [vmem:[#allocation6 + $0xae0] sm:$0xff]  ;;  %v17028_v13 = vcombine.high %v4449_v8, %v4453_v36 }
 0x2c5   :  { %7177 = vmatprep.subr.bf16.mxu0 %v16812_v47  ;;  %v4441_v47 = vld [vmem:[#allocation6 + $0xec0] sm:$0xff]  ;;  %v16892_v43 = vcombine.high %v4313_v37, %v4317_v12  ;;  %v16891_v51 = vcombine.low %v4313_v37, %v4317_v12  ;;  %v4014_v37 = vld [vmem:[#allocation6 + $0x168] sm:$0xff] }
 0x2c6   :  { %7217 = vmatpush1.bf16.msra.mxu1 %v16947_v57  ;;  %v4445_v57 = vld [vmem:[#allocation6 + $0xee0] sm:$0xff] }
 0x2c7   :  { %7218 = vmatprep.subr.bf16.mxu1 %v16940_v44  ;;  %v17027_v44 = vcombine.low %v4449_v8, %v4453_v36  ;;  %v4305_v59 = vld [vmem:[#allocation6 + $0xa80] sm:$0xff]  ;;  %v4022_v8 = vld [vmem:[#allocation6 + $0x1a8] sm:$0xff] }
 0x2c8   :  { %7178 = vmatpush1.bf16.msra.mxu0 %v16811_v46  ;;  %v4309_v45 = vld [vmem:[#allocation6 + $0xaa0] sm:$0xff]  ;;  %v17020_v46 = vcombine.high %v4441_v47, %v4445_v57 }
 0x2c9   :  { %7179 = vmatprep.subr.bf16.mxu0 %v16804_v19  ;;  %v4433_v19 = vld [vmem:[#allocation6 + $0xe80] sm:$0xff]  ;;  %v16884_v55 = vcombine.high %v4305_v59, %v4309_v45  ;;  %v16883_v2 = vcombine.low %v4305_v59, %v4309_v45  ;;  %v4006_v59 = vld [vmem:[#allocation6 + $0x128] sm:$0xff] }
 0x2ca   :  { %7219 = vmatpush1.bf16.msra.mxu1 %v16939_v49  ;;  %v4437_v49 = vld [vmem:[#allocation6 + $0xea0] sm:$0xff] }
 0x2cb   :  { %7220 = vmatprep.subr.bf16.mxu1 %v16932_v56  ;;  %v17019_v56 = vcombine.low %v4441_v47, %v4445_v57  ;;  %v4297_v61 = vld [vmem:[#allocation6 + $0xa40] sm:$0xff]  ;;  %v17011_v4 = vcombine.low %v4433_v19, %v4437_v49 }
 0x2cc   :  { %7180 = vmatpush1.bf16.msra.mxu0 %v16803_v62  ;;  %v4301_v38 = vld [vmem:[#allocation6 + $0xa60] sm:$0xff]  ;;  %v17012_v62 = vcombine.high %v4433_v19, %v4437_v49 }
 0x2cd   :  { %7181 = vmatprep.subr.bf16.mxu0 %v16924_v0  ;;  %v4425_v0 = vld [vmem:[#allocation6 + $0xe40] sm:$0xff]  ;;  %v16875_v7 = vcombine.low %v4297_v61, %v4301_v38 }
 0x2ce   :  { %7221 = vmatpush1.bf16.msra.mxu1 %v16931_v1  ;;  %v4429_v1 = vld [vmem:[#allocation6 + $0xe60] sm:$0xff] }
 0x2cf   :  { %7222 = vmatprep.subr.bf16.mxu1 %v17052_v3  ;;  %v16876_v3 = vcombine.high %v4297_v61, %v4301_v38  ;;  %v4289_v6 = vld [vmem:[#allocation6 + $0xa00] sm:$0xff]  ;;  %v17003_v21 = vcombine.low %v4425_v0, %v4429_v1  ;;  %v3998_v61 = vld [vmem:[#allocation6 + $0xe8] sm:$0xff] }
 0x2d0   :  { %7182 = vmatpush2.bf16.msra.mxu0 %v16923_v11  ;;  %v4293_v11 = vld [vmem:[#allocation6 + $0xa20] sm:$0xff] }
 0x2d1   :  { %7183 = vmatprep.subr.bf16.mxu0 %v16916_v16  ;;  %v17004_v16 = vcombine.high %v4425_v0, %v4429_v1  ;;  %v4421_v15 = vld [vmem:[#allocation6 + $0xe20] sm:$0xff]  ;;  %v16868_v18 = vcombine.high %v4289_v6, %v4293_v11  ;;  %v3986_v0 = vld [vmem:[#allocation6 + $0x88] sm:$0xff] }
 0x2d2   :  { %7223 = vmatpush2.bf16.msra.mxu1 %v17051_v14  ;;  %v4417_v14 = vld [vmem:[#allocation6 + $0xe00] sm:$0xff]  ;;  %v3990_v1 = vld [vmem:[#allocation6 + $0xa8] sm:$0xff] }
 0x2d3   :  { %7224 = vmatprep.subr.bf16.mxu1 %v17044_v17  ;;  %v3783_v17 = vadd.f32 %v18800_v42, %v3742_v39  ;;  %v16996_v41 = vcombine.high %v4417_v14, %v4421_v15  ;;  %v16995_v32 = vcombine.low %v4417_v14, %v4421_v15  ;;  %v16734_v42 = vcombine.high %v18805_v53, %v18807_v23  ;;  %v3974_v14 = vld [vmem:[#allocation6 + $0x28] sm:$0xff] }
 0x2d4   :  { %7184 = vmatpush2.bf16.msra.mxu0 %v16915_v24  ;;  %v4026_v24 = vld [vmem:[#allocation6 + $0x1c8] sm:$0xff]  ;;  %v16566_v39 = vcombine.high %v3986_v0, %v3990_v1 }
 0x2d5   :  { %7185 = vmatprep.subr.bf16.mxu0 %v16908_v25  ;;  %v16867_v25 = vcombine.low %v4289_v6, %v4293_v11  ;;  %v16606_v30 = vcombine.high %v4026_v24, %v4030_v63  ;;  %v16605_v36 = vcombine.low %v4026_v24, %v4030_v63  ;;  %v16565_v6 = vcombine.low %v3986_v0, %v3990_v1  ;;  %v4082_v63 = vld [vmem:[#allocation6 + $0x388] sm:$0xff] }
 0x2d6   :  { %7225 = vmatpush2.bf16.msra.mxu1 %v17043_v27  ;;  %v3957_v27 = vmax.f32 %v3783_v17, 0.0  ;;  %v4090_v17 = vld [vmem:[#allocation6 + $0x3c8] sm:$0xff]  ;;  %v18833_v0 = vsub.s32 7, %v18698_v60 }
 0x2d7   :  { %7226 = vmatprep.subr.bf16.mxu1 %v17036_v31  ;;  %v4018_v31 = vld [vmem:[#allocation6 + $0x188] sm:$0xff] }
 0x2d8   :  { %7186 = vmatpush2.bf16.msra.mxu0 %v16907_v40  ;;  %v18817_v40 = vpack.c.bf16 %v3957_v27, %v3957_v27  ;;  %v16597_v47 = vcombine.low %v4018_v31, %v4022_v8 }
 0x2d9   :  { %7187 = vmatprep.subr.bf16.mxu0 %v16900_v26  ;;  %v16598_v26 = vcombine.high %v4018_v31, %v4022_v8 }
 0x2da   :  { %7227 = vmatpush2.bf16.msra.mxu1 %v17035_v33  ;;  %v4010_v33 = vld [vmem:[#allocation6 + $0x148] sm:$0xff] }
 0x2db   :  { %7228 = vmatprep.subr.bf16.mxu1 %v17028_v13  ;;  %v16589_v19 = vcombine.low %v4010_v33, %v4014_v37 }
 0x2dc   :  { %7188 = vmatpush2.bf16.msra.mxu0 %v16899_v58  ;;  %v16590_v58 = vcombine.high %v4010_v33, %v4014_v37  ;;  %v4058_v37 = vld [vmem:[#allocation6 + $0x2c8] sm:$0xff] }
 0x2dd   :  { %7189 = vmatprep.subr.bf16.mxu0 %v16892_v43 }
 0x2de   :  { %7229 = vmatpush2.bf16.msra.mxu1 %v17027_v44  ;;  %v4002_v44 = vld [vmem:[#allocation6 + $0x108] sm:$0xff] }
 0x2df   :  { %7230 = vmatprep.subr.bf16.mxu1 %v17020_v46  ;;  %v16581_v38 = vcombine.low %v4002_v44, %v4006_v59 }
 0x2e0   :  { %7190 = vmatpush2.bf16.msra.mxu0 %v16891_v51  ;;  %v16582_v51 = vcombine.high %v4002_v44, %v4006_v59  ;;  %v4050_v59 = vld [vmem:[#allocation6 + $0x288] sm:$0xff] }
 0x2e1   :  { %7191 = vmatprep.subr.bf16.mxu0 %v16884_v55 }
 0x2e2   :  { %7231 = vmatpush2.bf16.msra.mxu1 %v17019_v56  ;;  %v3994_v56 = vld [vmem:[#allocation6 + $0xc8] sm:$0xff] }
 0x2e3   :  { %7232 = vmatprep.subr.bf16.mxu1 %v17012_v62  ;;  %v16574_v62 = vcombine.high %v3994_v56, %v3998_v61 }
 0x2e4   :  { %7192 = vmatpush2.bf16.msra.mxu0 %v16883_v2  ;;  %v16573_v2 = vcombine.low %v3994_v56, %v3998_v61  ;;  %v18830_v61 = vsub.s32 6, %v18698_v60  ;;  %v4278_v60 = vld [vmem:[#allocation6 + $0x9a8] sm:$0xff] }
 0x2e5   :  { %7193 = vmatprep.subr.bf16.mxu0 %v16876_v3  ;;  %v3978_v3 = vld [vmem:[#allocation6 + $0x48] sm:$0xff] }
 0x2e6   :  { %7233 = vmatpush2.bf16.msra.mxu1 %v17011_v4  ;;  %v3982_v4 = vld [vmem:[#allocation6 + $0x68] sm:$0xff] }
 0x2e7   :  { %7234 = vmatprep.subr.bf16.mxu1 %v17004_v16  ;;  %v16558_v11 = vcombine.high %v3978_v3, %v3982_v4  ;;  %v3970_v16 = vld [vmem:[#allocation6 + $0x8] sm:$0xff]  ;;  %v16557_v15 = vcombine.low %v3978_v3, %v3982_v4 }
 0x2e8   :  { %7194 = vmatpush2.bf16.msra.mxu0 %v16875_v7  ;;  %v16550_v7 = vcombine.high %v3970_v16, %v3974_v14  ;;  %v4282_v4 = vld [vmem:[#allocation6 + $0x9c8] sm:$0xff] }
 0x2e9   :  { %7195 = vmatprep.subr.bf16.mxu0 %v16868_v18  ;;  %v4094_v18 = vld [vmem:[#allocation6 + $0x3e8] sm:$0xff] }
 0x2ea   :  { %7235 = vmatpush2.bf16.msra.mxu1 %v17003_v21  ;;  %v16549_v21 = vcombine.low %v3970_v16, %v3974_v14  ;;  %v16670_v24 = vcombine.high %v4090_v17, %v4094_v18 }
 0x2eb   :  { %7236 = vmatprep.subr.bf16.mxu1 %v16996_v41  ;;  %v4086_v41 = vld [vmem:[#allocation6 + $0x3a8] sm:$0xff] }
 0x2ec   :  { %7196 = vmatpush2.bf16.msra.mxu0 %v16867_v25  ;;  %v16669_v25 = vcombine.low %v4090_v17, %v4094_v18  ;;  %v16662_v27 = vcombine.high %v4082_v63, %v4086_v41  ;;  %v16661_v31 = vcombine.low %v4082_v63, %v4086_v41  ;;  %v4266_v63 = vld [vmem:[#allocation6 + $0x948] sm:$0xff] }
 0x2ed   :  { %7247 = vmatprep.subr.bf16.mxu0 %v16606_v30  ;;  %v4074_v30 = vld [vmem:[#allocation6 + $0x348] sm:$0xff] }
 0x2ee   :  { %7237 = vmatpush2.bf16.msra.mxu1 %v16995_v32  ;;  %v4078_v32 = vld [vmem:[#allocation6 + $0x368] sm:$0xff] }
 0x2ef   :  { %7288 = vmatprep.subr.bf16.mxu1 %v16734_v42  ;;  %v18819_v12 = vpop.f32.mrf.mxu0  ;;  %7198 = vmatmul.mubr.bf16.vlgmr.msra.gmra.mxu0 %v18817_v40  ;;  %v16654_v8 = vcombine.high %v4074_v30, %v4078_v32  ;;  %v4066_v42 = vld [vmem:[#allocation6 + $0x308] sm:$0xff] }
 0x2f0   :  { %7248 = vmatpush1.bf16.msra.mxu0 %v16605_v36  ;;  %7279 = vmatprep.mubr.bf16.mxu0 %v18770_v35  ;;  %v4070_v36 = vld [vmem:[#allocation6 + $0x328] sm:$0xff] }
 0x2f1   :  { %v18822_v13 = vpop.f32.mrf.mxu1  ;;  %v18825_v57 = vpop.f32.mrf.mxu0  ;;  %7249 = vmatprep.subr.bf16.mxu0 %v16598_v26  ;;  %v16653_v26 = vcombine.low %v4074_v30, %v4078_v32  ;;  %v16646_v33 = vcombine.high %v4066_v42, %v4070_v36  ;;  %v4270_v41 = vld [vmem:[#allocation6 + $0x968] sm:$0xff] }
 0x2f3   :  { %v18827_v43 = vpop.f32.mrf.mxu1  ;;  %v3827_v45 = vpop.f32.mrf.mxu0 }
 0x2f4   :  { %7250 = vmatpush1.bf16.msra.mxu0 %v16597_v47  ;;  %v4062_v47 = vld [vmem:[#allocation6 + $0x2e8] sm:$0xff] }
 0x2f5   :  { %v3868_v46 = vpop.f32.mrf.mxu1  ;;  %v3828_v49 = vpop.f32.mrf.mxu0  ;;  %7251 = vmatprep.subr.bf16.mxu0 %v16590_v58  ;;  %v16645_v58 = vcombine.low %v4066_v42, %v4070_v36  ;;  %v16638_v44 = vcombine.high %v4058_v37, %v4062_v47  ;;  %v4054_v45 = vld [vmem:[#allocation6 + $0x2a8] sm:$0xff] }
 0x2f6   :  { %v16637_v46 = vcombine.low %v4058_v37, %v4062_v47  ;;  %v4042_v49 = vld [vmem:[#allocation6 + $0x248] sm:$0xff] }
 0x2f7   :  { %v3869_v55 = vpop.f32.mrf.mxu1 }
 0x2f8   :  { %7252 = vmatpush1.bf16.msra.mxu0 %v16589_v19  ;;  %v16630_v19 = vcombine.high %v4050_v59, %v4054_v45  ;;  %v16629_v55 = vcombine.low %v4050_v59, %v4054_v45 }
 0x2f9   :  { %7253 = vmatprep.subr.bf16.mxu0 %v16582_v51  ;;  %v4046_v51 = vld [vmem:[#allocation6 + $0x268] sm:$0xff] }
 0x2fa   :  { %v16622_v56 = vcombine.high %v4042_v49, %v4046_v51  ;;  %v16621_v1 = vcombine.low %v4042_v49, %v4046_v51  ;;  %v4150_v49 = vld [vmem:[#allocation6 + $0x5a8] sm:$0xff] }
 0x2fb   :  { %v4250_v51 = vld [vmem:[#allocation6 + $0x8c8] sm:$0xff] }
 0x2fc   :  { %7254 = vmatpush1.bf16.msra.mxu0 %v16581_v38  ;;  %v4034_v38 = vld [vmem:[#allocation6 + $0x208] sm:$0xff] }
 0x2fd   :  { %7255 = vmatprep.subr.bf16.mxu0 %v16574_v62  ;;  %v4038_v62 = vld [vmem:[#allocation6 + $0x228] sm:$0xff] }
 0x2fe   :  { %v16613_v16 = vcombine.low %v4034_v38, %v4038_v62 }
 0x300   :  { %7256 = vmatpush1.bf16.msra.mxu0 %v16573_v2  ;;  %v16614_v2 = vcombine.high %v4034_v38, %v4038_v62 }
 0x301   :  { %7257 = vmatprep.subr.bf16.mxu0 %v16566_v39  ;;  %v18325_v39 = vld [vmem:[#allocation4] sm:$0xff] }
 0x302   :  { %v696_v3 = vrot.slane %v18325_v39, %v18830_v61 }
 0x304   :  { %7258 = vmatpush1.bf16.msra.mxu0 %v16565_v6  ;;  %v4286_v6 = vld [vmem:[#allocation6 + $0x9e8] sm:$0xff] }
 0x305   :  { %7259 = vmatprep.subr.bf16.mxu0 %v16558_v11  ;;  %v700_v11 = vrot.slane %v18325_v39, %v18833_v0  ;;  %v16862_v14 = vcombine.high %v4282_v4, %v4286_v6  ;;  %v16861_v18 = vcombine.low %v4282_v4, %v4286_v6  ;;  %v4138_v39 = vld [vmem:[#allocation6 + $0x548] sm:$0xff] }
 0x306   :  { %v4242_v4 = vld [vmem:[#allocation6 + $0x888] sm:$0xff] }
 0x307   :  { %v3826_v17 = vadd.f32 %v18825_v57, %v700_v11  ;;  %v4246_v6 = vld [vmem:[#allocation6 + $0x8a8] sm:$0xff] }
 0x308   :  { %7260 = vmatpush1.bf16.msra.mxu0 %v16557_v15  ;;  %v3824_v15 = vadd.f32 %v18819_v12, %v696_v3  ;;  %v4142_v3 = vld [vmem:[#allocation6 + $0x568] sm:$0xff] }
 0x309   :  { %7261 = vmatprep.subr.bf16.mxu0 %v16550_v7  ;;  %v4274_v7 = vld [vmem:[#allocation6 + $0x988] sm:$0xff] }
 0x30a   :  { %v16853_v12 = vcombine.low %v4274_v7, %v4278_v60 }
 0x30c   :  { %7262 = vmatpush1.bf16.msra.mxu0 %v16549_v21  ;;  %v16854_v21 = vcombine.high %v4274_v7, %v4278_v60  ;;  %v4130_v7 = vld [vmem:[#allocation6 + $0x508] sm:$0xff] }
 0x30d   :  { %7263 = vmatprep.subr.bf16.mxu0 %v16670_v24  ;;  %v3865_v24 = vadd.f32 %v18822_v13, %v3824_v15  ;;  %v4258_v13 = vld [vmem:[#allocation6 + $0x908] sm:$0xff]  ;;  %v16822_v15 = vcombine.high %v4242_v4, %v4246_v6 }
 0x30e   :  { %v4134_v60 = vld [vmem:[#allocation6 + $0x528] sm:$0xff] }
 0x30f   :  { %v16710_v53 = vcombine.high %v4130_v7, %v4134_v60 }
 0x310   :  { %7264 = vmatpush2.bf16.msra.mxu0 %v16669_v25 }
 0x311   :  { %7265 = vmatprep.subr.bf16.mxu0 %v16662_v27  ;;  %v3867_v27 = vadd.f32 %v18827_v43, %v3826_v17  ;;  %v4234_v17 = vld [vmem:[#allocation6 + $0x848] sm:$0xff] }
 0x314   :  { %7266 = vmatpush2.bf16.msra.mxu0 %v16661_v31  ;;  %v16846_v31 = vcombine.high %v4266_v63, %v4270_v41 }
 0x315   :  { %7267 = vmatprep.subr.bf16.mxu0 %v16654_v8 }
 0x318   :  { %7268 = vmatpush2.bf16.msra.mxu0 %v16653_v26  ;;  %v4262_v26 = vld [vmem:[#allocation6 + $0x928] sm:$0xff] }
 0x319   :  { %7269 = vmatprep.subr.bf16.mxu0 %v16646_v33  ;;  %v16838_v59 = vcombine.high %v4258_v13, %v4262_v26  ;;  %v16837_v62 = vcombine.low %v4258_v13, %v4262_v26 }
 0x31c   :  { %7270 = vmatpush2.bf16.msra.mxu0 %v16645_v58  ;;  %v16845_v58 = vcombine.low %v4266_v63, %v4270_v41  ;;  %v4126_v63 = vld [vmem:[#allocation6 + $0x4e8] sm:$0xff] }
 0x31d   :  { %7271 = vmatprep.subr.bf16.mxu0 %v16638_v44  ;;  %v4226_v41 = vld [vmem:[#allocation6 + $0x808] sm:$0xff] }
 0x320   :  { %7272 = vmatpush2.bf16.msra.mxu0 %v16637_v46 }
 0x321   :  { %7273 = vmatprep.subr.bf16.mxu0 %v16630_v19  ;;  %v4146_v19 = vld [vmem:[#allocation6 + $0x588] sm:$0xff] }
 0x322   :  { %v16725_v11 = vcombine.low %v4146_v19, %v4150_v49 }
 0x324   :  { %7274 = vmatpush2.bf16.msra.mxu0 %v16629_v55  ;;  %v4254_v55 = vld [vmem:[#allocation6 + $0x8e8] sm:$0xff] }
 0x325   :  { %7275 = vmatprep.subr.bf16.mxu0 %v16622_v56 }
 0x328   :  { %7276 = vmatpush2.bf16.msra.mxu0 %v16621_v1  ;;  %v16726_v1 = vcombine.high %v4146_v19, %v4150_v49  ;;  %v4098_v19 = vld [vmem:[#allocation6 + $0x408] sm:$0xff] }
 0x329   :  { %7277 = vmatprep.subr.bf16.mxu0 %v16614_v2  ;;  %v16830_v2 = vcombine.high %v4250_v51, %v4254_v55  ;;  %v4102_v49 = vld [vmem:[#allocation6 + $0x428] sm:$0xff] }
 0x32c   :  { %7278 = vmatpush2.bf16.msra.mxu0 %v16613_v16  ;;  %v16829_v16 = vcombine.low %v4250_v51, %v4254_v55  ;;  %v4330_v51 = vld [vmem:[#allocation6 + $0xb48] sm:$0xff] }
 0x32d   :  { %7329 = vmatprep.subr.bf16.mxu0 %v16862_v14  ;;  %v16718_v14 = vcombine.high %v4138_v39, %v4142_v3  ;;  %v4334_v55 = vld [vmem:[#allocation6 + $0xb68] sm:$0xff] }
 0x32f   :  { %v3905_v25 = vpop.f32.mrf.mxu0  ;;  %7280 = vmatmul.mubr.bf16.vlgmr.msra.gmra.mxu0 %v18792_v29 }
 0x330   :  { %v3906_v30 = vadd.f32 %v3905_v25, %v3865_v24  ;;  %7330 = vmatpush1.bf16.msra.mxu0 %v16861_v18  ;;  %7361 = vmatprep.mubr.bf16.mxu0 %v18803_v20  ;;  %v4238_v18 = vld [vmem:[#allocation6 + $0x868] sm:$0xff]  ;;  %v16821_v24 = vcombine.low %v4242_v4, %v4246_v6 }
 0x331   :  { %v3946_v32 = vpop.f32.mrf.mxu1  ;;  %v3907_v57 = vpop.f32.mrf.mxu0  ;;  %7331 = vmatprep.subr.bf16.mxu0 %v16854_v21  ;;  %v16717_v21 = vcombine.low %v4138_v39, %v4142_v3  ;;  %v16814_v23 = vcombine.high %v4234_v17, %v4238_v18  ;;  %v4230_v25 = vld [vmem:[#allocation6 + $0x828] sm:$0xff]  ;;  %v16910_v39 = vcombine.high %v4330_v51, %v4334_v55 }
 0x332   :  { %v3947_v8 = vadd.f32 %v3946_v32, %v3906_v30  ;;  %v3908_v42 = vadd.f32 %v3907_v57, %v3867_v27  ;;  %v16709_v27 = vcombine.low %v4130_v7, %v4134_v60  ;;  %v16813_v30 = vcombine.low %v4234_v17, %v4238_v18  ;;  %v4114_v57 = vld [vmem:[#allocation6 + $0x488] sm:$0xff] }
 0x333   :  { %v3948_v36 = vpop.f32.mrf.mxu1  ;;  %v3909_v33 = vpop.f32.mrf.mxu0  ;;  %v16805_v13 = vcombine.low %v4226_v41, %v4230_v25  ;;  %v4218_v3 = vld [vmem:[#allocation6 + $0x7c8] sm:$0xff] }
 0x334   :  { %v3949_v37 = vadd.f32 %v3948_v36, %v3908_v42  ;;  %7332 = vmatpush1.bf16.msra.mxu0 %v16853_v12  ;;  %v3959_v43 = vmax.f32 %v3947_v8, 0.0  ;;  %v16806_v12 = vcombine.high %v4226_v41, %v4230_v25  ;;  %v4346_v8 = vld [vmem:[#allocation6 + $0xbc8] sm:$0xff] }
 0x335   :  { %v3950_v47 = vpop.f32.mrf.mxu1  ;;  %v3910_v44 = vpop.f32.mrf.mxu0  ;;  %7333 = vmatprep.subr.bf16.mxu0 %v16846_v31  ;;  %v4118_v31 = vld [vmem:[#allocation6 + $0x4a8] sm:$0xff] }
 0x336   :  { %v3960_v45 = vmax.f32 %v3949_v37, 0.0  ;;  %v18845_v38 = vpack.c.bf16 %v3959_v43, %v3959_v43  ;;  %v4350_v42 = vld [vmem:[#allocation6 + $0xbe8] sm:$0xff]  ;;  %v16694_v26 = vcombine.high %v4114_v57, %v4118_v31  ;;  %v16693_v44 = vcombine.low %v4114_v57, %v4118_v31 }
 0x337   :  { %v3951_v46 = vpop.f32.mrf.mxu1  ;;  %v16926_v33 = vcombine.high %v4346_v8, %v4350_v42  ;;  %v4106_v37 = vld [vmem:[#allocation6 + $0x448] sm:$0xff] }
 0x338   :  { %v18843_v56 = vpack.c.bf16 %v3960_v45, %v3960_v45  ;;  %7334 = vmatpush1.bf16.msra.mxu0 %v16845_v58  ;;  %v4110_v47 = vld [vmem:[#allocation6 + $0x468] sm:$0xff] }
 0x339   :  { %7335 = vmatprep.subr.bf16.mxu0 %v16838_v59  ;;  %v4338_v58 = vld [vmem:[#allocation6 + $0xb88] sm:$0xff]  ;;  %v16925_v59 = vcombine.low %v4346_v8, %v4350_v42  ;;  %v16686_v45 = vcombine.high %v4106_v37, %v4110_v47 }
 0x33a   :  { %7238 = vmatprep.mubr.bf16.mxu1 %v18843_v56  ;;  %v4342_v43 = vld [vmem:[#allocation6 + $0xba8] sm:$0xff] }
 0x33b   :  { %7239 = vmatmul.mubr.bf16.vlgmr.msra.gmra.mxu1 %v18845_v38  ;;  %v16918_v46 = vcombine.high %v4338_v58, %v4342_v43  ;;  %v4222_v4 = vld [vmem:[#allocation6 + $0x7e8] sm:$0xff] }
 0x33c   :  { %7289 = vmatpush1.bf16.msra.mxu1 %v16733_v28  ;;  %7320 = vmatprep.mubr.bf16.mxu1 %v18773_v50  ;;  %v4122_v28 = vld [vmem:[#allocation6 + $0x4c8] sm:$0xff] }
 0x33d   :  { %7336 = vmatpush1.bf16.msra.mxu0 %v16837_v62  ;;  %7290 = vmatprep.subr.bf16.mxu1 %v16726_v1  ;;  %v16702_v32 = vcombine.high %v4122_v28, %v4126_v63  ;;  %v16701_v36 = vcombine.low %v4122_v28, %v4126_v63  ;;  %v16685_v62 = vcombine.low %v4106_v37, %v4110_v47  ;;  %v4322_v6 = vld [vmem:[#allocation6 + $0xb08] sm:$0xff] }
 0x33e   :  { %7337 = vmatprep.subr.bf16.mxu0 %v16830_v2  ;;  %v16917_v1 = vcombine.low %v4338_v58, %v4342_v43  ;;  %v16678_v2 = vcombine.high %v4098_v19, %v4102_v49  ;;  %v4210_v60 = vld [vmem:[#allocation6 + $0x788] sm:$0xff] }
 0x33f   :  { %v4214_v17 = vld [vmem:[#allocation6 + $0x7a8] sm:$0xff] }
 0x340   :  { %7291 = vmatpush1.bf16.msra.mxu1 %v16725_v11  ;;  %v4326_v11 = vld [vmem:[#allocation6 + $0xb28] sm:$0xff] }
 0x341   :  { %7338 = vmatpush1.bf16.msra.mxu0 %v16829_v16  ;;  %7292 = vmatprep.subr.bf16.mxu1 %v16718_v14  ;;  %v16677_v16 = vcombine.low %v4098_v19, %v4102_v49  ;;  %v16909_v14 = vcombine.low %v4330_v51, %v4334_v55  ;;  %v16902_v7 = vcombine.high %v4322_v6, %v4326_v11  ;;  %v4314_v18 = vld [vmem:[#allocation6 + $0xac8] sm:$0xff]  ;;  %v4027_v55 = vld [vmem:[#allocation6 + $0x1d0] sm:$0xff] }
 0x342   :  { %7339 = vmatprep.subr.bf16.mxu0 %v16822_v15  ;;  %v16798_v15 = vcombine.high %v4218_v3, %v4222_v4  ;;  %v4202_v63 = vld [vmem:[#allocation6 + $0x748] sm:$0xff] }
 0x343   :  { %v4206_v41 = vld [vmem:[#allocation6 + $0x768] sm:$0xff] }
 0x344   :  { %7293 = vmatpush1.bf16.msra.mxu1 %v16717_v21  ;;  %v4318_v21 = vld [vmem:[#allocation6 + $0xae8] sm:$0xff] }
 0x345   :  { %7340 = vmatpush1.bf16.msra.mxu0 %v16821_v24  ;;  %7294 = vmatprep.subr.bf16.mxu1 %v16710_v53  ;;  %v16797_v24 = vcombine.low %v4218_v3, %v4222_v4  ;;  %v16901_v53 = vcombine.low %v4322_v6, %v4326_v11  ;;  %v16894_v28 = vcombine.high %v4314_v18, %v4318_v21  ;;  %v4306_v25 = vld [vmem:[#allocation6 + $0xa88] sm:$0xff]  ;;  %v4481_v3 = vld [vmem:[#allocation7] sm:$0xff] }
 0x346   :  { %7341 = vmatprep.subr.bf16.mxu0 %v16814_v23  ;;  %v16790_v23 = vcombine.high %v4210_v60, %v4214_v17  ;;  %v4194_v31 = vld [vmem:[#allocation6 + $0x708] sm:$0xff] }
 0x347   :  { %v4198_v8 = vld [vmem:[#allocation6 + $0x728] sm:$0xff] }
 0x348   :  { %7295 = vmatpush1.bf16.msra.mxu1 %v16709_v27  ;;  %v4310_v27 = vld [vmem:[#allocation6 + $0xaa8] sm:$0xff] }
 0x349   :  { %7342 = vmatpush1.bf16.msra.mxu0 %v16813_v30  ;;  %7296 = vmatprep.subr.bf16.mxu1 %v16702_v32  ;;  %v16789_v30 = vcombine.low %v4210_v60, %v4214_v17  ;;  %v16893_v32 = vcombine.low %v4314_v18, %v4318_v21  ;;  %v16886_v57 = vcombine.high %v4306_v25, %v4310_v27  ;;  %v4298_v42 = vld [vmem:[#allocation6 + $0xa48] sm:$0xff] }
 0x34a   :  { %7343 = vmatprep.subr.bf16.mxu0 %v16806_v12  ;;  %v16782_v12 = vcombine.high %v4202_v63, %v4206_v41  ;;  %v4186_v47 = vld [vmem:[#allocation6 + $0x6c8] sm:$0xff]  ;;  %v4490_v17 = vrot.slane %v4481_v3, %v18706_v10 }
 0x34b   :  { %v4190_v58 = vld [vmem:[#allocation6 + $0x6e8] sm:$0xff] }
 0x34c   :  { %7297 = vmatpush1.bf16.msra.mxu1 %v16701_v36  ;;  %v4302_v36 = vld [vmem:[#allocation6 + $0xa68] sm:$0xff] }
 0x34d   :  { %7344 = vmatpush1.bf16.msra.mxu0 %v16805_v13  ;;  %7298 = vmatprep.subr.bf16.mxu1 %v16694_v26  ;;  %v16781_v13 = vcombine.low %v4202_v63, %v4206_v41  ;;  %v16885_v26 = vcombine.low %v4306_v25, %v4310_v27  ;;  %v16878_v37 = vcombine.high %v4298_v42, %v4302_v36  ;;  %v4290_v43 = vld [vmem:[#allocation6 + $0xa08] sm:$0xff]  ;;  %v4015_v63 = vld [vmem:[#allocation6 + $0x170] sm:$0xff] }
 0x34e   :  { %7345 = vmatprep.subr.bf16.mxu0 %v16926_v33  ;;  %v16774_v33 = vcombine.high %v4194_v31, %v4198_v8  ;;  %v4178_v49 = vld [vmem:[#allocation6 + $0x688] sm:$0xff] }
 0x34f   :  { %v4182_v51 = vld [vmem:[#allocation6 + $0x6a8] sm:$0xff] }
 0x350   :  { %7299 = vmatpush1.bf16.msra.mxu1 %v16693_v44  ;;  %v4294_v44 = vld [vmem:[#allocation6 + $0xa28] sm:$0xff] }
 0x351   :  { %7346 = vmatpush2.bf16.msra.mxu0 %v16925_v59  ;;  %7300 = vmatprep.subr.bf16.mxu1 %v16686_v45  ;;  %v16773_v59 = vcombine.low %v4194_v31, %v4198_v8  ;;  %v16877_v45 = vcombine.low %v4298_v42, %v4302_v36  ;;  %v16870_v19 = vcombine.high %v4290_v43, %v4294_v44  ;;  %v4170_v6 = vld [vmem:[#allocation6 + $0x648] sm:$0xff] }
 0x352   :  { %7347 = vmatprep.subr.bf16.mxu0 %v16918_v46  ;;  %v16766_v46 = vcombine.high %v4186_v47, %v4190_v58  ;;  %v4174_v11 = vld [vmem:[#allocation6 + $0x668] sm:$0xff] }
 0x353   :  { %v16750_v18 = vcombine.high %v4170_v6, %v4174_v11  ;;  %v16749_v27 = vcombine.low %v4170_v6, %v4174_v11  ;;  %v4410_v36 = vld [vmem:[#allocation6 + $0xdc8] sm:$0xff]  ;;  %v3987_v11 = vld [vmem:[#allocation6 + $0x90] sm:$0xff] }
 0x354   :  { %7301 = vmatpush1.bf16.msra.mxu1 %v16685_v62  ;;  %v4031_v62 = vld [vmem:[#allocation6 + $0x1f0] sm:$0xff]  ;;  %v4398_v6 = vld [vmem:[#allocation6 + $0xd68] sm:$0xff] }
 0x355   :  { %7348 = vmatpush2.bf16.msra.mxu0 %v16917_v1  ;;  %7302 = vmatprep.subr.bf16.mxu1 %v16678_v2  ;;  %v16765_v1 = vcombine.low %v4186_v47, %v4190_v58  ;;  %v16869_v2 = vcombine.low %v4290_v43, %v4294_v44  ;;  %v16608_v4 = vcombine.high %v4027_v55, %v4031_v62 }
 0x356   :  { %7349 = vmatprep.subr.bf16.mxu0 %v16910_v39  ;;  %v16758_v39 = vcombine.high %v4178_v49, %v4182_v51  ;;  %v16607_v60 = vcombine.low %v4027_v55, %v4031_v62  ;;  %v3995_v55 = vld [vmem:[#allocation6 + $0xd0] sm:$0xff] }
 0x357   :  { %v3999_v62 = vld [vmem:[#allocation6 + $0xf0] sm:$0xff] }
 0x358   :  { %7303 = vmatpush1.bf16.msra.mxu1 %v16677_v16  ;;  %v4019_v16 = vld [vmem:[#allocation6 + $0x190] sm:$0xff] }
 0x359   :  { %7350 = vmatpush2.bf16.msra.mxu0 %v16909_v14  ;;  %7304 = vmatprep.subr.bf16.mxu1 %v16798_v15  ;;  %v4023_v14 = vld [vmem:[#allocation6 + $0x1b0] sm:$0xff]  ;;  %v16757_v15 = vcombine.low %v4178_v49, %v4182_v51  ;;  %v4402_v49 = vld [vmem:[#allocation6 + $0xd88] sm:$0xff] }
 0x35a   :  { %7351 = vmatprep.subr.bf16.mxu0 %v16902_v7  ;;  %v4486_v7 = vrot.slane %v4481_v3, %v18701_v5  ;;  %v16600_v21 = vcombine.high %v4019_v16, %v4023_v14  ;;  %v4406_v51 = vld [vmem:[#allocation6 + $0xda8] sm:$0xff]  ;;  %v16576_v3 = vcombine.high %v3995_v55, %v3999_v62 }
 0x35c   :  { %7305 = vmatpush2.bf16.msra.mxu1 %v16797_v24  ;;  %v4162_v24 = vld [vmem:[#allocation6 + $0x608] sm:$0xff] }
 0x35d   :  { %7352 = vmatpush2.bf16.msra.mxu0 %v16901_v53  ;;  %7306 = vmatprep.subr.bf16.mxu1 %v16790_v23  ;;  %v4166_v53 = vld [vmem:[#allocation6 + $0x628] sm:$0xff] }
 0x35e   :  { %7353 = vmatprep.subr.bf16.mxu0 %v16894_v28  ;;  %v4011_v28 = vld [vmem:[#allocation6 + $0x150] sm:$0xff]  ;;  %v16741_v43 = vcombine.low %v4162_v24, %v4166_v53 }
 0x35f   :  { %v16592_v42 = vcombine.high %v4011_v28, %v4015_v63 }
 0x360   :  { %7307 = vmatpush2.bf16.msra.mxu1 %v16789_v30 }
 0x361   :  { %7354 = vmatpush2.bf16.msra.mxu0 %v16893_v32  ;;  %7308 = vmatprep.subr.bf16.mxu1 %v16782_v12  ;;  %v16599_v32 = vcombine.low %v4019_v16, %v4023_v14  ;;  %v16742_v12 = vcombine.high %v4162_v24, %v4166_v53  ;;  %v3991_v16 = vld [vmem:[#allocation6 + $0xb0] sm:$0xff]  ;;  %v16981_v14 = vcombine.low %v4402_v49, %v4406_v51 }
 0x362   :  { %7355 = vmatprep.subr.bf16.mxu0 %v16886_v57  ;;  %v3983_v24 = vld [vmem:[#allocation6 + $0x70] sm:$0xff] }
 0x364   :  { %7309 = vmatpush2.bf16.msra.mxu1 %v16781_v13  ;;  %v4414_v13 = vld [vmem:[#allocation6 + $0xde8] sm:$0xff] }
 0x365   :  { %7356 = vmatpush2.bf16.msra.mxu0 %v16885_v26  ;;  %7310 = vmatprep.subr.bf16.mxu1 %v16774_v33  ;;  %v4003_v33 = vld [vmem:[#allocation6 + $0x110] sm:$0xff] }
 0x366   :  { %7357 = vmatprep.subr.bf16.mxu0 %v16878_v37  ;;  %v4007_v37 = vld [vmem:[#allocation6 + $0x130] sm:$0xff] }
 0x368   :  { %7311 = vmatpush2.bf16.msra.mxu1 %v16773_v59  ;;  %v16591_v59 = vcombine.low %v4011_v28, %v4015_v63 }
 0x369   :  { %7358 = vmatpush2.bf16.msra.mxu0 %v16877_v45  ;;  %7312 = vmatprep.subr.bf16.mxu1 %v16766_v46  ;;  %v16990_v45 = vcombine.high %v4410_v36, %v4414_v13 }
 0x36a   :  { %7359 = vmatprep.subr.bf16.mxu0 %v16870_v19  ;;  %v16584_v19 = vcombine.high %v4003_v33, %v4007_v37 }
 0x36c   :  { %7313 = vmatpush2.bf16.msra.mxu1 %v16765_v1  ;;  %v16989_v1 = vcombine.low %v4410_v36, %v4414_v13  ;;  %v4374_v36 = vld [vmem:[#allocation6 + $0xca8] sm:$0xff]  ;;  %v4091_v13 = vld [vmem:[#allocation6 + $0x3d0] sm:$0xff] }
 0x36d   :  { %7360 = vmatpush2.bf16.msra.mxu0 %v16869_v2  ;;  %7314 = vmatprep.subr.bf16.mxu1 %v16758_v39  ;;  %v16583_v2 = vcombine.low %v4003_v33, %v4007_v37  ;;  %v16982_v39 = vcombine.high %v4402_v49, %v4406_v51 }
 0x36e   :  { %7411 = vmatprep.subr.bf16.mxu0 %v16608_v4  ;;  %v4394_v4 = vld [vmem:[#allocation6 + $0xd48] sm:$0xff] }
 0x36f   :  { %v7117_v23 = vpop.f32.mrf.mxu0  ;;  %v16973_v53 = vcombine.low %v4394_v4, %v4398_v6 }
 0x370   :  { %v7118_v41 = vadd.f32 %v7117_v23, %v4486_v7  ;;  %7315 = vmatpush2.bf16.msra.mxu1 %v16757_v15  ;;  %7362 = vmatmul.mubr.bf16.vlgmr.msra.gmra.mxu0 %v18817_v40  ;;  %v16575_v15 = vcombine.low %v3995_v55, %v3999_v62  ;;  %v16974_v7 = vcombine.high %v4394_v4, %v4398_v6  ;;  %v4354_v62 = vld [vmem:[#allocation6 + $0xc08] sm:$0xff] }
 0x371   :  { %v7158_v25 = vpop.f32.mrf.mxu1  ;;  %7412 = vmatpush1.bf16.msra.mxu0 %v16607_v60  ;;  %7443 = vmatprep.mubr.bf16.mxu0 %v18770_v35  ;;  %v7119_v30 = vpop.f32.mrf.mxu0  ;;  %v16568_v60 = vcombine.high %v3987_v11, %v3991_v16  ;;  %v16567_v23 = vcombine.low %v3987_v11, %v3991_v16  ;;  %v4474_v16 = vld [vmem:[#allocation6 + $0xfc8] sm:$0xff] }
 0x372   :  { %v18857_v57 = vadd.f32 %v7158_v25, %v7118_v41  ;;  %v7120_v31 = vadd.f32 %v7119_v30, %v4490_v17  ;;  %7316 = vmatprep.subr.bf16.mxu1 %v16750_v18  ;;  %7413 = vmatprep.subr.bf16.mxu0 %v16600_v21  ;;  %v4386_v17 = vld [vmem:[#allocation6 + $0xd08] sm:$0xff]  ;;  %v3979_v21 = vld [vmem:[#allocation6 + $0x50] sm:$0xff] }
 0x373   :  { %v7160_v8 = vpop.f32.mrf.mxu1  ;;  %v7121_v26 = vpop.f32.mrf.mxu0  ;;  %v4390_v18 = vld [vmem:[#allocation6 + $0xd28] sm:$0xff]  ;;  %v16560_v63 = vcombine.high %v3979_v21, %v3983_v24  ;;  %v3975_v30 = vld [vmem:[#allocation6 + $0x30] sm:$0xff] }
 0x374   :  { %v18859_v47 = vadd.f32 %v7160_v8, %v7120_v31  ;;  %7317 = vmatpush2.bf16.msra.mxu1 %v16749_v27  ;;  %v16966_v28 = vcombine.high %v4386_v17, %v4390_v18  ;;  %v4378_v41 = vld [vmem:[#allocation6 + $0xcc8] sm:$0xff]  ;;  %v3971_v27 = vld [vmem:[#allocation6 + $0x10] sm:$0xff] }
 0x375   :  { %v7162_v58 = vpop.f32.mrf.mxu1  ;;  %7414 = vmatpush1.bf16.msra.mxu0 %v16599_v32  ;;  %v7122_v44 = vpop.f32.mrf.mxu0  ;;  %7318 = vmatprep.subr.bf16.mxu1 %v16742_v12  ;;  %v4382_v25 = vld [vmem:[#allocation6 + $0xce8] sm:$0xff]  ;;  %v16965_v32 = vcombine.low %v4386_v17, %v4390_v18  ;;  %v16559_v12 = vcombine.low %v3979_v21, %v3983_v24  ;;  %v16552_v8 = vcombine.high %v3971_v27, %v3975_v30  ;;  %v4095_v26 = vld [vmem:[#allocation6 + $0x3f0] sm:$0xff] }
 0x376   :  { %7415 = vmatprep.subr.bf16.mxu0 %v16592_v42  ;;  %v16958_v31 = vcombine.high %v4378_v41, %v4382_v25  ;;  %v4370_v42 = vld [vmem:[#allocation6 + $0xc88] sm:$0xff]  ;;  %v16957_v33 = vcombine.low %v4378_v41, %v4382_v25  ;;  %v16551_v37 = vcombine.low %v3971_v27, %v3975_v30  ;;  %v16671_v49 = vcombine.low %v4091_v13, %v4095_v26 }
 0x377   :  { %v7163_v46 = vpop.f32.mrf.mxu1  ;;  %v16950_v58 = vcombine.high %v4370_v42, %v4374_v36  ;;  %v4362_v44 = vld [vmem:[#allocation6 + $0xc48] sm:$0xff] }
 0x378   :  { %7319 = vmatpush2.bf16.msra.mxu1 %v16741_v43  ;;  %v16672_v43 = vcombine.high %v4091_v13, %v4095_v26  ;;  %v4087_v46 = vld [vmem:[#allocation6 + $0x3b0] sm:$0xff]  ;;  %v4466_v24 = vld [vmem:[#allocation6 + $0xf88] sm:$0xff] }
 0x379   :  { %7416 = vmatpush1.bf16.msra.mxu0 %v16591_v59  ;;  %7370 = vmatprep.subr.bf16.mxu1 %v16990_v45  ;;  %v4366_v59 = vld [vmem:[#allocation6 + $0xc68] sm:$0xff]  ;;  %v4083_v45 = vld [vmem:[#allocation6 + $0x390] sm:$0xff] }
 0x37a   :  { %7417 = vmatprep.subr.bf16.mxu0 %v16584_v19  ;;  %v16949_v19 = vcombine.low %v4370_v42, %v4374_v36  ;;  %v16942_v51 = vcombine.high %v4362_v44, %v4366_v59  ;;  %v16664_v55 = vcombine.high %v4083_v45, %v4087_v46  ;;  %v16663_v4 = vcombine.low %v4083_v45, %v4087_v46  ;;  %v4458_v30 = vld [vmem:[#allocation6 + $0xf48] sm:$0xff] }
 0x37b   :  { %7321 = vmatmul.mubr.bf16.vlgmr.msra.gmra.mxu1 %v18794_v34  ;;  %v4450_v26 = vld [vmem:[#allocation6 + $0xf08] sm:$0xff] }
 0x37c   :  { %7371 = vmatpush1.bf16.msra.mxu1 %v16989_v1  ;;  %7402 = vmatprep.mubr.bf16.mxu1 %v18843_v56  ;;  %v4358_v1 = vld [vmem:[#allocation6 + $0xc28] sm:$0xff] }
 0x37d   :  { %7418 = vmatpush1.bf16.msra.mxu0 %v16583_v2  ;;  %7372 = vmatprep.subr.bf16.mxu1 %v16982_v39  ;;  %v4075_v2 = vld [vmem:[#allocation6 + $0x350] sm:$0xff]  ;;  %v16934_v6 = vcombine.high %v4354_v62, %v4358_v1  ;;  %v4442_v46 = vld [vmem:[#allocation6 + $0xec8] sm:$0xff] }
 0x37e   :  { %7419 = vmatprep.subr.bf16.mxu0 %v16576_v3  ;;  %v4079_v39 = vld [vmem:[#allocation6 + $0x370] sm:$0xff]  ;;  %v16941_v3 = vcombine.low %v4362_v44, %v4366_v59 }
 0x37f   :  { %v16656_v11 = vcombine.high %v4075_v2, %v4079_v39  ;;  %v16655_v17 = vcombine.low %v4075_v2, %v4079_v39  ;;  %v4434_v39 = vld [vmem:[#allocation6 + $0xe88] sm:$0xff] }
 0x380   :  { %7373 = vmatpush1.bf16.msra.mxu1 %v16981_v14  ;;  %v4478_v14 = vld [vmem:[#allocation6 + $0xfe8] sm:$0xff] }
 0x381   :  { %7420 = vmatpush1.bf16.msra.mxu0 %v16575_v15  ;;  %7374 = vmatprep.subr.bf16.mxu1 %v16974_v7  ;;  %v4067_v15 = vld [vmem:[#allocation6 + $0x310] sm:$0xff]  ;;  %v17054_v18 = vcombine.high %v4474_v16, %v4478_v14 }
 0x382   :  { %7421 = vmatprep.subr.bf16.mxu0 %v16568_v60  ;;  %v4071_v7 = vld [vmem:[#allocation6 + $0x330] sm:$0xff]  ;;  %v16933_v60 = vcombine.low %v4354_v62, %v4358_v1 }
 0x383   :  { %v16648_v21 = vcombine.high %v4067_v15, %v4071_v7  ;;  %v16647_v41 = vcombine.low %v4067_v15, %v4071_v7  ;;  %v4426_v7 = vld [vmem:[#allocation6 + $0xe48] sm:$0xff] }
 0x384   :  { %7375 = vmatpush1.bf16.msra.mxu1 %v16973_v53  ;;  %v4470_v53 = vld [vmem:[#allocation6 + $0xfa8] sm:$0xff] }
 0x385   :  { %7422 = vmatpush1.bf16.msra.mxu0 %v16567_v23  ;;  %7376 = vmatprep.subr.bf16.mxu1 %v16966_v28  ;;  %v4059_v23 = vld [vmem:[#allocation6 + $0x2d0] sm:$0xff]  ;;  %v17046_v25 = vcombine.high %v4466_v24, %v4470_v53 }
 0x386   :  { %7423 = vmatprep.subr.bf16.mxu0 %v16560_v63  ;;  %v4063_v28 = vld [vmem:[#allocation6 + $0x2f0] sm:$0xff]  ;;  %v17053_v63 = vcombine.low %v4474_v16, %v4478_v14 }
 0x387   :  { %v16640_v27 = vcombine.high %v4059_v23, %v4063_v28  ;;  %v16639_v42 = vcombine.low %v4059_v23, %v4063_v28  ;;  %v4418_v28 = vld [vmem:[#allocation6 + $0xe08] sm:$0xff] }
 0x388   :  { %7377 = vmatpush1.bf16.msra.mxu1 %v16965_v32  ;;  %v4462_v32 = vld [vmem:[#allocation6 + $0xf68] sm:$0xff] }
 0x389   :  { %7424 = vmatpush1.bf16.msra.mxu0 %v16559_v12  ;;  %7378 = vmatprep.subr.bf16.mxu1 %v16958_v31  ;;  %v4051_v12 = vld [vmem:[#allocation6 + $0x290] sm:$0xff]  ;;  %v17038_v36 = vcombine.high %v4458_v30, %v4462_v32 }
 0x38a   :  { %7425 = vmatprep.subr.bf16.mxu0 %v16552_v8  ;;  %v4055_v31 = vld [vmem:[#allocation6 + $0x2b0] sm:$0xff]  ;;  %v17045_v8 = vcombine.low %v4466_v24, %v4470_v53 }
 0x38b   :  { %v16632_v13 = vcombine.high %v4051_v12, %v4055_v31  ;;  %v16631_v44 = vcombine.low %v4051_v12, %v4055_v31 }
 0x38c   :  { %7379 = vmatpush1.bf16.msra.mxu1 %v16957_v33  ;;  %v4454_v33 = vld [vmem:[#allocation6 + $0xf28] sm:$0xff] }
 0x38d   :  { %7426 = vmatpush1.bf16.msra.mxu0 %v16551_v37  ;;  %7380 = vmatprep.subr.bf16.mxu1 %v16950_v58  ;;  %v4043_v37 = vld [vmem:[#allocation6 + $0x250] sm:$0xff]  ;;  %v17030_v59 = vcombine.high %v4450_v26, %v4454_v33 }
 0x38e   :  { %7427 = vmatprep.subr.bf16.mxu0 %v16672_v43  ;;  %v4047_v58 = vld [vmem:[#allocation6 + $0x270] sm:$0xff]  ;;  %v17037_v43 = vcombine.low %v4458_v30, %v4462_v32 }
 0x38f   :  { %v16624_v45 = vcombine.high %v4043_v37, %v4047_v58  ;;  %v16623_v62 = vcombine.low %v4043_v37, %v4047_v58  ;;  %v4263_v37 = vld [vmem:[#allocation6 + $0x930] sm:$0xff] }
 0x390   :  { %7381 = vmatpush1.bf16.msra.mxu1 %v16949_v19  ;;  %v4446_v19 = vld [vmem:[#allocation6 + $0xee8] sm:$0xff] }
 0x391   :  { %7428 = vmatpush2.bf16.msra.mxu0 %v16671_v49  ;;  %7382 = vmatprep.subr.bf16.mxu1 %v16942_v51  ;;  %v4035_v49 = vld [vmem:[#allocation6 + $0x210] sm:$0xff]  ;;  %v17022_v1 = vcombine.high %v4442_v46, %v4446_v19 }
 0x392   :  { %7429 = vmatprep.subr.bf16.mxu0 %v16664_v55  ;;  %v4039_v51 = vld [vmem:[#allocation6 + $0x230] sm:$0xff]  ;;  %v17029_v55 = vcombine.low %v4450_v26, %v4454_v33 }
 0x393   :  { %v16616_v2 = vcombine.high %v4035_v49, %v4039_v51  ;;  %v16615_v16 = vcombine.low %v4035_v49, %v4039_v51  ;;  %v4159_v26 = vld [vmem:[#allocation6 + $0x5f0] sm:$0xff] }
 0x394   :  { %7383 = vmatpush1.bf16.msra.mxu1 %v16941_v3  ;;  %v4438_v3 = vld [vmem:[#allocation6 + $0xea8] sm:$0xff]  ;;  %v4259_v33 = vld [vmem:[#allocation6 + $0x910] sm:$0xff] }
 0x395   :  { %7430 = vmatpush2.bf16.msra.mxu0 %v16663_v4  ;;  %7384 = vmatprep.subr.bf16.mxu1 %v16934_v6  ;;  %v4283_v4 = vld [vmem:[#allocation6 + $0x9d0] sm:$0xff]  ;;  %v17014_v14 = vcombine.high %v4434_v39, %v4438_v3 }
 0x396   :  { %7431 = vmatprep.subr.bf16.mxu0 %v16656_v11  ;;  %v4287_v6 = vld [vmem:[#allocation6 + $0x9f0] sm:$0xff]  ;;  %v17021_v11 = vcombine.low %v4442_v46, %v4446_v19 }
 0x397   :  { %v16864_v15 = vcombine.high %v4283_v4, %v4287_v6  ;;  %v16863_v24 = vcombine.low %v4283_v4, %v4287_v6  ;;  %v4147_v46 = vld [vmem:[#allocation6 + $0x590] sm:$0xff] }
 0x398   :  { %7385 = vmatpush1.bf16.msra.mxu1 %v16933_v60  ;;  %v4430_v60 = vld [vmem:[#allocation6 + $0xe68] sm:$0xff]  ;;  %v4251_v19 = vld [vmem:[#allocation6 + $0x8d0] sm:$0xff] }
 0x399   :  { %7432 = vmatpush2.bf16.msra.mxu0 %v16655_v17  ;;  %7386 = vmatprep.subr.bf16.mxu1 %v17054_v18  ;;  %v4275_v17 = vld [vmem:[#allocation6 + $0x990] sm:$0xff]  ;;  %v17006_v53 = vcombine.high %v4426_v7, %v4430_v60  ;;  %v17005_v32 = vcombine.low %v4426_v7, %v4430_v60 }
 0x39a   :  { %7433 = vmatprep.subr.bf16.mxu0 %v16648_v21  ;;  %v4279_v18 = vld [vmem:[#allocation6 + $0x9b0] sm:$0xff]  ;;  %v17013_v21 = vcombine.low %v4434_v39, %v4438_v3 }
 0x39b   :  { %v16856_v23 = vcombine.high %v4275_v17, %v4279_v18  ;;  %v16855_v31 = vcombine.low %v4275_v17, %v4279_v18  ;;  %v4255_v49 = vld [vmem:[#allocation6 + $0x8f0] sm:$0xff] }
 0x39c   :  { %7387 = vmatpush2.bf16.msra.mxu1 %v17053_v63  ;;  %v4422_v63 = vld [vmem:[#allocation6 + $0xe28] sm:$0xff]  ;;  %v4143_v39 = vld [vmem:[#allocation6 + $0x570] sm:$0xff] }
 0x39d   :  { %7434 = vmatpush2.bf16.msra.mxu0 %v16647_v41  ;;  %7388 = vmatprep.subr.bf16.mxu1 %v17046_v25  ;;  %v4267_v25 = vld [vmem:[#allocation6 + $0x950] sm:$0xff]  ;;  %v16997_v58 = vcombine.low %v4418_v28, %v4422_v63 }
 0x39e   :  { %7435 = vmatprep.subr.bf16.mxu0 %v16640_v27  ;;  %v4271_v27 = vld [vmem:[#allocation6 + $0x970] sm:$0xff] }
 0x39f   :  { %v4243_v3 = vld [vmem:[#allocation6 + $0x890] sm:$0xff] }
 0x3a0   :  { %7389 = vmatpush2.bf16.msra.mxu1 %v17045_v8  ;;  %v16998_v8 = vcombine.high %v4418_v28, %v4422_v63  ;;  %v4247_v4 = vld [vmem:[#allocation6 + $0x8b0] sm:$0xff] }
 0x3a1   :  { %7436 = vmatpush2.bf16.msra.mxu0 %v16639_v42  ;;  %7390 = vmatprep.subr.bf16.mxu1 %v17038_v36  ;;  %v16848_v36 = vcombine.high %v4267_v25, %v4271_v27  ;;  %v4135_v7 = vld [vmem:[#allocation6 + $0x530] sm:$0xff] }
 0x3a2   :  { %7437 = vmatprep.subr.bf16.mxu0 %v16632_v13  ;;  %v4155_v13 = vld [vmem:[#allocation6 + $0x5d0] sm:$0xff] }
 0x3a3   :  { %v16735_v51 = vcombine.low %v4155_v13, %v4159_v26  ;;  %v4235_v60 = vld [vmem:[#allocation6 + $0x850] sm:$0xff] }
 0x3a4   :  { %7391 = vmatpush2.bf16.msra.mxu1 %v17037_v43  ;;  %v4239_v17 = vld [vmem:[#allocation6 + $0x870] sm:$0xff] }
 0x3a5   :  { %7438 = vmatpush2.bf16.msra.mxu0 %v16631_v44  ;;  %7392 = vmatprep.subr.bf16.mxu1 %v17030_v59  ;;  %v16847_v44 = vcombine.low %v4267_v25, %v4271_v27  ;;  %v16736_v59 = vcombine.high %v4155_v13, %v4159_v26  ;;  %v4127_v28 = vld [vmem:[#allocation6 + $0x4f0] sm:$0xff]  ;;  %v16815_v27 = vcombine.low %v4235_v60, %v4239_v17 }
 0x3a6   :  { %7439 = vmatprep.subr.bf16.mxu0 %v16624_v45  ;;  %v16840_v45 = vcombine.high %v4259_v33, %v4263_v37  ;;  %v4227_v63 = vld [vmem:[#allocation6 + $0x810] sm:$0xff] }
 0x3a7   :  { %v4351_v13 = vld [vmem:[#allocation6 + $0xbf0] sm:$0xff] }
 0x3a8   :  { %7393 = vmatpush2.bf16.msra.mxu1 %v17029_v55  ;;  %v16839_v55 = vcombine.low %v4259_v33, %v4263_v37 }
 0x3a9   :  { %7440 = vmatpush2.bf16.msra.mxu0 %v16623_v62  ;;  %7394 = vmatprep.subr.bf16.mxu1 %v17022_v1  ;;  %v16832_v1 = vcombine.high %v4251_v19, %v4255_v49 }
 0x3aa   :  { %7441 = vmatprep.subr.bf16.mxu0 %v16616_v2  ;;  %v4139_v2 = vld [vmem:[#allocation6 + $0x550] sm:$0xff] }
 0x3ab   :  { %v16719_v18 = vcombine.low %v4139_v2, %v4143_v39 }
 0x3ac   :  { %7395 = vmatpush2.bf16.msra.mxu1 %v17021_v11  ;;  %v16831_v11 = vcombine.low %v4251_v19, %v4255_v49  ;;  %v4099_v49 = vld [vmem:[#allocation6 + $0x410] sm:$0xff] }
 0x3ad   :  { %7442 = vmatpush2.bf16.msra.mxu0 %v16615_v16  ;;  %7396 = vmatprep.subr.bf16.mxu1 %v17014_v14  ;;  %v16720_v16 = vcombine.high %v4139_v2, %v4143_v39  ;;  %v16824_v14 = vcombine.high %v4243_v3, %v4247_v4 }
 0x3ae   :  { %7493 = vmatprep.subr.bf16.mxu0 %v16864_v15  ;;  %v4131_v15 = vld [vmem:[#allocation6 + $0x510] sm:$0xff] }
 0x3af   :  { %v7199_v41 = vpop.f32.mrf.mxu0  ;;  %v16711_v25 = vcombine.low %v4131_v15, %v4135_v7 }
 0x3b0   :  { %v18864_v30 = vadd.f32 %v7199_v41, %v18857_v57  ;;  %7397 = vmatpush2.bf16.msra.mxu1 %v17013_v21  ;;  %7444 = vmatmul.mubr.bf16.vlgmr.msra.gmra.mxu0 %v18792_v29  ;;  %v16823_v21 = vcombine.low %v4243_v3, %v4247_v4  ;;  %v4231_v41 = vld [vmem:[#allocation6 + $0x830] sm:$0xff] }
 0x3b1   :  { %7494 = vmatpush1.bf16.msra.mxu0 %v16863_v24  ;;  %7525 = vmatprep.mubr.bf16.mxu0 %v18803_v20  ;;  %v7201_v12 = vpop.f32.mrf.mxu0  ;;  %v16712_v24 = vcombine.high %v4131_v15, %v4135_v7  ;;  %v4219_v4 = vld [vmem:[#allocation6 + $0x7d0] sm:$0xff] }
 0x3b2   :  { %v18869_v42 = vadd.f32 %v7201_v12, %v18859_v47  ;;  %7398 = vmatprep.subr.bf16.mxu1 %v17006_v53  ;;  %7495 = vmatprep.subr.bf16.mxu0 %v16856_v23  ;;  %v4151_v47 = vld [vmem:[#allocation6 + $0x5b0] sm:$0xff]  ;;  %v16816_v53 = vcombine.high %v4235_v60, %v4239_v17  ;;  %v16808_v12 = vcombine.high %v4227_v63, %v4231_v41 }
 0x3b3   :  { %v7203_v57 = vpop.f32.mrf.mxu0  ;;  %v16728_v62 = vcombine.high %v4147_v46, %v4151_v47  ;;  %v16727_v6 = vcombine.low %v4147_v46, %v4151_v47  ;;  %v4123_v23 = vld [vmem:[#allocation6 + $0x4d0] sm:$0xff] }
 0x3b4   :  { %7399 = vmatpush2.bf16.msra.mxu1 %v17005_v32  ;;  %v16704_v32 = vcombine.high %v4123_v23, %v4127_v28  ;;  %v16703_v26 = vcombine.low %v4123_v23, %v4127_v28  ;;  %v16807_v57 = vcombine.low %v4227_v63, %v4231_v41  ;;  %v4211_v17 = vld [vmem:[#allocation6 + $0x790] sm:$0xff] }
 0x3b5   :  { %7496 = vmatpush1.bf16.msra.mxu0 %v16855_v31  ;;  %v7204_v43 = vpop.f32.mrf.mxu0  ;;  %7400 = vmatprep.subr.bf16.mxu1 %v16998_v8  ;;  %v4115_v31 = vld [vmem:[#allocation6 + $0x490] sm:$0xff] }
 0x3b6   :  { %7497 = vmatprep.subr.bf16.mxu0 %v16848_v36  ;;  %v4119_v8 = vld [vmem:[#allocation6 + $0x4b0] sm:$0xff] }
 0x3b7   :  { %v4347_v36 = vld [vmem:[#allocation6 + $0xbd0] sm:$0xff]  ;;  %v16696_v33 = vcombine.high %v4115_v31, %v4119_v8 }
 0x3b8   :  { %7401 = vmatpush2.bf16.msra.mxu1 %v16997_v58  ;;  %v16928_v37 = vcombine.high %v4347_v36, %v4351_v13  ;;  %v4107_v58 = vld [vmem:[#allocation6 + $0x450] sm:$0xff]  ;;  %v16927_v46 = vcombine.low %v4347_v36, %v4351_v13 }
 0x3b9   :  { %7498 = vmatpush1.bf16.msra.mxu0 %v16847_v44  ;;  %7452 = vmatprep.subr.bf16.mxu1 %v16736_v59  ;;  %v4111_v43 = vld [vmem:[#allocation6 + $0x470] sm:$0xff] }
 0x3ba   :  { %7499 = vmatprep.subr.bf16.mxu0 %v16840_v45  ;;  %v4339_v44 = vld [vmem:[#allocation6 + $0xb90] sm:$0xff]  ;;  %v16695_v45 = vcombine.low %v4115_v31, %v4119_v8  ;;  %v16688_v47 = vcombine.high %v4107_v58, %v4111_v43 }
 0x3bb   :  { %7403 = vmatmul.mubr.bf16.vlgmr.msra.gmra.mxu1 %v18845_v38  ;;  %v4343_v59 = vld [vmem:[#allocation6 + $0xbb0] sm:$0xff] }
 0x3bc   :  { %7453 = vmatpush1.bf16.msra.mxu1 %v16735_v51  ;;  %7484 = vmatprep.mubr.bf16.mxu1 %v18773_v50  ;;  %v16920_v19 = vcombine.high %v4339_v44, %v4343_v59  ;;  %v4103_v51 = vld [vmem:[#allocation6 + $0x430] sm:$0xff]  ;;  %v16919_v2 = vcombine.low %v4339_v44, %v4343_v59 }
 0x3bd   :  { %7500 = vmatpush1.bf16.msra.mxu0 %v16839_v55  ;;  %7454 = vmatprep.subr.bf16.mxu1 %v16728_v62  ;;  %v4331_v55 = vld [vmem:[#allocation6 + $0xb50] sm:$0xff]  ;;  %v16680_v39 = vcombine.high %v4099_v49, %v4103_v51 }
 0x3be   :  { %7501 = vmatprep.subr.bf16.mxu0 %v16832_v1  ;;  %v4335_v62 = vld [vmem:[#allocation6 + $0xb70] sm:$0xff]  ;;  %v16687_v1 = vcombine.low %v4107_v58, %v4111_v43 }
 0x3bf   :  { %v16912_v3 = vcombine.high %v4331_v55, %v4335_v62  ;;  %v16911_v15 = vcombine.low %v4331_v55, %v4335_v62  ;;  %v4203_v41 = vld [vmem:[#allocation6 + $0x750] sm:$0xff] }
 0x3c0   :  { %7455 = vmatpush1.bf16.msra.mxu1 %v16727_v6  ;;  %v4223_v6 = vld [vmem:[#allocation6 + $0x7f0] sm:$0xff] }
 0x3c1   :  { %7502 = vmatpush1.bf16.msra.mxu0 %v16831_v11  ;;  %7456 = vmatprep.subr.bf16.mxu1 %v16720_v16  ;;  %v4323_v11 = vld [vmem:[#allocation6 + $0xb10] sm:$0xff]  ;;  %v16800_v7 = vcombine.high %v4219_v4, %v4223_v6 }
 0x3c2   :  { %7503 = vmatprep.subr.bf16.mxu0 %v16824_v14  ;;  %v4327_v16 = vld [vmem:[#allocation6 + $0xb30] sm:$0xff]  ;;  %v16679_v14 = vcombine.low %v4099_v49, %v4103_v51 }
 0x3c3   :  { %v16904_v60 = vcombine.high %v4323_v11, %v4327_v16  ;;  %v16903_v23 = vcombine.low %v4323_v11, %v4327_v16  ;;  %v4195_v13 = vld [vmem:[#allocation6 + $0x710] sm:$0xff] }
 0x3c4   :  { %7457 = vmatpush1.bf16.msra.mxu1 %v16719_v18  ;;  %v4215_v18 = vld [vmem:[#allocation6 + $0x7b0] sm:$0xff] }
 0x3c5   :  { %7504 = vmatpush1.bf16.msra.mxu0 %v16823_v21  ;;  %7458 = vmatprep.subr.bf16.mxu1 %v16712_v24  ;;  %v4315_v21 = vld [vmem:[#allocation6 + $0xad0] sm:$0xff]  ;;  %v16792_v28 = vcombine.high %v4211_v17, %v4215_v18 }
 0x3c6   :  { %7505 = vmatprep.subr.bf16.mxu0 %v16816_v53  ;;  %v4319_v24 = vld [vmem:[#allocation6 + $0xaf0] sm:$0xff]  ;;  %v16799_v53 = vcombine.low %v4219_v4, %v4223_v6 }
 0x3c7   :  { %v16896_v63 = vcombine.high %v4315_v21, %v4319_v24  ;;  %v16895_v31 = vcombine.low %v4315_v21, %v4319_v24  ;;  %v4187_v59 = vld [vmem:[#allocation6 + $0x6d0] sm:$0xff] }
 0x3c8   :  { %7459 = vmatpush1.bf16.msra.mxu1 %v16711_v25  ;;  %v4207_v25 = vld [vmem:[#allocation6 + $0x770] sm:$0xff] }
 0x3c9   :  { %7506 = vmatpush1.bf16.msra.mxu0 %v16815_v27  ;;  %7460 = vmatprep.subr.bf16.mxu1 %v16704_v32  ;;  %v4307_v27 = vld [vmem:[#allocation6 + $0xa90] sm:$0xff]  ;;  %v16784_v8 = vcombine.high %v4203_v41, %v4207_v25 }
 0x3ca   :  { %7507 = vmatprep.subr.bf16.mxu0 %v16808_v12  ;;  %v4311_v32 = vld [vmem:[#allocation6 + $0xab0] sm:$0xff]  ;;  %v16791_v12 = vcombine.low %v4211_v17, %v4215_v18 }
 0x3cb   :  { %v16888_v36 = vcombine.high %v4307_v27, %v4311_v32  ;;  %v16887_v58 = vcombine.low %v4307_v27, %v4311_v32  ;;  %v4179_v62 = vld [vmem:[#allocation6 + $0x690] sm:$0xff] }
 0x3cc   :  { %7461 = vmatpush1.bf16.msra.mxu1 %v16703_v26  ;;  %v4199_v26 = vld [vmem:[#allocation6 + $0x730] sm:$0xff] }
 0x3cd   :  { %7508 = vmatpush1.bf16.msra.mxu0 %v16807_v57  ;;  %7462 = vmatprep.subr.bf16.mxu1 %v16696_v33  ;;  %v4299_v57 = vld [vmem:[#allocation6 + $0xa50] sm:$0xff]  ;;  %v16776_v43 = vcombine.high %v4195_v13, %v4199_v26 }
 0x3ce   :  { %7509 = vmatprep.subr.bf16.mxu0 %v16928_v37  ;;  %v4303_v33 = vld [vmem:[#allocation6 + $0xa70] sm:$0xff]  ;;  %v16783_v37 = vcombine.low %v4203_v41, %v4207_v25 }
 0x3cf   :  { %v16880_v44 = vcombine.high %v4299_v57, %v4303_v33  ;;  %v16879_v49 = vcombine.low %v4299_v57, %v4303_v33  ;;  %v4171_v16 = vld [vmem:[#allocation6 + $0x650] sm:$0xff] }
 0x3d0   :  { %7463 = vmatpush1.bf16.msra.mxu1 %v16695_v45  ;;  %v4191_v45 = vld [vmem:[#allocation6 + $0x6f0] sm:$0xff] }
 0x3d1   :  { %7510 = vmatpush2.bf16.msra.mxu0 %v16927_v46  ;;  %7464 = vmatprep.subr.bf16.mxu1 %v16688_v47  ;;  %v4291_v46 = vld [vmem:[#allocation6 + $0xa10] sm:$0xff]  ;;  %v16768_v51 = vcombine.high %v4187_v59, %v4191_v45 }
 0x3d2   :  { %7511 = vmatprep.subr.bf16.mxu0 %v16920_v19  ;;  %v4295_v47 = vld [vmem:[#allocation6 + $0xa30] sm:$0xff]  ;;  %v16775_v19 = vcombine.low %v4195_v13, %v4199_v26  ;;  %v4004_v13 = vld [vmem:[#allocation6 + $0x118] sm:$0xff] }
 0x3d3   :  { %v16872_v55 = vcombine.high %v4291_v46, %v4295_v47  ;;  %v16871_v4 = vcombine.low %v4291_v46, %v4295_v47  ;;  %v4163_v24 = vld [vmem:[#allocation6 + $0x610] sm:$0xff]  ;;  %v4008_v26 = vld [vmem:[#allocation6 + $0x138] sm:$0xff] }
 0x3d4   :  { %7465 = vmatpush1.bf16.msra.mxu1 %v16687_v1  ;;  %v4183_v1 = vld [vmem:[#allocation6 + $0x6b0] sm:$0xff]  ;;  %v16585_v47 = vcombine.low %v4004_v13, %v4008_v26 }
 0x3d5   :  { %7512 = vmatpush2.bf16.msra.mxu0 %v16919_v2  ;;  %7466 = vmatprep.subr.bf16.mxu1 %v16680_v39  ;;  %v4028_v2 = vld [vmem:[#allocation6 + $0x1d8] sm:$0xff]  ;;  %v16760_v6 = vcombine.high %v4179_v62, %v4183_v1 }
 0x3d6   :  { %7513 = vmatprep.subr.bf16.mxu0 %v16912_v3  ;;  %v4032_v39 = vld [vmem:[#allocation6 + $0x1f8] sm:$0xff]  ;;  %v16767_v3 = vcombine.low %v4187_v59, %v4191_v45 }
 0x3d7   :  { %v16610_v11 = vcombine.high %v4028_v2, %v4032_v39  ;;  %v16609_v17 = vcombine.low %v4028_v2, %v4032_v39  ;;  %v3996_v59 = vld [vmem:[#allocation6 + $0xd8] sm:$0xff] }
 0x3d8   :  { %7467 = vmatpush1.bf16.msra.mxu1 %v16679_v14  ;;  %v4175_v14 = vld [vmem:[#allocation6 + $0x670] sm:$0xff]  ;;  %v4000_v45 = vld [vmem:[#allocation6 + $0xf8] sm:$0xff] }
 0x3d9   :  { %7514 = vmatpush2.bf16.msra.mxu0 %v16911_v15  ;;  %7468 = vmatprep.subr.bf16.mxu1 %v16800_v7  ;;  %v4020_v15 = vld [vmem:[#allocation6 + $0x198] sm:$0xff]  ;;  %v16752_v18 = vcombine.high %v4171_v16, %v4175_v14  ;;  %v16751_v41 = vcombine.low %v4171_v16, %v4175_v14 }
 0x3da   :  { %7515 = vmatprep.subr.bf16.mxu0 %v16904_v60  ;;  %v4024_v7 = vld [vmem:[#allocation6 + $0x1b8] sm:$0xff]  ;;  %v16759_v60 = vcombine.low %v4179_v62, %v4183_v1 }
 0x3db   :  { %v16602_v21 = vcombine.high %v4020_v15, %v4024_v7  ;;  %v16601_v27 = vcombine.low %v4020_v15, %v4024_v7  ;;  %v3988_v1 = vld [vmem:[#allocation6 + $0x98] sm:$0xff]  ;;  %v4387_v15 = vld [vmem:[#allocation6 + $0xd10] sm:$0xff] }
 0x3dc   :  { %7469 = vmatpush2.bf16.msra.mxu1 %v16799_v53  ;;  %v4167_v53 = vld [vmem:[#allocation6 + $0x630] sm:$0xff]  ;;  %v3992_v2 = vld [vmem:[#allocation6 + $0xb8] sm:$0xff] }
 0x3dd   :  { %7516 = vmatpush2.bf16.msra.mxu0 %v16903_v23  ;;  %7470 = vmatprep.subr.bf16.mxu1 %v16792_v28  ;;  %v4012_v28 = vld [vmem:[#allocation6 + $0x158] sm:$0xff]  ;;  %v16744_v32 = vcombine.high %v4163_v24, %v4167_v53  ;;  %v16743_v57 = vcombine.low %v4163_v24, %v4167_v53  ;;  %v16570_v14 = vcombine.high %v3988_v1, %v3992_v2  ;;  %v4391_v7 = vld [vmem:[#allocation6 + $0xd30] sm:$0xff] }
 0x3de   :  { %7517 = vmatprep.subr.bf16.mxu0 %v16896_v63  ;;  %v4016_v63 = vld [vmem:[#allocation6 + $0x178] sm:$0xff]  ;;  %v16569_v24 = vcombine.low %v3988_v1, %v3992_v2  ;;  %v16968_v53 = vcombine.high %v4387_v15, %v4391_v7 }
 0x3df   :  { %v4080_v1 = vld [vmem:[#allocation6 + $0x378] sm:$0xff] }
 0x3e0   :  { %7471 = vmatpush2.bf16.msra.mxu1 %v16791_v12  ;;  %v16594_v12 = vcombine.high %v4012_v28, %v4016_v63 }
 0x3e1   :  { %7518 = vmatpush2.bf16.msra.mxu0 %v16895_v31  ;;  %7472 = vmatprep.subr.bf16.mxu1 %v16784_v8  ;;  %v4411_v31 = vld [vmem:[#allocation6 + $0xdd0] sm:$0xff] }
 0x3e2   :  { %7519 = vmatprep.subr.bf16.mxu0 %v16888_v36  ;;  %v4415_v8 = vld [vmem:[#allocation6 + $0xdf0] sm:$0xff] }
 0x3e3   :  { %v16991_v46 = vcombine.low %v4411_v31, %v4415_v8 }
 0x3e4   :  { %7473 = vmatpush2.bf16.msra.mxu1 %v16783_v37  ;;  %v16593_v37 = vcombine.low %v4012_v28, %v4016_v63  ;;  %v4379_v63 = vld [vmem:[#allocation6 + $0xcd0] sm:$0xff] }
 0x3e5   :  { %7520 = vmatpush2.bf16.msra.mxu0 %v16887_v58  ;;  %7474 = vmatprep.subr.bf16.mxu1 %v16776_v43  ;;  %v16992_v58 = vcombine.high %v4411_v31, %v4415_v8  ;;  %v4403_v43 = vld [vmem:[#allocation6 + $0xd90] sm:$0xff] }
 0x3e6   :  { %7521 = vmatprep.subr.bf16.mxu0 %v16880_v44  ;;  %v4407_v44 = vld [vmem:[#allocation6 + $0xdb0] sm:$0xff] }
 0x3e8   :  { %7475 = vmatpush2.bf16.msra.mxu1 %v16775_v19  ;;  %v16984_v19 = vcombine.high %v4403_v43, %v4407_v44 }
 0x3e9   :  { %7522 = vmatpush2.bf16.msra.mxu0 %v16879_v49  ;;  %7476 = vmatprep.subr.bf16.mxu1 %v16768_v51  ;;  %v16578_v49 = vcombine.high %v3996_v59, %v4000_v45  ;;  %v4395_v51 = vld [vmem:[#allocation6 + $0xd50] sm:$0xff] }
 0x3ea   :  { %7523 = vmatprep.subr.bf16.mxu0 %v16872_v55  ;;  %v4399_v55 = vld [vmem:[#allocation6 + $0xd70] sm:$0xff] }
 0x3ec   :  { %7477 = vmatpush2.bf16.msra.mxu1 %v16767_v3  ;;  %v16983_v3 = vcombine.low %v4403_v43, %v4407_v44  ;;  %v4363_v43 = vld [vmem:[#allocation6 + $0xc50] sm:$0xff] }
 0x3ed   :  { %7524 = vmatpush2.bf16.msra.mxu0 %v16871_v4  ;;  %7478 = vmatprep.subr.bf16.mxu1 %v16760_v6  ;;  %v16577_v6 = vcombine.low %v3996_v59, %v4000_v45  ;;  %v4367_v44 = vld [vmem:[#allocation6 + $0xc70] sm:$0xff]  ;;  %v4084_v59 = vld [vmem:[#allocation6 + $0x398] sm:$0xff] }
 0x3ee   :  { %7575 = vmatprep.subr.bf16.mxu0 %v16610_v11  ;;  %v16976_v11 = vcombine.high %v4395_v51, %v4399_v55  ;;  %v4088_v45 = vld [vmem:[#allocation6 + $0x3b8] sm:$0xff]  ;;  %v16943_v2 = vcombine.low %v4363_v43, %v4367_v44 }
 0x3ef   :  { %v18873_v23 = vpop.f32.mrf.mxu0 }
 0x3f0   :  { %7479 = vmatpush2.bf16.msra.mxu1 %v16759_v60  ;;  %7526 = vmatmul.mubr.bf16.vlgmr.msra.gmra.mxu0 %v18817_v40 }
 0x3f1   :  { %7576 = vmatpush1.bf16.msra.mxu0 %v16609_v17  ;;  %7607 = vmatprep.mubr.bf16.mxu0 %v18770_v35  ;;  %v18877_v25 = vpop.f32.mrf.mxu0  ;;  %v16586_v35 = vcombine.high %v4004_v13, %v4008_v26  ;;  %v3980_v17 = vld [vmem:[#allocation6 + $0x58] sm:$0xff]  ;;  %v4375_v13 = vld [vmem:[#allocation6 + $0xcb0] sm:$0xff] }
 0x3f2   :  { %7480 = vmatprep.subr.bf16.mxu1 %v16752_v18  ;;  %7577 = vmatprep.subr.bf16.mxu0 %v16602_v21  ;;  %v16975_v18 = vcombine.low %v4395_v51, %v4399_v55  ;;  %v4092_v26 = vld [vmem:[#allocation6 + $0x3d8] sm:$0xff]  ;;  %v4355_v51 = vld [vmem:[#allocation6 + $0xc10] sm:$0xff] }
 0x3f3   :  { %v7285_v36 = vpop.f32.mrf.mxu0  ;;  %v4359_v55 = vld [vmem:[#allocation6 + $0xc30] sm:$0xff] }
 0x3f4   :  { %7481 = vmatpush2.bf16.msra.mxu1 %v16751_v41  ;;  %v4383_v41 = vld [vmem:[#allocation6 + $0xcf0] sm:$0xff] }
 0x3f5   :  { %7578 = vmatpush1.bf16.msra.mxu0 %v16601_v27  ;;  %v7286_v33 = vpop.f32.mrf.mxu0  ;;  %7482 = vmatprep.subr.bf16.mxu1 %v16744_v32  ;;  %v3976_v27 = vld [vmem:[#allocation6 + $0x38] sm:$0xff]  ;;  %v16967_v32 = vcombine.low %v4387_v15, %v4391_v7  ;;  %v16960_v31 = vcombine.high %v4379_v63, %v4383_v41  ;;  %v4371_v36 = vld [vmem:[#allocation6 + $0xc90] sm:$0xff] }
 0x3f6   :  { %7579 = vmatprep.subr.bf16.mxu0 %v16594_v12  ;;  %v16959_v33 = vcombine.low %v4379_v63, %v4383_v41  ;;  %v4068_v15 = vld [vmem:[#allocation6 + $0x318] sm:$0xff] }
 0x3f7   :  { %v4072_v7 = vld [vmem:[#allocation6 + $0x338] sm:$0xff] }
 0x3f8   :  { %7483 = vmatpush2.bf16.msra.mxu1 %v16743_v57  ;;  %v4096_v57 = vld [vmem:[#allocation6 + $0x3f8] sm:$0xff]  ;;  %v16649_v41 = vcombine.low %v4068_v15, %v4072_v7 }
 0x3f9   :  { %7580 = vmatpush1.bf16.msra.mxu0 %v16593_v37  ;;  %7534 = vmatprep.subr.bf16.mxu1 %v16992_v58  ;;  %v16952_v58 = vcombine.high %v4371_v36, %v4375_v13 }
 0x3fa   :  { %7581 = vmatprep.subr.bf16.mxu0 %v16586_v35  ;;  %v16674_v35 = vcombine.high %v4092_v26, %v4096_v57 }
 0x3fb   :  { %7485 = vmatmul.mubr.bf16.vlgmr.msra.gmra.mxu1 %v18794_v34  ;;  %v7240_v62 = vpop.f32.mrf.mxu1 }
 0x3fc   :  { %v18881_v39 = vadd.f32 %v7240_v62, %v18864_v30  ;;  %7535 = vmatpush1.bf16.msra.mxu1 %v16991_v46  ;;  %7566 = vmatprep.mubr.bf16.mxu1 %v18843_v56  ;;  %v3984_v30 = vld [vmem:[#allocation6 + $0x78] sm:$0xff]  ;;  %v16951_v46 = vcombine.low %v4371_v36, %v4375_v13 }
 0x3fd   :  { %7582 = vmatpush1.bf16.msra.mxu0 %v16585_v47  ;;  %v7242_v4 = vpop.f32.mrf.mxu1  ;;  %7536 = vmatprep.subr.bf16.mxu1 %v16984_v19  ;;  %v16562_v28 = vcombine.high %v3980_v17, %v3984_v30  ;;  %v16561_v12 = vcombine.low %v3980_v17, %v3984_v30  ;;  %v16673_v47 = vcombine.low %v4092_v26, %v4096_v57  ;;  %v4076_v62 = vld [vmem:[#allocation6 + $0x358] sm:$0xff] }
 0x3fe   :  { %v18885_v16 = vadd.f32 %v7242_v4, %v18869_v42  ;;  %7583 = vmatprep.subr.bf16.mxu0 %v16578_v49  ;;  %v3972_v42 = vld [vmem:[#allocation6 + $0x18] sm:$0xff]  ;;  %v16944_v19 = vcombine.high %v4363_v43, %v4367_v44  ;;  %v16666_v49 = vcombine.high %v4084_v59, %v4088_v45  ;;  %v16936_v4 = vcombine.high %v4355_v51, %v4359_v55 }
 0x3ff   :  { %v7244_v60 = vpop.f32.mrf.mxu1  ;;  %v16554_v8 = vcombine.high %v3972_v42, %v3976_v27  ;;  %v16553_v37 = vcombine.low %v3972_v42, %v3976_v27  ;;  %v16657_v17 = vcombine.low %v4076_v62, %v4080_v1 }
 0x400   :  { %7537 = vmatpush1.bf16.msra.mxu1 %v16983_v3  ;;  %v16665_v3 = vcombine.low %v4084_v59, %v4088_v45  ;;  %v16935_v60 = vcombine.low %v4355_v51, %v4359_v55 }
 0x401   :  { %7584 = vmatpush1.bf16.msra.mxu0 %v16577_v6  ;;  %v7245_v21 = vpop.f32.mrf.mxu1  ;;  %7538 = vmatprep.subr.bf16.mxu1 %v16976_v11  ;;  %v16658_v6 = vcombine.high %v4076_v62, %v4080_v1  ;;  %v4475_v11 = vld [vmem:[#allocation6 + $0xfd0] sm:$0xff] }
 0x402   :  { %7585 = vmatprep.subr.bf16.mxu0 %v16570_v14  ;;  %v4479_v14 = vld [vmem:[#allocation6 + $0xff0] sm:$0xff] }
 0x403   :  { %v17056_v30 = vcombine.high %v4475_v11, %v4479_v14  ;;  %v4467_v21 = vld [vmem:[#allocation6 + $0xf90] sm:$0xff]  ;;  %v17055_v63 = vcombine.low %v4475_v11, %v4479_v14 }
 0x404   :  { %7539 = vmatpush1.bf16.msra.mxu1 %v16975_v18  ;;  %v16650_v18 = vcombine.high %v4068_v15, %v4072_v7 }
 0x405   :  { %7586 = vmatpush1.bf16.msra.mxu0 %v16569_v24  ;;  %7540 = vmatprep.subr.bf16.mxu1 %v16968_v53  ;;  %v4471_v24 = vld [vmem:[#allocation6 + $0xfb0] sm:$0xff]  ;;  %v4060_v53 = vld [vmem:[#allocation6 + $0x2d8] sm:$0xff] }
 0x406   :  { %7587 = vmatprep.subr.bf16.mxu0 %v16562_v28  ;;  %v4064_v28 = vld [vmem:[#allocation6 + $0x2f8] sm:$0xff]  ;;  %v17048_v42 = vcombine.high %v4467_v21, %v4471_v24  ;;  %v17047_v36 = vcombine.low %v4467_v21, %v4471_v24 }
 0x407   :  { %v16642_v27 = vcombine.high %v4060_v53, %v4064_v28  ;;  %v16641_v13 = vcombine.low %v4060_v53, %v4064_v28 }
 0x408   :  { %7541 = vmatpush1.bf16.msra.mxu1 %v16967_v32  ;;  %v4459_v32 = vld [vmem:[#allocation6 + $0xf50] sm:$0xff] }
 0x409   :  { %7588 = vmatpush1.bf16.msra.mxu0 %v16561_v12  ;;  %7542 = vmatprep.subr.bf16.mxu1 %v16960_v31  ;;  %v4463_v12 = vld [vmem:[#allocation6 + $0xf70] sm:$0xff]  ;;  %v4052_v31 = vld [vmem:[#allocation6 + $0x298] sm:$0xff] }
 0x40a   :  { %7589 = vmatprep.subr.bf16.mxu0 %v16554_v8  ;;  %v4056_v8 = vld [vmem:[#allocation6 + $0x2b8] sm:$0xff]  ;;  %v17040_v26 = vcombine.high %v4459_v32, %v4463_v12  ;;  %v17039_v43 = vcombine.low %v4459_v32, %v4463_v12 }
 0x40b   :  { %v16634_v57 = vcombine.high %v4052_v31, %v4056_v8  ;;  %v16633_v44 = vcombine.low %v4052_v31, %v4056_v8 }
 0x40c   :  { %7543 = vmatpush1.bf16.msra.mxu1 %v16959_v33  ;;  %v4451_v33 = vld [vmem:[#allocation6 + $0xf10] sm:$0xff] }
 0x40d   :  { %7590 = vmatpush1.bf16.msra.mxu0 %v16553_v37  ;;  %7544 = vmatprep.subr.bf16.mxu1 %v16952_v58  ;;  %v4455_v37 = vld [vmem:[#allocation6 + $0xf30] sm:$0xff]  ;;  %v4044_v58 = vld [vmem:[#allocation6 + $0x258] sm:$0xff] }
 0x40e   :  { %7591 = vmatprep.subr.bf16.mxu0 %v16674_v35  ;;  %v4048_v35 = vld [vmem:[#allocation6 + $0x278] sm:$0xff]  ;;  %v17032_v59 = vcombine.high %v4451_v33, %v4455_v37  ;;  %v17031_v51 = vcombine.low %v4451_v33, %v4455_v37 }
 0x40f   :  { %v16626_v45 = vcombine.high %v4044_v58, %v4048_v35  ;;  %v16625_v55 = vcombine.low %v4044_v58, %v4048_v35  ;;  %v4260_v33 = vld [vmem:[#allocation6 + $0x918] sm:$0xff] }
 0x410   :  { %7545 = vmatpush1.bf16.msra.mxu1 %v16951_v46  ;;  %v4443_v46 = vld [vmem:[#allocation6 + $0xed0] sm:$0xff]  ;;  %v4264_v37 = vld [vmem:[#allocation6 + $0x938] sm:$0xff] }
 0x411   :  { %7592 = vmatpush2.bf16.msra.mxu0 %v16673_v47  ;;  %7546 = vmatprep.subr.bf16.mxu1 %v16944_v19  ;;  %v4447_v47 = vld [vmem:[#allocation6 + $0xef0] sm:$0xff]  ;;  %v4036_v19 = vld [vmem:[#allocation6 + $0x218] sm:$0xff] }
 0x412   :  { %7593 = vmatprep.subr.bf16.mxu0 %v16666_v49  ;;  %v4040_v49 = vld [vmem:[#allocation6 + $0x238] sm:$0xff]  ;;  %v17024_v62 = vcombine.high %v4443_v46, %v4447_v47  ;;  %v17023_v11 = vcombine.low %v4443_v46, %v4447_v47 }
 0x413   :  { %v16618_v1 = vcombine.high %v4036_v19, %v4040_v49  ;;  %v16617_v14 = vcombine.low %v4036_v19, %v4040_v49  ;;  %v4148_v46 = vld [vmem:[#allocation6 + $0x598] sm:$0xff] }
 0x414   :  { %7547 = vmatpush1.bf16.msra.mxu1 %v16943_v2  ;;  %v4435_v2 = vld [vmem:[#allocation6 + $0xe90] sm:$0xff]  ;;  %v4152_v47 = vld [vmem:[#allocation6 + $0x5b8] sm:$0xff] }
 0x415   :  { %7594 = vmatpush2.bf16.msra.mxu0 %v16665_v3  ;;  %7548 = vmatprep.subr.bf16.mxu1 %v16936_v4  ;;  %v4439_v3 = vld [vmem:[#allocation6 + $0xeb0] sm:$0xff]  ;;  %v4284_v4 = vld [vmem:[#allocation6 + $0x9d8] sm:$0xff] }
 0x416   :  { %7595 = vmatprep.subr.bf16.mxu0 %v16658_v6  ;;  %v4288_v6 = vld [vmem:[#allocation6 + $0x9f8] sm:$0xff]  ;;  %v17016_v15 = vcombine.high %v4435_v2, %v4439_v3  ;;  %v17015_v21 = vcombine.low %v4435_v2, %v4439_v3 }
 0x417   :  { %v16866_v7 = vcombine.high %v4284_v4, %v4288_v6  ;;  %v16865_v24 = vcombine.low %v4284_v4, %v4288_v6  ;;  %v4252_v19 = vld [vmem:[#allocation6 + $0x8d8] sm:$0xff] }
 0x418   :  { %7549 = vmatpush1.bf16.msra.mxu1 %v16935_v60  ;;  %v4427_v60 = vld [vmem:[#allocation6 + $0xe50] sm:$0xff]  ;;  %v4256_v49 = vld [vmem:[#allocation6 + $0x8f8] sm:$0xff] }
 0x419   :  { %7596 = vmatpush2.bf16.msra.mxu0 %v16657_v17  ;;  %7550 = vmatprep.subr.bf16.mxu1 %v17056_v30  ;;  %v4431_v17 = vld [vmem:[#allocation6 + $0xe70] sm:$0xff]  ;;  %v4276_v30 = vld [vmem:[#allocation6 + $0x998] sm:$0xff]  ;;  %v16834_v3 = vcombine.high %v4252_v19, %v4256_v49 }
 0x41a   :  { %7597 = vmatprep.subr.bf16.mxu0 %v16650_v18  ;;  %v4280_v18 = vld [vmem:[#allocation6 + $0x9b8] sm:$0xff]  ;;  %v17008_v53 = vcombine.high %v4427_v60, %v4431_v17  ;;  %v17007_v12 = vcombine.low %v4427_v60, %v4431_v17  ;;  %v16729_v17 = vcombine.low %v4148_v46, %v4152_v47 }
 0x41b   :  { %v16858_v28 = vcombine.high %v4276_v30, %v4280_v18  ;;  %v16857_v31 = vcombine.low %v4276_v30, %v4280_v18  ;;  %v4140_v4 = vld [vmem:[#allocation6 + $0x558] sm:$0xff] }
 0x41c   :  { %7551 = vmatpush2.bf16.msra.mxu1 %v17055_v63  ;;  %v4419_v63 = vld [vmem:[#allocation6 + $0xe10] sm:$0xff]  ;;  %v4144_v6 = vld [vmem:[#allocation6 + $0x578] sm:$0xff] }
 0x41d   :  { %7598 = vmatpush2.bf16.msra.mxu0 %v16649_v41  ;;  %7552 = vmatprep.subr.bf16.mxu1 %v17048_v42  ;;  %v4423_v41 = vld [vmem:[#allocation6 + $0xe30] sm:$0xff]  ;;  %v4268_v42 = vld [vmem:[#allocation6 + $0x958] sm:$0xff]  ;;  %v16722_v18 = vcombine.high %v4140_v4, %v4144_v6 }
 0x41e   :  { %7599 = vmatprep.subr.bf16.mxu0 %v16642_v27  ;;  %v4272_v27 = vld [vmem:[#allocation6 + $0x978] sm:$0xff]  ;;  %v17000_v8 = vcombine.high %v4419_v63, %v4423_v41  ;;  %v16999_v35 = vcombine.low %v4419_v63, %v4423_v41 }
 0x420   :  { %7553 = vmatpush2.bf16.msra.mxu1 %v17047_v36 }
 0x421   :  { %7600 = vmatpush2.bf16.msra.mxu0 %v16641_v13  ;;  %7554 = vmatprep.subr.bf16.mxu1 %v17040_v26  ;;  %v16850_v13 = vcombine.high %v4268_v42, %v4272_v27  ;;  %v4156_v26 = vld [vmem:[#allocation6 + $0x5d8] sm:$0xff] }
 0x422   :  { %7601 = vmatprep.subr.bf16.mxu0 %v16634_v57  ;;  %v4160_v57 = vld [vmem:[#allocation6 + $0x5f8] sm:$0xff] }
 0x424   :  { %7555 = vmatpush2.bf16.msra.mxu1 %v17039_v43  ;;  %v16738_v43 = vcombine.high %v4156_v26, %v4160_v57 }
 0x425   :  { %7602 = vmatpush2.bf16.msra.mxu0 %v16633_v44  ;;  %7556 = vmatprep.subr.bf16.mxu1 %v17032_v59  ;;  %v18891_v44 = vld [vmem:[#allocation7] sm:$0xff] }
 0x426   :  { %7603 = vmatprep.subr.bf16.mxu0 %v16626_v45  ;;  %v16842_v45 = vcombine.high %v4260_v33, %v4264_v37 }
 0x428   :  { %7557 = vmatpush2.bf16.msra.mxu1 %v17031_v51  ;;  %v4498_v51 = vrot.slane %v18891_v44, %v18734_v52 }
 0x429   :  { %7604 = vmatpush2.bf16.msra.mxu0 %v16625_v55  ;;  %7558 = vmatprep.subr.bf16.mxu1 %v17024_v62  ;;  %v16737_v55 = vcombine.low %v4156_v26, %v4160_v57  ;;  %v16841_v62 = vcombine.low %v4260_v33, %v4264_v37  ;;  %v4124_v26 = vld [vmem:[#allocation6 + $0x4d8] sm:$0xff] }
 0x42a   :  { %7605 = vmatprep.subr.bf16.mxu0 %v16618_v1  ;;  %v16730_v1 = vcombine.high %v4148_v46, %v4152_v47  ;;  %v4128_v57 = vld [vmem:[#allocation6 + $0x4f8] sm:$0xff] }
 0x42b   :  { %v4228_v33 = vld [vmem:[#allocation6 + $0x818] sm:$0xff] }
 0x42c   :  { %7559 = vmatpush2.bf16.msra.mxu1 %v17023_v11  ;;  %v4232_v37 = vld [vmem:[#allocation6 + $0x838] sm:$0xff] }
 0x42d   :  { %7606 = vmatpush2.bf16.msra.mxu0 %v16617_v14  ;;  %7560 = vmatprep.subr.bf16.mxu1 %v17016_v15  ;;  %v4244_v14 = vld [vmem:[#allocation6 + $0x898] sm:$0xff]  ;;  %v16809_v46 = vcombine.low %v4228_v33, %v4232_v37 }
 0x42e   :  { %7657 = vmatprep.subr.bf16.mxu0 %v16866_v7  ;;  %v4248_v15 = vld [vmem:[#allocation6 + $0x8b8] sm:$0xff]  ;;  %v7284_v7 = vadd.f32 %v18877_v25, %v4498_v51 }
 0x42f   :  { %v4236_v25 = vld [vmem:[#allocation6 + $0x858] sm:$0xff] }
 0x430   :  { %v18887_v32 = vpop.f32.mrf.mxu0  ;;  %7561 = vmatpush2.bf16.msra.mxu1 %v17015_v21  ;;  %7608 = vmatmul.mubr.bf16.vlgmr.msra.gmra.mxu0 %v18792_v29  ;;  %v16849_v29 = vcombine.low %v4268_v42, %v4272_v27  ;;  %v4240_v42 = vld [vmem:[#allocation6 + $0x878] sm:$0xff]  ;;  %v16721_v27 = vcombine.low %v4140_v4, %v4144_v6 }
 0x431   :  { %7658 = vmatpush1.bf16.msra.mxu0 %v16865_v24  ;;  %7689 = vmatprep.mubr.bf16.mxu0 %v18803_v20  ;;  %v4494_v20 = vrot.slane %v18891_v44, %v18731_v48  ;;  %v16826_v24 = vcombine.high %v4244_v14, %v4248_v15  ;;  %v4112_v51 = vld [vmem:[#allocation6 + $0x478] sm:$0xff] }
 0x432   :  { %v7365_v36 = vpop.f32.mrf.mxu0  ;;  %7562 = vmatprep.subr.bf16.mxu1 %v17008_v53  ;;  %7659 = vmatprep.subr.bf16.mxu0 %v16858_v28  ;;  %v4132_v53 = vld [vmem:[#allocation6 + $0x518] sm:$0xff] }
 0x433   :  { %v7282_v2 = vadd.f32 %v18873_v23, %v4494_v20  ;;  %v16833_v23 = vcombine.low %v4252_v19, %v4256_v49  ;;  %v4136_v28 = vld [vmem:[#allocation6 + $0x538] sm:$0xff] }
 0x434   :  { %v7367_v58 = vpop.f32.mrf.mxu0  ;;  %7563 = vmatpush2.bf16.msra.mxu1 %v17007_v12  ;;  %v4348_v20 = vld [vmem:[#allocation6 + $0xbd8] sm:$0xff] }
 0x435   :  { %7660 = vmatpush1.bf16.msra.mxu0 %v16857_v31  ;;  %7564 = vmatprep.subr.bf16.mxu1 %v17000_v8  ;;  %v16825_v31 = vcombine.low %v4244_v14, %v4248_v15  ;;  %v16714_v8 = vcombine.high %v4132_v53, %v4136_v28  ;;  %v16817_v58 = vcombine.low %v4236_v25, %v4240_v42  ;;  %v4108_v49 = vld [vmem:[#allocation6 + $0x458] sm:$0xff] }
 0x436   :  { %v7368_v59 = vpop.f32.mrf.mxu0  ;;  %7661 = vmatprep.subr.bf16.mxu0 %v16850_v13  ;;  %v16818_v13 = vcombine.high %v4236_v25, %v4240_v42  ;;  %v4100_v6 = vld [vmem:[#allocation6 + $0x418] sm:$0xff] }
 0x437   :  { %v4352_v59 = vld [vmem:[#allocation6 + $0xbf8] sm:$0xff] }
 0x438   :  { %7565 = vmatpush2.bf16.msra.mxu1 %v16999_v35  ;;  %v16706_v35 = vcombine.high %v4124_v26, %v4128_v57  ;;  %v16930_v19 = vcombine.high %v4348_v20, %v4352_v59  ;;  %v4332_v14 = vld [vmem:[#allocation6 + $0xb58] sm:$0xff] }
 0x439   :  { %7662 = vmatpush1.bf16.msra.mxu0 %v16849_v29  ;;  %7616 = vmatprep.subr.bf16.mxu1 %v16738_v43  ;;  %v4116_v29 = vld [vmem:[#allocation6 + $0x498] sm:$0xff] }
 0x43a   :  { %7663 = vmatprep.subr.bf16.mxu0 %v16842_v45  ;;  %v4120_v43 = vld [vmem:[#allocation6 + $0x4b8] sm:$0xff]  ;;  %v16705_v45 = vcombine.low %v4124_v26, %v4128_v57 }
 0x43b   :  { %v7322_v11 = vpop.f32.mrf.mxu1  ;;  %7567 = vmatmul.mubr.bf16.vlgmr.msra.gmra.mxu1 %v18845_v38  ;;  %v16698_v47 = vcombine.high %v4116_v29, %v4120_v43  ;;  %v4336_v15 = vld [vmem:[#allocation6 + $0xb78] sm:$0xff] }
 0x43c   :  { %v7323_v60 = vadd.f32 %v7322_v11, %v7282_v2  ;;  %7617 = vmatpush1.bf16.msra.mxu1 %v16737_v55  ;;  %7648 = vmatprep.mubr.bf16.mxu1 %v18773_v50  ;;  %v4340_v55 = vld [vmem:[#allocation6 + $0xb98] sm:$0xff]  ;;  %v16929_v2 = vcombine.low %v4348_v20, %v4352_v59 }
 0x43d   :  { %v7324_v30 = vpop.f32.mrf.mxu1  ;;  %7664 = vmatpush1.bf16.msra.mxu0 %v16841_v62  ;;  %7618 = vmatprep.subr.bf16.mxu1 %v16730_v1  ;;  %v4344_v62 = vld [vmem:[#allocation6 + $0xbb8] sm:$0xff]  ;;  %v16697_v1 = vcombine.low %v4116_v29, %v4120_v43 }
 0x43e   :  { %v7325_v21 = vadd.f32 %v7324_v30, %v7284_v7  ;;  %7665 = vmatprep.subr.bf16.mxu0 %v16834_v3  ;;  %v18902_v63 = vadd.f32 %v18887_v32, %v7323_v60  ;;  %v16713_v32 = vcombine.low %v4132_v53, %v4136_v28  ;;  %v16690_v3 = vcombine.high %v4108_v49, %v4112_v51  ;;  %v4104_v11 = vld [vmem:[#allocation6 + $0x438] sm:$0xff] }
 0x43f   :  { %v7326_v41 = vpop.f32.mrf.mxu1  ;;  %v16922_v4 = vcombine.high %v4340_v55, %v4344_v62  ;;  %v16689_v7 = vcombine.low %v4108_v49, %v4112_v51  ;;  %v16921_v60 = vcombine.low %v4340_v55, %v4344_v62  ;;  %v16914_v30 = vcombine.high %v4332_v14, %v4336_v15  ;;  %v4212_v42 = vld [vmem:[#allocation6 + $0x798] sm:$0xff] }
 0x440   :  { %7619 = vmatpush1.bf16.msra.mxu1 %v16729_v17  ;;  %v18904_v50 = vadd.f32 %v7365_v36, %v7325_v21  ;;  %v16810_v36 = vcombine.high %v4228_v33, %v4232_v37  ;;  %v16682_v17 = vcombine.high %v4100_v6, %v4104_v11  ;;  %v4324_v21 = vld [vmem:[#allocation6 + $0xb18] sm:$0xff]  ;;  %v16681_v53 = vcombine.low %v4100_v6, %v4104_v11 }
 0x441   :  { %v7327_v12 = vpop.f32.mrf.mxu1  ;;  %7666 = vmatpush1.bf16.msra.mxu0 %v16833_v23  ;;  %7620 = vmatprep.subr.bf16.mxu1 %v16722_v18  ;;  %v4220_v23 = vld [vmem:[#allocation6 + $0x7d8] sm:$0xff]  ;;  %v16913_v28 = vcombine.low %v4332_v14, %v4336_v15 }
 0x442   :  { %7667 = vmatprep.subr.bf16.mxu0 %v16826_v24  ;;  %v4224_v18 = vld [vmem:[#allocation6 + $0x7f8] sm:$0xff] }
 0x443   :  { %v4328_v24 = vld [vmem:[#allocation6 + $0xb38] sm:$0xff]  ;;  %v16802_v41 = vcombine.high %v4220_v23, %v4224_v18 }
 0x444   :  { %7621 = vmatpush1.bf16.msra.mxu1 %v16721_v27  ;;  %v16906_v25 = vcombine.high %v4324_v21, %v4328_v24  ;;  %v4216_v27 = vld [vmem:[#allocation6 + $0x7b8] sm:$0xff] }
 0x445   :  { %7668 = vmatpush1.bf16.msra.mxu0 %v16825_v31  ;;  %7622 = vmatprep.subr.bf16.mxu1 %v16714_v8  ;;  %v4316_v12 = vld [vmem:[#allocation6 + $0xad8] sm:$0xff]  ;;  %v16801_v8 = vcombine.low %v4220_v23, %v4224_v18  ;;  %v16794_v26 = vcombine.high %v4212_v42, %v4216_v27 }
 0x446   :  { %7669 = vmatprep.subr.bf16.mxu0 %v16818_v13  ;;  %v4320_v31 = vld [vmem:[#allocation6 + $0xaf8] sm:$0xff]  ;;  %v16905_v13 = vcombine.low %v4324_v21, %v4328_v24  ;;  %v7740_v24 = vmax.f32 %v18885_v16, 0.0 }
 0x447   :  { %v16898_v57 = vcombine.high %v4316_v12, %v4320_v31  ;;  %v4204_v33 = vld [vmem:[#allocation6 + $0x758] sm:$0xff] }
 0x448   :  { %7623 = vmatpush1.bf16.msra.mxu1 %v16713_v32  ;;  %v4208_v37 = vld [vmem:[#allocation6 + $0x778] sm:$0xff] }
 0x449   :  { %7670 = vmatpush1.bf16.msra.mxu0 %v16817_v58  ;;  %7624 = vmatprep.subr.bf16.mxu1 %v16706_v35  ;;  %v4308_v32 = vld [vmem:[#allocation6 + $0xa98] sm:$0xff]  ;;  %v16793_v35 = vcombine.low %v4212_v42, %v4216_v27  ;;  %v16786_v29 = vcombine.high %v4204_v33, %v4208_v37 }
 0x44a   :  { %7671 = vmatprep.subr.bf16.mxu0 %v16810_v36  ;;  %v4312_v58 = vld [vmem:[#allocation6 + $0xab8] sm:$0xff]  ;;  %v16897_v36 = vcombine.low %v4316_v12, %v4320_v31 }
 0x44b   :  { %v16890_v43 = vcombine.high %v4308_v32, %v4312_v58  ;;  %v4196_v20 = vld [vmem:[#allocation6 + $0x718] sm:$0xff] }
 0x44c   :  { %7625 = vmatpush1.bf16.msra.mxu1 %v16705_v45  ;;  %v4200_v59 = vld [vmem:[#allocation6 + $0x738] sm:$0xff] }
 0x44d   :  { %7672 = vmatpush1.bf16.msra.mxu0 %v16809_v46  ;;  %7626 = vmatprep.subr.bf16.mxu1 %v16698_v47  ;;  %v4300_v45 = vld [vmem:[#allocation6 + $0xa58] sm:$0xff]  ;;  %v16785_v47 = vcombine.low %v4204_v33, %v4208_v37  ;;  %v16778_v49 = vcombine.high %v4196_v20, %v4200_v59 }
 0x44e   :  { %7673 = vmatprep.subr.bf16.mxu0 %v16930_v19  ;;  %v4304_v46 = vld [vmem:[#allocation6 + $0xa78] sm:$0xff]  ;;  %v16889_v19 = vcombine.low %v4308_v32, %v4312_v58 }
 0x44f   :  { %v16882_v51 = vcombine.high %v4300_v45, %v4304_v46  ;;  %v4188_v55 = vld [vmem:[#allocation6 + $0x6d8] sm:$0xff] }
 0x450   :  { %7627 = vmatpush1.bf16.msra.mxu1 %v16697_v1  ;;  %v4192_v62 = vld [vmem:[#allocation6 + $0x6f8] sm:$0xff] }
 0x451   :  { %7674 = vmatpush2.bf16.msra.mxu0 %v16929_v2  ;;  %7628 = vmatprep.subr.bf16.mxu1 %v16690_v3  ;;  %v4292_v1 = vld [vmem:[#allocation6 + $0xa18] sm:$0xff]  ;;  %v16777_v3 = vcombine.low %v4196_v20, %v4200_v59  ;;  %v16770_v6 = vcombine.high %v4188_v55, %v4192_v62  ;;  %v7791_v20 = vld [vmem:[#allocation9 + $0x120] sm:$0xff] }
 0x452   :  { %7675 = vmatprep.subr.bf16.mxu0 %v16922_v4  ;;  %v4296_v2 = vld [vmem:[#allocation6 + $0xa38] sm:$0xff]  ;;  %v16881_v4 = vcombine.low %v4300_v45, %v4304_v46 }
 0x453   :  { %v16874_v11 = vcombine.high %v4292_v1, %v4296_v2  ;;  %v4180_v14 = vld [vmem:[#allocation6 + $0x698] sm:$0xff] }
 0x454   :  { %7629 = vmatpush1.bf16.msra.mxu1 %v16689_v7  ;;  %v4184_v15 = vld [vmem:[#allocation6 + $0x6b8] sm:$0xff]  ;;  %v7811_v7 = vld [vmem:[#allocation9 + $0x1c0] sm:$0xff] }
 0x455   :  { %7676 = vmatpush2.bf16.msra.mxu0 %v16921_v60  ;;  %7630 = vmatprep.subr.bf16.mxu1 %v16682_v17  ;;  %v7815_v60 = vld [vmem:[#allocation9 + $0x1e0] sm:$0xff]  ;;  %v16769_v17 = vcombine.low %v4188_v55, %v4192_v62  ;;  %v16762_v23 = vcombine.high %v4180_v14, %v4184_v15  ;;  %v4172_v21 = vld [vmem:[#allocation6 + $0x658] sm:$0xff] }
 0x456   :  { %7677 = vmatprep.subr.bf16.mxu0 %v16914_v30  ;;  %v16873_v30 = vcombine.low %v4292_v1, %v4296_v2  ;;  %v17116_v18 = vcombine.high %v7811_v7, %v7815_v60  ;;  %v17115_v42 = vcombine.low %v7811_v7, %v7815_v60  ;;  %v4164_v31 = vld [vmem:[#allocation6 + $0x618] sm:$0xff]  ;;  %v7779_v55 = vld [vmem:[#allocation9 + $0xc0] sm:$0xff] }
 0x457   :  { %v7783_v62 = vld [vmem:[#allocation9 + $0xe0] sm:$0xff] }
 0x458   :  { %7631 = vmatpush1.bf16.msra.mxu1 %v16681_v53  ;;  %v4176_v53 = vld [vmem:[#allocation6 + $0x678] sm:$0xff]  ;;  %v7775_v7 = vld [vmem:[#allocation9 + $0xa0] sm:$0xff] }
 0x459   :  { %7678 = vmatpush2.bf16.msra.mxu0 %v16913_v28  ;;  %7632 = vmatprep.subr.bf16.mxu1 %v16802_v41  ;;  %v7803_v28 = vld [vmem:[#allocation9 + $0x180] sm:$0xff]  ;;  %v16754_v27 = vcombine.high %v4172_v21, %v4176_v53  ;;  %v16753_v16 = vcombine.low %v4172_v21, %v4176_v53  ;;  %v4392_v53 = vld [vmem:[#allocation6 + $0xd38] sm:$0xff] }
 0x45a   :  { %7679 = vmatprep.subr.bf16.mxu0 %v16906_v25  ;;  %v7807_v41 = vld [vmem:[#allocation9 + $0x1a0] sm:$0xff]  ;;  %v16761_v25 = vcombine.low %v4180_v14, %v4184_v15 }
 0x45b   :  { %v17108_v12 = vcombine.high %v7803_v28, %v7807_v41  ;;  %v17107_v37 = vcombine.low %v7803_v28, %v7807_v41  ;;  %v7771_v15 = vld [vmem:[#allocation9 + $0x80] sm:$0xff] }
 0x45c   :  { %7633 = vmatpush2.bf16.msra.mxu1 %v16801_v8  ;;  %v4168_v8 = vld [vmem:[#allocation6 + $0x638] sm:$0xff]  ;;  %v17076_v21 = vcombine.high %v7771_v15, %v7775_v7  ;;  %v7763_v28 = vld [vmem:[#allocation9 + $0x40] sm:$0xff] }
 0x45d   :  { %7680 = vmatpush2.bf16.msra.mxu0 %v16905_v13  ;;  %7634 = vmatprep.subr.bf16.mxu1 %v16794_v26  ;;  %v18907_v13 = vpack.c.bf16 %v7740_v24, %v7740_v24  ;;  %v7795_v26 = vld [vmem:[#allocation9 + $0x140] sm:$0xff]  ;;  %v16746_v32 = vcombine.high %v4164_v31, %v4168_v8  ;;  %v16745_v45 = vcombine.low %v4164_v31, %v4168_v8  ;;  %v4388_v24 = vld [vmem:[#allocation6 + $0xd18] sm:$0xff] }
 0x45e   :  { %7681 = vmatprep.subr.bf16.mxu0 %v16898_v57  ;;  %v7799_v57 = vld [vmem:[#allocation9 + $0x160] sm:$0xff]  ;;  %v4384_v31 = vld [vmem:[#allocation6 + $0xcf8] sm:$0xff] }
 0x45f   :  { %v7767_v41 = vld [vmem:[#allocation9 + $0x60] sm:$0xff] }
 0x460   :  { %7635 = vmatpush2.bf16.msra.mxu1 %v16793_v35  ;;  %v17100_v35 = vcombine.high %v7795_v26, %v7799_v57  ;;  %v7755_v8 = vld [vmem:[#allocation9] sm:$0xff] }
 0x461   :  { %7682 = vmatpush2.bf16.msra.mxu0 %v16897_v36  ;;  %7636 = vmatprep.subr.bf16.mxu1 %v16786_v29  ;;  %v4412_v36 = vld [vmem:[#allocation6 + $0xdd8] sm:$0xff] }
 0x462   :  { %7683 = vmatprep.subr.bf16.mxu0 %v16890_v43  ;;  %v4416_v29 = vld [vmem:[#allocation6 + $0xdf8] sm:$0xff]  ;;  %v7787_v43 = vld [vmem:[#allocation9 + $0x100] sm:$0xff] }
 0x463   :  { %v16994_v46 = vcombine.high %v4412_v36, %v4416_v29  ;;  %v16993_v1 = vcombine.low %v4412_v36, %v4416_v29  ;;  %v17091_v2 = vcombine.low %v7787_v43, %v7791_v20  ;;  %v4376_v36 = vld [vmem:[#allocation6 + $0xcb8] sm:$0xff]  ;;  %v7875_v29 = vld [vmem:[#allocation9 + $0x3c0] sm:$0xff] }
 0x464   :  { %7637 = vmatpush2.bf16.msra.mxu1 %v16785_v47 }
 0x465   :  { %7684 = vmatpush2.bf16.msra.mxu0 %v16889_v19  ;;  %7638 = vmatprep.subr.bf16.mxu1 %v16778_v49  ;;  %v17092_v19 = vcombine.high %v7787_v43, %v7791_v20  ;;  %v4404_v49 = vld [vmem:[#allocation6 + $0xd98] sm:$0xff]  ;;  %v7879_v43 = vld [vmem:[#allocation9 + $0x3e0] sm:$0xff] }
 0x466   :  { %7685 = vmatprep.subr.bf16.mxu0 %v16882_v51  ;;  %v4408_v51 = vld [vmem:[#allocation6 + $0xdb8] sm:$0xff] }
 0x468   :  { %7639 = vmatpush2.bf16.msra.mxu1 %v16777_v3  ;;  %v16986_v3 = vcombine.high %v4404_v49, %v4408_v51 }
 0x469   :  { %7686 = vmatpush2.bf16.msra.mxu0 %v16881_v4  ;;  %7640 = vmatprep.subr.bf16.mxu1 %v16770_v6  ;;  %v17084_v4 = vcombine.high %v7779_v55, %v7783_v62  ;;  %v4396_v6 = vld [vmem:[#allocation6 + $0xd58] sm:$0xff] }
 0x46a   :  { %7687 = vmatprep.subr.bf16.mxu0 %v16874_v11  ;;  %v4400_v11 = vld [vmem:[#allocation6 + $0xd78] sm:$0xff] }
 0x46c   :  { %7641 = vmatpush2.bf16.msra.mxu1 %v16769_v17  ;;  %v16985_v17 = vcombine.low %v4404_v49, %v4408_v51  ;;  %v7871_v49 = vld [vmem:[#allocation9 + $0x3a0] sm:$0xff] }
 0x46d   :  { %7688 = vmatpush2.bf16.msra.mxu0 %v16873_v30  ;;  %7642 = vmatprep.subr.bf16.mxu1 %v16762_v23  ;;  %v17083_v23 = vcombine.low %v7779_v55, %v7783_v62  ;;  %v17179_v55 = vcombine.low %v7875_v29, %v7879_v43 }
 0x46e   :  { %10869 = vmatprep.subr.bf16.mxu0 %v17116_v18  ;;  %v16978_v18 = vcombine.high %v4396_v6, %v4400_v11 }
 0x470   :  { %v18909_v33 = vpop.f32.mrf.mxu0  ;;  %7643 = vmatpush2.bf16.msra.mxu1 %v16761_v25  ;;  %7690 = vmatmul.mubr.bf16.vlgmr.msra.gmra.mxu0 %v18817_v40  ;;  %v17099_v40 = vcombine.low %v7795_v26, %v7799_v57  ;;  %v7759_v26 = vld [vmem:[#allocation9 + $0x20] sm:$0xff]  ;;  %v16969_v57 = vcombine.low %v4388_v24, %v4392_v53 }
 0x471   :  { %10870 = vmatpush1.bf16.msra.mxu0 %v17115_v42  ;;  %10901 = vmatprep.mubr.bf16.mxu0 %v18907_v13  ;;  %v16970_v42 = vcombine.high %v4388_v24, %v4392_v53 }
 0x472   :  { %v18913_v58 = vpop.f32.mrf.mxu0  ;;  %7644 = vmatprep.subr.bf16.mxu1 %v16754_v27  ;;  %10871 = vmatprep.subr.bf16.mxu0 %v17108_v12  ;;  %v17068_v27 = vcombine.high %v7763_v28, %v7767_v41  ;;  %v4380_v12 = vld [vmem:[#allocation6 + $0xcd8] sm:$0xff] }
 0x473   :  { %v16961_v20 = vcombine.low %v4380_v12, %v4384_v31 }
 0x474   :  { %v7449_v59 = vpop.f32.mrf.mxu0  ;;  %7645 = vmatpush2.bf16.msra.mxu1 %v16753_v16  ;;  %v17067_v16 = vcombine.low %v7763_v28, %v7767_v41  ;;  %v4468_v41 = vld [vmem:[#allocation6 + $0xf98] sm:$0xff] }
 0x475   :  { %10872 = vmatpush1.bf16.msra.mxu0 %v17107_v37  ;;  %7646 = vmatprep.subr.bf16.mxu1 %v16746_v32  ;;  %v16962_v37 = vcombine.high %v4380_v12, %v4384_v31  ;;  %v17060_v32 = vcombine.high %v7755_v8, %v7759_v26  ;;  %v17059_v59 = vcombine.low %v7755_v8, %v7759_v26  ;;  %v4460_v8 = vld [vmem:[#allocation6 + $0xf58] sm:$0xff] }
 0x476   :  { %v7450_v47 = vpop.f32.mrf.mxu0  ;;  %10873 = vmatprep.subr.bf16.mxu0 %v17100_v35  ;;  %v4372_v35 = vld [vmem:[#allocation6 + $0xc98] sm:$0xff] }
 0x477   :  { %v4368_v47 = vld [vmem:[#allocation6 + $0xc78] sm:$0xff]  ;;  %v16953_v51 = vcombine.low %v4372_v35, %v4376_v36 }
 0x478   :  { %7647 = vmatpush2.bf16.msra.mxu1 %v16745_v45  ;;  %v16954_v45 = vcombine.high %v4372_v35, %v4376_v36  ;;  %v4464_v26 = vld [vmem:[#allocation6 + $0xf78] sm:$0xff] }
 0x479   :  { %10874 = vmatpush1.bf16.msra.mxu0 %v17099_v40  ;;  %7698 = vmatprep.subr.bf16.mxu1 %v16994_v46  ;;  %v17180_v40 = vcombine.high %v7875_v29, %v7879_v43  ;;  %v4364_v46 = vld [vmem:[#allocation6 + $0xc58] sm:$0xff]  ;;  %v17042_v35 = vcombine.high %v4460_v8, %v4464_v26 }
 0x47a   :  { %10875 = vmatprep.subr.bf16.mxu0 %v17092_v19  ;;  %v7867_v19 = vld [vmem:[#allocation9 + $0x380] sm:$0xff]  ;;  %v16946_v62 = vcombine.high %v4364_v46, %v4368_v47  ;;  %v4452_v29 = vld [vmem:[#allocation6 + $0xf18] sm:$0xff] }
 0x47b   :  { %v7404_v14 = vpop.f32.mrf.mxu1  ;;  %7649 = vmatmul.mubr.bf16.vlgmr.msra.gmra.mxu1 %v18794_v34  ;;  %v4456_v43 = vld [vmem:[#allocation6 + $0xf38] sm:$0xff] }
 0x47c   :  { %v18917_v60 = vadd.f32 %v7404_v14, %v18902_v63  ;;  %7699 = vmatpush1.bf16.msra.mxu1 %v16993_v1  ;;  %7730 = vmatprep.mubr.bf16.mxu1 %v18843_v56  ;;  %v16977_v63 = vcombine.low %v4396_v6, %v4400_v11  ;;  %v17075_v56 = vcombine.low %v7771_v15, %v7775_v7  ;;  %v7863_v6 = vld [vmem:[#allocation9 + $0x360] sm:$0xff] }
 0x47d   :  { %v18920_v30 = vpop.f32.mrf.mxu1  ;;  %10876 = vmatpush1.bf16.msra.mxu0 %v17091_v2  ;;  %7700 = vmatprep.subr.bf16.mxu1 %v16986_v3  ;;  %v17172_v1 = vcombine.high %v7867_v19, %v7871_v49  ;;  %v4356_v2 = vld [vmem:[#allocation6 + $0xc18] sm:$0xff]  ;;  %v16945_v11 = vcombine.low %v4364_v46, %v4368_v47  ;;  %v17171_v14 = vcombine.low %v7867_v19, %v7871_v49 }
 0x47e   :  { %10877 = vmatprep.subr.bf16.mxu0 %v17084_v4  ;;  %v4360_v3 = vld [vmem:[#allocation6 + $0xc38] sm:$0xff]  ;;  %v7859_v4 = vld [vmem:[#allocation9 + $0x340] sm:$0xff]  ;;  %v17034_v46 = vcombine.high %v4452_v29, %v4456_v43 }
 0x47f   :  { %v7408_v34 = vpop.f32.mrf.mxu1  ;;  %v16938_v15 = vcombine.high %v4356_v2, %v4360_v3  ;;  %v17164_v7 = vcombine.high %v7859_v4, %v7863_v6  ;;  %v16937_v24 = vcombine.low %v4356_v2, %v4360_v3  ;;  %v17163_v53 = vcombine.low %v7859_v4, %v7863_v6  ;;  %v4444_v19 = vld [vmem:[#allocation6 + $0xed8] sm:$0xff] }
 0x480   :  { %7701 = vmatpush1.bf16.msra.mxu1 %v16985_v17  ;;  %v4476_v17 = vld [vmem:[#allocation6 + $0xfd8] sm:$0xff] }
 0x481   :  { %v7409_v25 = vpop.f32.mrf.mxu1  ;;  %10878 = vmatpush1.bf16.msra.mxu0 %v17083_v23  ;;  %7702 = vmatprep.subr.bf16.mxu1 %v16978_v18  ;;  %v4480_v23 = vld [vmem:[#allocation6 + $0xff8] sm:$0xff]  ;;  %v7851_v18 = vld [vmem:[#allocation9 + $0x300] sm:$0xff] }
 0x482   :  { %10879 = vmatprep.subr.bf16.mxu0 %v17076_v21  ;;  %v7855_v21 = vld [vmem:[#allocation9 + $0x320] sm:$0xff]  ;;  %v17058_v34 = vcombine.high %v4476_v17, %v4480_v23  ;;  %v4448_v49 = vld [vmem:[#allocation6 + $0xef8] sm:$0xff] }
 0x483   :  { %v17156_v28 = vcombine.high %v7851_v18, %v7855_v21  ;;  %v7843_v25 = vld [vmem:[#allocation9 + $0x2c0] sm:$0xff]  ;;  %v17026_v2 = vcombine.high %v4444_v19, %v4448_v49  ;;  %v4436_v4 = vld [vmem:[#allocation6 + $0xe98] sm:$0xff] }
 0x484   :  { %7703 = vmatpush1.bf16.msra.mxu1 %v16977_v63  ;;  %v4472_v63 = vld [vmem:[#allocation6 + $0xfb8] sm:$0xff] }
 0x485   :  { %10880 = vmatpush1.bf16.msra.mxu0 %v17075_v56  ;;  %7704 = vmatprep.subr.bf16.mxu1 %v16970_v42  ;;  %v7847_v56 = vld [vmem:[#allocation9 + $0x2e0] sm:$0xff]  ;;  %v17057_v42 = vcombine.low %v4476_v17, %v4480_v23  ;;  %v17050_v12 = vcombine.high %v4468_v41, %v4472_v63  ;;  %v4440_v6 = vld [vmem:[#allocation6 + $0xeb8] sm:$0xff]  ;;  %v7739_v23 = vmax.f32 %v18881_v39, 0.0 }
 0x486   :  { %10881 = vmatprep.subr.bf16.mxu0 %v17068_v27  ;;  %v17155_v27 = vcombine.low %v7851_v18, %v7855_v21  ;;  %v17148_v31 = vcombine.high %v7843_v25, %v7847_v56  ;;  %v17018_v17 = vcombine.high %v4436_v4, %v4440_v6  ;;  %v4428_v18 = vld [vmem:[#allocation6 + $0xe58] sm:$0xff]  ;;  %v8055_v39 = vld [vmem:[#allocation9 + $0x960] sm:$0xff] }
 0x487   :  { %v4432_v21 = vld [vmem:[#allocation6 + $0xe78] sm:$0xff] }
 0x488   :  { %7705 = vmatpush1.bf16.msra.mxu1 %v16969_v57  ;;  %v7835_v57 = vld [vmem:[#allocation9 + $0x280] sm:$0xff] }
 0x489   :  { %10882 = vmatpush1.bf16.msra.mxu0 %v17067_v16  ;;  %7706 = vmatprep.subr.bf16.mxu1 %v16962_v37  ;;  %v7839_v16 = vld [vmem:[#allocation9 + $0x2a0] sm:$0xff]  ;;  %v17049_v37 = vcombine.low %v4468_v41, %v4472_v63  ;;  %v17010_v41 = vcombine.high %v4428_v18, %v4432_v21 }
 0x48a   :  { %10883 = vmatprep.subr.bf16.mxu0 %v17060_v32  ;;  %v17147_v32 = vcombine.low %v7843_v25, %v7847_v56  ;;  %v17140_v36 = vcombine.high %v7835_v57, %v7839_v16  ;;  %v18923_v25 = vpack.c.bf16 %v7739_v23, %v7739_v23  ;;  %v4420_v56 = vld [vmem:[#allocation6 + $0xe18] sm:$0xff]  ;;  %v8031_v23 = vld [vmem:[#allocation9 + $0x8a0] sm:$0xff] }
 0x48c   :  { %7707 = vmatpush1.bf16.msra.mxu1 %v16961_v20  ;;  %v7827_v20 = vld [vmem:[#allocation9 + $0x240] sm:$0xff] }
 0x48d   :  { %10884 = vmatpush1.bf16.msra.mxu0 %v17059_v59  ;;  %7708 = vmatprep.subr.bf16.mxu1 %v16954_v45  ;;  %v7831_v59 = vld [vmem:[#allocation9 + $0x260] sm:$0xff]  ;;  %v17041_v45 = vcombine.low %v4460_v8, %v4464_v26  ;;  %v17009_v8 = vcombine.low %v4428_v18, %v4432_v21 }
 0x48e   :  { %10885 = vmatprep.subr.bf16.mxu0 %v17180_v40  ;;  %v17139_v40 = vcombine.low %v7835_v57, %v7839_v16  ;;  %v17132_v47 = vcombine.high %v7827_v20, %v7831_v59  ;;  %v7407_v16 = vadd.f32 %v18920_v30, %v18904_v50  ;;  %v7931_v50 = vld [vmem:[#allocation9 + $0x580] sm:$0xff] }
 0x48f   :  { %v7935_v30 = vld [vmem:[#allocation9 + $0x5a0] sm:$0xff] }
 0x490   :  { %7709 = vmatpush1.bf16.msra.mxu1 %v16953_v51  ;;  %v7819_v51 = vld [vmem:[#allocation9 + $0x200] sm:$0xff]  ;;  %v17235_v21 = vcombine.low %v7931_v50, %v7935_v30 }
 0x491   :  { %10886 = vmatpush2.bf16.msra.mxu0 %v17179_v55  ;;  %7710 = vmatprep.subr.bf16.mxu1 %v16946_v62  ;;  %v7823_v55 = vld [vmem:[#allocation9 + $0x220] sm:$0xff]  ;;  %v17033_v62 = vcombine.low %v4452_v29, %v4456_v43 }
 0x492   :  { %10887 = vmatprep.subr.bf16.mxu0 %v17172_v1  ;;  %v17131_v1 = vcombine.low %v7827_v20, %v7831_v59  ;;  %v17124_v3 = vcombine.high %v7819_v51, %v7823_v55  ;;  %v8043_v29 = vld [vmem:[#allocation9 + $0x900] sm:$0xff] }
 0x493   :  { %v8047_v43 = vld [vmem:[#allocation9 + $0x920] sm:$0xff] }
 0x494   :  { %7711 = vmatpush1.bf16.msra.mxu1 %v16945_v11  ;;  %v8067_v11 = vld [vmem:[#allocation9 + $0x9c0] sm:$0xff] }
 0x495   :  { %10888 = vmatpush2.bf16.msra.mxu0 %v17171_v14  ;;  %7712 = vmatprep.subr.bf16.mxu1 %v16938_v15  ;;  %v8071_v14 = vld [vmem:[#allocation9 + $0x9e0] sm:$0xff]  ;;  %v17025_v15 = vcombine.low %v4444_v19, %v4448_v49  ;;  %v17348_v49 = vcombine.high %v8043_v29, %v8047_v43 }
 0x496   :  { %10889 = vmatprep.subr.bf16.mxu0 %v17164_v7  ;;  %v17123_v7 = vcombine.low %v7819_v51, %v7823_v55  ;;  %v17371_v63 = vcombine.low %v8067_v11, %v8071_v14  ;;  %v8035_v51 = vld [vmem:[#allocation9 + $0x8c0] sm:$0xff] }
 0x497   :  { %v8039_v55 = vld [vmem:[#allocation9 + $0x8e0] sm:$0xff] }
 0x498   :  { %7713 = vmatpush1.bf16.msra.mxu1 %v16937_v24  ;;  %v17372_v24 = vcombine.high %v8067_v11, %v8071_v14  ;;  %v7923_v11 = vld [vmem:[#allocation9 + $0x540] sm:$0xff] }
 0x499   :  { %10890 = vmatpush2.bf16.msra.mxu0 %v17163_v53  ;;  %7714 = vmatprep.subr.bf16.mxu1 %v17058_v34  ;;  %v8059_v53 = vld [vmem:[#allocation9 + $0x980] sm:$0xff] }
 0x49a   :  { %10891 = vmatprep.subr.bf16.mxu0 %v17156_v28  ;;  %v8063_v34 = vld [vmem:[#allocation9 + $0x9a0] sm:$0xff]  ;;  %v17017_v28 = vcombine.low %v4436_v4, %v4440_v6 }
 0x49b   :  { %v17363_v57 = vcombine.low %v8059_v53, %v8063_v34  ;;  %v7927_v14 = vld [vmem:[#allocation9 + $0x560] sm:$0xff] }
 0x49c   :  { %7715 = vmatpush2.bf16.msra.mxu1 %v17057_v42  ;;  %v4424_v42 = vld [vmem:[#allocation6 + $0xe38] sm:$0xff] }
 0x49d   :  { %10892 = vmatpush2.bf16.msra.mxu0 %v17155_v27  ;;  %7716 = vmatprep.subr.bf16.mxu1 %v17050_v12  ;;  %v17364_v27 = vcombine.high %v8059_v53, %v8063_v34  ;;  %v8051_v12 = vld [vmem:[#allocation9 + $0x940] sm:$0xff]  ;;  %v17002_v26 = vcombine.high %v4420_v56, %v4424_v42  ;;  %v17001_v59 = vcombine.low %v4420_v56, %v4424_v42 }
 0x49e   :  { %10893 = vmatprep.subr.bf16.mxu0 %v17148_v31  ;;  %v17339_v53 = vcombine.low %v8035_v51, %v8039_v55  ;;  %v8023_v42 = vld [vmem:[#allocation9 + $0x860] sm:$0xff] }
 0x4a0   :  { %7717 = vmatpush2.bf16.msra.mxu1 %v17049_v37 }
 0x4a1   :  { %10894 = vmatpush2.bf16.msra.mxu0 %v17147_v32  ;;  %7718 = vmatprep.subr.bf16.mxu1 %v17042_v35  ;;  %v7939_v32 = vld [vmem:[#allocation9 + $0x5c0] sm:$0xff] }
 0x4a2   :  { %10895 = vmatprep.subr.bf16.mxu0 %v17140_v36  ;;  %v7943_v35 = vld [vmem:[#allocation9 + $0x5e0] sm:$0xff]  ;;  %v17356_v36 = vcombine.high %v8051_v12, %v8055_v39 }
 0x4a4   :  { %7719 = vmatpush2.bf16.msra.mxu1 %v17041_v45  ;;  %v17244_v45 = vcombine.high %v7939_v32, %v7943_v35 }
 0x4a5   :  { %10896 = vmatpush2.bf16.msra.mxu0 %v17139_v40  ;;  %7720 = vmatprep.subr.bf16.mxu1 %v17034_v46  ;;  %v17355_v40 = vcombine.low %v8051_v12, %v8055_v39  ;;  %v4502_v46 = vrot.slane %v18891_v44, %v18763_v54 }
 0x4a6   :  { %10897 = vmatprep.subr.bf16.mxu0 %v17132_v47  ;;  %v7742_v47 = vmax.f32 %v7407_v16, 0.0  ;;  %v7911_v16 = vld [vmem:[#allocation9 + $0x4e0] sm:$0xff] }
 0x4a7   :  { %v7446_v4 = vadd.f32 %v18909_v33, %v4502_v46  ;;  %v17228_v33 = vcombine.high %v7923_v11, %v7927_v14 }
 0x4a8   :  { %7721 = vmatpush2.bf16.msra.mxu1 %v17033_v62  ;;  %v4506_v62 = vrot.slane %v18891_v44, %v18785_v9  ;;  %v18935_v6 = vpack.c.bf16 %v7742_v47, %v7742_v47 }
 0x4a9   :  { %10898 = vmatpush2.bf16.msra.mxu0 %v17131_v1  ;;  %7722 = vmatprep.subr.bf16.mxu1 %v17026_v2  ;;  %v17243_v1 = vcombine.low %v7939_v32, %v7943_v35  ;;  %v17236_v2 = vcombine.high %v7931_v50, %v7935_v30  ;;  %v8011_v35 = vld [vmem:[#allocation9 + $0x800] sm:$0xff] }
 0x4aa   :  { %10899 = vmatprep.subr.bf16.mxu0 %v17124_v3  ;;  %v17347_v3 = vcombine.low %v8043_v29, %v8047_v43  ;;  %v7448_v44 = vadd.f32 %v18913_v58, %v4506_v62  ;;  %v8019_v58 = vld [vmem:[#allocation9 + $0x840] sm:$0xff] }
 0x4ab   :  { %v17324_v32 = vcombine.high %v8019_v58, %v8023_v42  ;;  %v17323_v43 = vcombine.low %v8019_v58, %v8023_v42  ;;  %v7891_v50 = vld [vmem:[#allocation9 + $0x440] sm:$0xff] }
 0x4ac   :  { %7723 = vmatpush2.bf16.msra.mxu1 %v17025_v15  ;;  %v17340_v15 = vcombine.high %v8035_v51, %v8039_v55  ;;  %v7895_v30 = vld [vmem:[#allocation9 + $0x460] sm:$0xff] }
 0x4ad   :  { %10900 = vmatpush2.bf16.msra.mxu0 %v17123_v7  ;;  %7724 = vmatprep.subr.bf16.mxu1 %v17018_v17  ;;  %v8027_v17 = vld [vmem:[#allocation9 + $0x880] sm:$0xff] }
 0x4ae   :  { %10951 = vmatprep.subr.bf16.mxu0 %v17372_v24  ;;  %v8123_v51 = vld [vmem:[#allocation9 + $0xb80] sm:$0xff] }
 0x4af   :  { %v8127_v55 = vld [vmem:[#allocation9 + $0xba0] sm:$0xff] }
 0x4b0   :  { %v18925_v31 = vpop.f32.mrf.mxu0  ;;  %7725 = vmatpush2.bf16.msra.mxu1 %v17017_v28  ;;  %10902 = vmatmul.mubr.bf16.vlgmr.msra.gmra.mxu0 %v18923_v25  ;;  %v7915_v28 = vld [vmem:[#allocation9 + $0x500] sm:$0xff] }
 0x4b1   :  { %7726 = vmatprep.subr.bf16.mxu1 %v17010_v41  ;;  %10952 = vmatpush1.bf16.msra.mxu0 %v17371_v63  ;;  %v7919_v41 = vld [vmem:[#allocation9 + $0x520] sm:$0xff]  ;;  %v17332_v63 = vcombine.high %v8027_v17, %v8031_v23 }
 0x4b2   :  { %v7529_v37 = vpop.f32.mrf.mxu0  ;;  %10953 = vmatprep.subr.bf16.mxu0 %v17364_v27  ;;  %v17227_v27 = vcombine.low %v7923_v11, %v7927_v14  ;;  %v17428_v11 = vcombine.high %v8123_v51, %v8127_v55  ;;  %v8115_v14 = vld [vmem:[#allocation9 + $0xb40] sm:$0xff] }
 0x4b3   :  { %v8099_v58 = vld [vmem:[#allocation9 + $0xac0] sm:$0xff] }
 0x4b4   :  { %v7531_v20 = vpop.f32.mrf.mxu0  ;;  %7727 = vmatpush2.bf16.msra.mxu1 %v17009_v8  ;;  %v17220_v8 = vcombine.high %v7915_v28, %v7919_v41  ;;  %v8103_v42 = vld [vmem:[#allocation9 + $0xae0] sm:$0xff] }
 0x4b5   :  { %7728 = vmatprep.subr.bf16.mxu1 %v17002_v26  ;;  %10954 = vmatpush1.bf16.msra.mxu0 %v17363_v57  ;;  %v17331_v26 = vcombine.low %v8027_v17, %v8031_v23  ;;  %v7907_v57 = vld [vmem:[#allocation9 + $0x4c0] sm:$0xff]  ;;  %v17427_v23 = vcombine.low %v8123_v51, %v8127_v55 }
 0x4b6   :  { %v7532_v19 = vpop.f32.mrf.mxu0  ;;  %10955 = vmatprep.subr.bf16.mxu0 %v17356_v36  ;;  %v8015_v36 = vld [vmem:[#allocation9 + $0x820] sm:$0xff]  ;;  %v17212_v29 = vcombine.high %v7907_v57, %v7911_v16  ;;  %v17211_v46 = vcombine.low %v7907_v57, %v7911_v16  ;;  %v17404_v16 = vcombine.high %v8099_v58, %v8103_v42 }
 0x4b7   :  { %v7899_v20 = vld [vmem:[#allocation9 + $0x480] sm:$0xff]  ;;  %v17315_v19 = vcombine.low %v8011_v35, %v8015_v36 }
 0x4b8   :  { %7729 = vmatpush2.bf16.msra.mxu1 %v17001_v59  ;;  %v17316_v59 = vcombine.high %v8011_v35, %v8015_v36  ;;  %v7991_v57 = vld [vmem:[#allocation9 + $0x760] sm:$0xff] }
 0x4b9   :  { %10910 = vmatprep.subr.bf16.mxu1 %v17244_v45  ;;  %10956 = vmatpush1.bf16.msra.mxu0 %v17355_v40  ;;  %v8131_v45 = vld [vmem:[#allocation9 + $0xbc0] sm:$0xff] }
 0x4ba   :  { %10957 = vmatprep.subr.bf16.mxu0 %v17348_v49  ;;  %v8135_v40 = vld [vmem:[#allocation9 + $0xbe0] sm:$0xff] }
 0x4bb   :  { %v7486_v7 = vpop.f32.mrf.mxu1  ;;  %7731 = vmatmul.mubr.bf16.vlgmr.msra.gmra.mxu1 %v18845_v38  ;;  %v17436_v49 = vcombine.high %v8131_v45, %v8135_v40  ;;  %v8095_v35 = vld [vmem:[#allocation9 + $0xaa0] sm:$0xff] }
 0x4bc   :  { %v7487_v18 = vadd.f32 %v7486_v7, %v7446_v4  ;;  %10911 = vmatpush1.bf16.msra.mxu1 %v17243_v1  ;;  %10942 = vmatprep.mubr.bf16.mxu1 %v18935_v6  ;;  %v17196_v1 = vcombine.high %v7891_v50, %v7895_v30  ;;  %v7887_v4 = vld [vmem:[#allocation9 + $0x420] sm:$0xff]  ;;  %v17195_v7 = vcombine.low %v7891_v50, %v7895_v30 }
 0x4bd   :  { %v7488_v24 = vpop.f32.mrf.mxu1  ;;  %10912 = vmatprep.subr.bf16.mxu1 %v17236_v2  ;;  %10958 = vmatpush1.bf16.msra.mxu0 %v17347_v3  ;;  %v17435_v2 = vcombine.low %v8131_v45, %v8135_v40  ;;  %v7883_v3 = vld [vmem:[#allocation9 + $0x400] sm:$0xff] }
 0x4be   :  { %v7489_v34 = vadd.f32 %v7488_v24, %v7448_v44  ;;  %10959 = vmatprep.subr.bf16.mxu0 %v17340_v15  ;;  %v18941_v38 = vadd.f32 %v18925_v31, %v7487_v18  ;;  %v17219_v31 = vcombine.low %v7915_v28, %v7919_v41  ;;  %v8119_v15 = vld [vmem:[#allocation9 + $0xb60] sm:$0xff]  ;;  %v17188_v17 = vcombine.high %v7883_v3, %v7887_v4 }
 0x4bf   :  { %v7490_v56 = vpop.f32.mrf.mxu1  ;;  %v8003_v44 = vld [vmem:[#allocation9 + $0x7c0] sm:$0xff]  ;;  %v17419_v28 = vcombine.low %v8115_v14, %v8119_v15 }
 0x4c0   :  { %10913 = vmatpush1.bf16.msra.mxu1 %v17235_v21  ;;  %v18943_v12 = vadd.f32 %v7529_v37, %v7489_v34  ;;  %v7903_v37 = vld [vmem:[#allocation9 + $0x4a0] sm:$0xff]  ;;  %v17420_v21 = vcombine.high %v8115_v14, %v8119_v15  ;;  %v18947_v14 = vld [vmem:[#allocation9 + $0x1e8] sm:$0xff] }
 0x4c1   :  { %v7491_v39 = vpop.f32.mrf.mxu1  ;;  %10914 = vmatprep.subr.bf16.mxu1 %v17228_v33  ;;  %10960 = vmatpush1.bf16.msra.mxu0 %v17339_v53  ;;  %v17204_v47 = vcombine.high %v7899_v20, %v7903_v37  ;;  %v17203_v62 = vcombine.low %v7899_v20, %v7903_v37  ;;  %v8007_v18 = vld [vmem:[#allocation9 + $0x7e0] sm:$0xff]  ;;  %v17187_v53 = vcombine.low %v7883_v3, %v7887_v4 }
 0x4c2   :  { %10961 = vmatprep.subr.bf16.mxu0 %v17332_v63  ;;  %v8107_v24 = vld [vmem:[#allocation9 + $0xb00] sm:$0xff]  ;;  %v17308_v34 = vcombine.high %v8003_v44, %v8007_v18 }
 0x4c3   :  { %v8111_v33 = vld [vmem:[#allocation9 + $0xb20] sm:$0xff] }
 0x4c4   :  { %10915 = vmatpush1.bf16.msra.mxu1 %v17227_v27  ;;  %v7995_v41 = vld [vmem:[#allocation9 + $0x780] sm:$0xff]  ;;  %v17412_v56 = vcombine.high %v8107_v24, %v8111_v33  ;;  %v17307_v27 = vcombine.low %v8003_v44, %v8007_v18 }
 0x4c5   :  { %10916 = vmatprep.subr.bf16.mxu1 %v17220_v8  ;;  %10962 = vmatpush1.bf16.msra.mxu0 %v17331_v26  ;;  %v7999_v63 = vld [vmem:[#allocation9 + $0x7a0] sm:$0xff]  ;;  %v17411_v8 = vcombine.low %v8107_v24, %v8111_v33 }
 0x4c6   :  { %10963 = vmatprep.subr.bf16.mxu0 %v17324_v32  ;;  %v17300_v39 = vcombine.high %v7995_v41, %v7999_v63  ;;  %v7987_v26 = vld [vmem:[#allocation9 + $0x740] sm:$0xff]  ;;  %v17299_v36 = vcombine.low %v7995_v41, %v7999_v63 }
 0x4c7   :  { %v8091_v32 = vld [vmem:[#allocation9 + $0xa80] sm:$0xff]  ;;  %v17291_v40 = vcombine.low %v7987_v26, %v7991_v57 }
 0x4c8   :  { %10917 = vmatpush1.bf16.msra.mxu1 %v17219_v31  ;;  %v17292_v31 = vcombine.high %v7987_v26, %v7991_v57  ;;  %v7983_v20 = vld [vmem:[#allocation9 + $0x720] sm:$0xff]  ;;  %v17396_v37 = vcombine.high %v8091_v32, %v8095_v35 }
 0x4c9   :  { %10918 = vmatprep.subr.bf16.mxu1 %v17212_v29  ;;  %10964 = vmatpush1.bf16.msra.mxu0 %v17323_v43  ;;  %v17403_v29 = vcombine.low %v8099_v58, %v8103_v42  ;;  %v7979_v43 = vld [vmem:[#allocation9 + $0x700] sm:$0xff] }
 0x4ca   :  { %10965 = vmatprep.subr.bf16.mxu0 %v17316_v59  ;;  %v8083_v59 = vld [vmem:[#allocation9 + $0xa40] sm:$0xff]  ;;  %v17283_v55 = vcombine.low %v7979_v43, %v7983_v20 }
 0x4cb   :  { %v8087_v45 = vld [vmem:[#allocation9 + $0xa60] sm:$0xff] }
 0x4cc   :  { %10919 = vmatpush1.bf16.msra.mxu1 %v17211_v46  ;;  %v17284_v46 = vcombine.high %v7979_v43, %v7983_v20  ;;  %v7975_v50 = vld [vmem:[#allocation9 + $0x6e0] sm:$0xff]  ;;  %v17388_v30 = vcombine.high %v8083_v59, %v8087_v45 }
 0x4cd   :  { %10920 = vmatprep.subr.bf16.mxu1 %v17204_v47  ;;  %10966 = vmatpush1.bf16.msra.mxu0 %v17315_v19  ;;  %v17395_v47 = vcombine.low %v8091_v32, %v8095_v35  ;;  %v7971_v19 = vld [vmem:[#allocation9 + $0x6c0] sm:$0xff] }
 0x4ce   :  { %10967 = vmatprep.subr.bf16.mxu0 %v17436_v49  ;;  %v8075_v49 = vld [vmem:[#allocation9 + $0xa00] sm:$0xff]  ;;  %v17275_v15 = vcombine.low %v7971_v19, %v7975_v50 }
 0x4cf   :  { %v8079_v51 = vld [vmem:[#allocation9 + $0xa20] sm:$0xff] }
 0x4d0   :  { %10921 = vmatpush1.bf16.msra.mxu1 %v17203_v62  ;;  %v17276_v62 = vcombine.high %v7971_v19, %v7975_v50  ;;  %v7967_v3 = vld [vmem:[#allocation9 + $0x6a0] sm:$0xff]  ;;  %v17380_v4 = vcombine.high %v8075_v49, %v8079_v51 }
 0x4d1   :  { %10922 = vmatprep.subr.bf16.mxu1 %v17196_v1  ;;  %10968 = vmatpush2.bf16.msra.mxu0 %v17435_v2  ;;  %v17387_v1 = vcombine.low %v8083_v59, %v8087_v45  ;;  %v7963_v2 = vld [vmem:[#allocation9 + $0x680] sm:$0xff] }
 0x4d2   :  { %10969 = vmatprep.subr.bf16.mxu0 %v17428_v11  ;;  %v18945_v11 = vld [vmem:[#allocation9 + $0x1c8] sm:$0xff]  ;;  %v7959_v44 = vld [vmem:[#allocation9 + $0x660] sm:$0xff] }
 0x4d3   :  { %v17118_v18 = vcombine.high %v18945_v11, %v18947_v14  ;;  %v7947_v33 = vld [vmem:[#allocation9 + $0x600] sm:$0xff] }
 0x4d4   :  { %10923 = vmatpush1.bf16.msra.mxu1 %v17195_v7  ;;  %v17268_v7 = vcombine.high %v7963_v2, %v7967_v3  ;;  %v8199_v58 = vld [vmem:[#allocation9 + $0xde0] sm:$0xff] }
 0x4d5   :  { %10924 = vmatprep.subr.bf16.mxu1 %v17188_v17  ;;  %10970 = vmatpush2.bf16.msra.mxu0 %v17427_v23  ;;  %v17379_v17 = vcombine.low %v8075_v49, %v8079_v51  ;;  %v7955_v23 = vld [vmem:[#allocation9 + $0x640] sm:$0xff]  ;;  %v7808_v49 = vld [vmem:[#allocation9 + $0x1a8] sm:$0xff] }
 0x4d6   :  { %10971 = vmatprep.subr.bf16.mxu0 %v17420_v21  ;;  %v17267_v21 = vcombine.low %v7963_v2, %v7967_v3  ;;  %v17260_v24 = vcombine.high %v7955_v23, %v7959_v44  ;;  %v8187_v57 = vld [vmem:[#allocation9 + $0xd80] sm:$0xff]  ;;  %v17117_v2 = vcombine.low %v18945_v11, %v18947_v14 }
 0x4d7   :  { %v8167_v3 = vld [vmem:[#allocation9 + $0xce0] sm:$0xff] }
 0x4d8   :  { %10925 = vmatpush1.bf16.msra.mxu1 %v17187_v53  ;;  %v7951_v53 = vld [vmem:[#allocation9 + $0x620] sm:$0xff] }
 0x4d9   :  { %10926 = vmatprep.subr.bf16.mxu1 %v17308_v34  ;;  %10972 = vmatpush2.bf16.msra.mxu0 %v17419_v28  ;;  %v17259_v28 = vcombine.low %v7955_v23, %v7959_v44  ;;  %v17252_v41 = vcombine.high %v7947_v33, %v7951_v53  ;;  %v7800_v23 = vld [vmem:[#allocation9 + $0x168] sm:$0xff] }
 0x4da   :  { %10973 = vmatprep.subr.bf16.mxu0 %v17412_v56  ;;  %v8195_v56 = vld [vmem:[#allocation9 + $0xdc0] sm:$0xff] }
 0x4db   :  { %v17499_v32 = vcombine.low %v8195_v56, %v8199_v58 }
 0x4dc   :  { %10927 = vmatpush2.bf16.msra.mxu1 %v17307_v27  ;;  %v17251_v27 = vcombine.low %v7947_v33, %v7951_v53  ;;  %v7788_v53 = vld [vmem:[#allocation9 + $0x108] sm:$0xff] }
 0x4dd   :  { %10928 = vmatprep.subr.bf16.mxu1 %v17300_v39  ;;  %10974 = vmatpush2.bf16.msra.mxu0 %v17411_v8  ;;  %v7741_v39 = vmax.f32 %v18917_v60, 0.0  ;;  %v17500_v8 = vcombine.high %v8195_v56, %v8199_v58 }
 0x4de   :  { %10975 = vmatprep.subr.bf16.mxu0 %v17404_v16  ;;  %v8191_v16 = vld [vmem:[#allocation9 + $0xda0] sm:$0xff] }
 0x4df   :  { %v18956_v35 = vpack.c.bf16 %v7741_v39, %v7741_v39  ;;  %v17491_v60 = vcombine.low %v8187_v57, %v8191_v16 }
 0x4e0   :  { %10929 = vmatpush2.bf16.msra.mxu1 %v17299_v36  ;;  %v17492_v36 = vcombine.high %v8187_v57, %v8191_v16 }
 0x4e1   :  { %10930 = vmatprep.subr.bf16.mxu1 %v17292_v31  ;;  %10976 = vmatpush2.bf16.msra.mxu0 %v17403_v29  ;;  %v8179_v31 = vld [vmem:[#allocation9 + $0xd40] sm:$0xff] }
 0x4e2   :  { %10977 = vmatprep.subr.bf16.mxu0 %v17396_v37  ;;  %v8183_v29 = vld [vmem:[#allocation9 + $0xd60] sm:$0xff] }
 0x4e3   :  { %v17484_v59 = vcombine.high %v8179_v31, %v8183_v29  ;;  %v17483_v51 = vcombine.low %v8179_v31, %v8183_v29  ;;  %v8143_v31 = vld [vmem:[#allocation9 + $0xc20] sm:$0xff] }
 0x4e4   :  { %10931 = vmatpush2.bf16.msra.mxu1 %v17291_v40  ;;  %v8171_v40 = vld [vmem:[#allocation9 + $0xd00] sm:$0xff] }
 0x4e5   :  { %10932 = vmatprep.subr.bf16.mxu1 %v17284_v46  ;;  %10978 = vmatpush2.bf16.msra.mxu0 %v17395_v47  ;;  %v8175_v46 = vld [vmem:[#allocation9 + $0xd20] sm:$0xff] }
 0x4e6   :  { %10979 = vmatprep.subr.bf16.mxu0 %v17388_v30  ;;  %v7804_v30 = vld [vmem:[#allocation9 + $0x188] sm:$0xff]  ;;  %v17475_v44 = vcombine.low %v8171_v40, %v8175_v46 }
 0x4e7   :  { %v17109_v14 = vcombine.low %v7804_v30, %v7808_v49 }
 0x4e8   :  { %10933 = vmatpush2.bf16.msra.mxu1 %v17283_v55 }
 0x4e9   :  { %10934 = vmatprep.subr.bf16.mxu1 %v17276_v62  ;;  %10980 = vmatpush2.bf16.msra.mxu0 %v17387_v1  ;;  %v17476_v62 = vcombine.high %v8171_v40, %v8175_v46  ;;  %v8263_v40 = vld [vmem:[#allocation9 + $0xfe0] sm:$0xff] }
 0x4ea   :  { %10981 = vmatprep.subr.bf16.mxu0 %v17380_v4  ;;  %v18967_v4 = vld [vmem:[#allocation9 + $0x5e8] sm:$0xff] }
 0x4ec   :  { %10935 = vmatpush2.bf16.msra.mxu1 %v17275_v15 }
 0x4ed   :  { %10936 = vmatprep.subr.bf16.mxu1 %v17268_v7  ;;  %10982 = vmatpush2.bf16.msra.mxu0 %v17379_v17  ;;  %v17110_v7 = vcombine.high %v7804_v30, %v7808_v49  ;;  %v7796_v17 = vld [vmem:[#allocation9 + $0x148] sm:$0xff] }
 0x4ee   :  { %11033 = vmatprep.subr.bf16.mxu0 %v17118_v18  ;;  %v17102_v33 = vcombine.high %v7796_v17, %v7800_v23  ;;  %v17101_v58 = vcombine.low %v7796_v17, %v7800_v23  ;;  %v8243_v23 = vld [vmem:[#allocation9 + $0xf40] sm:$0xff] }
 0x4f0   :  { %v18951_v34 = vpop.f32.mrf.mxu0  ;;  %10937 = vmatpush2.bf16.msra.mxu1 %v17267_v21  ;;  %v8155_v21 = vld [vmem:[#allocation9 + $0xc80] sm:$0xff] }
 0x4f1   :  { %10938 = vmatprep.subr.bf16.mxu1 %v17260_v24  ;;  %v8159_v24 = vld [vmem:[#allocation9 + $0xca0] sm:$0xff] }
 0x4f2   :  { %v18953_v63 = vpop.f32.mrf.mxu0  ;;  %v17460_v56 = vcombine.high %v8155_v21, %v8159_v24  ;;  %v17459_v57 = vcombine.low %v8155_v21, %v8159_v24  ;;  %v7880_v21 = vld [vmem:[#allocation9 + $0x3e8] sm:$0xff] }
 0x4f4   :  { %v7613_v42 = vpop.f32.mrf.mxu0  ;;  %10939 = vmatpush2.bf16.msra.mxu1 %v17259_v28  ;;  %v7792_v28 = vld [vmem:[#allocation9 + $0x128] sm:$0xff] }
 0x4f5   :  { %10940 = vmatprep.subr.bf16.mxu1 %v17252_v41  ;;  %v8147_v42 = vld [vmem:[#allocation9 + $0xc40] sm:$0xff]  ;;  %v17094_v39 = vcombine.high %v7788_v53, %v7792_v28 }
 0x4f6   :  { %v7614_v26 = vpop.f32.mrf.mxu0 }
 0x4f7   :  { %v7784_v26 = vld [vmem:[#allocation9 + $0xe8] sm:$0xff] }
 0x4f8   :  { %10941 = vmatpush2.bf16.msra.mxu1 %v17251_v27  ;;  %v8151_v27 = vld [vmem:[#allocation9 + $0xc60] sm:$0xff] }
 0x4f9   :  { %10992 = vmatprep.subr.bf16.mxu1 %v17500_v8  ;;  %v7780_v8 = vld [vmem:[#allocation9 + $0xc8] sm:$0xff]  ;;  %v17452_v16 = vcombine.high %v8147_v42, %v8151_v27 }
 0x4fa   :  { %v17086_v29 = vcombine.high %v7780_v8, %v7784_v26 }
 0x4fb   :  { %v7568_v43 = vpop.f32.mrf.mxu1  ;;  %10943 = vmatmul.mubr.bf16.vlgmr.msra.gmra.mxu1 %v18956_v35 }
 0x4fc   :  { %v7569_v20 = vadd.f32 %v7568_v43, %v18941_v38  ;;  %10993 = vmatpush1.bf16.msra.mxu1 %v17499_v32  ;;  %v8163_v38 = vld [vmem:[#allocation9 + $0xcc0] sm:$0xff]  ;;  %v17093_v32 = vcombine.low %v7788_v53, %v7792_v28  ;;  %v7772_v43 = vld [vmem:[#allocation9 + $0x88] sm:$0xff] }
 0x4fd   :  { %v7570_v37 = vpop.f32.mrf.mxu1  ;;  %10994 = vmatprep.subr.bf16.mxu1 %v17492_v36  ;;  %v17468_v11 = vcombine.high %v8163_v38, %v8167_v3  ;;  %v17467_v41 = vcombine.low %v8163_v38, %v8167_v3  ;;  %v8139_v36 = vld [vmem:[#allocation9 + $0xc00] sm:$0xff]  ;;  %v7756_v38 = vld [vmem:[#allocation9 + $0x8] sm:$0xff] }
 0x4fe   :  { %v7571_v45 = vadd.f32 %v7570_v37, %v18943_v12  ;;  %v7743_v47 = vmax.f32 %v7569_v20, 0.0  ;;  %v18965_v12 = vld [vmem:[#allocation9 + $0x5c8] sm:$0xff]  ;;  %v17444_v37 = vcombine.high %v8139_v36, %v8143_v31  ;;  %v8235_v28 = vld [vmem:[#allocation9 + $0xf00] sm:$0xff] }
 0x4ff   :  { %v7572_v19 = vpop.f32.mrf.mxu1  ;;  %v17245_v18 = vcombine.low %v18965_v12, %v18967_v4  ;;  %v7776_v20 = vld [vmem:[#allocation9 + $0xa8] sm:$0xff] }
 0x500   :  { %v7744_v50 = vmax.f32 %v7571_v45, 0.0  ;;  %10995 = vmatpush1.bf16.msra.mxu1 %v17491_v60  ;;  %v18969_v15 = vpack.c.bf16 %v7743_v47, %v7743_v47  ;;  %v17451_v60 = vcombine.low %v8147_v42, %v8151_v27  ;;  %v8259_v45 = vld [vmem:[#allocation9 + $0xfc0] sm:$0xff]  ;;  %v17078_v46 = vcombine.high %v7772_v43, %v7776_v20  ;;  %v7764_v47 = vld [vmem:[#allocation9 + $0x48] sm:$0xff] }
 0x501   :  { %v7573_v55 = vpop.f32.mrf.mxu1  ;;  %10996 = vmatprep.subr.bf16.mxu1 %v17484_v59  ;;  %v17085_v59 = vcombine.low %v7780_v8, %v7784_v26  ;;  %v7768_v19 = vld [vmem:[#allocation9 + $0x68] sm:$0xff]  ;;  %v17564_v30 = vcombine.high %v8259_v45, %v8263_v40  ;;  %v17077_v49 = vcombine.low %v7772_v43, %v7776_v20  ;;  %v17563_v3 = vcombine.low %v8259_v45, %v8263_v40  ;;  %v8227_v26 = vld [vmem:[#allocation9 + $0xec0] sm:$0xff] }
 0x502   :  { %v18961_v1 = vpack.c.bf16 %v7744_v50, %v7744_v50  ;;  %v17443_v50 = vcombine.low %v8139_v36, %v8143_v31  ;;  %v8255_v55 = vld [vmem:[#allocation9 + $0xfa0] sm:$0xff]  ;;  %v17069_v17 = vcombine.low %v7764_v47, %v7768_v19  ;;  %v7872_v42 = vld [vmem:[#allocation9 + $0x3a8] sm:$0xff] }
 0x503   :  { %v7864_v36 = vld [vmem:[#allocation9 + $0x368] sm:$0xff]  ;;  %v8219_v20 = vld [vmem:[#allocation9 + $0xe80] sm:$0xff] }
 0x504   :  { %10983 = vmatprep.mubr.bf16.mxu0 %v18961_v1  ;;  %10997 = vmatpush1.bf16.msra.mxu1 %v17483_v51  ;;  %v8251_v51 = vld [vmem:[#allocation9 + $0xf80] sm:$0xff]  ;;  %v7856_v45 = vld [vmem:[#allocation9 + $0x328] sm:$0xff] }
 0x505   :  { %10984 = vmatmul.mubr.bf16.vlgmr.msra.gmra.mxu0 %v18969_v15  ;;  %10998 = vmatprep.subr.bf16.mxu1 %v17476_v62  ;;  %v17070_v62 = vcombine.high %v7764_v47, %v7768_v19  ;;  %v17555_v24 = vcombine.low %v8251_v51, %v8255_v55  ;;  %v8211_v19 = vld [vmem:[#allocation9 + $0xe40] sm:$0xff] }
 0x506   :  { %11034 = vmatpush1.bf16.msra.mxu0 %v17117_v2  ;;  %11065 = vmatprep.mubr.bf16.mxu0 %v18907_v13  ;;  %v7760_v2 = vld [vmem:[#allocation9 + $0x28] sm:$0xff] }
 0x507   :  { %11035 = vmatprep.subr.bf16.mxu0 %v17110_v7  ;;  %v17556_v7 = vcombine.high %v8251_v51, %v8255_v55  ;;  %v17061_v53 = vcombine.low %v7756_v38, %v7760_v2  ;;  %v7848_v51 = vld [vmem:[#allocation9 + $0x2e8] sm:$0xff] }
 0x508   :  { %10999 = vmatpush1.bf16.msra.mxu1 %v17475_v44  ;;  %v8247_v44 = vld [vmem:[#allocation9 + $0xf60] sm:$0xff] }
 0x509   :  { %11000 = vmatprep.subr.bf16.mxu1 %v17468_v11  ;;  %v17062_v11 = vcombine.high %v7756_v38, %v7760_v2  ;;  %v17547_v27 = vcombine.low %v8243_v23, %v8247_v44  ;;  %v8203_v2 = vld [vmem:[#allocation9 + $0xe00] sm:$0xff] }
 0x50a   :  { %11036 = vmatpush1.bf16.msra.mxu0 %v17109_v14  ;;  %v7876_v14 = vld [vmem:[#allocation9 + $0x3c8] sm:$0xff] }
 0x50b   :  { %11037 = vmatprep.subr.bf16.mxu0 %v17102_v33  ;;  %v17548_v33 = vcombine.high %v8243_v23, %v8247_v44  ;;  %v17181_v8 = vcombine.low %v7876_v14, %v7880_v21  ;;  %v7836_v23 = vld [vmem:[#allocation9 + $0x288] sm:$0xff] }
 0x50c   :  { %11001 = vmatpush1.bf16.msra.mxu1 %v17467_v41  ;;  %v8239_v41 = vld [vmem:[#allocation9 + $0xf20] sm:$0xff]  ;;  %v7840_v44 = vld [vmem:[#allocation9 + $0x2a8] sm:$0xff] }
 0x50d   :  { %11002 = vmatprep.subr.bf16.mxu1 %v17460_v56  ;;  %v17182_v56 = vcombine.high %v7876_v14, %v7880_v21  ;;  %v17539_v31 = vcombine.low %v8235_v28, %v8239_v41 }
 0x50e   :  { %11038 = vmatpush1.bf16.msra.mxu0 %v17101_v58  ;;  %v7868_v58 = vld [vmem:[#allocation9 + $0x388] sm:$0xff] }
 0x50f   :  { %11039 = vmatprep.subr.bf16.mxu0 %v17094_v39  ;;  %v17540_v39 = vcombine.high %v8235_v28, %v8239_v41  ;;  %v17173_v43 = vcombine.low %v7868_v58, %v7872_v42  ;;  %v7828_v28 = vld [vmem:[#allocation9 + $0x248] sm:$0xff] }
 0x510   :  { %11003 = vmatpush1.bf16.msra.mxu1 %v17459_v57  ;;  %v8231_v57 = vld [vmem:[#allocation9 + $0xee0] sm:$0xff]  ;;  %v7832_v41 = vld [vmem:[#allocation9 + $0x268] sm:$0xff] }
 0x511   :  { %11004 = vmatprep.subr.bf16.mxu1 %v17452_v16  ;;  %v17174_v16 = vcombine.high %v7868_v58, %v7872_v42  ;;  %v17531_v40 = vcombine.low %v8227_v26, %v8231_v57  ;;  %v17246_v58 = vcombine.high %v18965_v12, %v18967_v4  ;;  %v18327_v42 = vld [vmem:[#allocation7] sm:$0xff] }
 0x512   :  { %11040 = vmatpush1.bf16.msra.mxu0 %v17093_v32  ;;  %v7860_v32 = vld [vmem:[#allocation9 + $0x348] sm:$0xff] }
 0x513   :  { %11041 = vmatprep.subr.bf16.mxu0 %v17086_v29  ;;  %v17532_v29 = vcombine.high %v8227_v26, %v8231_v57  ;;  %v17165_v47 = vcombine.low %v7860_v32, %v7864_v36  ;;  %v17134_v26 = vcombine.high %v7828_v28, %v7832_v41  ;;  %v4514_v57 = vrot.slane %v18327_v42, %v18833_v0 }
 0x514   :  { %11005 = vmatpush1.bf16.msra.mxu1 %v17451_v60  ;;  %v8223_v60 = vld [vmem:[#allocation9 + $0xea0] sm:$0xff] }
 0x515   :  { %11006 = vmatprep.subr.bf16.mxu1 %v17444_v37  ;;  %v17166_v37 = vcombine.high %v7860_v32, %v7864_v36  ;;  %v17523_v55 = vcombine.low %v8219_v20, %v8223_v60  ;;  %v7824_v32 = vld [vmem:[#allocation9 + $0x228] sm:$0xff] }
 0x516   :  { %11042 = vmatpush1.bf16.msra.mxu0 %v17085_v59  ;;  %v7852_v59 = vld [vmem:[#allocation9 + $0x308] sm:$0xff] }
 0x517   :  { %11043 = vmatprep.subr.bf16.mxu0 %v17078_v46  ;;  %v17524_v46 = vcombine.high %v8219_v20, %v8223_v60  ;;  %v17157_v38 = vcombine.low %v7852_v59, %v7856_v45  ;;  %v7612_v20 = vadd.f32 %v18953_v63, %v4514_v57 }
 0x518   :  { %11007 = vmatpush1.bf16.msra.mxu1 %v17443_v50  ;;  %v8215_v50 = vld [vmem:[#allocation9 + $0xe60] sm:$0xff] }
 0x519   :  { %11008 = vmatprep.subr.bf16.mxu1 %v17564_v30  ;;  %v17158_v30 = vcombine.high %v7852_v59, %v7856_v45  ;;  %v8072_v59 = vld [vmem:[#allocation9 + $0x9e8] sm:$0xff] }
 0x51a   :  { %11044 = vmatpush1.bf16.msra.mxu0 %v17077_v49  ;;  %v7844_v49 = vld [vmem:[#allocation9 + $0x2c8] sm:$0xff] }
 0x51b   :  { %11045 = vmatprep.subr.bf16.mxu0 %v17070_v62  ;;  %v17516_v62 = vcombine.high %v8211_v19, %v8215_v50 }
 0x51c   :  { %11009 = vmatpush2.bf16.msra.mxu1 %v17563_v3  ;;  %v8207_v3 = vld [vmem:[#allocation9 + $0xe20] sm:$0xff] }
 0x51d   :  { %11010 = vmatprep.subr.bf16.mxu1 %v17556_v7  ;;  %v17150_v7 = vcombine.high %v7844_v49, %v7848_v51  ;;  %v17508_v14 = vcombine.high %v8203_v2, %v8207_v3 }
 0x51e   :  { %11046 = vmatpush1.bf16.msra.mxu0 %v17069_v17 }
 0x51f   :  { %11047 = vmatprep.subr.bf16.mxu0 %v17062_v11  ;;  %v17515_v11 = vcombine.low %v8211_v19, %v8215_v50 }
 0x520   :  { %11011 = vmatpush2.bf16.msra.mxu1 %v17555_v24  ;;  %v17149_v24 = vcombine.low %v7844_v49, %v7848_v51 }
 0x521   :  { %11012 = vmatprep.subr.bf16.mxu1 %v17548_v33  ;;  %v17142_v33 = vcombine.high %v7836_v23, %v7840_v44 }
 0x522   :  { %11048 = vmatpush1.bf16.msra.mxu0 %v17061_v53 }
 0x523   :  { %11049 = vmatprep.subr.bf16.mxu0 %v17182_v56  ;;  %v17507_v56 = vcombine.low %v8203_v2, %v8207_v3 }
 0x524   :  { %11013 = vmatpush2.bf16.msra.mxu1 %v17547_v27  ;;  %v4510_v27 = vrot.slane %v18327_v42, %v18830_v61 }
 0x525   :  { %11014 = vmatprep.subr.bf16.mxu1 %v17540_v39 }
 0x526   :  { %11050 = vmatpush2.bf16.msra.mxu0 %v17181_v8  ;;  %v17141_v8 = vcombine.low %v7836_v23, %v7840_v44  ;;  %v7610_v36 = vadd.f32 %v18951_v34, %v4510_v27  ;;  %v8060_v34 = vld [vmem:[#allocation9 + $0x988] sm:$0xff] }
 0x527   :  { %11051 = vmatprep.subr.bf16.mxu0 %v17174_v16  ;;  %v7820_v16 = vld [vmem:[#allocation9 + $0x208] sm:$0xff] }
 0x528   :  { %11015 = vmatpush2.bf16.msra.mxu1 %v17539_v31  ;;  %v17133_v31 = vcombine.low %v7828_v28, %v7832_v41 }
 0x529   :  { %11016 = vmatprep.subr.bf16.mxu1 %v17532_v29 }
 0x52a   :  { %11052 = vmatpush2.bf16.msra.mxu0 %v17173_v43  ;;  %v17126_v43 = vcombine.high %v7820_v16, %v7824_v32 }
 0x52b   :  { %11053 = vmatprep.subr.bf16.mxu0 %v17166_v37  ;;  %v8068_v37 = vld [vmem:[#allocation9 + $0x9c8] sm:$0xff] }
 0x52c   :  { %11017 = vmatpush2.bf16.msra.mxu1 %v17531_v40  ;;  %v17374_v50 = vcombine.high %v8068_v37, %v8072_v59 }
 0x52d   :  { %11018 = vmatprep.subr.bf16.mxu1 %v17524_v46  ;;  %v17125_v46 = vcombine.low %v7820_v16, %v7824_v32  ;;  %v8132_v16 = vld [vmem:[#allocation9 + $0xbc8] sm:$0xff] }
 0x52e   :  { %11054 = vmatpush2.bf16.msra.mxu0 %v17165_v47  ;;  %v8136_v32 = vld [vmem:[#allocation9 + $0xbe8] sm:$0xff] }
 0x52f   :  { %11055 = vmatprep.subr.bf16.mxu0 %v17158_v30  ;;  %v8064_v30 = vld [vmem:[#allocation9 + $0x9a8] sm:$0xff] }
 0x530   :  { %v7691_v17 = vpop.f32.mrf.mxu0  ;;  %11019 = vmatpush2.bf16.msra.mxu1 %v17523_v55  ;;  %v17373_v55 = vcombine.low %v8068_v37, %v8072_v59  ;;  %v17366_v63 = vcombine.high %v8060_v34, %v8064_v30  ;;  %v17365_v2 = vcombine.low %v8060_v34, %v8064_v30  ;;  %v8116_v37 = vld [vmem:[#allocation9 + $0xb48] sm:$0xff] }
 0x531   :  { %11020 = vmatprep.subr.bf16.mxu1 %v17516_v62  ;;  %v8052_v62 = vld [vmem:[#allocation9 + $0x948] sm:$0xff] }
 0x532   :  { %11056 = vmatpush2.bf16.msra.mxu0 %v17157_v38  ;;  %v7693_v21 = vpop.f32.mrf.mxu0  ;;  %v8056_v38 = vld [vmem:[#allocation9 + $0x968] sm:$0xff] }
 0x533   :  { %11057 = vmatprep.subr.bf16.mxu0 %v17150_v7  ;;  %v17358_v3 = vcombine.high %v8052_v62, %v8056_v38  ;;  %v8044_v7 = vld [vmem:[#allocation9 + $0x908] sm:$0xff]  ;;  %v17357_v23 = vcombine.low %v8052_v62, %v8056_v38 }
 0x534   :  { %v7695_v53 = vpop.f32.mrf.mxu0  ;;  %11021 = vmatpush2.bf16.msra.mxu1 %v17515_v11  ;;  %v8036_v11 = vld [vmem:[#allocation9 + $0x8c8] sm:$0xff] }
 0x535   :  { %11022 = vmatprep.subr.bf16.mxu1 %v17508_v14  ;;  %v8040_v14 = vld [vmem:[#allocation9 + $0x8e8] sm:$0xff] }
 0x536   :  { %11058 = vmatpush2.bf16.msra.mxu0 %v17149_v24  ;;  %v7696_v39 = vpop.f32.mrf.mxu0  ;;  %v17342_v24 = vcombine.high %v8036_v11, %v8040_v14  ;;  %v8032_v53 = vld [vmem:[#allocation9 + $0x8a8] sm:$0xff]  ;;  %v17341_v28 = vcombine.low %v8036_v11, %v8040_v14 }
 0x537   :  { %11059 = vmatprep.subr.bf16.mxu0 %v17142_v33  ;;  %v8028_v33 = vld [vmem:[#allocation9 + $0x888] sm:$0xff] }
 0x538   :  { %11023 = vmatpush2.bf16.msra.mxu1 %v17507_v56  ;;  %v17334_v41 = vcombine.high %v8028_v33, %v8032_v53  ;;  %v8020_v56 = vld [vmem:[#allocation9 + $0x848] sm:$0xff]  ;;  %v17333_v42 = vcombine.low %v8028_v33, %v8032_v53 }
 0x539   :  { %11074 = vmatprep.subr.bf16.mxu1 %v17246_v58  ;;  %v8024_v58 = vld [vmem:[#allocation9 + $0x868] sm:$0xff] }
 0x53a   :  { %11060 = vmatpush2.bf16.msra.mxu0 %v17141_v8  ;;  %v17326_v27 = vcombine.high %v8020_v56, %v8024_v58  ;;  %v8012_v39 = vld [vmem:[#allocation9 + $0x808] sm:$0xff] }
 0x53b   :  { %v7650_v29 = vpop.f32.mrf.mxu1  ;;  %11061 = vmatprep.subr.bf16.mxu0 %v17134_v26  ;;  %v8016_v8 = vld [vmem:[#allocation9 + $0x828] sm:$0xff]  ;;  %v17325_v26 = vcombine.low %v8020_v56, %v8024_v58 }
 0x53c   :  { %v7651_v60 = vadd.f32 %v7650_v29, %v7610_v36  ;;  %v17318_v57 = vcombine.high %v8012_v39, %v8016_v8  ;;  %v17317_v36 = vcombine.low %v8012_v39, %v8016_v8  ;;  %v8124_v29 = vld [vmem:[#allocation9 + $0xb88] sm:$0xff] }
 0x53d   :  { %v7652_v45 = vpop.f32.mrf.mxu1  ;;  %v8120_v59 = vld [vmem:[#allocation9 + $0xb68] sm:$0xff] }
 0x53e   :  { %v7653_v40 = vadd.f32 %v7652_v45, %v7612_v20  ;;  %11062 = vmatpush2.bf16.msra.mxu0 %v17133_v31  ;;  %v18982_v47 = vadd.f32 %v7691_v17, %v7651_v60  ;;  %v8048_v17 = vld [vmem:[#allocation9 + $0x928] sm:$0xff]  ;;  %v17438_v31 = vcombine.high %v8132_v16, %v8136_v32  ;;  %v17437_v20 = vcombine.low %v8132_v16, %v8136_v32 }
 0x53f   :  { %v7654_v19 = vpop.f32.mrf.mxu1  ;;  %11063 = vmatprep.subr.bf16.mxu0 %v17126_v43  ;;  %v17350_v44 = vcombine.high %v8044_v7, %v8048_v17  ;;  %v8128_v43 = vld [vmem:[#allocation9 + $0xba8] sm:$0xff] }
 0x540   :  { %v18984_v49 = vadd.f32 %v7693_v21, %v7653_v40  ;;  %v17349_v21 = vcombine.low %v8044_v7, %v8048_v17  ;;  %v17430_v60 = vcombine.high %v8124_v29, %v8128_v43  ;;  %v17429_v45 = vcombine.low %v8124_v29, %v8128_v43  ;;  %v8112_v19 = vld [vmem:[#allocation9 + $0xb28] sm:$0xff] }
 0x541   :  { %v7655_v51 = vpop.f32.mrf.mxu1  ;;  %v17422_v40 = vcombine.high %v8116_v37, %v8120_v59  ;;  %v8100_v30 = vld [vmem:[#allocation9 + $0xac8] sm:$0xff] }
 0x542   :  { %11064 = vmatpush2.bf16.msra.mxu0 %v17125_v46  ;;  %v8108_v46 = vld [vmem:[#allocation9 + $0xb08] sm:$0xff] }
 0x543   :  { %11115 = vmatprep.subr.bf16.mxu0 %v17374_v50  ;;  %v17421_v50 = vcombine.low %v8116_v37, %v8120_v59  ;;  %v17414_v34 = vcombine.high %v8108_v46, %v8112_v19  ;;  %v8104_v51 = vld [vmem:[#allocation9 + $0xae8] sm:$0xff] }
 0x544   :  { %v8092_v38 = vld [vmem:[#allocation9 + $0xa88] sm:$0xff]  ;;  %v17405_v7 = vcombine.low %v8100_v30, %v8104_v51 }
 0x545   :  { %11066 = vmatmul.mubr.bf16.vlgmr.msra.gmra.mxu0 %v18923_v25  ;;  %v8088_v11 = vld [vmem:[#allocation9 + $0xa68] sm:$0xff] }
 0x546   :  { %11116 = vmatpush1.bf16.msra.mxu0 %v17373_v55  ;;  %11147 = vmatprep.mubr.bf16.mxu0 %v18961_v1  ;;  %v17413_v55 = vcombine.low %v8108_v46, %v8112_v19  ;;  %v8076_v33 = vld [vmem:[#allocation9 + $0xa08] sm:$0xff]  ;;  %v7797_v19 = vld [vmem:[#allocation9 + $0x150] sm:$0xff] }
 0x547   :  { %11117 = vmatprep.subr.bf16.mxu0 %v17366_v63  ;;  %v17406_v63 = vcombine.high %v8100_v30, %v8104_v51  ;;  %v8080_v53 = vld [vmem:[#allocation9 + $0xa28] sm:$0xff] }
 0x548   :  { %v17382_v56 = vcombine.high %v8076_v33, %v8080_v53  ;;  %v7936_v43 = vld [vmem:[#allocation9 + $0x5a8] sm:$0xff] }
 0x549   :  { %v7928_v46 = vld [vmem:[#allocation9 + $0x568] sm:$0xff] }
 0x54a   :  { %11118 = vmatpush1.bf16.msra.mxu0 %v17365_v2  ;;  %v8096_v2 = vld [vmem:[#allocation9 + $0xaa8] sm:$0xff] }
 0x54b   :  { %11119 = vmatprep.subr.bf16.mxu0 %v17358_v3  ;;  %v17398_v17 = vcombine.high %v8092_v38, %v8096_v2 }
 0x54e   :  { %11120 = vmatpush1.bf16.msra.mxu0 %v17357_v23 }
 0x54f   :  { %11121 = vmatprep.subr.bf16.mxu0 %v17350_v44  ;;  %v8084_v44 = vld [vmem:[#allocation9 + $0xa48] sm:$0xff] }
 0x552   :  { %11122 = vmatpush1.bf16.msra.mxu0 %v17349_v21  ;;  %v17397_v21 = vcombine.low %v8092_v38, %v8096_v2  ;;  %v7920_v38 = vld [vmem:[#allocation9 + $0x528] sm:$0xff]  ;;  %v7789_v2 = vld [vmem:[#allocation9 + $0x110] sm:$0xff] }
 0x553   :  { %11123 = vmatprep.subr.bf16.mxu0 %v17342_v24  ;;  %v17390_v24 = vcombine.high %v8084_v44, %v8088_v11 }
 0x556   :  { %11124 = vmatpush1.bf16.msra.mxu0 %v17341_v28  ;;  %v17389_v28 = vcombine.low %v8084_v44, %v8088_v11  ;;  %v7912_v44 = vld [vmem:[#allocation9 + $0x4e8] sm:$0xff]  ;;  %v7781_v11 = vld [vmem:[#allocation9 + $0xd0] sm:$0xff] }
 0x557   :  { %11125 = vmatprep.subr.bf16.mxu0 %v17334_v41 }
 0x55a   :  { %11126 = vmatpush1.bf16.msra.mxu0 %v17333_v42  ;;  %v7813_v42 = vld [vmem:[#allocation9 + $0x1d0] sm:$0xff] }
 0x55b   :  { %11127 = vmatprep.subr.bf16.mxu0 %v17326_v27  ;;  %v7817_v27 = vld [vmem:[#allocation9 + $0x1f0] sm:$0xff] }
 0x55c   :  { %v17120_v32 = vcombine.high %v7813_v42, %v7817_v27 }
 0x55e   :  { %11128 = vmatpush1.bf16.msra.mxu0 %v17325_v26  ;;  %v17381_v26 = vcombine.low %v8076_v33, %v8080_v53 }
 0x55f   :  { %11129 = vmatprep.subr.bf16.mxu0 %v17318_v57 }
 0x562   :  { %11130 = vmatpush1.bf16.msra.mxu0 %v17317_v36 }
 0x563   :  { %11131 = vmatprep.subr.bf16.mxu0 %v17438_v31  ;;  %v7932_v31 = vld [vmem:[#allocation9 + $0x588] sm:$0xff] }
 0x566   :  { %11132 = vmatpush2.bf16.msra.mxu0 %v17437_v20  ;;  %v7805_v20 = vld [vmem:[#allocation9 + $0x190] sm:$0xff] }
 0x567   :  { %11133 = vmatprep.subr.bf16.mxu0 %v17430_v60  ;;  %v7809_v60 = vld [vmem:[#allocation9 + $0x1b0] sm:$0xff] }
 0x568   :  { %v17111_v30 = vcombine.low %v7805_v20, %v7809_v60 }
 0x56a   :  { %11134 = vmatpush2.bf16.msra.mxu0 %v17429_v45  ;;  %v17238_v45 = vcombine.high %v7932_v31, %v7936_v43 }
 0x56b   :  { %11135 = vmatprep.subr.bf16.mxu0 %v17422_v40  ;;  %v17112_v40 = vcombine.high %v7805_v20, %v7809_v60  ;;  %v7884_v20 = vld [vmem:[#allocation9 + $0x408] sm:$0xff] }
 0x56c   :  { %v7888_v60 = vld [vmem:[#allocation9 + $0x428] sm:$0xff] }
 0x56e   :  { %11136 = vmatpush2.bf16.msra.mxu0 %v17421_v50  ;;  %v7801_v50 = vld [vmem:[#allocation9 + $0x170] sm:$0xff] }
 0x56f   :  { %11137 = vmatprep.subr.bf16.mxu0 %v17414_v34  ;;  %v17237_v34 = vcombine.low %v7932_v31, %v7936_v43  ;;  %v17103_v12 = vcombine.low %v7797_v19, %v7801_v50 }
 0x570   :  { %v18988_v62 = vpop.f32.mrf.mxu0 }
 0x572   :  { %11138 = vmatpush2.bf16.msra.mxu0 %v17413_v55  ;;  %v18990_v3 = vpop.f32.mrf.mxu0  ;;  %v17104_v55 = vcombine.high %v7797_v19, %v7801_v50  ;;  %v8004_v50 = vld [vmem:[#allocation9 + $0x7c8] sm:$0xff] }
 0x573   :  { %11139 = vmatprep.subr.bf16.mxu0 %v17406_v63  ;;  %v7916_v63 = vld [vmem:[#allocation9 + $0x508] sm:$0xff] }
 0x574   :  { %v10907_v23 = vpop.f32.mrf.mxu0  ;;  %v17222_v4 = vcombine.high %v7916_v63, %v7920_v38 }
 0x575   :  { %v7908_v23 = vld [vmem:[#allocation9 + $0x4c8] sm:$0xff] }
 0x576   :  { %11140 = vmatpush2.bf16.msra.mxu0 %v17405_v7  ;;  %v10908_v14 = vpop.f32.mrf.mxu0  ;;  %v7793_v7 = vld [vmem:[#allocation9 + $0x130] sm:$0xff]  ;;  %v17214_v33 = vcombine.high %v7908_v23, %v7912_v44 }
 0x577   :  { %11141 = vmatprep.subr.bf16.mxu0 %v17398_v17  ;;  %v7785_v14 = vld [vmem:[#allocation9 + $0xf0] sm:$0xff] }
 0x578   :  { %v17088_v53 = vcombine.high %v7781_v11, %v7785_v14 }
 0x57a   :  { %11142 = vmatpush2.bf16.msra.mxu0 %v17397_v21  ;;  %v17221_v21 = vcombine.low %v7916_v63, %v7920_v38 }
 0x57b   :  { %v7732_v41 = vpop.f32.mrf.mxu1  ;;  %11143 = vmatprep.subr.bf16.mxu0 %v17390_v24  ;;  %v17095_v24 = vcombine.low %v7789_v2, %v7793_v7 }
 0x57c   :  { %v7733_v58 = vadd.f32 %v7732_v41, %v18982_v47  ;;  %v17119_v47 = vcombine.low %v7813_v42, %v7817_v27  ;;  %v7904_v41 = vld [vmem:[#allocation9 + $0x4a8] sm:$0xff]  ;;  %v17213_v42 = vcombine.low %v7908_v23, %v7912_v44  ;;  %v17087_v27 = vcombine.low %v7781_v11, %v7785_v14 }
 0x57d   :  { %v7734_v39 = vpop.f32.mrf.mxu1  ;;  %v7988_v14 = vld [vmem:[#allocation9 + $0x748] sm:$0xff] }
 0x57e   :  { %v7735_v8 = vadd.f32 %v7734_v39, %v18984_v49  ;;  %11144 = vmatpush2.bf16.msra.mxu0 %v17389_v28  ;;  %v7745_v57 = vmax.f32 %v7733_v58, 0.0  ;;  %v7924_v49 = vld [vmem:[#allocation9 + $0x548] sm:$0xff]  ;;  %v7777_v58 = vld [vmem:[#allocation9 + $0xb0] sm:$0xff] }
 0x57f   :  { %v7736_v16 = vpop.f32.mrf.mxu1  ;;  %11145 = vmatprep.subr.bf16.mxu0 %v17382_v56  ;;  %v17230_v51 = vcombine.high %v7924_v49, %v7928_v46  ;;  %v17229_v17 = vcombine.low %v7924_v49, %v7928_v46  ;;  %v7900_v28 = vld [vmem:[#allocation9 + $0x488] sm:$0xff]  ;;  %v7773_v56 = vld [vmem:[#allocation9 + $0x90] sm:$0xff]  ;;  %v17190_v46 = vcombine.high %v7884_v20, %v7888_v60 }
 0x580   :  { %v7746_v36 = vmax.f32 %v7735_v8, 0.0  ;;  %v18996_v59 = vpack.c.bf16 %v7745_v57, %v7745_v57  ;;  %v17206_v39 = vcombine.high %v7900_v28, %v7904_v41  ;;  %v17080_v8 = vcombine.high %v7773_v56, %v7777_v58  ;;  %v7896_v57 = vld [vmem:[#allocation9 + $0x468] sm:$0xff]  ;;  %v7765_v16 = vld [vmem:[#allocation9 + $0x50] sm:$0xff] }
 0x581   :  { %v7737_v29 = vpop.f32.mrf.mxu1  ;;  %v17079_v31 = vcombine.low %v7773_v56, %v7777_v58  ;;  %v7761_v49 = vld [vmem:[#allocation9 + $0x30] sm:$0xff]  ;;  %v7980_v58 = vld [vmem:[#allocation9 + $0x708] sm:$0xff] }
 0x582   :  { %v18994_v37 = vpack.c.bf16 %v7746_v36, %v7746_v36  ;;  %11146 = vmatpush2.bf16.msra.mxu0 %v17381_v26  ;;  %v7892_v26 = vld [vmem:[#allocation9 + $0x448] sm:$0xff]  ;;  %v17205_v36 = vcombine.low %v7900_v28, %v7904_v41 }
 0x583   :  { %11197 = vmatprep.subr.bf16.mxu0 %v17120_v32  ;;  %v7769_v32 = vld [vmem:[#allocation9 + $0x70] sm:$0xff]  ;;  %v17198_v29 = vcombine.high %v7892_v26, %v7896_v57 }
 0x584   :  { %11024 = vmatprep.mubr.bf16.mxu1 %v18994_v37  ;;  %v17072_v43 = vcombine.high %v7765_v16, %v7769_v32 }
 0x585   :  { %11148 = vmatmul.mubr.bf16.vlgmr.msra.gmra.mxu0 %v18969_v15  ;;  %11025 = vmatmul.mubr.bf16.vlgmr.msra.gmra.mxu1 %v18996_v59 }
 0x586   :  { %11075 = vmatpush1.bf16.msra.mxu1 %v17245_v18  ;;  %11198 = vmatpush1.bf16.msra.mxu0 %v17119_v47  ;;  %v17096_v18 = vcombine.high %v7789_v2, %v7793_v7  ;;  %v7757_v47 = vld [vmem:[#allocation9 + $0x10] sm:$0xff]  ;;  %v7996_v7 = vld [vmem:[#allocation9 + $0x788] sm:$0xff] }
 0x587   :  { %11229 = vmatprep.mubr.bf16.mxu0 %v18907_v13  ;;  %11106 = vmatprep.mubr.bf16.mxu1 %v18935_v6  ;;  %v17064_v19 = vcombine.high %v7757_v47, %v7761_v49  ;;  %v17063_v63 = vcombine.low %v7757_v47, %v7761_v49  ;;  %v7964_v49 = vld [vmem:[#allocation9 + $0x688] sm:$0xff] }
 0x588   :  { %11076 = vmatprep.subr.bf16.mxu1 %v17238_v45  ;;  %11199 = vmatprep.subr.bf16.mxu0 %v17112_v40  ;;  %v17197_v45 = vcombine.low %v7892_v26, %v7896_v57  ;;  %v17071_v40 = vcombine.low %v7765_v16, %v7769_v32  ;;  %v7972_v32 = vld [vmem:[#allocation9 + $0x6c8] sm:$0xff] }
 0x58a   :  { %11077 = vmatpush1.bf16.msra.mxu1 %v17237_v34  ;;  %11200 = vmatpush1.bf16.msra.mxu0 %v17111_v30  ;;  %v8008_v34 = vld [vmem:[#allocation9 + $0x7e8] sm:$0xff]  ;;  %v7877_v30 = vld [vmem:[#allocation9 + $0x3d0] sm:$0xff] }
 0x58b   :  { %11078 = vmatprep.subr.bf16.mxu1 %v17230_v51  ;;  %11201 = vmatprep.subr.bf16.mxu0 %v17104_v55  ;;  %v7881_v51 = vld [vmem:[#allocation9 + $0x3f0] sm:$0xff]  ;;  %v17189_v55 = vcombine.low %v7884_v20, %v7888_v60  ;;  %v17310_v38 = vcombine.high %v8004_v50, %v8008_v34 }
 0x58c   :  { %v17184_v2 = vcombine.high %v7877_v30, %v7881_v51  ;;  %v17183_v23 = vcombine.low %v7877_v30, %v7881_v51 }
 0x58e   :  { %11079 = vmatpush1.bf16.msra.mxu1 %v17229_v17  ;;  %11202 = vmatpush1.bf16.msra.mxu0 %v17103_v12  ;;  %v8000_v17 = vld [vmem:[#allocation9 + $0x7a8] sm:$0xff]  ;;  %v7869_v12 = vld [vmem:[#allocation9 + $0x390] sm:$0xff] }
 0x58f   :  { %11080 = vmatprep.subr.bf16.mxu1 %v17222_v4  ;;  %11203 = vmatprep.subr.bf16.mxu0 %v17096_v18  ;;  %v7873_v4 = vld [vmem:[#allocation9 + $0x3b0] sm:$0xff]  ;;  %v17309_v18 = vcombine.low %v8004_v50, %v8008_v34  ;;  %v17302_v44 = vcombine.high %v7996_v7, %v8000_v17  ;;  %v8267_v34 = vld [vmem:[#allocation10] sm:$0xff] }
 0x590   :  { %v17176_v11 = vcombine.high %v7869_v12, %v7873_v4  ;;  %v17175_v28 = vcombine.low %v7869_v12, %v7873_v4 }
 0x592   :  { %11081 = vmatpush1.bf16.msra.mxu1 %v17221_v21  ;;  %11204 = vmatpush1.bf16.msra.mxu0 %v17095_v24  ;;  %v7992_v21 = vld [vmem:[#allocation9 + $0x768] sm:$0xff]  ;;  %v7861_v24 = vld [vmem:[#allocation9 + $0x350] sm:$0xff] }
 0x593   :  { %11082 = vmatprep.subr.bf16.mxu1 %v17214_v33  ;;  %11205 = vmatprep.subr.bf16.mxu0 %v17088_v53  ;;  %v7865_v33 = vld [vmem:[#allocation9 + $0x370] sm:$0xff]  ;;  %v17301_v53 = vcombine.low %v7996_v7, %v8000_v17  ;;  %v17294_v41 = vcombine.high %v7988_v14, %v7992_v21  ;;  %v8272_v7 = vrot.slane %v8267_v34, %v18701_v5 }
 0x594   :  { %v17168_v56 = vcombine.high %v7861_v24, %v7865_v33  ;;  %v17167_v26 = vcombine.low %v7861_v24, %v7865_v33 }
 0x595   :  { %v10904_v24 = vadd.f32 %v18988_v62, %v8272_v7 }
 0x596   :  { %11083 = vmatpush1.bf16.msra.mxu1 %v17213_v42  ;;  %11206 = vmatpush1.bf16.msra.mxu0 %v17087_v27  ;;  %v7984_v42 = vld [vmem:[#allocation9 + $0x728] sm:$0xff]  ;;  %v7853_v27 = vld [vmem:[#allocation9 + $0x310] sm:$0xff] }
 0x597   :  { %11084 = vmatprep.subr.bf16.mxu1 %v17206_v39  ;;  %11207 = vmatprep.subr.bf16.mxu0 %v17080_v8  ;;  %v7857_v39 = vld [vmem:[#allocation9 + $0x330] sm:$0xff]  ;;  %v17293_v8 = vcombine.low %v7988_v14, %v7992_v21  ;;  %v17286_v57 = vcombine.high %v7980_v58, %v7984_v42 }
 0x598   :  { %v17160_v16 = vcombine.high %v7853_v27, %v7857_v39  ;;  %v17159_v20 = vcombine.low %v7853_v27, %v7857_v39  ;;  %v7821_v14 = vld [vmem:[#allocation9 + $0x210] sm:$0xff]  ;;  %v8200_v39 = vld [vmem:[#allocation9 + $0xde8] sm:$0xff] }
 0x599   :  { %v7825_v21 = vld [vmem:[#allocation9 + $0x230] sm:$0xff] }
 0x59a   :  { %11085 = vmatpush1.bf16.msra.mxu1 %v17205_v36  ;;  %11208 = vmatpush1.bf16.msra.mxu0 %v17079_v31  ;;  %v7976_v36 = vld [vmem:[#allocation9 + $0x6e8] sm:$0xff]  ;;  %v7845_v31 = vld [vmem:[#allocation9 + $0x2d0] sm:$0xff] }
 0x59b   :  { %11086 = vmatprep.subr.bf16.mxu1 %v17198_v29  ;;  %11209 = vmatprep.subr.bf16.mxu0 %v17072_v43  ;;  %v7849_v29 = vld [vmem:[#allocation9 + $0x2f0] sm:$0xff]  ;;  %v17285_v43 = vcombine.low %v7980_v58, %v7984_v42  ;;  %v17278_v60 = vcombine.high %v7972_v32, %v7976_v36  ;;  %v8196_v58 = vld [vmem:[#allocation9 + $0xdc8] sm:$0xff] }
 0x59c   :  { %v17152_v47 = vcombine.high %v7845_v31, %v7849_v29  ;;  %v17151_v50 = vcombine.low %v7845_v31, %v7849_v29  ;;  %v17502_v31 = vcombine.high %v8196_v58, %v8200_v39 }
 0x59e   :  { %11087 = vmatpush1.bf16.msra.mxu1 %v17197_v45  ;;  %11210 = vmatpush1.bf16.msra.mxu0 %v17071_v40  ;;  %v7968_v45 = vld [vmem:[#allocation9 + $0x6a8] sm:$0xff]  ;;  %v7837_v40 = vld [vmem:[#allocation9 + $0x290] sm:$0xff] }
 0x59f   :  { %11088 = vmatprep.subr.bf16.mxu1 %v17190_v46  ;;  %11211 = vmatprep.subr.bf16.mxu0 %v17064_v19  ;;  %v7841_v46 = vld [vmem:[#allocation9 + $0x2b0] sm:$0xff]  ;;  %v17277_v19 = vcombine.low %v7972_v32, %v7976_v36  ;;  %v17270_v30 = vcombine.high %v7964_v49, %v7968_v45  ;;  %v17269_v17 = vcombine.low %v7964_v49, %v7968_v45 }
 0x5a0   :  { %v17144_v51 = vcombine.high %v7837_v40, %v7841_v46  ;;  %v17143_v12 = vcombine.low %v7837_v40, %v7841_v46  ;;  %v17127_v32 = vcombine.low %v7821_v14, %v7825_v21  ;;  %v17501_v49 = vcombine.low %v8196_v58, %v8200_v39  ;;  %v8041_v58 = vld [vmem:[#allocation9 + $0x8f0] sm:$0xff] }
 0x5a2   :  { %11089 = vmatpush1.bf16.msra.mxu1 %v17189_v55  ;;  %11212 = vmatpush1.bf16.msra.mxu0 %v17063_v63  ;;  %v7956_v55 = vld [vmem:[#allocation9 + $0x648] sm:$0xff] }
 0x5a3   :  { %11090 = vmatprep.subr.bf16.mxu1 %v17310_v38  ;;  %11213 = vmatprep.subr.bf16.mxu0 %v17184_v2  ;;  %v7960_v63 = vld [vmem:[#allocation9 + $0x668] sm:$0xff]  ;;  %v7829_v38 = vld [vmem:[#allocation9 + $0x250] sm:$0xff] }
 0x5a4   :  { %v7833_v2 = vld [vmem:[#allocation9 + $0x270] sm:$0xff]  ;;  %v17262_v4 = vcombine.high %v7956_v55, %v7960_v63  ;;  %v17261_v33 = vcombine.low %v7956_v55, %v7960_v63 }
 0x5a6   :  { %11091 = vmatpush2.bf16.msra.mxu1 %v17309_v18  ;;  %11214 = vmatpush2.bf16.msra.mxu0 %v17183_v23  ;;  %v17136_v18 = vcombine.high %v7829_v38, %v7833_v2  ;;  %v7948_v23 = vld [vmem:[#allocation9 + $0x608] sm:$0xff] }
 0x5a7   :  { %11092 = vmatprep.subr.bf16.mxu1 %v17302_v44  ;;  %11215 = vmatprep.subr.bf16.mxu0 %v17176_v11  ;;  %v8276_v44 = vrot.slane %v8267_v34, %v18706_v10  ;;  %v7952_v11 = vld [vmem:[#allocation9 + $0x628] sm:$0xff] }
 0x5a8   :  { %v17253_v62 = vcombine.low %v7948_v23, %v7952_v11 }
 0x5a9   :  { %v10906_v42 = vadd.f32 %v18990_v3, %v8276_v44  ;;  %v8065_v3 = vld [vmem:[#allocation9 + $0x9b0] sm:$0xff] }
 0x5aa   :  { %11093 = vmatpush2.bf16.msra.mxu1 %v17301_v53  ;;  %11216 = vmatpush2.bf16.msra.mxu0 %v17175_v28  ;;  %v17135_v53 = vcombine.low %v7829_v38, %v7833_v2  ;;  %v8045_v44 = vld [vmem:[#allocation9 + $0x910] sm:$0xff] }
 0x5ab   :  { %11094 = vmatprep.subr.bf16.mxu1 %v17294_v41  ;;  %11217 = vmatprep.subr.bf16.mxu0 %v17168_v56  ;;  %v17254_v41 = vcombine.high %v7948_v23, %v7952_v11  ;;  %v17128_v56 = vcombine.high %v7821_v14, %v7825_v21  ;;  %v8049_v11 = vld [vmem:[#allocation9 + $0x930] sm:$0xff] }
 0x5ae   :  { %11095 = vmatpush2.bf16.msra.mxu1 %v17293_v8  ;;  %11218 = vmatpush2.bf16.msra.mxu0 %v17167_v26  ;;  %v8069_v8 = vld [vmem:[#allocation9 + $0x9d0] sm:$0xff] }
 0x5af   :  { %11096 = vmatprep.subr.bf16.mxu1 %v17286_v57  ;;  %11219 = vmatprep.subr.bf16.mxu0 %v17160_v16  ;;  %v8073_v26 = vld [vmem:[#allocation9 + $0x9f0] sm:$0xff] }
 0x5b0   :  { %v17376_v29 = vcombine.high %v8069_v8, %v8073_v26  ;;  %v17375_v45 = vcombine.low %v8069_v8, %v8073_v26  ;;  %v8156_v26 = vld [vmem:[#allocation9 + $0xc88] sm:$0xff] }
 0x5b2   :  { %11097 = vmatpush2.bf16.msra.mxu1 %v17285_v43  ;;  %11220 = vmatpush2.bf16.msra.mxu0 %v17159_v20  ;;  %v8188_v43 = vld [vmem:[#allocation9 + $0xd88] sm:$0xff] }
 0x5b3   :  { %11098 = vmatprep.subr.bf16.mxu1 %v17278_v60  ;;  %11221 = vmatprep.subr.bf16.mxu0 %v17152_v47  ;;  %v8192_v60 = vld [vmem:[#allocation9 + $0xda8] sm:$0xff]  ;;  %v8061_v47 = vld [vmem:[#allocation9 + $0x990] sm:$0xff] }
 0x5b4   :  { %v17494_v40 = vcombine.high %v8188_v43, %v8192_v60  ;;  %v17368_v46 = vcombine.high %v8061_v47, %v8065_v3  ;;  %v17493_v63 = vcombine.low %v8188_v43, %v8192_v60  ;;  %v17367_v2 = vcombine.low %v8061_v47, %v8065_v3  ;;  %v8148_v43 = vld [vmem:[#allocation9 + $0xc48] sm:$0xff]  ;;  %v8021_v60 = vld [vmem:[#allocation9 + $0x850] sm:$0xff] }
 0x5b5   :  { %v8025_v47 = vld [vmem:[#allocation9 + $0x870] sm:$0xff] }
 0x5b6   :  { %11099 = vmatpush2.bf16.msra.mxu1 %v17277_v19  ;;  %11222 = vmatpush2.bf16.msra.mxu0 %v17151_v50  ;;  %v8180_v19 = vld [vmem:[#allocation9 + $0xd48] sm:$0xff] }
 0x5b7   :  { %11100 = vmatprep.subr.bf16.mxu1 %v17270_v30  ;;  %11223 = vmatprep.subr.bf16.mxu0 %v17144_v51  ;;  %v8184_v50 = vld [vmem:[#allocation9 + $0xd68] sm:$0xff]  ;;  %v8053_v30 = vld [vmem:[#allocation9 + $0x950] sm:$0xff] }
 0x5b8   :  { %v8057_v51 = vld [vmem:[#allocation9 + $0x970] sm:$0xff]  ;;  %v17486_v7 = vcombine.high %v8180_v19, %v8184_v50  ;;  %v17485_v14 = vcombine.low %v8180_v19, %v8184_v50  ;;  %v8144_v19 = vld [vmem:[#allocation9 + $0xc28] sm:$0xff] }
 0x5b9   :  { %v8013_v50 = vld [vmem:[#allocation9 + $0x810] sm:$0xff] }
 0x5ba   :  { %11101 = vmatpush2.bf16.msra.mxu1 %v17269_v17  ;;  %11224 = vmatpush2.bf16.msra.mxu0 %v17143_v12  ;;  %v17360_v12 = vcombine.high %v8053_v30, %v8057_v51 }
 0x5bb   :  { %v10944_v28 = vpop.f32.mrf.mxu1  ;;  %11102 = vmatprep.subr.bf16.mxu1 %v17262_v4  ;;  %11225 = vmatprep.subr.bf16.mxu0 %v17136_v18  ;;  %v8172_v4 = vld [vmem:[#allocation9 + $0xd08] sm:$0xff] }
 0x5bc   :  { %v10945_v27 = vadd.f32 %v10944_v28, %v10904_v24  ;;  %v8176_v18 = vld [vmem:[#allocation9 + $0xd28] sm:$0xff]  ;;  %v17359_v24 = vcombine.low %v8053_v30, %v8057_v51  ;;  %v17327_v51 = vcombine.low %v8021_v60, %v8025_v47 }
 0x5bd   :  { %v10946_v57 = vpop.f32.mrf.mxu1  ;;  %v8164_v28 = vld [vmem:[#allocation9 + $0xcc8] sm:$0xff] }
 0x5be   :  { %v10947_v16 = vadd.f32 %v10946_v57, %v10906_v42  ;;  %11103 = vmatpush2.bf16.msra.mxu1 %v17261_v33  ;;  %11226 = vmatpush2.bf16.msra.mxu0 %v17135_v53  ;;  %v17478_v33 = vcombine.high %v8172_v4, %v8176_v18  ;;  %v17352_v53 = vcombine.high %v8045_v44, %v8049_v11  ;;  %v8160_v57 = vld [vmem:[#allocation9 + $0xca8] sm:$0xff] }
 0x5bf   :  { %v10948_v36 = vpop.f32.mrf.mxu1  ;;  %11104 = vmatprep.subr.bf16.mxu1 %v17254_v41  ;;  %11227 = vmatprep.subr.bf16.mxu0 %v17128_v56  ;;  %v8168_v41 = vld [vmem:[#allocation9 + $0xce8] sm:$0xff]  ;;  %v8037_v56 = vld [vmem:[#allocation9 + $0x8d0] sm:$0xff]  ;;  %v17477_v42 = vcombine.low %v8172_v4, %v8176_v18  ;;  %v17461_v3 = vcombine.low %v8156_v26, %v8160_v57 }
 0x5c0   :  { %v17470_v39 = vcombine.high %v8164_v28, %v8168_v41  ;;  %v17344_v8 = vcombine.high %v8037_v56, %v8041_v58  ;;  %v17343_v36 = vcombine.low %v8037_v56, %v8041_v58  ;;  %v8137_v4 = vld [vmem:[#allocation9 + $0xbf0] sm:$0xff]  ;;  %v8244_v58 = vld [vmem:[#allocation9 + $0xf48] sm:$0xff] }
 0x5c1   :  { %v10949_v20 = vpop.f32.mrf.mxu1 }
 0x5c2   :  { %11105 = vmatpush2.bf16.msra.mxu1 %v17253_v62  ;;  %11228 = vmatpush2.bf16.msra.mxu0 %v17127_v32  ;;  %v8033_v62 = vld [vmem:[#allocation9 + $0x8b0] sm:$0xff]  ;;  %v17469_v32 = vcombine.low %v8164_v28, %v8168_v41  ;;  %v8152_v20 = vld [vmem:[#allocation9 + $0xc68] sm:$0xff] }
 0x5c3   :  { %11156 = vmatprep.subr.bf16.mxu1 %v17502_v31  ;;  %11279 = vmatprep.subr.bf16.mxu0 %v17376_v29  ;;  %v17462_v31 = vcombine.high %v8156_v26, %v8160_v57  ;;  %v17453_v30 = vcombine.low %v8148_v43, %v8152_v20 }
 0x5c5   :  { %11107 = vmatmul.mubr.bf16.vlgmr.msra.gmra.mxu1 %v18956_v35  ;;  %11230 = vmatmul.mubr.bf16.vlgmr.msra.gmra.mxu0 %v18923_v25  ;;  %v10985_v34 = vpop.f32.mrf.mxu0 }
 0x5c6   :  { %v19012_v55 = vadd.f32 %v10985_v34, %v10945_v27  ;;  %11157 = vmatpush1.bf16.msra.mxu1 %v17501_v49  ;;  %11188 = vmatprep.mubr.bf16.mxu1 %v18994_v37  ;;  %v17351_v27 = vcombine.low %v8045_v44, %v8049_v11  ;;  %v8017_v34 = vld [vmem:[#allocation9 + $0x830] sm:$0xff] }
 0x5c7   :  { %11280 = vmatpush1.bf16.msra.mxu0 %v17375_v45  ;;  %11311 = vmatprep.mubr.bf16.mxu0 %v18961_v1  ;;  %v10987_v38 = vpop.f32.mrf.mxu0  ;;  %v17454_v45 = vcombine.high %v8148_v43, %v8152_v20 }
 0x5c8   :  { %v19016_v17 = vadd.f32 %v10987_v38, %v10947_v16  ;;  %11158 = vmatprep.subr.bf16.mxu1 %v17494_v40  ;;  %11281 = vmatprep.subr.bf16.mxu0 %v17368_v46  ;;  %v8029_v16 = vld [vmem:[#allocation9 + $0x890] sm:$0xff]  ;;  %v17328_v40 = vcombine.high %v8021_v60, %v8025_v47  ;;  %v8140_v46 = vld [vmem:[#allocation9 + $0xc08] sm:$0xff]  ;;  %v17320_v38 = vcombine.high %v8013_v50, %v8017_v34 }
 0x5c9   :  { %v10989_v23 = vpop.f32.mrf.mxu0  ;;  %v17336_v29 = vcombine.high %v8029_v16, %v8033_v62  ;;  %v17335_v49 = vcombine.low %v8029_v16, %v8033_v62  ;;  %v17445_v18 = vcombine.low %v8140_v46, %v8144_v19  ;;  %v8236_v62 = vld [vmem:[#allocation9 + $0xf08] sm:$0xff] }
 0x5ca   :  { %11159 = vmatpush1.bf16.msra.mxu1 %v17493_v63  ;;  %v17446_v63 = vcombine.high %v8140_v46, %v8144_v19  ;;  %v17319_v23 = vcombine.low %v8013_v50, %v8017_v34  ;;  %v8228_v47 = vld [vmem:[#allocation9 + $0xec8] sm:$0xff] }
 0x5cb   :  { %11282 = vmatpush1.bf16.msra.mxu0 %v17367_v2  ;;  %v10990_v21 = vpop.f32.mrf.mxu0  ;;  %11160 = vmatprep.subr.bf16.mxu1 %v17486_v7  ;;  %v8260_v2 = vld [vmem:[#allocation9 + $0xfc8] sm:$0xff] }
 0x5cc   :  { %11283 = vmatprep.subr.bf16.mxu0 %v17360_v12  ;;  %v8264_v7 = vld [vmem:[#allocation9 + $0xfe8] sm:$0xff]  ;;  %v8133_v12 = vld [vmem:[#allocation9 + $0xbd0] sm:$0xff] }
 0x5cd   :  { %v17566_v44 = vcombine.high %v8260_v2, %v8264_v7  ;;  %v17440_v11 = vcombine.high %v8133_v12, %v8137_v4  ;;  %v8256_v21 = vld [vmem:[#allocation9 + $0xfa8] sm:$0xff]  ;;  %v17439_v28 = vcombine.low %v8133_v12, %v8137_v4 }
 0x5ce   :  { %11161 = vmatpush1.bf16.msra.mxu1 %v17485_v14  ;;  %v8252_v14 = vld [vmem:[#allocation9 + $0xf88] sm:$0xff] }
 0x5cf   :  { %11284 = vmatpush1.bf16.msra.mxu0 %v17359_v24  ;;  %11162 = vmatprep.subr.bf16.mxu1 %v17478_v33  ;;  %v8125_v24 = vld [vmem:[#allocation9 + $0xb90] sm:$0xff]  ;;  %v17558_v41 = vcombine.high %v8252_v14, %v8256_v21  ;;  %v8220_v34 = vld [vmem:[#allocation9 + $0xe88] sm:$0xff] }
 0x5d0   :  { %11285 = vmatprep.subr.bf16.mxu0 %v17352_v53  ;;  %v8129_v33 = vld [vmem:[#allocation9 + $0xbb0] sm:$0xff]  ;;  %v17565_v53 = vcombine.low %v8260_v2, %v8264_v7  ;;  %v8212_v4 = vld [vmem:[#allocation9 + $0xe48] sm:$0xff] }
 0x5d1   :  { %v17432_v56 = vcombine.high %v8125_v24, %v8129_v33  ;;  %v17431_v26 = vcombine.low %v8125_v24, %v8129_v33  ;;  %v8204_v33 = vld [vmem:[#allocation9 + $0xe08] sm:$0xff] }
 0x5d2   :  { %11163 = vmatpush1.bf16.msra.mxu1 %v17477_v42  ;;  %v8248_v42 = vld [vmem:[#allocation9 + $0xf68] sm:$0xff] }
 0x5d3   :  { %11286 = vmatpush1.bf16.msra.mxu0 %v17351_v27  ;;  %11164 = vmatprep.subr.bf16.mxu1 %v17470_v39  ;;  %v8117_v27 = vld [vmem:[#allocation9 + $0xb50] sm:$0xff]  ;;  %v17550_v57 = vcombine.high %v8244_v58, %v8248_v42 }
 0x5d4   :  { %11287 = vmatprep.subr.bf16.mxu0 %v17344_v8  ;;  %v8121_v39 = vld [vmem:[#allocation9 + $0xb70] sm:$0xff]  ;;  %v17557_v8 = vcombine.low %v8252_v14, %v8256_v21 }
 0x5d5   :  { %v17424_v16 = vcombine.high %v8117_v27, %v8121_v39  ;;  %v17423_v43 = vcombine.low %v8117_v27, %v8121_v39  ;;  %v7941_v39 = vld [vmem:[#allocation9 + $0x5d0] sm:$0xff] }
 0x5d6   :  { %11165 = vmatpush1.bf16.msra.mxu1 %v17469_v32  ;;  %v8240_v32 = vld [vmem:[#allocation9 + $0xf28] sm:$0xff] }
 0x5d7   :  { %11288 = vmatpush1.bf16.msra.mxu0 %v17343_v36  ;;  %11166 = vmatprep.subr.bf16.mxu1 %v17462_v31  ;;  %v8109_v36 = vld [vmem:[#allocation9 + $0xb10] sm:$0xff]  ;;  %v17542_v20 = vcombine.high %v8236_v62, %v8240_v32 }
 0x5d8   :  { %11289 = vmatprep.subr.bf16.mxu0 %v17336_v29  ;;  %v8113_v31 = vld [vmem:[#allocation9 + $0xb30] sm:$0xff]  ;;  %v17549_v29 = vcombine.low %v8244_v58, %v8248_v42 }
 0x5d9   :  { %v17416_v60 = vcombine.high %v8109_v36, %v8113_v31  ;;  %v17415_v46 = vcombine.low %v8109_v36, %v8113_v31  ;;  %v7933_v31 = vld [vmem:[#allocation9 + $0x590] sm:$0xff] }
 0x5da   :  { %11167 = vmatpush1.bf16.msra.mxu1 %v17461_v3  ;;  %v8232_v3 = vld [vmem:[#allocation9 + $0xee8] sm:$0xff] }
 0x5db   :  { %11290 = vmatpush1.bf16.msra.mxu0 %v17335_v49  ;;  %11168 = vmatprep.subr.bf16.mxu1 %v17454_v45  ;;  %v8101_v49 = vld [vmem:[#allocation9 + $0xad0] sm:$0xff]  ;;  %v17534_v19 = vcombine.high %v8228_v47, %v8232_v3 }
 0x5dc   :  { %11291 = vmatprep.subr.bf16.mxu0 %v17328_v40  ;;  %v8105_v45 = vld [vmem:[#allocation9 + $0xaf0] sm:$0xff]  ;;  %v17541_v40 = vcombine.low %v8236_v62, %v8240_v32 }
 0x5dd   :  { %v17408_v50 = vcombine.high %v8101_v49, %v8105_v45  ;;  %v17407_v2 = vcombine.low %v8101_v49, %v8105_v45  ;;  %v7925_v49 = vld [vmem:[#allocation9 + $0x550] sm:$0xff] }
 0x5de   :  { %11169 = vmatpush1.bf16.msra.mxu1 %v17453_v30  ;;  %v8224_v30 = vld [vmem:[#allocation9 + $0xea8] sm:$0xff]  ;;  %v7929_v45 = vld [vmem:[#allocation9 + $0x570] sm:$0xff] }
 0x5df   :  { %11292 = vmatpush1.bf16.msra.mxu0 %v17327_v51  ;;  %11170 = vmatprep.subr.bf16.mxu1 %v17446_v63  ;;  %v8093_v51 = vld [vmem:[#allocation9 + $0xa90] sm:$0xff]  ;;  %v17526_v7 = vcombine.high %v8220_v34, %v8224_v30 }
 0x5e0   :  { %11293 = vmatprep.subr.bf16.mxu0 %v17320_v38  ;;  %v8097_v63 = vld [vmem:[#allocation9 + $0xab0] sm:$0xff]  ;;  %v17533_v38 = vcombine.low %v8228_v47, %v8232_v3 }
 0x5e1   :  { %v17400_v12 = vcombine.high %v8093_v51, %v8097_v63  ;;  %v17399_v14 = vcombine.low %v8093_v51, %v8097_v63  ;;  %v17232_v63 = vcombine.high %v7925_v49, %v7929_v45 }
 0x5e2   :  { %11171 = vmatpush1.bf16.msra.mxu1 %v17445_v18  ;;  %v8216_v18 = vld [vmem:[#allocation9 + $0xe68] sm:$0xff] }
 0x5e3   :  { %11294 = vmatpush1.bf16.msra.mxu0 %v17319_v23  ;;  %11172 = vmatprep.subr.bf16.mxu1 %v17566_v44  ;;  %v8085_v23 = vld [vmem:[#allocation9 + $0xa50] sm:$0xff]  ;;  %v17518_v21 = vcombine.high %v8212_v4, %v8216_v18 }
 0x5e4   :  { %11295 = vmatprep.subr.bf16.mxu0 %v17440_v11  ;;  %v8089_v44 = vld [vmem:[#allocation9 + $0xa70] sm:$0xff]  ;;  %v17525_v11 = vcombine.low %v8220_v34, %v8224_v30 }
 0x5e5   :  { %v17392_v24 = vcombine.high %v8085_v23, %v8089_v44  ;;  %v17391_v58 = vcombine.low %v8085_v23, %v8089_v44  ;;  %v17231_v23 = vcombine.low %v7925_v49, %v7929_v45  ;;  %v7889_v49 = vld [vmem:[#allocation9 + $0x430] sm:$0xff]  ;;  %v7758_v45 = vld [vmem:[#allocation9 + $0x18] sm:$0xff] }
 0x5e6   :  { %11173 = vmatpush2.bf16.msra.mxu1 %v17565_v53  ;;  %v8208_v53 = vld [vmem:[#allocation9 + $0xe28] sm:$0xff] }
 0x5e7   :  { %11296 = vmatpush2.bf16.msra.mxu0 %v17439_v28  ;;  %11174 = vmatprep.subr.bf16.mxu1 %v17558_v41  ;;  %v8077_v28 = vld [vmem:[#allocation9 + $0xa10] sm:$0xff]  ;;  %v17510_v42 = vcombine.high %v8204_v33, %v8208_v53 }
 0x5e8   :  { %11297 = vmatprep.subr.bf16.mxu0 %v17432_v56  ;;  %v8081_v41 = vld [vmem:[#allocation9 + $0xa30] sm:$0xff]  ;;  %v17517_v56 = vcombine.low %v8212_v4, %v8216_v18  ;;  %v7790_v4 = vld [vmem:[#allocation9 + $0x118] sm:$0xff] }
 0x5e9   :  { %v17384_v27 = vcombine.high %v8077_v28, %v8081_v41  ;;  %v17383_v62 = vcombine.low %v8077_v28, %v8081_v41  ;;  %v7794_v18 = vld [vmem:[#allocation9 + $0x138] sm:$0xff] }
 0x5ea   :  { %11175 = vmatpush2.bf16.msra.mxu1 %v17557_v8  ;;  %v7945_v8 = vld [vmem:[#allocation9 + $0x5f0] sm:$0xff]  ;;  %v17097_v41 = vcombine.low %v7790_v4, %v7794_v18 }
 0x5eb   :  { %11298 = vmatpush2.bf16.msra.mxu0 %v17431_v26  ;;  %11176 = vmatprep.subr.bf16.mxu1 %v17550_v57  ;;  %v7814_v26 = vld [vmem:[#allocation9 + $0x1d8] sm:$0xff]  ;;  %v17248_v32 = vcombine.high %v7941_v39, %v7945_v8 }
 0x5ec   :  { %11299 = vmatprep.subr.bf16.mxu0 %v17424_v16  ;;  %v7818_v57 = vld [vmem:[#allocation9 + $0x1f8] sm:$0xff]  ;;  %v17509_v16 = vcombine.low %v8204_v33, %v8208_v53  ;;  %v7913_v33 = vld [vmem:[#allocation9 + $0x4f0] sm:$0xff] }
 0x5ed   :  { %v17122_v36 = vcombine.high %v7814_v26, %v7818_v57  ;;  %v17121_v47 = vcombine.low %v7814_v26, %v7818_v57  ;;  %v7786_v53 = vld [vmem:[#allocation9 + $0xf8] sm:$0xff] }
 0x5ee   :  { %11177 = vmatpush2.bf16.msra.mxu1 %v17549_v29  ;;  %v7937_v29 = vld [vmem:[#allocation9 + $0x5b0] sm:$0xff] }
 0x5ef   :  { %11300 = vmatpush2.bf16.msra.mxu0 %v17423_v43  ;;  %11178 = vmatprep.subr.bf16.mxu1 %v17542_v20  ;;  %v17247_v43 = vcombine.low %v7941_v39, %v7945_v8  ;;  %v7806_v20 = vld [vmem:[#allocation9 + $0x198] sm:$0xff]  ;;  %v17240_v3 = vcombine.high %v7933_v31, %v7937_v29  ;;  %v17239_v34 = vcombine.low %v7933_v31, %v7937_v29 }
 0x5f0   :  { %11301 = vmatprep.subr.bf16.mxu0 %v17416_v60  ;;  %v7810_v60 = vld [vmem:[#allocation9 + $0x1b8] sm:$0xff] }
 0x5f1   :  { %v17113_v51 = vcombine.low %v7806_v20, %v7810_v60  ;;  %v7774_v39 = vld [vmem:[#allocation9 + $0x98] sm:$0xff] }
 0x5f2   :  { %11179 = vmatpush2.bf16.msra.mxu1 %v17541_v40  ;;  %v7778_v8 = vld [vmem:[#allocation9 + $0xb8] sm:$0xff] }
 0x5f3   :  { %11302 = vmatpush2.bf16.msra.mxu0 %v17415_v46  ;;  %11180 = vmatprep.subr.bf16.mxu1 %v17534_v19  ;;  %v17114_v46 = vcombine.high %v7806_v20, %v7810_v60  ;;  %v7798_v19 = vld [vmem:[#allocation9 + $0x158] sm:$0xff]  ;;  %v17081_v20 = vcombine.low %v7774_v39, %v7778_v8 }
 0x5f4   :  { %11303 = vmatprep.subr.bf16.mxu0 %v17408_v50  ;;  %v7802_v50 = vld [vmem:[#allocation9 + $0x178] sm:$0xff] }
 0x5f5   :  { %v7766_v31 = vld [vmem:[#allocation9 + $0x58] sm:$0xff] }
 0x5f6   :  { %11181 = vmatpush2.bf16.msra.mxu1 %v17533_v38  ;;  %v17106_v38 = vcombine.high %v7798_v19, %v7802_v50  ;;  %v7770_v29 = vld [vmem:[#allocation9 + $0x78] sm:$0xff] }
 0x5f7   :  { %11304 = vmatpush2.bf16.msra.mxu0 %v17407_v2  ;;  %11182 = vmatprep.subr.bf16.mxu1 %v17526_v7  ;;  %v7917_v2 = vld [vmem:[#allocation9 + $0x510] sm:$0xff] }
 0x5f8   :  { %11305 = vmatprep.subr.bf16.mxu0 %v17400_v12  ;;  %v7921_v7 = vld [vmem:[#allocation9 + $0x530] sm:$0xff] }
 0x5f9   :  { %v17223_v28 = vcombine.low %v7917_v2, %v7921_v7 }
 0x5fa   :  { %11183 = vmatpush2.bf16.msra.mxu1 %v17525_v11  ;;  %v17105_v11 = vcombine.low %v7798_v19, %v7802_v50  ;;  %v17073_v50 = vcombine.low %v7766_v31, %v7770_v29 }
 0x5fb   :  { %11306 = vmatpush2.bf16.msra.mxu0 %v17399_v14  ;;  %11184 = vmatprep.subr.bf16.mxu1 %v17518_v21  ;;  %v17224_v14 = vcombine.high %v7917_v2, %v7921_v7  ;;  %v17098_v21 = vcombine.high %v7790_v4, %v7794_v18  ;;  %v7878_v2 = vld [vmem:[#allocation9 + $0x3d8] sm:$0xff] }
 0x5fc   :  { %11307 = vmatprep.subr.bf16.mxu0 %v17392_v24  ;;  %v7909_v24 = vld [vmem:[#allocation9 + $0x4d0] sm:$0xff]  ;;  %v7882_v7 = vld [vmem:[#allocation9 + $0x3f8] sm:$0xff] }
 0x5fd   :  { %v17215_v26 = vcombine.low %v7909_v24, %v7913_v33 }
 0x5fe   :  { %11185 = vmatpush2.bf16.msra.mxu1 %v17517_v56  ;;  %v17216_v56 = vcombine.high %v7909_v24, %v7913_v33  ;;  %v17185_v33 = vcombine.low %v7878_v2, %v7882_v7 }
 0x5ff   :  { %11308 = vmatpush2.bf16.msra.mxu0 %v17391_v58  ;;  %11186 = vmatprep.subr.bf16.mxu1 %v17510_v42  ;;  %v7901_v42 = vld [vmem:[#allocation9 + $0x490] sm:$0xff] }
 0x600   :  { %11309 = vmatprep.subr.bf16.mxu0 %v17384_v27  ;;  %v7905_v27 = vld [vmem:[#allocation9 + $0x4b0] sm:$0xff] }
 0x602   :  { %11187 = vmatpush2.bf16.msra.mxu1 %v17509_v16  ;;  %v17208_v16 = vcombine.high %v7901_v42, %v7905_v27 }
 0x603   :  { %11310 = vmatpush2.bf16.msra.mxu0 %v17383_v62  ;;  %11238 = vmatprep.subr.bf16.mxu1 %v17248_v32  ;;  %v17082_v62 = vcombine.high %v7774_v39, %v7778_v8  ;;  %v7893_v32 = vld [vmem:[#allocation9 + $0x450] sm:$0xff] }
 0x604   :  { %11361 = vmatprep.subr.bf16.mxu0 %v17122_v36  ;;  %v7897_v36 = vld [vmem:[#allocation9 + $0x470] sm:$0xff] }
 0x605   :  { %v19018_v40 = vpop.f32.mrf.mxu0  ;;  %11189 = vmatmul.mubr.bf16.vlgmr.msra.gmra.mxu1 %v18996_v59  ;;  %v17200_v60 = vcombine.high %v7893_v32, %v7897_v36  ;;  %v17199_v19 = vcombine.low %v7893_v32, %v7897_v36 }
 0x606   :  { %11312 = vmatmul.mubr.bf16.vlgmr.msra.gmra.mxu0 %v18969_v15  ;;  %11239 = vmatpush1.bf16.msra.mxu1 %v17247_v43  ;;  %v17207_v43 = vcombine.low %v7901_v42, %v7905_v27 }
 0x607   :  { %11270 = vmatprep.mubr.bf16.mxu1 %v18935_v6  ;;  %11362 = vmatpush1.bf16.msra.mxu0 %v17121_v47  ;;  %v19023_v30 = vpop.f32.mrf.mxu0  ;;  %v17074_v47 = vcombine.high %v7766_v31, %v7770_v29 }
 0x608   :  { %11393 = vmatprep.mubr.bf16.mxu0 %v18907_v13  ;;  %11240 = vmatprep.subr.bf16.mxu1 %v17240_v3  ;;  %v7782_v13 = vld [vmem:[#allocation9 + $0xd8] sm:$0xff]  ;;  %v7885_v3 = vld [vmem:[#allocation9 + $0x410] sm:$0xff] }
 0x609   :  { %v11071_v12 = vpop.f32.mrf.mxu0  ;;  %11363 = vmatprep.subr.bf16.mxu0 %v17114_v46  ;;  %v17090_v58 = vcombine.high %v7782_v13, %v7786_v53  ;;  %v17089_v57 = vcombine.low %v7782_v13, %v7786_v53  ;;  %v7762_v46 = vld [vmem:[#allocation9 + $0x38] sm:$0xff] }
 0x60a   :  { %11241 = vmatpush1.bf16.msra.mxu1 %v17239_v34  ;;  %v17192_v34 = vcombine.high %v7885_v3, %v7889_v49  ;;  %v17191_v12 = vcombine.low %v7885_v3, %v7889_v49  ;;  %v17065_v4 = vcombine.low %v7758_v45, %v7762_v46 }
 0x60b   :  { %11364 = vmatpush1.bf16.msra.mxu0 %v17113_v51  ;;  %v11072_v44 = vpop.f32.mrf.mxu0  ;;  %11242 = vmatprep.subr.bf16.mxu1 %v17232_v63  ;;  %v17066_v51 = vcombine.high %v7758_v45, %v7762_v46  ;;  %v8005_v63 = vld [vmem:[#allocation9 + $0x7d0] sm:$0xff] }
 0x60c   :  { %11365 = vmatprep.subr.bf16.mxu0 %v17106_v38  ;;  %v8009_v38 = vld [vmem:[#allocation9 + $0x7f0] sm:$0xff] }
 0x60d   :  { %v17312_v18 = vcombine.high %v8005_v63, %v8009_v38  ;;  %v7997_v44 = vld [vmem:[#allocation9 + $0x790] sm:$0xff]  ;;  %v17311_v24 = vcombine.low %v8005_v63, %v8009_v38 }
 0x60e   :  { %11243 = vmatpush1.bf16.msra.mxu1 %v17231_v23  ;;  %v17186_v23 = vcombine.high %v7878_v2, %v7882_v7 }
 0x60f   :  { %11366 = vmatpush1.bf16.msra.mxu0 %v17105_v11  ;;  %11244 = vmatprep.subr.bf16.mxu1 %v17224_v14  ;;  %v8001_v11 = vld [vmem:[#allocation9 + $0x7b0] sm:$0xff]  ;;  %v7870_v14 = vld [vmem:[#allocation9 + $0x398] sm:$0xff] }
 0x610   :  { %11367 = vmatprep.subr.bf16.mxu0 %v17098_v21  ;;  %v7874_v21 = vld [vmem:[#allocation9 + $0x3b8] sm:$0xff]  ;;  %v17304_v13 = vcombine.high %v7997_v44, %v8001_v11  ;;  %v17303_v42 = vcombine.low %v7997_v44, %v8001_v11 }
 0x611   :  { %v17178_v53 = vcombine.high %v7870_v14, %v7874_v21  ;;  %v17177_v27 = vcombine.low %v7870_v14, %v7874_v21 }
 0x612   :  { %11245 = vmatpush1.bf16.msra.mxu1 %v17223_v28  ;;  %v7989_v28 = vld [vmem:[#allocation9 + $0x750] sm:$0xff] }
 0x613   :  { %11368 = vmatpush1.bf16.msra.mxu0 %v17097_v41  ;;  %11246 = vmatprep.subr.bf16.mxu1 %v17216_v56  ;;  %v7993_v41 = vld [vmem:[#allocation9 + $0x770] sm:$0xff]  ;;  %v7862_v56 = vld [vmem:[#allocation9 + $0x358] sm:$0xff] }
 0x614   :  { %11369 = vmatprep.subr.bf16.mxu0 %v17090_v58  ;;  %v7866_v58 = vld [vmem:[#allocation9 + $0x378] sm:$0xff]  ;;  %v17296_v39 = vcombine.high %v7989_v28, %v7993_v41  ;;  %v17295_v32 = vcombine.low %v7989_v28, %v7993_v41 }
 0x615   :  { %v17170_v8 = vcombine.high %v7862_v56, %v7866_v58  ;;  %v17169_v36 = vcombine.low %v7862_v56, %v7866_v58 }
 0x616   :  { %11247 = vmatpush1.bf16.msra.mxu1 %v17215_v26  ;;  %v7981_v26 = vld [vmem:[#allocation9 + $0x710] sm:$0xff] }
 0x617   :  { %11370 = vmatpush1.bf16.msra.mxu0 %v17089_v57  ;;  %11248 = vmatprep.subr.bf16.mxu1 %v17208_v16  ;;  %v7985_v57 = vld [vmem:[#allocation9 + $0x730] sm:$0xff]  ;;  %v7854_v16 = vld [vmem:[#allocation9 + $0x318] sm:$0xff] }
 0x618   :  { %11371 = vmatprep.subr.bf16.mxu0 %v17082_v62  ;;  %v7858_v62 = vld [vmem:[#allocation9 + $0x338] sm:$0xff]  ;;  %v17288_v31 = vcombine.high %v7981_v26, %v7985_v57  ;;  %v17287_v3 = vcombine.low %v7981_v26, %v7985_v57 }
 0x619   :  { %v17162_v29 = vcombine.high %v7854_v16, %v7858_v62  ;;  %v17161_v49 = vcombine.low %v7854_v16, %v7858_v62 }
 0x61a   :  { %11249 = vmatpush1.bf16.msra.mxu1 %v17207_v43  ;;  %v7973_v43 = vld [vmem:[#allocation9 + $0x6d0] sm:$0xff] }
 0x61b   :  { %11372 = vmatpush1.bf16.msra.mxu0 %v17081_v20  ;;  %11250 = vmatprep.subr.bf16.mxu1 %v17200_v60  ;;  %v7977_v20 = vld [vmem:[#allocation9 + $0x6f0] sm:$0xff]  ;;  %v7846_v60 = vld [vmem:[#allocation9 + $0x2d8] sm:$0xff] }
 0x61c   :  { %11373 = vmatprep.subr.bf16.mxu0 %v17074_v47  ;;  %v7850_v47 = vld [vmem:[#allocation9 + $0x2f8] sm:$0xff]  ;;  %v17280_v45 = vcombine.high %v7973_v43, %v7977_v20  ;;  %v17279_v63 = vcombine.low %v7973_v43, %v7977_v20 }
 0x61d   :  { %v17154_v46 = vcombine.high %v7846_v60, %v7850_v47  ;;  %v17153_v38 = vcombine.low %v7846_v60, %v7850_v47  ;;  %v8066_v43 = vld [vmem:[#allocation9 + $0x9b8] sm:$0xff]  ;;  %v8181_v47 = vld [vmem:[#allocation9 + $0xd50] sm:$0xff] }
 0x61e   :  { %11251 = vmatpush1.bf16.msra.mxu1 %v17199_v19  ;;  %v7965_v19 = vld [vmem:[#allocation9 + $0x690] sm:$0xff] }
 0x61f   :  { %11374 = vmatpush1.bf16.msra.mxu0 %v17073_v50  ;;  %11252 = vmatprep.subr.bf16.mxu1 %v17192_v34  ;;  %v7969_v50 = vld [vmem:[#allocation9 + $0x6b0] sm:$0xff]  ;;  %v7838_v34 = vld [vmem:[#allocation9 + $0x298] sm:$0xff] }
 0x620   :  { %11375 = vmatprep.subr.bf16.mxu0 %v17066_v51  ;;  %v7842_v51 = vld [vmem:[#allocation9 + $0x2b8] sm:$0xff]  ;;  %v17272_v2 = vcombine.high %v7965_v19, %v7969_v50  ;;  %v17271_v44 = vcombine.low %v7965_v19, %v7969_v50 }
 0x621   :  { %v17146_v7 = vcombine.high %v7838_v34, %v7842_v51  ;;  %v17145_v11 = vcombine.low %v7838_v34, %v7842_v51  ;;  %v8054_v19 = vld [vmem:[#allocation9 + $0x958] sm:$0xff] }
 0x622   :  { %11253 = vmatpush1.bf16.msra.mxu1 %v17191_v12  ;;  %v7957_v12 = vld [vmem:[#allocation9 + $0x650] sm:$0xff]  ;;  %v8058_v50 = vld [vmem:[#allocation9 + $0x978] sm:$0xff] }
 0x623   :  { %11376 = vmatpush1.bf16.msra.mxu0 %v17065_v4  ;;  %11254 = vmatprep.subr.bf16.mxu1 %v17312_v18  ;;  %v7961_v4 = vld [vmem:[#allocation9 + $0x670] sm:$0xff]  ;;  %v7830_v18 = vld [vmem:[#allocation9 + $0x258] sm:$0xff] }
 0x624   :  { %11377 = vmatprep.subr.bf16.mxu0 %v17186_v23  ;;  %v7834_v23 = vld [vmem:[#allocation9 + $0x278] sm:$0xff]  ;;  %v17264_v14 = vcombine.high %v7957_v12, %v7961_v4  ;;  %v17263_v28 = vcombine.low %v7957_v12, %v7961_v4  ;;  %v17362_v12 = vcombine.high %v8054_v19, %v8058_v50  ;;  %v8173_v4 = vld [vmem:[#allocation9 + $0xd10] sm:$0xff] }
 0x625   :  { %v17138_v21 = vcombine.high %v7830_v18, %v7834_v23  ;;  %v17137_v41 = vcombine.low %v7830_v18, %v7834_v23  ;;  %v8046_v23 = vld [vmem:[#allocation9 + $0x918] sm:$0xff] }
 0x626   :  { %11255 = vmatpush2.bf16.msra.mxu1 %v17311_v24  ;;  %v7949_v24 = vld [vmem:[#allocation9 + $0x610] sm:$0xff] }
 0x627   :  { %11378 = vmatpush2.bf16.msra.mxu0 %v17185_v33  ;;  %11256 = vmatprep.subr.bf16.mxu1 %v17304_v13  ;;  %v7953_v33 = vld [vmem:[#allocation9 + $0x630] sm:$0xff]  ;;  %v7822_v13 = vld [vmem:[#allocation9 + $0x218] sm:$0xff] }
 0x628   :  { %11379 = vmatprep.subr.bf16.mxu0 %v17178_v53  ;;  %v7826_v53 = vld [vmem:[#allocation9 + $0x238] sm:$0xff]  ;;  %v17256_v56 = vcombine.high %v7949_v24, %v7953_v33  ;;  %v17255_v26 = vcombine.low %v7949_v24, %v7953_v33  ;;  %v17361_v24 = vcombine.low %v8054_v19, %v8058_v50  ;;  %v8145_v19 = vld [vmem:[#allocation9 + $0xc30] sm:$0xff] }
 0x629   :  { %v17130_v58 = vcombine.high %v7822_v13, %v7826_v53  ;;  %v17129_v57 = vcombine.low %v7822_v13, %v7826_v53  ;;  %v8169_v53 = vld [vmem:[#allocation9 + $0xcf0] sm:$0xff]  ;;  %v8014_v50 = vld [vmem:[#allocation9 + $0x818] sm:$0xff] }
 0x62a   :  { %11257 = vmatpush2.bf16.msra.mxu1 %v17303_v42  ;;  %v8197_v42 = vld [vmem:[#allocation9 + $0xdd0] sm:$0xff] }
 0x62b   :  { %11380 = vmatpush2.bf16.msra.mxu0 %v17177_v27  ;;  %11258 = vmatprep.subr.bf16.mxu1 %v17296_v39  ;;  %v8201_v27 = vld [vmem:[#allocation9 + $0xdf0] sm:$0xff]  ;;  %v8070_v39 = vld [vmem:[#allocation9 + $0x9d8] sm:$0xff] }
 0x62c   :  { %11381 = vmatprep.subr.bf16.mxu0 %v17170_v8  ;;  %v8074_v8 = vld [vmem:[#allocation9 + $0x9f8] sm:$0xff]  ;;  %v17504_v16 = vcombine.high %v8197_v42, %v8201_v27 }
 0x62d   :  { %v17378_v62 = vcombine.high %v8070_v39, %v8074_v8  ;;  %v17377_v20 = vcombine.low %v8070_v39, %v8074_v8  ;;  %v8157_v39 = vld [vmem:[#allocation9 + $0xc90] sm:$0xff] }
 0x62e   :  { %11259 = vmatpush2.bf16.msra.mxu1 %v17295_v32  ;;  %v8189_v32 = vld [vmem:[#allocation9 + $0xd90] sm:$0xff] }
 0x62f   :  { %11382 = vmatpush2.bf16.msra.mxu0 %v17169_v36  ;;  %11260 = vmatprep.subr.bf16.mxu1 %v17288_v31  ;;  %v8193_v36 = vld [vmem:[#allocation9 + $0xdb0] sm:$0xff]  ;;  %v17503_v31 = vcombine.low %v8197_v42, %v8201_v27 }
 0x630   :  { %11383 = vmatprep.subr.bf16.mxu0 %v17162_v29  ;;  %v8062_v29 = vld [vmem:[#allocation9 + $0x998] sm:$0xff]  ;;  %v17496_v60 = vcombine.high %v8189_v32, %v8193_v36  ;;  %v17495_v51 = vcombine.low %v8189_v32, %v8193_v36  ;;  %v8161_v8 = vld [vmem:[#allocation9 + $0xcb0] sm:$0xff] }
 0x631   :  { %v17464_v32 = vcombine.high %v8157_v39, %v8161_v8 }
 0x632   :  { %11261 = vmatpush2.bf16.msra.mxu1 %v17287_v3  ;;  %v8185_v3 = vld [vmem:[#allocation9 + $0xd70] sm:$0xff] }
 0x633   :  { %11384 = vmatpush2.bf16.msra.mxu0 %v17161_v49  ;;  %11262 = vmatprep.subr.bf16.mxu1 %v17280_v45 }
 0x634   :  { %11385 = vmatprep.subr.bf16.mxu0 %v17154_v46  ;;  %v17370_v46 = vcombine.high %v8062_v29, %v8066_v43 }
 0x636   :  { %11263 = vmatpush2.bf16.msra.mxu1 %v17279_v63 }
 0x637   :  { %11386 = vmatpush2.bf16.msra.mxu0 %v17153_v38  ;;  %11264 = vmatprep.subr.bf16.mxu1 %v17272_v2  ;;  %v17369_v2 = vcombine.low %v8062_v29, %v8066_v43  ;;  %v8153_v29 = vld [vmem:[#allocation9 + $0xc70] sm:$0xff]  ;;  %v8022_v43 = vld [vmem:[#allocation9 + $0x858] sm:$0xff] }
 0x638   :  { %11387 = vmatprep.subr.bf16.mxu0 %v17146_v7  ;;  %v17488_v7 = vcombine.high %v8181_v47, %v8185_v3 }
 0x63a   :  { %11265 = vmatpush2.bf16.msra.mxu1 %v17271_v44  ;;  %v8050_v44 = vld [vmem:[#allocation9 + $0x938] sm:$0xff] }
 0x63b   :  { %11388 = vmatpush2.bf16.msra.mxu0 %v17145_v11  ;;  %11266 = vmatprep.subr.bf16.mxu1 %v17264_v14  ;;  %v17487_v11 = vcombine.low %v8181_v47, %v8185_v3  ;;  %v17354_v13 = vcombine.high %v8046_v23, %v8050_v44 }
 0x63c   :  { %11389 = vmatprep.subr.bf16.mxu0 %v17138_v21 }
 0x63e   :  { %11267 = vmatpush2.bf16.msra.mxu1 %v17263_v28  ;;  %v8038_v28 = vld [vmem:[#allocation9 + $0x8d8] sm:$0xff] }
 0x63f   :  { %11390 = vmatpush2.bf16.msra.mxu0 %v17137_v41  ;;  %11268 = vmatprep.subr.bf16.mxu1 %v17256_v56  ;;  %v8042_v41 = vld [vmem:[#allocation9 + $0x8f8] sm:$0xff] }
 0x640   :  { %11391 = vmatprep.subr.bf16.mxu0 %v17130_v58  ;;  %v17353_v58 = vcombine.low %v8046_v23, %v8050_v44  ;;  %v17346_v27 = vcombine.high %v8038_v28, %v8042_v41  ;;  %v8138_v23 = vld [vmem:[#allocation9 + $0xbf8] sm:$0xff] }
 0x642   :  { %11269 = vmatpush2.bf16.msra.mxu1 %v17255_v26  ;;  %v8030_v26 = vld [vmem:[#allocation9 + $0x898] sm:$0xff] }
 0x643   :  { %11392 = vmatpush2.bf16.msra.mxu0 %v17129_v57  ;;  %11320 = vmatprep.subr.bf16.mxu1 %v17504_v16  ;;  %v8034_v57 = vld [vmem:[#allocation9 + $0x8b8] sm:$0xff] }
 0x644   :  { %11443 = vmatprep.subr.bf16.mxu0 %v17378_v62  ;;  %v17345_v62 = vcombine.low %v8038_v28, %v8042_v41  ;;  %v17338_v36 = vcombine.high %v8030_v26, %v8034_v57  ;;  %v17337_v47 = vcombine.low %v8030_v26, %v8034_v57 }
 0x645   :  { %v19026_v49 = vpop.f32.mrf.mxu0  ;;  %11271 = vmatmul.mubr.bf16.vlgmr.msra.gmra.mxu1 %v18956_v35  ;;  %v11026_v45 = vpop.f32.mrf.mxu1 }
 0x646   :  { %11394 = vmatmul.mubr.bf16.vlgmr.msra.gmra.mxu0 %v18923_v25  ;;  %v19031_v34 = vadd.f32 %v11026_v45, %v19012_v55  ;;  %11321 = vmatpush1.bf16.msra.mxu1 %v17503_v31  ;;  %v8177_v25 = vld [vmem:[#allocation9 + $0xd30] sm:$0xff] }
 0x647   :  { %11352 = vmatprep.mubr.bf16.mxu1 %v18994_v37  ;;  %11444 = vmatpush1.bf16.msra.mxu0 %v17377_v20  ;;  %v19034_v63 = vpop.f32.mrf.mxu0  ;;  %v19036_v38 = vpop.f32.mrf.mxu1  ;;  %v17480_v33 = vcombine.high %v8173_v4, %v8177_v25  ;;  %v17479_v56 = vcombine.low %v8173_v4, %v8177_v25  ;;  %v8149_v31 = vld [vmem:[#allocation9 + $0xc50] sm:$0xff]  ;;  %v8026_v20 = vld [vmem:[#allocation9 + $0x878] sm:$0xff] }
 0x648   :  { %11475 = vmatprep.mubr.bf16.mxu0 %v18961_v1  ;;  %11322 = vmatprep.subr.bf16.mxu1 %v17496_v60  ;;  %v8165_v1 = vld [vmem:[#allocation9 + $0xcd0] sm:$0xff]  ;;  %v17463_v60 = vcombine.low %v8157_v39, %v8161_v8  ;;  %v17456_v3 = vcombine.high %v8149_v31, %v8153_v29  ;;  %v17330_v45 = vcombine.high %v8022_v43, %v8026_v20  ;;  %v8122_v39 = vld [vmem:[#allocation9 + $0xb78] sm:$0xff] }
 0x649   :  { %v11153_v18 = vpop.f32.mrf.mxu0  ;;  %11445 = vmatprep.subr.bf16.mxu0 %v17370_v46  ;;  %v11030_v55 = vpop.f32.mrf.mxu1  ;;  %v17472_v42 = vcombine.high %v8165_v1, %v8169_v53  ;;  %v17471_v16 = vcombine.low %v8165_v1, %v8169_v53  ;;  %v8141_v46 = vld [vmem:[#allocation9 + $0xc10] sm:$0xff]  ;;  %v8130_v1 = vld [vmem:[#allocation9 + $0xbb8] sm:$0xff] }
 0x64a   :  { %11323 = vmatpush1.bf16.msra.mxu1 %v17495_v51  ;;  %v8018_v51 = vld [vmem:[#allocation9 + $0x838] sm:$0xff]  ;;  %v8261_v25 = vld [vmem:[#allocation9 + $0xfd0] sm:$0xff]  ;;  %v17447_v44 = vcombine.low %v8141_v46, %v8145_v19 }
 0x64b   :  { %11446 = vmatpush1.bf16.msra.mxu0 %v17369_v2  ;;  %v11154_v14 = vpop.f32.mrf.mxu0  ;;  %v11031_v21 = vpop.f32.mrf.mxu1  ;;  %11324 = vmatprep.subr.bf16.mxu1 %v17488_v7  ;;  %v17455_v2 = vcombine.low %v8149_v31, %v8153_v29  ;;  %v17329_v7 = vcombine.low %v8022_v43, %v8026_v20  ;;  %v17322_v4 = vcombine.high %v8014_v50, %v8018_v51  ;;  %v8265_v18 = vld [vmem:[#allocation9 + $0xff0] sm:$0xff]  ;;  %v8134_v55 = vld [vmem:[#allocation9 + $0xbd8] sm:$0xff] }
 0x64c   :  { %11447 = vmatprep.subr.bf16.mxu0 %v17362_v12  ;;  %v17448_v12 = vcombine.high %v8141_v46, %v8145_v19  ;;  %v17568_v14 = vcombine.high %v8261_v25, %v8265_v18  ;;  %v17442_v21 = vcombine.high %v8134_v55, %v8138_v23  ;;  %v17567_v53 = vcombine.low %v8261_v25, %v8265_v18  ;;  %v8114_v31 = vld [vmem:[#allocation9 + $0xb38] sm:$0xff] }
 0x64d   :  { %v17441_v28 = vcombine.low %v8134_v55, %v8138_v23  ;;  %v8106_v46 = vld [vmem:[#allocation9 + $0xaf8] sm:$0xff] }
 0x64e   :  { %11325 = vmatpush1.bf16.msra.mxu1 %v17487_v11  ;;  %v17321_v11 = vcombine.low %v8014_v50, %v8018_v51  ;;  %v8098_v25 = vld [vmem:[#allocation9 + $0xab8] sm:$0xff] }
 0x64f   :  { %11448 = vmatpush1.bf16.msra.mxu0 %v17361_v24  ;;  %11326 = vmatprep.subr.bf16.mxu1 %v17480_v33  ;;  %v8253_v24 = vld [vmem:[#allocation9 + $0xf90] sm:$0xff] }
 0x650   :  { %11449 = vmatprep.subr.bf16.mxu0 %v17354_v13  ;;  %v8257_v33 = vld [vmem:[#allocation9 + $0xfb0] sm:$0xff]  ;;  %v8126_v13 = vld [vmem:[#allocation9 + $0xb98] sm:$0xff] }
 0x651   :  { %v17560_v41 = vcombine.high %v8253_v24, %v8257_v33  ;;  %v17559_v8 = vcombine.low %v8253_v24, %v8257_v33  ;;  %v17433_v26 = vcombine.low %v8126_v13, %v8130_v1  ;;  %v8090_v24 = vld [vmem:[#allocation9 + $0xa78] sm:$0xff] }
 0x652   :  { %11327 = vmatpush1.bf16.msra.mxu1 %v17479_v56  ;;  %v17434_v56 = vcombine.high %v8126_v13, %v8130_v1 }
 0x653   :  { %11450 = vmatpush1.bf16.msra.mxu0 %v17353_v58  ;;  %11328 = vmatprep.subr.bf16.mxu1 %v17472_v42  ;;  %v8245_v58 = vld [vmem:[#allocation9 + $0xf50] sm:$0xff] }
 0x654   :  { %11451 = vmatprep.subr.bf16.mxu0 %v17346_v27  ;;  %v8249_v42 = vld [vmem:[#allocation9 + $0xf70] sm:$0xff]  ;;  %v8118_v27 = vld [vmem:[#allocation9 + $0xb58] sm:$0xff] }
 0x655   :  { %v17552_v57 = vcombine.high %v8245_v58, %v8249_v42  ;;  %v17551_v29 = vcombine.low %v8245_v58, %v8249_v42  ;;  %v17425_v43 = vcombine.low %v8118_v27, %v8122_v39  ;;  %v8082_v58 = vld [vmem:[#allocation9 + $0xa38] sm:$0xff] }
 0x656   :  { %11329 = vmatpush1.bf16.msra.mxu1 %v17471_v16  ;;  %v17426_v16 = vcombine.high %v8118_v27, %v8122_v39 }
 0x657   :  { %11452 = vmatpush1.bf16.msra.mxu0 %v17345_v62  ;;  %11330 = vmatprep.subr.bf16.mxu1 %v17464_v32  ;;  %v8237_v62 = vld [vmem:[#allocation9 + $0xf10] sm:$0xff] }
 0x658   :  { %11453 = vmatprep.subr.bf16.mxu0 %v17338_v36  ;;  %v8241_v32 = vld [vmem:[#allocation9 + $0xf30] sm:$0xff]  ;;  %v8110_v36 = vld [vmem:[#allocation9 + $0xb18] sm:$0xff] }
 0x659   :  { %v17544_v20 = vcombine.high %v8237_v62, %v8241_v32  ;;  %v17543_v19 = vcombine.low %v8237_v62, %v8241_v32  ;;  %v17417_v50 = vcombine.low %v8110_v36, %v8114_v31  ;;  %v11601_v62 = vld [vmem:[#allocation12 + $0x1e0] sm:$0xff]  ;;  %v11029_v32 = vadd.f32 %v19036_v38, %v19016_v17 }
 0x65a   :  { %11331 = vmatpush1.bf16.msra.mxu1 %v17463_v60  ;;  %v17418_v60 = vcombine.high %v8110_v36, %v8114_v31  ;;  %v11589_v38 = vld [vmem:[#allocation12 + $0x180] sm:$0xff] }
 0x65b   :  { %11454 = vmatpush1.bf16.msra.mxu0 %v17337_v47  ;;  %11332 = vmatprep.subr.bf16.mxu1 %v17456_v3  ;;  %v8229_v47 = vld [vmem:[#allocation9 + $0xed0] sm:$0xff] }
 0x65c   :  { %11455 = vmatprep.subr.bf16.mxu0 %v17330_v45  ;;  %v8233_v3 = vld [vmem:[#allocation9 + $0xef0] sm:$0xff]  ;;  %v8102_v45 = vld [vmem:[#allocation9 + $0xad8] sm:$0xff] }
 0x65d   :  { %v17536_v51 = vcombine.high %v8229_v47, %v8233_v3  ;;  %v17535_v18 = vcombine.low %v8229_v47, %v8233_v3  ;;  %v17409_v55 = vcombine.low %v8102_v45, %v8106_v46  ;;  %v7934_v3 = vld [vmem:[#allocation9 + $0x598] sm:$0xff] }
 0x65e   :  { %11333 = vmatpush1.bf16.msra.mxu1 %v17455_v2  ;;  %v17410_v2 = vcombine.high %v8102_v45, %v8106_v46  ;;  %v7938_v45 = vld [vmem:[#allocation9 + $0x5b8] sm:$0xff]  ;;  %v11526_v46 = vmax.f32 %v11029_v32, 0.0  ;;  %v11569_v32 = vld [vmem:[#allocation12 + $0xe0] sm:$0xff] }
 0x65f   :  { %11456 = vmatpush1.bf16.msra.mxu0 %v17329_v7  ;;  %11334 = vmatprep.subr.bf16.mxu1 %v17448_v12  ;;  %v8221_v7 = vld [vmem:[#allocation9 + $0xe90] sm:$0xff] }
 0x660   :  { %11457 = vmatprep.subr.bf16.mxu0 %v17322_v4  ;;  %v8225_v12 = vld [vmem:[#allocation9 + $0xeb0] sm:$0xff]  ;;  %v8094_v4 = vld [vmem:[#allocation9 + $0xa98] sm:$0xff] }
 0x661   :  { %v17528_v23 = vcombine.high %v8221_v7, %v8225_v12  ;;  %v17527_v33 = vcombine.low %v8221_v7, %v8225_v12  ;;  %v17401_v13 = vcombine.low %v8094_v4, %v8098_v25  ;;  %v7926_v7 = vld [vmem:[#allocation9 + $0x558] sm:$0xff] }
 0x662   :  { %11335 = vmatpush1.bf16.msra.mxu1 %v17447_v44  ;;  %v17402_v44 = vcombine.high %v8094_v4, %v8098_v25  ;;  %v7930_v12 = vld [vmem:[#allocation9 + $0x578] sm:$0xff] }
 0x663   :  { %11458 = vmatpush1.bf16.msra.mxu0 %v17321_v11  ;;  %11336 = vmatprep.subr.bf16.mxu1 %v17568_v14  ;;  %v8213_v11 = vld [vmem:[#allocation9 + $0xe50] sm:$0xff] }
 0x664   :  { %11459 = vmatprep.subr.bf16.mxu0 %v17442_v21  ;;  %v8217_v14 = vld [vmem:[#allocation9 + $0xe70] sm:$0xff]  ;;  %v8086_v21 = vld [vmem:[#allocation9 + $0xa58] sm:$0xff] }
 0x665   :  { %v17520_v1 = vcombine.high %v8213_v11, %v8217_v14  ;;  %v17519_v42 = vcombine.low %v8213_v11, %v8217_v14  ;;  %v17393_v27 = vcombine.low %v8086_v21, %v8090_v24  ;;  %v19052_v11 = vpack.c.bf16 %v11526_v46, %v11526_v46 }
 0x666   :  { %11337 = vmatpush2.bf16.msra.mxu1 %v17567_v53  ;;  %v17394_v53 = vcombine.high %v8086_v21, %v8090_v24 }
 0x667   :  { %11460 = vmatpush2.bf16.msra.mxu0 %v17441_v28  ;;  %11338 = vmatprep.subr.bf16.mxu1 %v17560_v41  ;;  %v8205_v28 = vld [vmem:[#allocation9 + $0xe10] sm:$0xff] }
 0x668   :  { %11461 = vmatprep.subr.bf16.mxu0 %v17434_v56  ;;  %v8209_v41 = vld [vmem:[#allocation9 + $0xe30] sm:$0xff]  ;;  %v8078_v56 = vld [vmem:[#allocation9 + $0xa18] sm:$0xff] }
 0x669   :  { %v17512_v39 = vcombine.high %v8205_v28, %v8209_v41  ;;  %v17511_v36 = vcombine.low %v8205_v28, %v8209_v41  ;;  %v17385_v31 = vcombine.low %v8078_v56, %v8082_v58  ;;  %v7922_v28 = vld [vmem:[#allocation9 + $0x538] sm:$0xff] }
 0x66a   :  { %11339 = vmatpush2.bf16.msra.mxu1 %v17559_v8  ;;  %v17386_v8 = vcombine.high %v8078_v56, %v8082_v58  ;;  %v11573_v56 = vld [vmem:[#allocation12 + $0x100] sm:$0xff] }
 0x66b   :  { %11462 = vmatpush2.bf16.msra.mxu0 %v17433_v26  ;;  %11340 = vmatprep.subr.bf16.mxu1 %v17552_v57  ;;  %v7942_v26 = vld [vmem:[#allocation9 + $0x5d8] sm:$0xff]  ;;  %v11577_v58 = vld [vmem:[#allocation12 + $0x120] sm:$0xff] }
 0x66c   :  { %11463 = vmatprep.subr.bf16.mxu0 %v17426_v16  ;;  %v7946_v57 = vld [vmem:[#allocation9 + $0x5f8] sm:$0xff]  ;;  %v11597_v16 = vld [vmem:[#allocation12 + $0x1c0] sm:$0xff] }
 0x66d   :  { %v17249_v17 = vcombine.low %v7942_v26, %v7946_v57 }
 0x66e   :  { %11341 = vmatpush2.bf16.msra.mxu1 %v17551_v29  ;;  %v17250_v29 = vcombine.high %v7942_v26, %v7946_v57  ;;  %v17604_v26 = vcombine.high %v11573_v56, %v11577_v58  ;;  %v7910_v57 = vld [vmem:[#allocation9 + $0x4d8] sm:$0xff] }
 0x66f   :  { %11464 = vmatpush2.bf16.msra.mxu0 %v17425_v43  ;;  %11342 = vmatprep.subr.bf16.mxu1 %v17544_v20  ;;  %v19041_v43 = vld [vmem:[#allocation10] sm:$0xff] }
 0x670   :  { %11465 = vmatprep.subr.bf16.mxu0 %v17418_v60  ;;  %v8280_v20 = vrot.slane %v19041_v43, %v18731_v48  ;;  %v17628_v60 = vcombine.high %v11597_v16, %v11601_v62  ;;  %v8284_v47 = vrot.slane %v19041_v43, %v18734_v52 }
 0x672   :  { %11343 = vmatpush2.bf16.msra.mxu1 %v17543_v19  ;;  %v11593_v19 = vld [vmem:[#allocation12 + $0x1a0] sm:$0xff]  ;;  %v11070_v4 = vadd.f32 %v19023_v30, %v8284_v47  ;;  %v7906_v47 = vld [vmem:[#allocation9 + $0x4b8] sm:$0xff] }
 0x673   :  { %11466 = vmatpush2.bf16.msra.mxu0 %v17417_v50  ;;  %11344 = vmatprep.subr.bf16.mxu1 %v17536_v51  ;;  %v17627_v50 = vcombine.low %v11597_v16, %v11601_v62  ;;  %v11068_v51 = vadd.f32 %v19018_v40, %v8280_v20  ;;  %v17241_v40 = vcombine.low %v7934_v3, %v7938_v45  ;;  %v7914_v16 = vld [vmem:[#allocation9 + $0x4f8] sm:$0xff]  ;;  %v11565_v62 = vld [vmem:[#allocation12 + $0xc0] sm:$0xff] }
 0x674   :  { %11467 = vmatprep.subr.bf16.mxu0 %v17410_v2  ;;  %v17242_v2 = vcombine.high %v7934_v3, %v7938_v45  ;;  %v17619_v24 = vcombine.low %v11589_v38, %v11593_v19  ;;  %v17596_v20 = vcombine.high %v11565_v62, %v11569_v32  ;;  %v11557_v3 = vld [vmem:[#allocation12 + $0x80] sm:$0xff]  ;;  %v17217_v46 = vcombine.low %v7910_v57, %v7914_v16 }
 0x675   :  { %v11561_v45 = vld [vmem:[#allocation12 + $0xa0] sm:$0xff] }
 0x676   :  { %11345 = vmatpush2.bf16.msra.mxu1 %v17535_v18 }
 0x677   :  { %11468 = vmatpush2.bf16.msra.mxu0 %v17409_v55  ;;  %11346 = vmatprep.subr.bf16.mxu1 %v17528_v23  ;;  %v17620_v55 = vcombine.high %v11589_v38, %v11593_v19  ;;  %v11581_v23 = vld [vmem:[#allocation12 + $0x140] sm:$0xff]  ;;  %v17588_v19 = vcombine.high %v11557_v3, %v11561_v45 }
 0x678   :  { %11469 = vmatprep.subr.bf16.mxu0 %v17402_v44  ;;  %v11585_v44 = vld [vmem:[#allocation12 + $0x160] sm:$0xff] }
 0x67a   :  { %11347 = vmatpush2.bf16.msra.mxu1 %v17527_v33  ;;  %v17234_v33 = vcombine.high %v7926_v7, %v7930_v12 }
 0x67b   :  { %11470 = vmatpush2.bf16.msra.mxu0 %v17401_v13  ;;  %11348 = vmatprep.subr.bf16.mxu1 %v17520_v1  ;;  %v17612_v1 = vcombine.high %v11581_v23, %v11585_v44 }
 0x67c   :  { %11471 = vmatprep.subr.bf16.mxu0 %v17394_v53  ;;  %v7918_v53 = vld [vmem:[#allocation9 + $0x518] sm:$0xff] }
 0x67e   :  { %11349 = vmatpush2.bf16.msra.mxu1 %v17519_v42 }
 0x67f   :  { %11472 = vmatpush2.bf16.msra.mxu0 %v17393_v27  ;;  %11350 = vmatprep.subr.bf16.mxu1 %v17512_v39  ;;  %v17611_v39 = vcombine.low %v11581_v23, %v11585_v44  ;;  %v7886_v23 = vld [vmem:[#allocation9 + $0x418] sm:$0xff] }
 0x680   :  { %11473 = vmatprep.subr.bf16.mxu0 %v17386_v8  ;;  %v17226_v8 = vcombine.high %v7918_v53, %v7922_v28  ;;  %v7890_v44 = vld [vmem:[#allocation9 + $0x438] sm:$0xff] }
 0x682   :  { %11351 = vmatpush2.bf16.msra.mxu1 %v17511_v36  ;;  %v17225_v36 = vcombine.low %v7918_v53, %v7922_v28  ;;  %v8006_v28 = vld [vmem:[#allocation9 + $0x7d8] sm:$0xff] }
 0x683   :  { %11474 = vmatpush2.bf16.msra.mxu0 %v17385_v31  ;;  %11402 = vmatprep.subr.bf16.mxu1 %v17250_v29  ;;  %v17603_v31 = vcombine.low %v11573_v56, %v11577_v58  ;;  %v17218_v29 = vcombine.high %v7910_v57, %v7914_v16  ;;  %v11665_v56 = vld [vmem:[#allocation12 + $0x3e0] sm:$0xff]  ;;  %v17193_v58 = vcombine.low %v7886_v23, %v7890_v44 }
 0x684   :  { %14655 = vmatprep.subr.bf16.mxu0 %v17628_v60  ;;  %v7902_v60 = vld [vmem:[#allocation9 + $0x498] sm:$0xff]  ;;  %v11657_v57 = vld [vmem:[#allocation12 + $0x3a0] sm:$0xff] }
 0x685   :  { %v11108_v25 = vpop.f32.mrf.mxu1  ;;  %v19049_v18 = vpop.f32.mrf.mxu0  ;;  %11353 = vmatmul.mubr.bf16.vlgmr.msra.gmra.mxu1 %v18996_v59  ;;  %v17210_v38 = vcombine.high %v7902_v60, %v7906_v47 }
 0x686   :  { %v19054_v14 = vadd.f32 %v11108_v25, %v11068_v51  ;;  %11476 = vmatmul.mubr.bf16.vlgmr.msra.gmra.mxu0 %v18969_v15  ;;  %11403 = vmatpush1.bf16.msra.mxu1 %v17249_v17  ;;  %v17595_v17 = vcombine.low %v11565_v62, %v11569_v32  ;;  %v7898_v51 = vld [vmem:[#allocation9 + $0x478] sm:$0xff] }
 0x687   :  { %11434 = vmatprep.mubr.bf16.mxu1 %v18935_v6  ;;  %14656 = vmatpush1.bf16.msra.mxu0 %v17627_v50  ;;  %v11110_v30 = vpop.f32.mrf.mxu1  ;;  %v19058_v21 = vpop.f32.mrf.mxu0  ;;  %v17233_v6 = vcombine.low %v7926_v7, %v7930_v12  ;;  %v7894_v50 = vld [vmem:[#allocation9 + $0x458] sm:$0xff]  ;;  %v11553_v7 = vld [vmem:[#allocation12 + $0x60] sm:$0xff]  ;;  %v17209_v12 = vcombine.low %v7902_v60, %v7906_v47 }
 0x688   :  { %14687 = vmatprep.mubr.bf16.mxu0 %v19052_v11  ;;  %v19061_v13 = vadd.f32 %v11110_v30, %v11070_v4  ;;  %11404 = vmatprep.subr.bf16.mxu1 %v17242_v2  ;;  %v11549_v2 = vld [vmem:[#allocation12 + $0x40] sm:$0xff]  ;;  %v17587_v4 = vcombine.low %v11557_v3, %v11561_v45  ;;  %v17202_v25 = vcombine.high %v7894_v50, %v7898_v51 }
 0x689   :  { %v11112_v41 = vpop.f32.mrf.mxu1  ;;  %v11235_v15 = vpop.f32.mrf.mxu0  ;;  %14657 = vmatprep.subr.bf16.mxu0 %v17620_v55  ;;  %v17580_v55 = vcombine.high %v11549_v2, %v11553_v7  ;;  %v11545_v30 = vld [vmem:[#allocation12 + $0x20] sm:$0xff] }
 0x68a   :  { %11405 = vmatpush1.bf16.msra.mxu1 %v17241_v40  ;;  %v11541_v40 = vld [vmem:[#allocation12] sm:$0xff]  ;;  %v8010_v41 = vld [vmem:[#allocation9 + $0x7f8] sm:$0xff] }
 0x68b   :  { %14658 = vmatpush1.bf16.msra.mxu0 %v17619_v24  ;;  %v11113_v42 = vpop.f32.mrf.mxu1  ;;  %v11236_v27 = vpop.f32.mrf.mxu0  ;;  %11406 = vmatprep.subr.bf16.mxu1 %v17234_v33  ;;  %v17201_v24 = vcombine.low %v7894_v50, %v7898_v51  ;;  %v17579_v33 = vcombine.low %v11549_v2, %v11553_v7  ;;  %v17572_v53 = vcombine.high %v11541_v40, %v11545_v30  ;;  %v11661_v15 = vld [vmem:[#allocation12 + $0x3c0] sm:$0xff] }
 0x68c   :  { %14659 = vmatprep.subr.bf16.mxu0 %v17612_v1  ;;  %v17194_v1 = vcombine.high %v7886_v23, %v7890_v44  ;;  %v17314_v42 = vcombine.high %v8006_v28, %v8010_v41  ;;  %v17692_v27 = vcombine.high %v11661_v15, %v11665_v56  ;;  %v17313_v16 = vcombine.low %v8006_v28, %v8010_v41  ;;  %v11649_v60 = vld [vmem:[#allocation12 + $0x360] sm:$0xff] }
 0x68d   :  { %v17691_v62 = vcombine.low %v11661_v15, %v11665_v56  ;;  %v11641_v50 = vld [vmem:[#allocation12 + $0x320] sm:$0xff] }
 0x68e   :  { %11407 = vmatpush1.bf16.msra.mxu1 %v17233_v6  ;;  %v17571_v6 = vcombine.low %v11541_v40, %v11545_v30  ;;  %v11633_v23 = vld [vmem:[#allocation12 + $0x2e0] sm:$0xff] }
 0x68f   :  { %14660 = vmatpush1.bf16.msra.mxu0 %v17611_v39  ;;  %11408 = vmatprep.subr.bf16.mxu1 %v17226_v8  ;;  %v7998_v39 = vld [vmem:[#allocation9 + $0x798] sm:$0xff]  ;;  %v11625_v28 = vld [vmem:[#allocation12 + $0x2a0] sm:$0xff] }
 0x690   :  { %14661 = vmatprep.subr.bf16.mxu0 %v17604_v26  ;;  %v8002_v8 = vld [vmem:[#allocation9 + $0x7b8] sm:$0xff]  ;;  %v11653_v26 = vld [vmem:[#allocation12 + $0x380] sm:$0xff] }
 0x691   :  { %v17306_v32 = vcombine.high %v7998_v39, %v8002_v8  ;;  %v17305_v47 = vcombine.low %v7998_v39, %v8002_v8  ;;  %v17683_v3 = vcombine.low %v11653_v26, %v11657_v57  ;;  %v11617_v39 = vld [vmem:[#allocation12 + $0x260] sm:$0xff] }
 0x692   :  { %11409 = vmatpush1.bf16.msra.mxu1 %v17225_v36  ;;  %v17684_v36 = vcombine.high %v11653_v26, %v11657_v57 }
 0x693   :  { %14662 = vmatpush1.bf16.msra.mxu0 %v17603_v31  ;;  %11410 = vmatprep.subr.bf16.mxu1 %v17218_v29  ;;  %v7990_v31 = vld [vmem:[#allocation9 + $0x758] sm:$0xff] }
 0x694   :  { %14663 = vmatprep.subr.bf16.mxu0 %v17596_v20  ;;  %v7994_v29 = vld [vmem:[#allocation9 + $0x778] sm:$0xff]  ;;  %v11645_v20 = vld [vmem:[#allocation12 + $0x340] sm:$0xff] }
 0x695   :  { %v17298_v45 = vcombine.high %v7990_v31, %v7994_v29  ;;  %v17297_v51 = vcombine.low %v7990_v31, %v7994_v29  ;;  %v17675_v2 = vcombine.low %v11645_v20, %v11649_v60  ;;  %v11609_v31 = vld [vmem:[#allocation12 + $0x220] sm:$0xff] }
 0x696   :  { %11411 = vmatpush1.bf16.msra.mxu1 %v17217_v46  ;;  %v17676_v46 = vcombine.high %v11645_v20, %v11649_v60 }
 0x697   :  { %14664 = vmatpush1.bf16.msra.mxu0 %v17595_v17  ;;  %11412 = vmatprep.subr.bf16.mxu1 %v17210_v38  ;;  %v7982_v17 = vld [vmem:[#allocation9 + $0x718] sm:$0xff] }
 0x698   :  { %14665 = vmatprep.subr.bf16.mxu0 %v17588_v19  ;;  %v7986_v38 = vld [vmem:[#allocation9 + $0x738] sm:$0xff]  ;;  %v11637_v19 = vld [vmem:[#allocation12 + $0x300] sm:$0xff] }
 0x699   :  { %v17290_v7 = vcombine.high %v7982_v17, %v7986_v38  ;;  %v17289_v44 = vcombine.low %v7982_v17, %v7986_v38  ;;  %v17667_v40 = vcombine.low %v11637_v19, %v11641_v50  ;;  %v11857_v17 = vld [vmem:[#allocation12 + $0x9e0] sm:$0xff] }
 0x69a   :  { %11413 = vmatpush1.bf16.msra.mxu1 %v17209_v12  ;;  %v17668_v12 = vcombine.high %v11637_v19, %v11641_v50 }
 0x69b   :  { %14666 = vmatpush1.bf16.msra.mxu0 %v17587_v4  ;;  %11414 = vmatprep.subr.bf16.mxu1 %v17202_v25  ;;  %v7974_v4 = vld [vmem:[#allocation9 + $0x6d8] sm:$0xff] }
 0x69c   :  { %14667 = vmatprep.subr.bf16.mxu0 %v17580_v55  ;;  %v7978_v25 = vld [vmem:[#allocation9 + $0x6f8] sm:$0xff]  ;;  %v11629_v55 = vld [vmem:[#allocation12 + $0x2c0] sm:$0xff] }
 0x69d   :  { %v17282_v30 = vcombine.high %v7974_v4, %v7978_v25  ;;  %v17281_v41 = vcombine.low %v7974_v4, %v7978_v25  ;;  %v17659_v15 = vcombine.low %v11629_v55, %v11633_v23  ;;  %v11845_v25 = vld [vmem:[#allocation12 + $0x980] sm:$0xff] }
 0x69e   :  { %11415 = vmatpush1.bf16.msra.mxu1 %v17201_v24  ;;  %v17660_v24 = vcombine.high %v11629_v55, %v11633_v23  ;;  %v11849_v55 = vld [vmem:[#allocation12 + $0x9a0] sm:$0xff] }
 0x69f   :  { %14668 = vmatpush1.bf16.msra.mxu0 %v17579_v33  ;;  %11416 = vmatprep.subr.bf16.mxu1 %v17194_v1  ;;  %v7966_v33 = vld [vmem:[#allocation9 + $0x698] sm:$0xff] }
 0x6a0   :  { %14669 = vmatprep.subr.bf16.mxu0 %v17572_v53  ;;  %v7970_v1 = vld [vmem:[#allocation9 + $0x6b8] sm:$0xff]  ;;  %v11621_v53 = vld [vmem:[#allocation12 + $0x280] sm:$0xff] }
 0x6a1   :  { %v17274_v56 = vcombine.high %v7966_v33, %v7970_v1  ;;  %v17273_v8 = vcombine.low %v7966_v33, %v7970_v1  ;;  %v17651_v26 = vcombine.low %v11621_v53, %v11625_v28  ;;  %v17876_v1 = vcombine.high %v11845_v25, %v11849_v55 }
 0x6a2   :  { %11417 = vmatpush1.bf16.msra.mxu1 %v17193_v58  ;;  %v17652_v58 = vcombine.high %v11621_v53, %v11625_v28 }
 0x6a3   :  { %14670 = vmatpush1.bf16.msra.mxu0 %v17571_v6  ;;  %11418 = vmatprep.subr.bf16.mxu1 %v17314_v42  ;;  %v7958_v6 = vld [vmem:[#allocation9 + $0x658] sm:$0xff] }
 0x6a4   :  { %14671 = vmatprep.subr.bf16.mxu0 %v17692_v27  ;;  %v7962_v42 = vld [vmem:[#allocation9 + $0x678] sm:$0xff]  ;;  %v11613_v27 = vld [vmem:[#allocation12 + $0x240] sm:$0xff] }
 0x6a5   :  { %v17266_v57 = vcombine.high %v7958_v6, %v7962_v42  ;;  %v17265_v29 = vcombine.low %v7958_v6, %v7962_v42  ;;  %v17643_v20 = vcombine.low %v11613_v27, %v11617_v39  ;;  %v8178_v6 = vld [vmem:[#allocation9 + $0xd38] sm:$0xff]  ;;  %v17875_v42 = vcombine.low %v11845_v25, %v11849_v55 }
 0x6a6   :  { %11419 = vmatpush2.bf16.msra.mxu1 %v17313_v16  ;;  %v17644_v16 = vcombine.high %v11613_v27, %v11617_v39  ;;  %v8150_v55 = vld [vmem:[#allocation9 + $0xc58] sm:$0xff] }
 0x6a7   :  { %14672 = vmatpush2.bf16.msra.mxu0 %v17691_v62  ;;  %11420 = vmatprep.subr.bf16.mxu1 %v17306_v32  ;;  %v7950_v62 = vld [vmem:[#allocation9 + $0x618] sm:$0xff] }
 0x6a8   :  { %14673 = vmatprep.subr.bf16.mxu0 %v17684_v36  ;;  %v7954_v32 = vld [vmem:[#allocation9 + $0x638] sm:$0xff]  ;;  %v11605_v36 = vld [vmem:[#allocation12 + $0x200] sm:$0xff] }
 0x6a9   :  { %v17258_v60 = vcombine.high %v7950_v62, %v7954_v32  ;;  %v17257_v38 = vcombine.low %v7950_v62, %v7954_v32  ;;  %v17635_v19 = vcombine.low %v11605_v36, %v11609_v31 }
 0x6aa   :  { %11421 = vmatpush2.bf16.msra.mxu1 %v17305_v47  ;;  %v17636_v47 = vcombine.high %v11605_v36, %v11609_v31  ;;  %v8166_v36 = vld [vmem:[#allocation9 + $0xcd8] sm:$0xff] }
 0x6ab   :  { %14674 = vmatpush2.bf16.msra.mxu0 %v17683_v3  ;;  %11422 = vmatprep.subr.bf16.mxu1 %v17298_v45  ;;  %v8198_v3 = vld [vmem:[#allocation9 + $0xdd8] sm:$0xff] }
 0x6ac   :  { %14675 = vmatprep.subr.bf16.mxu0 %v17676_v46  ;;  %v8202_v45 = vld [vmem:[#allocation9 + $0xdf8] sm:$0xff]  ;;  %v11853_v46 = vld [vmem:[#allocation12 + $0x9c0] sm:$0xff] }
 0x6ad   :  { %v17506_v50 = vcombine.high %v8198_v3, %v8202_v45  ;;  %v17505_v4 = vcombine.low %v8198_v3, %v8202_v45  ;;  %v17883_v33 = vcombine.low %v11853_v46, %v11857_v17  ;;  %v8170_v31 = vld [vmem:[#allocation9 + $0xcf8] sm:$0xff]  ;;  %v11821_v45 = vld [vmem:[#allocation12 + $0x8c0] sm:$0xff] }
 0x6ae   :  { %11423 = vmatpush2.bf16.msra.mxu1 %v17297_v51  ;;  %v11525_v51 = vmax.f32 %v19031_v34, 0.0 }
 0x6af   :  { %14676 = vmatpush2.bf16.msra.mxu0 %v17675_v2  ;;  %11424 = vmatprep.subr.bf16.mxu1 %v17290_v7  ;;  %v8190_v2 = vld [vmem:[#allocation9 + $0xd98] sm:$0xff] }
 0x6b0   :  { %14677 = vmatprep.subr.bf16.mxu0 %v17668_v12  ;;  %v8194_v7 = vld [vmem:[#allocation9 + $0xdb8] sm:$0xff]  ;;  %v17884_v12 = vcombine.high %v11853_v46, %v11857_v17  ;;  %v11825_v46 = vld [vmem:[#allocation12 + $0x8e0] sm:$0xff] }
 0x6b1   :  { %v17498_v23 = vcombine.high %v8190_v2, %v8194_v7 }
 0x6b2   :  { %11425 = vmatpush2.bf16.msra.mxu1 %v17289_v44  ;;  %v19064_v44 = vpack.c.bf16 %v11525_v51, %v11525_v51 }
 0x6b3   :  { %14678 = vmatpush2.bf16.msra.mxu0 %v17667_v40  ;;  %11426 = vmatprep.subr.bf16.mxu1 %v17282_v30  ;;  %v11150_v40 = vadd.f32 %v19026_v49, %v19054_v14  ;;  %v8182_v30 = vld [vmem:[#allocation9 + $0xd58] sm:$0xff] }
 0x6b4   :  { %14679 = vmatprep.subr.bf16.mxu0 %v17660_v24  ;;  %v8186_v24 = vld [vmem:[#allocation9 + $0xd78] sm:$0xff] }
 0x6b5   :  { %v17490_v14 = vcombine.high %v8182_v30, %v8186_v24 }
 0x6b6   :  { %11427 = vmatpush2.bf16.msra.mxu1 %v17281_v41  ;;  %v17497_v41 = vcombine.low %v8190_v2, %v8194_v7  ;;  %v17852_v2 = vcombine.high %v11821_v45, %v11825_v46  ;;  %v17473_v7 = vcombine.low %v8166_v36, %v8170_v31 }
 0x6b7   :  { %14680 = vmatpush2.bf16.msra.mxu0 %v17659_v15  ;;  %11428 = vmatprep.subr.bf16.mxu1 %v17274_v56  ;;  %v11837_v15 = vld [vmem:[#allocation12 + $0x940] sm:$0xff] }
 0x6b8   :  { %14681 = vmatprep.subr.bf16.mxu0 %v17652_v58  ;;  %v11841_v56 = vld [vmem:[#allocation12 + $0x960] sm:$0xff] }
 0x6b9   :  { %v17868_v39 = vcombine.high %v11837_v15, %v11841_v56 }
 0x6ba   :  { %11429 = vmatpush2.bf16.msra.mxu1 %v17273_v8 }
 0x6bb   :  { %14682 = vmatpush2.bf16.msra.mxu0 %v17651_v26  ;;  %11430 = vmatprep.subr.bf16.mxu1 %v17266_v57  ;;  %v17489_v26 = vcombine.low %v8182_v30, %v8186_v24  ;;  %v11829_v57 = vld [vmem:[#allocation12 + $0x900] sm:$0xff] }
 0x6bc   :  { %14683 = vmatprep.subr.bf16.mxu0 %v17644_v16  ;;  %v11833_v16 = vld [vmem:[#allocation12 + $0x920] sm:$0xff] }
 0x6bd   :  { %v17859_v51 = vcombine.low %v11829_v57, %v11833_v16 }
 0x6be   :  { %11431 = vmatpush2.bf16.msra.mxu1 %v17265_v29  ;;  %v17867_v29 = vcombine.low %v11837_v15, %v11841_v56  ;;  %v8146_v15 = vld [vmem:[#allocation9 + $0xc38] sm:$0xff] }
 0x6bf   :  { %14684 = vmatpush2.bf16.msra.mxu0 %v17643_v20  ;;  %11432 = vmatprep.subr.bf16.mxu1 %v17258_v60  ;;  %v17860_v20 = vcombine.high %v11829_v57, %v11833_v16  ;;  %v19079_v60 = vld [vmem:[#allocation12 + $0x1c8] sm:$0xff] }
 0x6c0   :  { %14685 = vmatprep.subr.bf16.mxu0 %v17636_v47  ;;  %v19081_v47 = vld [vmem:[#allocation12 + $0x1e8] sm:$0xff] }
 0x6c1   :  { %v17629_v17 = vcombine.low %v19079_v60, %v19081_v47 }
 0x6c2   :  { %11433 = vmatpush2.bf16.msra.mxu1 %v17257_v38  ;;  %v17474_v38 = vcombine.high %v8166_v36, %v8170_v31  ;;  %v8254_v36 = vld [vmem:[#allocation9 + $0xf98] sm:$0xff] }
 0x6c3   :  { %14686 = vmatpush2.bf16.msra.mxu0 %v17635_v19  ;;  %11484 = vmatprep.subr.bf16.mxu1 %v17506_v50  ;;  %v8158_v19 = vld [vmem:[#allocation9 + $0xc98] sm:$0xff] }
 0x6c4   :  { %14737 = vmatprep.subr.bf16.mxu0 %v17884_v12  ;;  %v8162_v50 = vld [vmem:[#allocation9 + $0xcb8] sm:$0xff]  ;;  %v11813_v12 = vld [vmem:[#allocation12 + $0x880] sm:$0xff] }
 0x6c5   :  { %v11190_v34 = vpop.f32.mrf.mxu1  ;;  %11435 = vmatmul.mubr.bf16.vlgmr.msra.gmra.mxu1 %v18956_v35  ;;  %v8174_v35 = vld [vmem:[#allocation9 + $0xd18] sm:$0xff]  ;;  %v17466_v25 = vcombine.high %v8158_v19, %v8162_v50  ;;  %v17465_v24 = vcombine.low %v8158_v19, %v8162_v50 }
 0x6c6   :  { %v19069_v53 = vadd.f32 %v11190_v34, %v11150_v40  ;;  %v19071_v28 = vpop.f32.mrf.mxu0  ;;  %14688 = vmatmul.mubr.bf16.vlgmr.msra.gmra.mxu0 %v19064_v44  ;;  %11485 = vmatpush1.bf16.msra.mxu1 %v17505_v4  ;;  %v17481_v3 = vcombine.low %v8174_v35, %v8178_v6  ;;  %v11817_v4 = vld [vmem:[#allocation12 + $0x8a0] sm:$0xff]  ;;  %v17851_v40 = vcombine.low %v11821_v45, %v11825_v46  ;;  %v8258_v31 = vld [vmem:[#allocation9 + $0xfb8] sm:$0xff] }
 0x6c7   :  { %11516 = vmatprep.mubr.bf16.mxu1 %v18994_v37  ;;  %v19075_v49 = vpop.f32.mrf.mxu1  ;;  %11486 = vmatprep.subr.bf16.mxu1 %v17498_v23  ;;  %v17482_v37 = vcombine.high %v8174_v35, %v8178_v6  ;;  %v8154_v23 = vld [vmem:[#allocation9 + $0xc78] sm:$0xff]  ;;  %v17844_v30 = vcombine.high %v11813_v12, %v11817_v4  ;;  %v11809_v34 = vld [vmem:[#allocation12 + $0x860] sm:$0xff]  ;;  %v17843_v56 = vcombine.low %v11813_v12, %v11817_v4 }
 0x6c8   :  { %v19077_v58 = vpop.f32.mrf.mxu0  ;;  %14738 = vmatpush1.bf16.msra.mxu0 %v17883_v33  ;;  %v11805_v33 = vld [vmem:[#allocation12 + $0x840] sm:$0xff]  ;;  %v17457_v35 = vcombine.low %v8150_v55, %v8154_v23  ;;  %v8246_v19 = vld [vmem:[#allocation9 + $0xf58] sm:$0xff] }
 0x6c9   :  { %v11194_v27 = vpop.f32.mrf.mxu1  ;;  %14739 = vmatprep.subr.bf16.mxu0 %v17876_v1  ;;  %v17458_v1 = vcombine.high %v8150_v55, %v8154_v23  ;;  %v11797_v6 = vld [vmem:[#allocation12 + $0x800] sm:$0xff]  ;;  %v8250_v50 = vld [vmem:[#allocation9 + $0xf78] sm:$0xff] }
 0x6ca   :  { %v11317_v8 = vpop.f32.mrf.mxu0  ;;  %11487 = vmatpush1.bf16.msra.mxu1 %v17497_v41  ;;  %v8142_v41 = vld [vmem:[#allocation9 + $0xc18] sm:$0xff]  ;;  %v11909_v45 = vld [vmem:[#allocation12 + $0xb80] sm:$0xff] }
 0x6cb   :  { %v11195_v62 = vpop.f32.mrf.mxu1  ;;  %11488 = vmatprep.subr.bf16.mxu1 %v17490_v14  ;;  %v17836_v14 = vcombine.high %v11805_v33, %v11809_v34  ;;  %v17450_v27 = vcombine.high %v8142_v41, %v8146_v15  ;;  %v8266_v8 = vld [vmem:[#allocation9 + $0xff8] sm:$0xff]  ;;  %v17449_v16 = vcombine.low %v8142_v41, %v8146_v15  ;;  %v11913_v46 = vld [vmem:[#allocation12 + $0xba0] sm:$0xff] }
 0x6cc   :  { %v11318_v32 = vpop.f32.mrf.mxu0  ;;  %14740 = vmatpush1.bf16.msra.mxu0 %v17875_v42  ;;  %v11801_v42 = vld [vmem:[#allocation12 + $0x820] sm:$0xff]  ;;  %v8238_v55 = vld [vmem:[#allocation9 + $0xf18] sm:$0xff] }
 0x6cd   :  { %14741 = vmatprep.subr.bf16.mxu0 %v17868_v39  ;;  %v8262_v39 = vld [vmem:[#allocation9 + $0xfd8] sm:$0xff]  ;;  %v17828_v57 = vcombine.high %v11797_v6, %v11801_v42  ;;  %v11917_v62 = vld [vmem:[#allocation12 + $0xbc0] sm:$0xff] }
 0x6ce   :  { %11489 = vmatpush1.bf16.msra.mxu1 %v17489_v26  ;;  %v17835_v26 = vcombine.low %v11805_v33, %v11809_v34  ;;  %v17570_v32 = vcombine.high %v8262_v39, %v8266_v8  ;;  %v11901_v12 = vld [vmem:[#allocation12 + $0xb40] sm:$0xff]  ;;  %v8242_v23 = vld [vmem:[#allocation9 + $0xf38] sm:$0xff] }
 0x6cf   :  { %11490 = vmatprep.subr.bf16.mxu1 %v17482_v37  ;;  %v11921_v37 = vld [vmem:[#allocation12 + $0xbe0] sm:$0xff]  ;;  %v8230_v41 = vld [vmem:[#allocation9 + $0xed8] sm:$0xff] }
 0x6d0   :  { %14742 = vmatpush1.bf16.msra.mxu0 %v17867_v29  ;;  %v17827_v29 = vcombine.low %v11797_v6, %v11801_v42  ;;  %v11905_v4 = vld [vmem:[#allocation12 + $0xb60] sm:$0xff]  ;;  %v8234_v15 = vld [vmem:[#allocation9 + $0xef8] sm:$0xff] }
 0x6d1   :  { %14743 = vmatprep.subr.bf16.mxu0 %v17860_v20  ;;  %v17948_v20 = vcombine.high %v11917_v62, %v11921_v37  ;;  %v11893_v33 = vld [vmem:[#allocation12 + $0xb00] sm:$0xff] }
 0x6d2   :  { %11491 = vmatpush1.bf16.msra.mxu1 %v17481_v3  ;;  %v17569_v3 = vcombine.low %v8262_v39, %v8266_v8  ;;  %v11897_v34 = vld [vmem:[#allocation12 + $0xb20] sm:$0xff]  ;;  %v8222_v39 = vld [vmem:[#allocation9 + $0xe98] sm:$0xff] }
 0x6d3   :  { %11492 = vmatprep.subr.bf16.mxu1 %v17474_v38  ;;  %v17562_v38 = vcombine.high %v8254_v36, %v8258_v31  ;;  %v11885_v6 = vld [vmem:[#allocation12 + $0xac0] sm:$0xff]  ;;  %v8226_v8 = vld [vmem:[#allocation9 + $0xeb8] sm:$0xff] }
 0x6d4   :  { %14744 = vmatpush1.bf16.msra.mxu0 %v17859_v51  ;;  %v17947_v51 = vcombine.low %v11917_v62, %v11921_v37  ;;  %v11889_v42 = vld [vmem:[#allocation12 + $0xae0] sm:$0xff] }
 0x6d5   :  { %14745 = vmatprep.subr.bf16.mxu0 %v17852_v2  ;;  %v17940_v2 = vcombine.high %v11909_v45, %v11913_v46  ;;  %v11877_v62 = vld [vmem:[#allocation12 + $0xa80] sm:$0xff] }
 0x6d6   :  { %11493 = vmatpush1.bf16.msra.mxu1 %v17473_v7  ;;  %v17561_v7 = vcombine.low %v8254_v36, %v8258_v31  ;;  %v11881_v37 = vld [vmem:[#allocation12 + $0xaa0] sm:$0xff]  ;;  %v8214_v36 = vld [vmem:[#allocation9 + $0xe58] sm:$0xff] }
 0x6d7   :  { %11494 = vmatprep.subr.bf16.mxu1 %v17466_v25  ;;  %v17554_v25 = vcombine.high %v8246_v19, %v8250_v50  ;;  %v8218_v31 = vld [vmem:[#allocation9 + $0xe78] sm:$0xff] }
 0x6d8   :  { %14746 = vmatpush1.bf16.msra.mxu0 %v17851_v40  ;;  %v17939_v40 = vcombine.low %v11909_v45, %v11913_v46  ;;  %v11869_v45 = vld [vmem:[#allocation12 + $0xa40] sm:$0xff] }
 0x6d9   :  { %14747 = vmatprep.subr.bf16.mxu0 %v17844_v30  ;;  %v17932_v30 = vcombine.high %v11901_v12, %v11905_v4  ;;  %v11873_v46 = vld [vmem:[#allocation12 + $0xa60] sm:$0xff] }
 0x6da   :  { %11495 = vmatpush1.bf16.msra.mxu1 %v17465_v24  ;;  %v17553_v24 = vcombine.low %v8246_v19, %v8250_v50  ;;  %v8206_v19 = vld [vmem:[#allocation9 + $0xe18] sm:$0xff] }
 0x6db   :  { %11496 = vmatprep.subr.bf16.mxu1 %v17458_v1  ;;  %v17546_v1 = vcombine.high %v8238_v55, %v8242_v23  ;;  %v8210_v50 = vld [vmem:[#allocation9 + $0xe38] sm:$0xff] }
 0x6dc   :  { %14748 = vmatpush1.bf16.msra.mxu0 %v17843_v56  ;;  %v17931_v56 = vcombine.low %v11901_v12, %v11905_v4  ;;  %v17521_v12 = vcombine.low %v8214_v36, %v8218_v31  ;;  %v11861_v4 = vld [vmem:[#allocation12 + $0xa00] sm:$0xff] }
 0x6dd   :  { %14749 = vmatprep.subr.bf16.mxu0 %v17836_v14  ;;  %v17924_v14 = vcombine.high %v11893_v33, %v11897_v34 }
 0x6de   :  { %11497 = vmatpush1.bf16.msra.mxu1 %v17457_v35  ;;  %v17545_v35 = vcombine.low %v8238_v55, %v8242_v23  ;;  %v17514_v55 = vcombine.high %v8206_v19, %v8210_v50 }
 0x6df   :  { %11498 = vmatprep.subr.bf16.mxu1 %v17450_v27  ;;  %v17538_v27 = vcombine.high %v8230_v41, %v8234_v15 }
 0x6e0   :  { %14750 = vmatpush1.bf16.msra.mxu0 %v17835_v26  ;;  %v17923_v26 = vcombine.low %v11893_v33, %v11897_v34  ;;  %v17513_v34 = vcombine.low %v8206_v19, %v8210_v50  ;;  %v11693_v50 = vld [vmem:[#allocation12 + $0x4c0] sm:$0xff] }
 0x6e1   :  { %14751 = vmatprep.subr.bf16.mxu0 %v17828_v57  ;;  %v17916_v57 = vcombine.high %v11885_v6, %v11889_v42 }
 0x6e2   :  { %11499 = vmatpush1.bf16.msra.mxu1 %v17449_v16  ;;  %v17537_v16 = vcombine.low %v8230_v41, %v8234_v15  ;;  %v11717_v41 = vld [vmem:[#allocation12 + $0x580] sm:$0xff] }
 0x6e3   :  { %11500 = vmatprep.subr.bf16.mxu1 %v17570_v32  ;;  %v17530_v32 = vcombine.high %v8222_v39, %v8226_v8  ;;  %v11721_v15 = vld [vmem:[#allocation12 + $0x5a0] sm:$0xff] }
 0x6e4   :  { %14752 = vmatpush1.bf16.msra.mxu0 %v17827_v29  ;;  %v17915_v29 = vcombine.low %v11885_v6, %v11889_v42  ;;  %v17748_v6 = vcombine.high %v11717_v41, %v11721_v15 }
 0x6e5   :  { %14753 = vmatprep.subr.bf16.mxu0 %v17948_v20  ;;  %v17908_v20 = vcombine.high %v11877_v62, %v11881_v37 }
 0x6e6   :  { %11501 = vmatpush2.bf16.msra.mxu1 %v17569_v3  ;;  %v17529_v3 = vcombine.low %v8222_v39, %v8226_v8  ;;  %v11709_v39 = vld [vmem:[#allocation12 + $0x540] sm:$0xff] }
 0x6e7   :  { %11502 = vmatprep.subr.bf16.mxu1 %v17562_v38  ;;  %v17522_v38 = vcombine.high %v8214_v36, %v8218_v31  ;;  %v11713_v8 = vld [vmem:[#allocation12 + $0x560] sm:$0xff] }
 0x6e8   :  { %14754 = vmatpush2.bf16.msra.mxu0 %v17947_v51  ;;  %v17907_v51 = vcombine.low %v11877_v62, %v11881_v37  ;;  %v11701_v31 = vld [vmem:[#allocation12 + $0x500] sm:$0xff] }
 0x6e9   :  { %14755 = vmatprep.subr.bf16.mxu0 %v17940_v2  ;;  %v17900_v2 = vcombine.high %v11869_v45, %v11873_v46 }
 0x6ea   :  { %11503 = vmatpush2.bf16.msra.mxu1 %v17561_v7  ;;  %v11152_v7 = vadd.f32 %v19034_v63, %v19061_v13  ;;  %v8288_v63 = vrot.slane %v19041_v43, %v18763_v54 }
 0x6eb   :  { %11504 = vmatprep.subr.bf16.mxu1 %v17554_v25  ;;  %v11865_v25 = vld [vmem:[#allocation12 + $0xa20] sm:$0xff] }
 0x6ec   :  { %14756 = vmatpush2.bf16.msra.mxu0 %v17939_v40  ;;  %v11193_v23 = vadd.f32 %v19075_v49, %v11152_v7  ;;  %v11725_v40 = vld [vmem:[#allocation12 + $0x5c0] sm:$0xff]  ;;  %v17892_v33 = vcombine.high %v11861_v4, %v11865_v25  ;;  %v17630_v49 = vcombine.high %v19079_v60, %v19081_v47  ;;  %v11232_v42 = vadd.f32 %v19049_v18, %v8288_v63  ;;  %v11566_v47 = vld [vmem:[#allocation12 + $0xc8] sm:$0xff] }
 0x6ed   :  { %14757 = vmatprep.subr.bf16.mxu0 %v17932_v30  ;;  %v11729_v30 = vld [vmem:[#allocation12 + $0x5e0] sm:$0xff]  ;;  %v17740_v18 = vcombine.high %v11709_v39, %v11713_v8 }
 0x6ee   :  { %11505 = vmatpush2.bf16.msra.mxu1 %v17553_v24  ;;  %v17899_v24 = vcombine.low %v11869_v45, %v11873_v46  ;;  %v11528_v13 = vmax.f32 %v11193_v23, 0.0  ;;  %v11681_v23 = vld [vmem:[#allocation12 + $0x460] sm:$0xff] }
 0x6ef   :  { %11506 = vmatprep.subr.bf16.mxu1 %v17546_v1  ;;  %v17756_v1 = vcombine.high %v11725_v40, %v11729_v30  ;;  %v11793_v63 = vld [vmem:[#allocation12 + $0x7e0] sm:$0xff] }
 0x6f0   :  { %14758 = vmatpush2.bf16.msra.mxu0 %v17931_v56  ;;  %v17891_v56 = vcombine.low %v11861_v4, %v11865_v25 }
 0x6f1   :  { %14759 = vmatprep.subr.bf16.mxu0 %v17924_v14  ;;  %v8292_v14 = vrot.slane %v19041_v43, %v18785_v9  ;;  %v17747_v43 = vcombine.low %v11717_v41, %v11721_v15  ;;  %v11781_v15 = vld [vmem:[#allocation12 + $0x780] sm:$0xff] }
 0x6f2   :  { %11507 = vmatpush2.bf16.msra.mxu1 %v17545_v35  ;;  %v17755_v35 = vcombine.low %v11725_v40, %v11729_v30  ;;  %v11669_v30 = vld [vmem:[#allocation12 + $0x400] sm:$0xff] }
 0x6f3   :  { %11508 = vmatprep.subr.bf16.mxu1 %v17538_v27  ;;  %v19095_v27 = vpack.c.bf16 %v11528_v13, %v11528_v13 }
 0x6f4   :  { %14760 = vmatpush2.bf16.msra.mxu0 %v17923_v26 }
 0x6f5   :  { %14761 = vmatprep.subr.bf16.mxu0 %v17916_v57  ;;  %v11234_v57 = vadd.f32 %v19058_v21, %v8292_v14 }
 0x6f6   :  { %11509 = vmatpush2.bf16.msra.mxu1 %v17537_v16 }
 0x6f7   :  { %11510 = vmatprep.subr.bf16.mxu1 %v17530_v32 }
 0x6f8   :  { %14762 = vmatpush2.bf16.msra.mxu0 %v17915_v29  ;;  %v11705_v29 = vld [vmem:[#allocation12 + $0x520] sm:$0xff] }
 0x6f9   :  { %14763 = vmatprep.subr.bf16.mxu0 %v17908_v20 }
 0x6fa   :  { %11511 = vmatpush2.bf16.msra.mxu1 %v17529_v3  ;;  %v17739_v3 = vcombine.low %v11709_v39, %v11713_v8  ;;  %v11765_v8 = vld [vmem:[#allocation12 + $0x700] sm:$0xff] }
 0x6fb   :  { %11512 = vmatprep.subr.bf16.mxu1 %v17522_v38  ;;  %v17732_v38 = vcombine.high %v11701_v31, %v11705_v29 }
 0x6fc   :  { %14764 = vmatpush2.bf16.msra.mxu0 %v17907_v51  ;;  %v11697_v51 = vld [vmem:[#allocation12 + $0x4e0] sm:$0xff] }
 0x6fd   :  { %14765 = vmatprep.subr.bf16.mxu0 %v17900_v2  ;;  %v17731_v2 = vcombine.low %v11701_v31, %v11705_v29  ;;  %v17724_v7 = vcombine.high %v11693_v50, %v11697_v51  ;;  %v17723_v4 = vcombine.low %v11693_v50, %v11697_v51  ;;  %v11749_v31 = vld [vmem:[#allocation12 + $0x680] sm:$0xff] }
 0x6fe   :  { %11513 = vmatpush2.bf16.msra.mxu1 %v17521_v12  ;;  %v11685_v12 = vld [vmem:[#allocation12 + $0x480] sm:$0xff] }
 0x6ff   :  { %11514 = vmatprep.subr.bf16.mxu1 %v17514_v55  ;;  %v11677_v55 = vld [vmem:[#allocation12 + $0x440] sm:$0xff] }
 0x700   :  { %14766 = vmatpush2.bf16.msra.mxu0 %v17899_v24  ;;  %v17708_v40 = vcombine.high %v11677_v55, %v11681_v23  ;;  %v11673_v24 = vld [vmem:[#allocation12 + $0x420] sm:$0xff] }
 0x701   :  { %14767 = vmatprep.subr.bf16.mxu0 %v17892_v33  ;;  %v17707_v33 = vcombine.low %v11677_v55, %v11681_v23  ;;  %v17699_v13 = vcombine.low %v11669_v30, %v11673_v24  ;;  %v11753_v29 = vld [vmem:[#allocation12 + $0x6a0] sm:$0xff] }
 0x702   :  { %11515 = vmatpush2.bf16.msra.mxu1 %v17513_v34  ;;  %v17700_v34 = vcombine.high %v11669_v30, %v11673_v24  ;;  %v11733_v50 = vld [vmem:[#allocation12 + $0x600] sm:$0xff] }
 0x703   :  { %14696 = vmatprep.subr.bf16.mxu1 %v17756_v1  ;;  %v11789_v1 = vld [vmem:[#allocation12 + $0x7c0] sm:$0xff] }
 0x704   :  { %14768 = vmatpush2.bf16.msra.mxu0 %v17891_v56  ;;  %v17820_v41 = vcombine.high %v11789_v1, %v11793_v63  ;;  %v11785_v56 = vld [vmem:[#allocation12 + $0x7a0] sm:$0xff] }
 0x705   :  { %v11272_v26 = vpop.f32.mrf.mxu1  ;;  %11517 = vmatmul.mubr.bf16.vlgmr.msra.gmra.mxu1 %v18996_v59  ;;  %14819 = vmatprep.subr.bf16.mxu0 %v17630_v49  ;;  %v17819_v49 = vcombine.low %v11789_v1, %v11793_v63  ;;  %v17812_v14 = vcombine.high %v11781_v15, %v11785_v56  ;;  %v11737_v51 = vld [vmem:[#allocation12 + $0x620] sm:$0xff] }
 0x706   :  { %v11273_v16 = vadd.f32 %v11272_v26, %v11232_v42  ;;  %v19099_v62 = vpop.f32.mrf.mxu0  ;;  %14697 = vmatpush1.bf16.msra.mxu1 %v17755_v35  ;;  %14728 = vmatprep.mubr.bf16.mxu1 %v19095_v27  ;;  %v11773_v35 = vld [vmem:[#allocation12 + $0x740] sm:$0xff]  ;;  %v17811_v42 = vcombine.low %v11781_v15, %v11785_v56 }
 0x707   :  { %v11274_v37 = vpop.f32.mrf.mxu1  ;;  %14698 = vmatprep.subr.bf16.mxu1 %v17748_v6  ;;  %v11777_v6 = vld [vmem:[#allocation12 + $0x760] sm:$0xff] }
 0x708   :  { %v11275_v32 = vadd.f32 %v11274_v37, %v11234_v57  ;;  %v19102_v36 = vpop.f32.mrf.mxu0  ;;  %v19105_v59 = vadd.f32 %v19071_v28, %v11273_v16  ;;  %v11689_v28 = vld [vmem:[#allocation12 + $0x4a0] sm:$0xff]  ;;  %v17804_v39 = vcombine.high %v11773_v35, %v11777_v6  ;;  %v17803_v57 = vcombine.low %v11773_v35, %v11777_v6 }
 0x709   :  { %v11276_v20 = vpop.f32.mrf.mxu1  ;;  %v17716_v25 = vcombine.high %v11685_v12, %v11689_v28  ;;  %v11769_v26 = vld [vmem:[#allocation12 + $0x720] sm:$0xff] }
 0x70a   :  { %v11399_v21 = vpop.f32.mrf.mxu0  ;;  %14699 = vmatpush1.bf16.msra.mxu1 %v17747_v43  ;;  %v19108_v45 = vadd.f32 %v19077_v58, %v11275_v32  ;;  %v17715_v58 = vcombine.low %v11685_v12, %v11689_v28  ;;  %v17796_v16 = vcombine.high %v11765_v8, %v11769_v26  ;;  %v11757_v43 = vld [vmem:[#allocation12 + $0x6c0] sm:$0xff] }
 0x70b   :  { %v11277_v46 = vpop.f32.mrf.mxu1  ;;  %14700 = vmatprep.subr.bf16.mxu1 %v17740_v18  ;;  %v11761_v37 = vld [vmem:[#allocation12 + $0x6e0] sm:$0xff]  ;;  %v17795_v18 = vcombine.low %v11765_v8, %v11769_v26  ;;  %v17780_v21 = vcombine.high %v11749_v31, %v11753_v29  ;;  %v11590_v26 = vld [vmem:[#allocation12 + $0x188] sm:$0xff] }
 0x70c   :  { %v11400_v19 = vpop.f32.mrf.mxu0  ;;  %v17788_v32 = vcombine.high %v11757_v43, %v11761_v37  ;;  %v17787_v20 = vcombine.low %v11757_v43, %v11761_v37  ;;  %v11745_v46 = vld [vmem:[#allocation12 + $0x660] sm:$0xff] }
 0x70d   :  { %v11981_v12 = vld [vmem:[#allocation12 + $0xdc0] sm:$0xff] }
 0x70e   :  { %14701 = vmatpush1.bf16.msra.mxu1 %v17739_v3  ;;  %v11741_v3 = vld [vmem:[#allocation12 + $0x640] sm:$0xff] }
 0x70f   :  { %14702 = vmatprep.subr.bf16.mxu1 %v17732_v38  ;;  %v17779_v38 = vcombine.low %v11749_v31, %v11753_v29  ;;  %v17772_v19 = vcombine.high %v11741_v3, %v11745_v46  ;;  %v11985_v28 = vld [vmem:[#allocation12 + $0xde0] sm:$0xff] }
 0x710   :  { %v18012_v55 = vcombine.high %v11981_v12, %v11985_v28  ;;  %v11973_v23 = vld [vmem:[#allocation12 + $0xd80] sm:$0xff] }
 0x711   :  { %v11961_v35 = vld [vmem:[#allocation12 + $0xd20] sm:$0xff] }
 0x712   :  { %14703 = vmatpush1.bf16.msra.mxu1 %v17731_v2  ;;  %v17771_v2 = vcombine.low %v11741_v3, %v11745_v46  ;;  %v11582_v3 = vld [vmem:[#allocation12 + $0x148] sm:$0xff] }
 0x713   :  { %14704 = vmatprep.subr.bf16.mxu1 %v17724_v7  ;;  %v17764_v7 = vcombine.high %v11733_v50, %v11737_v51  ;;  %v11586_v46 = vld [vmem:[#allocation12 + $0x168] sm:$0xff] }
 0x716   :  { %14705 = vmatpush1.bf16.msra.mxu1 %v17723_v4  ;;  %v17763_v4 = vcombine.low %v11733_v50, %v11737_v51 }
 0x717   :  { %14706 = vmatprep.subr.bf16.mxu1 %v17716_v25  ;;  %v11527_v25 = vmax.f32 %v19069_v53, 0.0 }
 0x719   :  { %v19111_v30 = vpack.c.bf16 %v11527_v25, %v11527_v25 }
 0x71a   :  { %14707 = vmatpush1.bf16.msra.mxu1 %v17715_v58  ;;  %v11977_v58 = vld [vmem:[#allocation12 + $0xda0] sm:$0xff] }
 0x71b   :  { %14708 = vmatprep.subr.bf16.mxu1 %v17708_v40  ;;  %v18011_v40 = vcombine.low %v11981_v12, %v11985_v28  ;;  %v18004_v24 = vcombine.high %v11973_v23, %v11977_v58  ;;  %v18003_v53 = vcombine.low %v11973_v23, %v11977_v58  ;;  %v17614_v12 = vcombine.high %v11582_v3, %v11586_v46  ;;  %v11574_v28 = vld [vmem:[#allocation12 + $0x108] sm:$0xff]  ;;  %v11933_v58 = vld [vmem:[#allocation12 + $0xc40] sm:$0xff] }
 0x71c   :  { %v17613_v23 = vcombine.low %v11582_v3, %v11586_v46 }
 0x71e   :  { %14709 = vmatpush1.bf16.msra.mxu1 %v17707_v33  ;;  %v11965_v33 = vld [vmem:[#allocation12 + $0xd40] sm:$0xff] }
 0x71f   :  { %14710 = vmatprep.subr.bf16.mxu1 %v17700_v34  ;;  %v11969_v34 = vld [vmem:[#allocation12 + $0xd60] sm:$0xff] }
 0x720   :  { %v17996_v15 = vcombine.high %v11965_v33, %v11969_v34 }
 0x722   :  { %14711 = vmatpush1.bf16.msra.mxu1 %v17699_v13 }
 0x723   :  { %14712 = vmatprep.subr.bf16.mxu1 %v17820_v41 }
 0x726   :  { %14713 = vmatpush2.bf16.msra.mxu1 %v17819_v49 }
 0x727   :  { %14714 = vmatprep.subr.bf16.mxu1 %v17812_v14  ;;  %v11957_v14 = vld [vmem:[#allocation12 + $0xd00] sm:$0xff] }
 0x728   :  { %v17988_v43 = vcombine.high %v11957_v14, %v11961_v35 }
 0x72a   :  { %14715 = vmatpush2.bf16.msra.mxu1 %v17811_v42 }
 0x72b   :  { %14716 = vmatprep.subr.bf16.mxu1 %v17804_v39 }
 0x72e   :  { %14717 = vmatpush2.bf16.msra.mxu1 %v17803_v57  ;;  %v11594_v57 = vld [vmem:[#allocation12 + $0x1a8] sm:$0xff] }
 0x72f   :  { %14718 = vmatprep.subr.bf16.mxu1 %v17796_v16  ;;  %v17622_v29 = vcombine.high %v11590_v26, %v11594_v57  ;;  %v17621_v51 = vcombine.low %v11590_v26, %v11594_v57  ;;  %v11554_v26 = vld [vmem:[#allocation12 + $0x68] sm:$0xff] }
 0x732   :  { %14719 = vmatpush2.bf16.msra.mxu1 %v17795_v18 }
 0x733   :  { %14720 = vmatprep.subr.bf16.mxu1 %v17788_v32  ;;  %v11949_v32 = vld [vmem:[#allocation12 + $0xcc0] sm:$0xff] }
 0x736   :  { %14721 = vmatpush2.bf16.msra.mxu1 %v17787_v20  ;;  %v19124_v20 = vld [vmem:[#allocation12 + $0x5c8] sm:$0xff] }
 0x737   :  { %14722 = vmatprep.subr.bf16.mxu1 %v17780_v21  ;;  %v19126_v21 = vld [vmem:[#allocation12 + $0x5e8] sm:$0xff] }
 0x73a   :  { %14723 = vmatpush2.bf16.msra.mxu1 %v17779_v38  ;;  %v17987_v38 = vcombine.low %v11957_v14, %v11961_v35 }
 0x73b   :  { %14724 = vmatprep.subr.bf16.mxu1 %v17772_v19  ;;  %v17757_v19 = vcombine.low %v19124_v20, %v19126_v21 }
 0x73e   :  { %14725 = vmatpush2.bf16.msra.mxu1 %v17771_v2  ;;  %v11941_v2 = vld [vmem:[#allocation12 + $0xc80] sm:$0xff] }
 0x73f   :  { %14726 = vmatprep.subr.bf16.mxu1 %v17764_v7  ;;  %v11945_v7 = vld [vmem:[#allocation12 + $0xca0] sm:$0xff] }
 0x742   :  { %14727 = vmatpush2.bf16.msra.mxu1 %v17763_v4  ;;  %v11578_v4 = vld [vmem:[#allocation12 + $0x128] sm:$0xff] }
 0x743   :  { %14778 = vmatprep.subr.bf16.mxu1 %v18012_v55  ;;  %v17972_v55 = vcombine.high %v11941_v2, %v11945_v7  ;;  %v17606_v60 = vcombine.high %v11574_v28, %v11578_v4 }
 0x745   :  { %v11354_v1 = vpop.f32.mrf.mxu1  ;;  %14729 = vmatmul.mubr.bf16.vlgmr.msra.gmra.mxu1 %v19111_v30 }
 0x746   :  { %v11355_v63 = vadd.f32 %v11354_v1, %v19105_v59  ;;  %v19115_v13 = vpop.f32.mrf.mxu0  ;;  %14779 = vmatpush1.bf16.msra.mxu1 %v18011_v40  ;;  %v17995_v59 = vcombine.low %v11965_v33, %v11969_v34  ;;  %v11937_v40 = vld [vmem:[#allocation12 + $0xc60] sm:$0xff]  ;;  %v17605_v34 = vcombine.low %v11574_v28, %v11578_v4 }
 0x747   :  { %v11356_v41 = vpop.f32.mrf.mxu1  ;;  %14780 = vmatprep.subr.bf16.mxu1 %v18004_v24  ;;  %v17971_v24 = vcombine.low %v11941_v2, %v11945_v7  ;;  %v17964_v33 = vcombine.high %v11933_v58, %v11937_v40  ;;  %v11925_v1 = vld [vmem:[#allocation12 + $0xc00] sm:$0xff]  ;;  %v11662_v7 = vld [vmem:[#allocation12 + $0x3c8] sm:$0xff] }
 0x748   :  { %v11357_v56 = vadd.f32 %v11356_v41, %v19108_v45  ;;  %v19118_v49 = vpop.f32.mrf.mxu0  ;;  %v11529_v6 = vmax.f32 %v11355_v63, 0.0  ;;  %v11953_v45 = vld [vmem:[#allocation12 + $0xce0] sm:$0xff]  ;;  %v11558_v41 = vld [vmem:[#allocation12 + $0x88] sm:$0xff] }
 0x749   :  { %v11358_v42 = vpop.f32.mrf.mxu1  ;;  %v17980_v50 = vcombine.high %v11949_v32, %v11953_v45  ;;  %v17979_v25 = vcombine.low %v11949_v32, %v11953_v45  ;;  %v11929_v63 = vld [vmem:[#allocation12 + $0xc20] sm:$0xff]  ;;  %v11542_v45 = vld [vmem:[#allocation12 + $0x8] sm:$0xff] }
 0x74a   :  { %v11530_v39 = vmax.f32 %v11357_v56, 0.0  ;;  %v11481_v8 = vpop.f32.mrf.mxu0  ;;  %14781 = vmatpush1.bf16.msra.mxu1 %v18003_v53  ;;  %v19122_v31 = vpack.c.bf16 %v11529_v6, %v11529_v6  ;;  %v17963_v56 = vcombine.low %v11933_v58, %v11937_v40  ;;  %v17956_v14 = vcombine.high %v11925_v1, %v11929_v63  ;;  %v12045_v6 = vld [vmem:[#allocation12 + $0xfc0] sm:$0xff]  ;;  %v11654_v40 = vld [vmem:[#allocation12 + $0x388] sm:$0xff] }
 0x74b   :  { %v11359_v16 = vpop.f32.mrf.mxu1  ;;  %14782 = vmatprep.subr.bf16.mxu1 %v17996_v15  ;;  %v11562_v15 = vld [vmem:[#allocation12 + $0xa8] sm:$0xff]  ;;  %v12049_v42 = vld [vmem:[#allocation12 + $0xfe0] sm:$0xff]  ;;  %v17955_v57 = vcombine.low %v11925_v1, %v11929_v63 }
 0x74c   :  { %v19120_v37 = vpack.c.bf16 %v11530_v39, %v11530_v39  ;;  %v11482_v18 = vpop.f32.mrf.mxu0  ;;  %v17590_v39 = vcombine.high %v11558_v41, %v11562_v15  ;;  %v11550_v8 = vld [vmem:[#allocation12 + $0x48] sm:$0xff]  ;;  %v17589_v16 = vcombine.low %v11558_v41, %v11562_v15  ;;  %v18075_v3 = vcombine.low %v12045_v6, %v12049_v42 }
 0x74d   :  { %v12041_v18 = vld [vmem:[#allocation12 + $0xfa0] sm:$0xff]  ;;  %v17582_v32 = vcombine.high %v11550_v8, %v11554_v26  ;;  %v11646_v63 = vld [vmem:[#allocation12 + $0x348] sm:$0xff] }
 0x74e   :  { %14769 = vmatprep.mubr.bf16.mxu0 %v19120_v37  ;;  %14783 = vmatpush1.bf16.msra.mxu1 %v17995_v59  ;;  %v18076_v59 = vcombine.high %v12045_v6, %v12049_v42  ;;  %v11638_v42 = vld [vmem:[#allocation12 + $0x308] sm:$0xff] }
 0x74f   :  { %14770 = vmatmul.mubr.bf16.vlgmr.msra.gmra.mxu0 %v19122_v31  ;;  %14784 = vmatprep.subr.bf16.mxu1 %v17988_v43  ;;  %v12037_v43 = vld [vmem:[#allocation12 + $0xf80] sm:$0xff] }
 0x750   :  { %14820 = vmatpush1.bf16.msra.mxu0 %v17629_v17  ;;  %14851 = vmatprep.mubr.bf16.mxu0 %v19052_v11  ;;  %v11570_v17 = vld [vmem:[#allocation12 + $0xe8] sm:$0xff]  ;;  %v18068_v46 = vcombine.high %v12037_v43, %v12041_v18  ;;  %v18067_v28 = vcombine.low %v12037_v43, %v12041_v18 }
 0x751   :  { %14821 = vmatprep.subr.bf16.mxu0 %v17622_v29  ;;  %v17598_v53 = vcombine.high %v11566_v47, %v11570_v17  ;;  %v17597_v35 = vcombine.low %v11566_v47, %v11570_v17  ;;  %v11546_v29 = vld [vmem:[#allocation12 + $0x28] sm:$0xff] }
 0x752   :  { %14785 = vmatpush1.bf16.msra.mxu1 %v17987_v38  ;;  %v17581_v38 = vcombine.low %v11550_v8, %v11554_v26  ;;  %v17574_v2 = vcombine.high %v11542_v45, %v11546_v29  ;;  %v11630_v18 = vld [vmem:[#allocation12 + $0x2c8] sm:$0xff] }
 0x753   :  { %14786 = vmatprep.subr.bf16.mxu1 %v17980_v50  ;;  %v12029_v50 = vld [vmem:[#allocation12 + $0xf40] sm:$0xff] }
 0x754   :  { %14822 = vmatpush1.bf16.msra.mxu0 %v17621_v51  ;;  %v12033_v51 = vld [vmem:[#allocation12 + $0xf60] sm:$0xff] }
 0x755   :  { %14823 = vmatprep.subr.bf16.mxu0 %v17614_v12  ;;  %v11666_v12 = vld [vmem:[#allocation12 + $0x3e8] sm:$0xff]  ;;  %v18060_v4 = vcombine.high %v12029_v50, %v12033_v51  ;;  %v18059_v47 = vcombine.low %v12029_v50, %v12033_v51 }
 0x756   :  { %14787 = vmatpush1.bf16.msra.mxu1 %v17979_v25  ;;  %v17573_v25 = vcombine.low %v11542_v45, %v11546_v29  ;;  %v17694_v58 = vcombine.high %v11662_v7, %v11666_v12  ;;  %v11622_v51 = vld [vmem:[#allocation12 + $0x288] sm:$0xff] }
 0x757   :  { %14788 = vmatprep.subr.bf16.mxu1 %v17972_v55  ;;  %v12021_v55 = vld [vmem:[#allocation12 + $0xf00] sm:$0xff] }
 0x758   :  { %14824 = vmatpush1.bf16.msra.mxu0 %v17613_v23  ;;  %v12025_v23 = vld [vmem:[#allocation12 + $0xf20] sm:$0xff] }
 0x759   :  { %14825 = vmatprep.subr.bf16.mxu0 %v17606_v60  ;;  %v11658_v60 = vld [vmem:[#allocation12 + $0x3a8] sm:$0xff]  ;;  %v18052_v17 = vcombine.high %v12021_v55, %v12025_v23  ;;  %v18051_v41 = vcombine.low %v12021_v55, %v12025_v23 }
 0x75a   :  { %14789 = vmatpush1.bf16.msra.mxu1 %v17971_v24  ;;  %v17693_v24 = vcombine.low %v11662_v7, %v11666_v12  ;;  %v17686_v1 = vcombine.high %v11654_v40, %v11658_v60  ;;  %v11618_v55 = vld [vmem:[#allocation12 + $0x268] sm:$0xff] }
 0x75b   :  { %14790 = vmatprep.subr.bf16.mxu1 %v17964_v33  ;;  %v12013_v33 = vld [vmem:[#allocation12 + $0xec0] sm:$0xff] }
 0x75c   :  { %14826 = vmatpush1.bf16.msra.mxu0 %v17605_v34  ;;  %v12017_v34 = vld [vmem:[#allocation12 + $0xee0] sm:$0xff] }
 0x75d   :  { %14827 = vmatprep.subr.bf16.mxu0 %v17598_v53  ;;  %v11650_v53 = vld [vmem:[#allocation12 + $0x368] sm:$0xff]  ;;  %v18044_v15 = vcombine.high %v12013_v33, %v12017_v34  ;;  %v18043_v8 = vcombine.low %v12013_v33, %v12017_v34 }
 0x75e   :  { %14791 = vmatpush1.bf16.msra.mxu1 %v17963_v56  ;;  %v17685_v56 = vcombine.low %v11654_v40, %v11658_v60  ;;  %v17678_v6 = vcombine.high %v11646_v63, %v11650_v53  ;;  %v18329_v40 = vld [vmem:[#allocation10] sm:$0xff]  ;;  %v11606_v33 = vld [vmem:[#allocation12 + $0x208] sm:$0xff] }
 0x75f   :  { %14792 = vmatprep.subr.bf16.mxu1 %v17956_v14  ;;  %v12005_v14 = vld [vmem:[#allocation12 + $0xe80] sm:$0xff]  ;;  %v8296_v60 = vrot.slane %v18329_v40, %v18830_v61  ;;  %v11610_v34 = vld [vmem:[#allocation12 + $0x228] sm:$0xff] }
 0x760   :  { %14828 = vmatpush1.bf16.msra.mxu0 %v17597_v35  ;;  %v12009_v35 = vld [vmem:[#allocation12 + $0xea0] sm:$0xff] }
 0x761   :  { %14829 = vmatprep.subr.bf16.mxu0 %v17590_v39  ;;  %v11642_v39 = vld [vmem:[#allocation12 + $0x328] sm:$0xff]  ;;  %v18036_v26 = vcombine.high %v12005_v14, %v12009_v35  ;;  %v18035_v45 = vcombine.low %v12005_v14, %v12009_v35 }
 0x762   :  { %14793 = vmatpush1.bf16.msra.mxu1 %v17955_v57  ;;  %v17677_v57 = vcombine.low %v11646_v63, %v11650_v53  ;;  %v17670_v43 = vcombine.high %v11638_v42, %v11642_v39  ;;  %v11854_v35 = vld [vmem:[#allocation12 + $0x9c8] sm:$0xff] }
 0x763   :  { %14794 = vmatprep.subr.bf16.mxu1 %v18076_v59  ;;  %v11997_v59 = vld [vmem:[#allocation12 + $0xe40] sm:$0xff] }
 0x764   :  { %14830 = vmatpush1.bf16.msra.mxu0 %v17589_v16  ;;  %v12001_v16 = vld [vmem:[#allocation12 + $0xe60] sm:$0xff] }
 0x765   :  { %14831 = vmatprep.subr.bf16.mxu0 %v17582_v32  ;;  %v11634_v32 = vld [vmem:[#allocation12 + $0x2e8] sm:$0xff]  ;;  %v18028_v29 = vcombine.high %v11997_v59, %v12001_v16  ;;  %v18027_v7 = vcombine.low %v11997_v59, %v12001_v16 }
 0x766   :  { %14795 = vmatpush2.bf16.msra.mxu1 %v18075_v3  ;;  %v17669_v3 = vcombine.low %v11638_v42, %v11642_v39  ;;  %v17662_v50 = vcombine.high %v11630_v18, %v11634_v32 }
 0x767   :  { %14796 = vmatprep.subr.bf16.mxu1 %v18068_v46  ;;  %v11989_v46 = vld [vmem:[#allocation12 + $0xe00] sm:$0xff] }
 0x768   :  { %14832 = vmatpush1.bf16.msra.mxu0 %v17581_v38  ;;  %v11993_v38 = vld [vmem:[#allocation12 + $0xe20] sm:$0xff] }
 0x769   :  { %14833 = vmatprep.subr.bf16.mxu0 %v17574_v2  ;;  %v11626_v2 = vld [vmem:[#allocation12 + $0x2a8] sm:$0xff]  ;;  %v18020_v12 = vcombine.high %v11989_v46, %v11993_v38  ;;  %v18019_v23 = vcombine.low %v11989_v46, %v11993_v38 }
 0x76a   :  { %14797 = vmatpush2.bf16.msra.mxu1 %v18067_v28  ;;  %v17661_v28 = vcombine.low %v11630_v18, %v11634_v32  ;;  %v11838_v46 = vld [vmem:[#allocation12 + $0x948] sm:$0xff] }
 0x76b   :  { %14798 = vmatprep.subr.bf16.mxu1 %v18060_v4  ;;  %v17654_v4 = vcombine.high %v11622_v51, %v11626_v2  ;;  %v11842_v38 = vld [vmem:[#allocation12 + $0x968] sm:$0xff] }
 0x76c   :  { %14834 = vmatpush1.bf16.msra.mxu0 %v17573_v25  ;;  %v11614_v25 = vld [vmem:[#allocation12 + $0x248] sm:$0xff] }
 0x76d   :  { %14835 = vmatprep.subr.bf16.mxu0 %v17694_v58  ;;  %v17758_v58 = vcombine.high %v19124_v20, %v19126_v21  ;;  %v17645_v63 = vcombine.low %v11614_v25, %v11618_v55 }
 0x76e   :  { %14799 = vmatpush2.bf16.msra.mxu1 %v18059_v47  ;;  %v17653_v47 = vcombine.low %v11622_v51, %v11626_v2  ;;  %v11830_v51 = vld [vmem:[#allocation12 + $0x908] sm:$0xff] }
 0x76f   :  { %14800 = vmatprep.subr.bf16.mxu1 %v18052_v17  ;;  %v17646_v17 = vcombine.high %v11614_v25, %v11618_v55  ;;  %v11834_v2 = vld [vmem:[#allocation12 + $0x928] sm:$0xff] }
 0x770   :  { %14836 = vmatpush2.bf16.msra.mxu0 %v17693_v24  ;;  %v8300_v24 = vrot.slane %v18329_v40, %v18833_v0  ;;  %v11814_v55 = vld [vmem:[#allocation12 + $0x888] sm:$0xff] }
 0x771   :  { %14837 = vmatprep.subr.bf16.mxu0 %v17686_v1  ;;  %v11396_v1 = vadd.f32 %v19099_v62, %v8296_v60  ;;  %v11806_v60 = vld [vmem:[#allocation12 + $0x848] sm:$0xff] }
 0x772   :  { %14801 = vmatpush2.bf16.msra.mxu1 %v18051_v41  ;;  %v17638_v41 = vcombine.high %v11606_v33, %v11610_v34 }
 0x773   :  { %14802 = vmatprep.subr.bf16.mxu1 %v18044_v15  ;;  %v11398_v15 = vadd.f32 %v19102_v36, %v8300_v24  ;;  %v11850_v36 = vld [vmem:[#allocation12 + $0x9a8] sm:$0xff] }
 0x774   :  { %14838 = vmatpush2.bf16.msra.mxu0 %v17685_v56 }
 0x775   :  { %14839 = vmatprep.subr.bf16.mxu0 %v17678_v6  ;;  %v11858_v6 = vld [vmem:[#allocation12 + $0x9e8] sm:$0xff] }
 0x776   :  { %14803 = vmatpush2.bf16.msra.mxu1 %v18043_v8  ;;  %v17886_v59 = vcombine.high %v11854_v35, %v11858_v6 }
 0x777   :  { %14804 = vmatprep.subr.bf16.mxu1 %v18036_v26  ;;  %v17637_v26 = vcombine.low %v11606_v33, %v11610_v34  ;;  %v11798_v33 = vld [vmem:[#allocation12 + $0x808] sm:$0xff] }
 0x778   :  { %14840 = vmatpush2.bf16.msra.mxu0 %v17677_v57  ;;  %v11802_v34 = vld [vmem:[#allocation12 + $0x828] sm:$0xff] }
 0x779   :  { %14841 = vmatprep.subr.bf16.mxu0 %v17670_v43  ;;  %v11846_v43 = vld [vmem:[#allocation12 + $0x988] sm:$0xff] }
 0x77a   :  { %14805 = vmatpush2.bf16.msra.mxu1 %v18035_v45 }
 0x77b   :  { %14806 = vmatprep.subr.bf16.mxu1 %v18028_v29  ;;  %v17885_v29 = vcombine.low %v11854_v35, %v11858_v6  ;;  %v11910_v35 = vld [vmem:[#allocation12 + $0xb88] sm:$0xff] }
 0x77c   :  { %14842 = vmatpush2.bf16.msra.mxu0 %v17669_v3  ;;  %v17878_v3 = vcombine.high %v11846_v43, %v11850_v36  ;;  %v11914_v6 = vld [vmem:[#allocation12 + $0xba8] sm:$0xff] }
 0x77d   :  { %14843 = vmatprep.subr.bf16.mxu0 %v17662_v50  ;;  %v17870_v50 = vcombine.high %v11838_v46, %v11842_v38 }
 0x77e   :  { %14807 = vmatpush2.bf16.msra.mxu1 %v18027_v7  ;;  %v17862_v7 = vcombine.high %v11830_v51, %v11834_v2 }
 0x77f   :  { %14808 = vmatprep.subr.bf16.mxu1 %v18020_v12  ;;  %v11822_v12 = vld [vmem:[#allocation12 + $0x8c8] sm:$0xff] }
 0x780   :  { %14844 = vmatpush2.bf16.msra.mxu0 %v17661_v28  ;;  %v11826_v28 = vld [vmem:[#allocation12 + $0x8e8] sm:$0xff] }
 0x781   :  { %14845 = vmatprep.subr.bf16.mxu0 %v17654_v4  ;;  %v17861_v4 = vcombine.low %v11830_v51, %v11834_v2  ;;  %v17854_v25 = vcombine.high %v11822_v12, %v11826_v28 }
 0x782   :  { %14809 = vmatpush2.bf16.msra.mxu1 %v18019_v23  ;;  %v11818_v23 = vld [vmem:[#allocation12 + $0x8a8] sm:$0xff] }
 0x783   :  { %14860 = vmatprep.subr.bf16.mxu1 %v17758_v58  ;;  %v17853_v58 = vcombine.low %v11822_v12, %v11826_v28  ;;  %v17846_v40 = vcombine.high %v11814_v55, %v11818_v23 }
 0x784   :  { %14846 = vmatpush2.bf16.msra.mxu0 %v17653_v47  ;;  %v11810_v47 = vld [vmem:[#allocation12 + $0x868] sm:$0xff] }
 0x785   :  { %v11436_v53 = vpop.f32.mrf.mxu1  ;;  %14847 = vmatprep.subr.bf16.mxu0 %v17646_v17  ;;  %v17845_v17 = vcombine.low %v11814_v55, %v11818_v23  ;;  %v17838_v24 = vcombine.high %v11806_v60, %v11810_v47 }
 0x786   :  { %v11437_v56 = vadd.f32 %v11436_v53, %v11396_v1  ;;  %v19142_v14 = vpop.f32.mrf.mxu0  ;;  %v17837_v1 = vcombine.low %v11806_v60, %v11810_v47  ;;  %v11918_v53 = vld [vmem:[#allocation12 + $0xbc8] sm:$0xff]  ;;  %v11599_v60 = vld [vmem:[#allocation12 + $0x1d0] sm:$0xff] }
 0x787   :  { %v11438_v42 = vpop.f32.mrf.mxu1  ;;  %v11603_v47 = vld [vmem:[#allocation12 + $0x1f0] sm:$0xff] }
 0x788   :  { %v11439_v39 = vadd.f32 %v11438_v42, %v11398_v15  ;;  %v19144_v8 = vpop.f32.mrf.mxu0  ;;  %14848 = vmatpush2.bf16.msra.mxu0 %v17645_v63  ;;  %v19147_v62 = vadd.f32 %v19115_v13, %v11437_v56  ;;  %v17877_v13 = vcombine.low %v11846_v43, %v11850_v36  ;;  %v17830_v63 = vcombine.high %v11798_v33, %v11802_v34  ;;  %v11894_v43 = vld [vmem:[#allocation12 + $0xb08] sm:$0xff] }
 0x789   :  { %v11440_v57 = vpop.f32.mrf.mxu1  ;;  %14849 = vmatprep.subr.bf16.mxu0 %v17638_v41  ;;  %v11922_v41 = vld [vmem:[#allocation12 + $0xbe8] sm:$0xff]  ;;  %v17829_v15 = vcombine.low %v11798_v33, %v11802_v34 }
 0x78a   :  { %v14693_v16 = vpop.f32.mrf.mxu0  ;;  %v19150_v18 = vadd.f32 %v19118_v49, %v11439_v39  ;;  %v17869_v49 = vcombine.low %v11838_v46, %v11842_v38  ;;  %v17950_v56 = vcombine.high %v11918_v53, %v11922_v41  ;;  %v17949_v42 = vcombine.low %v11918_v53, %v11922_v41  ;;  %v11906_v57 = vld [vmem:[#allocation12 + $0xb68] sm:$0xff] }
 0x78b   :  { %v11441_v32 = vpop.f32.mrf.mxu1  ;;  %v17942_v39 = vcombine.high %v11910_v35, %v11914_v6  ;;  %v11898_v36 = vld [vmem:[#allocation12 + $0xb28] sm:$0xff] }
 0x78c   :  { %v14694_v45 = vpop.f32.mrf.mxu0  ;;  %14850 = vmatpush2.bf16.msra.mxu0 %v17637_v26  ;;  %v11902_v26 = vld [vmem:[#allocation12 + $0xb48] sm:$0xff]  ;;  %v17925_v46 = vcombine.low %v11894_v43, %v11898_v36 }
 0x78d   :  { %14901 = vmatprep.subr.bf16.mxu0 %v17886_v59  ;;  %v17941_v59 = vcombine.low %v11910_v35, %v11914_v6  ;;  %v17934_v16 = vcombine.high %v11902_v26, %v11906_v57  ;;  %v17933_v32 = vcombine.low %v11902_v26, %v11906_v57  ;;  %v17926_v45 = vcombine.high %v11894_v43, %v11898_v36  ;;  %v11718_v41 = vld [vmem:[#allocation12 + $0x588] sm:$0xff]  ;;  %v11591_v35 = vld [vmem:[#allocation12 + $0x190] sm:$0xff] }
 0x78e   :  { %v11595_v6 = vld [vmem:[#allocation12 + $0x1b0] sm:$0xff] }
 0x78f   :  { %14852 = vmatmul.mubr.bf16.vlgmr.msra.gmra.mxu0 %v19064_v44  ;;  %v17624_v57 = vcombine.high %v11591_v35, %v11595_v6  ;;  %v11587_v43 = vld [vmem:[#allocation12 + $0x170] sm:$0xff] }
 0x790   :  { %14902 = vmatpush1.bf16.msra.mxu0 %v17885_v29  ;;  %14933 = vmatprep.mubr.bf16.mxu0 %v19120_v37  ;;  %v11886_v29 = vld [vmem:[#allocation12 + $0xac8] sm:$0xff] }
 0x791   :  { %14903 = vmatprep.subr.bf16.mxu0 %v17878_v3  ;;  %v11890_v3 = vld [vmem:[#allocation12 + $0xae8] sm:$0xff] }
 0x792   :  { %v17918_v38 = vcombine.high %v11886_v29, %v11890_v3  ;;  %v17917_v51 = vcombine.low %v11886_v29, %v11890_v3  ;;  %v11702_v3 = vld [vmem:[#allocation12 + $0x508] sm:$0xff] }
 0x794   :  { %14904 = vmatpush1.bf16.msra.mxu0 %v17877_v13  ;;  %v11878_v13 = vld [vmem:[#allocation12 + $0xa88] sm:$0xff] }
 0x795   :  { %14905 = vmatprep.subr.bf16.mxu0 %v17870_v50  ;;  %v11882_v50 = vld [vmem:[#allocation12 + $0xaa8] sm:$0xff] }
 0x796   :  { %v17910_v2 = vcombine.high %v11878_v13, %v11882_v50  ;;  %v17909_v12 = vcombine.low %v11878_v13, %v11882_v50  ;;  %v11579_v13 = vld [vmem:[#allocation12 + $0x130] sm:$0xff] }
 0x798   :  { %14906 = vmatpush1.bf16.msra.mxu0 %v17869_v49  ;;  %v11870_v49 = vld [vmem:[#allocation12 + $0xa48] sm:$0xff] }
 0x799   :  { %14907 = vmatprep.subr.bf16.mxu0 %v17862_v7  ;;  %v11874_v7 = vld [vmem:[#allocation12 + $0xa68] sm:$0xff] }
 0x79a   :  { %v17902_v28 = vcombine.high %v11870_v49, %v11874_v7  ;;  %v17901_v55 = vcombine.low %v11870_v49, %v11874_v7  ;;  %v11567_v49 = vld [vmem:[#allocation12 + $0xd0] sm:$0xff] }
 0x79b   :  { %v11571_v7 = vld [vmem:[#allocation12 + $0xf0] sm:$0xff] }
 0x79c   :  { %14908 = vmatpush1.bf16.msra.mxu0 %v17861_v4  ;;  %v11862_v4 = vld [vmem:[#allocation12 + $0xa08] sm:$0xff] }
 0x79d   :  { %14909 = vmatprep.subr.bf16.mxu0 %v17854_v25  ;;  %v11866_v25 = vld [vmem:[#allocation12 + $0xa28] sm:$0xff] }
 0x79e   :  { %v17893_v33 = vcombine.low %v11862_v4, %v11866_v25 }
 0x7a0   :  { %14910 = vmatpush1.bf16.msra.mxu0 %v17853_v58  ;;  %v17894_v58 = vcombine.high %v11862_v4, %v11866_v25  ;;  %v17600_v25 = vcombine.high %v11567_v49, %v11571_v7 }
 0x7a1   :  { %14911 = vmatprep.subr.bf16.mxu0 %v17846_v40 }
 0x7a4   :  { %14912 = vmatpush1.bf16.msra.mxu0 %v17845_v17 }
 0x7a5   :  { %14913 = vmatprep.subr.bf16.mxu0 %v17838_v24 }
 0x7a8   :  { %14914 = vmatpush1.bf16.msra.mxu0 %v17837_v1 }
 0x7a9   :  { %14915 = vmatprep.subr.bf16.mxu0 %v17830_v63  ;;  %v17632_v63 = vcombine.high %v11599_v60, %v11603_v47 }
 0x7ac   :  { %14916 = vmatpush1.bf16.msra.mxu0 %v17829_v15 }
 0x7ad   :  { %14917 = vmatprep.subr.bf16.mxu0 %v17950_v56  ;;  %v11722_v56 = vld [vmem:[#allocation12 + $0x5a8] sm:$0xff] }
 0x7ae   :  { %v17750_v26 = vcombine.high %v11718_v41, %v11722_v56  ;;  %v17749_v36 = vcombine.low %v11718_v41, %v11722_v56 }
 0x7b0   :  { %14918 = vmatpush2.bf16.msra.mxu0 %v17949_v42 }
 0x7b1   :  { %14919 = vmatprep.subr.bf16.mxu0 %v17942_v39 }
 0x7b4   :  { %14920 = vmatpush2.bf16.msra.mxu0 %v17941_v59  ;;  %v11714_v59 = vld [vmem:[#allocation12 + $0x568] sm:$0xff] }
 0x7b5   :  { %14921 = vmatprep.subr.bf16.mxu0 %v17934_v16  ;;  %v11583_v16 = vld [vmem:[#allocation12 + $0x150] sm:$0xff] }
 0x7b6   :  { %v17616_v29 = vcombine.high %v11583_v16, %v11587_v43  ;;  %v17615_v20 = vcombine.low %v11583_v16, %v11587_v43  ;;  %v11790_v43 = vld [vmem:[#allocation12 + $0x7c8] sm:$0xff] }
 0x7b8   :  { %14922 = vmatpush2.bf16.msra.mxu0 %v17933_v32  ;;  %v17623_v32 = vcombine.low %v11591_v35, %v11595_v6  ;;  %v11670_v35 = vld [vmem:[#allocation12 + $0x408] sm:$0xff] }
 0x7b9   :  { %14923 = vmatprep.subr.bf16.mxu0 %v17926_v45  ;;  %v11674_v6 = vld [vmem:[#allocation12 + $0x428] sm:$0xff] }
 0x7bc   :  { %14924 = vmatpush2.bf16.msra.mxu0 %v17925_v46  ;;  %v11706_v46 = vld [vmem:[#allocation12 + $0x528] sm:$0xff] }
 0x7bd   :  { %14925 = vmatprep.subr.bf16.mxu0 %v17918_v38  ;;  %v11575_v38 = vld [vmem:[#allocation12 + $0x110] sm:$0xff]  ;;  %v17734_v21 = vcombine.high %v11702_v3, %v11706_v46 }
 0x7c0   :  { %14926 = vmatpush2.bf16.msra.mxu0 %v17917_v51  ;;  %v11694_v51 = vld [vmem:[#allocation12 + $0x4c8] sm:$0xff] }
 0x7c1   :  { %14927 = vmatprep.subr.bf16.mxu0 %v17910_v2  ;;  %v11698_v2 = vld [vmem:[#allocation12 + $0x4e8] sm:$0xff] }
 0x7c2   :  { %v17726_v4 = vcombine.high %v11694_v51, %v11698_v2 }
 0x7c4   :  { %14928 = vmatpush2.bf16.msra.mxu0 %v17909_v12  ;;  %v17733_v12 = vcombine.low %v11702_v3, %v11706_v46 }
 0x7c5   :  { %v11518_v23 = vpop.f32.mrf.mxu1  ;;  %14929 = vmatprep.subr.bf16.mxu0 %v17902_v28  ;;  %v17607_v28 = vcombine.low %v11575_v38, %v11579_v13 }
 0x7c6   :  { %v11519_v40 = vadd.f32 %v11518_v23, %v19147_v62  ;;  %v17631_v62 = vcombine.low %v11599_v60, %v11603_v47  ;;  %v11690_v23 = vld [vmem:[#allocation12 + $0x4a8] sm:$0xff]  ;;  %v17725_v60 = vcombine.low %v11694_v51, %v11698_v2  ;;  %v17599_v47 = vcombine.low %v11567_v49, %v11571_v7 }
 0x7c7   :  { %v11520_v17 = vpop.f32.mrf.mxu1  ;;  %v11774_v7 = vld [vmem:[#allocation12 + $0x748] sm:$0xff] }
 0x7c8   :  { %v11521_v24 = vadd.f32 %v11520_v17, %v19150_v18  ;;  %14930 = vmatpush2.bf16.msra.mxu0 %v17901_v55  ;;  %v11531_v34 = vmax.f32 %v11519_v40, 0.0  ;;  %v11710_v18 = vld [vmem:[#allocation12 + $0x548] sm:$0xff]  ;;  %v11563_v40 = vld [vmem:[#allocation12 + $0xb0] sm:$0xff] }
 0x7c9   :  { %v11522_v1 = vpop.f32.mrf.mxu1  ;;  %14931 = vmatprep.subr.bf16.mxu0 %v17894_v58  ;;  %v17742_v45 = vcombine.high %v11710_v18, %v11714_v59  ;;  %v17741_v50 = vcombine.low %v11710_v18, %v11714_v59  ;;  %v11686_v55 = vld [vmem:[#allocation12 + $0x488] sm:$0xff]  ;;  %v11559_v58 = vld [vmem:[#allocation12 + $0x90] sm:$0xff]  ;;  %v17702_v59 = vcombine.high %v11670_v35, %v11674_v6 }
 0x7ca   :  { %v11532_v53 = vmax.f32 %v11521_v24, 0.0  ;;  %v19158_v39 = vpack.c.bf16 %v11531_v34, %v11531_v34  ;;  %v17718_v17 = vcombine.high %v11686_v55, %v11690_v23  ;;  %v17592_v24 = vcombine.high %v11559_v58, %v11563_v40  ;;  %v11682_v34 = vld [vmem:[#allocation12 + $0x468] sm:$0xff]  ;;  %v11551_v1 = vld [vmem:[#allocation12 + $0x50] sm:$0xff] }
 0x7cb   :  { %v11523_v15 = vpop.f32.mrf.mxu1  ;;  %v17591_v41 = vcombine.low %v11559_v58, %v11563_v40  ;;  %v11547_v18 = vld [vmem:[#allocation12 + $0x30] sm:$0xff]  ;;  %v11766_v40 = vld [vmem:[#allocation12 + $0x708] sm:$0xff] }
 0x7cc   :  { %v19156_v42 = vpack.c.bf16 %v11532_v53, %v11532_v53  ;;  %14932 = vmatpush2.bf16.msra.mxu0 %v17893_v33  ;;  %v11678_v33 = vld [vmem:[#allocation12 + $0x448] sm:$0xff]  ;;  %v17717_v53 = vcombine.low %v11686_v55, %v11690_v23 }
 0x7cd   :  { %14983 = vmatprep.subr.bf16.mxu0 %v17632_v63  ;;  %v11555_v63 = vld [vmem:[#allocation12 + $0x70] sm:$0xff]  ;;  %v17710_v15 = vcombine.high %v11678_v33, %v11682_v34 }
 0x7ce   :  { %14810 = vmatprep.mubr.bf16.mxu1 %v19156_v42  ;;  %v17584_v56 = vcombine.high %v11551_v1, %v11555_v63 }
 0x7cf   :  { %14934 = vmatmul.mubr.bf16.vlgmr.msra.gmra.mxu0 %v19122_v31  ;;  %14811 = vmatmul.mubr.bf16.vlgmr.msra.gmra.mxu1 %v19158_v39 }
 0x7d0   :  { %14861 = vmatpush1.bf16.msra.mxu1 %v17757_v19  ;;  %14984 = vmatpush1.bf16.msra.mxu0 %v17631_v62  ;;  %v17608_v19 = vcombine.high %v11575_v38, %v11579_v13  ;;  %v11543_v62 = vld [vmem:[#allocation12 + $0x10] sm:$0xff]  ;;  %v11782_v13 = vld [vmem:[#allocation12 + $0x788] sm:$0xff] }
 0x7d1   :  { %15015 = vmatprep.mubr.bf16.mxu0 %v19052_v11  ;;  %14892 = vmatprep.mubr.bf16.mxu1 %v19095_v27  ;;  %v17576_v16 = vcombine.high %v11543_v62, %v11547_v18  ;;  %v17575_v3 = vcombine.low %v11543_v62, %v11547_v18  ;;  %v11750_v18 = vld [vmem:[#allocation12 + $0x688] sm:$0xff] }
 0x7d2   :  { %14862 = vmatprep.subr.bf16.mxu1 %v17750_v26  ;;  %14985 = vmatprep.subr.bf16.mxu0 %v17624_v57  ;;  %v17709_v26 = vcombine.low %v11678_v33, %v11682_v34  ;;  %v17583_v57 = vcombine.low %v11551_v1, %v11555_v63  ;;  %v11758_v63 = vld [vmem:[#allocation12 + $0x6c8] sm:$0xff] }
 0x7d4   :  { %14863 = vmatpush1.bf16.msra.mxu1 %v17749_v36  ;;  %14986 = vmatpush1.bf16.msra.mxu0 %v17623_v32  ;;  %v11794_v36 = vld [vmem:[#allocation12 + $0x7e8] sm:$0xff]  ;;  %v11663_v32 = vld [vmem:[#allocation12 + $0x3d0] sm:$0xff] }
 0x7d5   :  { %14864 = vmatprep.subr.bf16.mxu1 %v17742_v45  ;;  %14987 = vmatprep.subr.bf16.mxu0 %v17616_v29  ;;  %v11667_v45 = vld [vmem:[#allocation12 + $0x3f0] sm:$0xff]  ;;  %v17701_v29 = vcombine.low %v11670_v35, %v11674_v6  ;;  %v17822_v46 = vcombine.high %v11790_v43, %v11794_v36 }
 0x7d6   :  { %v17696_v38 = vcombine.high %v11663_v32, %v11667_v45  ;;  %v17695_v51 = vcombine.low %v11663_v32, %v11667_v45 }
 0x7d8   :  { %14865 = vmatpush1.bf16.msra.mxu1 %v17741_v50  ;;  %14988 = vmatpush1.bf16.msra.mxu0 %v17615_v20  ;;  %v11786_v50 = vld [vmem:[#allocation12 + $0x7a8] sm:$0xff]  ;;  %v11655_v20 = vld [vmem:[#allocation12 + $0x390] sm:$0xff] }
 0x7d9   :  { %14866 = vmatprep.subr.bf16.mxu1 %v17734_v21  ;;  %14989 = vmatprep.subr.bf16.mxu0 %v17608_v19  ;;  %v11659_v21 = vld [vmem:[#allocation12 + $0x3b0] sm:$0xff]  ;;  %v17821_v19 = vcombine.low %v11790_v43, %v11794_v36  ;;  %v17814_v2 = vcombine.high %v11782_v13, %v11786_v50  ;;  %v12053_v36 = vld [vmem:[#allocation13] sm:$0xff] }
 0x7da   :  { %v17688_v49 = vcombine.high %v11655_v20, %v11659_v21  ;;  %v17687_v55 = vcombine.low %v11655_v20, %v11659_v21 }
 0x7dc   :  { %14867 = vmatpush1.bf16.msra.mxu1 %v17733_v12  ;;  %14990 = vmatpush1.bf16.msra.mxu0 %v17607_v28  ;;  %v11778_v12 = vld [vmem:[#allocation12 + $0x768] sm:$0xff]  ;;  %v11647_v28 = vld [vmem:[#allocation12 + $0x350] sm:$0xff] }
 0x7dd   :  { %14868 = vmatprep.subr.bf16.mxu1 %v17726_v4  ;;  %14991 = vmatprep.subr.bf16.mxu0 %v17600_v25  ;;  %v11651_v4 = vld [vmem:[#allocation12 + $0x370] sm:$0xff]  ;;  %v17813_v25 = vcombine.low %v11782_v13, %v11786_v50  ;;  %v17806_v23 = vcombine.high %v11774_v7, %v11778_v12  ;;  %v12058_v13 = vrot.slane %v12053_v36, %v18701_v5 }
 0x7de   :  { %v17680_v58 = vcombine.high %v11647_v28, %v11651_v4  ;;  %v17679_v33 = vcombine.low %v11647_v28, %v11651_v4 }
 0x7df   :  { %v14690_v28 = vadd.f32 %v19142_v14, %v12058_v13 }
 0x7e0   :  { %14869 = vmatpush1.bf16.msra.mxu1 %v17725_v60  ;;  %14992 = vmatpush1.bf16.msra.mxu0 %v17599_v47  ;;  %v11770_v60 = vld [vmem:[#allocation12 + $0x728] sm:$0xff]  ;;  %v11639_v47 = vld [vmem:[#allocation12 + $0x310] sm:$0xff] }
 0x7e1   :  { %14870 = vmatprep.subr.bf16.mxu1 %v17718_v17  ;;  %14993 = vmatprep.subr.bf16.mxu0 %v17592_v24  ;;  %v11643_v17 = vld [vmem:[#allocation12 + $0x330] sm:$0xff]  ;;  %v17805_v24 = vcombine.low %v11774_v7, %v11778_v12  ;;  %v17798_v34 = vcombine.high %v11766_v40, %v11770_v60 }
 0x7e2   :  { %v17672_v1 = vcombine.high %v11639_v47, %v11643_v17  ;;  %v17671_v35 = vcombine.low %v11639_v47, %v11643_v17  ;;  %v11607_v7 = vld [vmem:[#allocation12 + $0x210] sm:$0xff]  ;;  %v11986_v47 = vld [vmem:[#allocation12 + $0xde8] sm:$0xff] }
 0x7e3   :  { %v11611_v12 = vld [vmem:[#allocation12 + $0x230] sm:$0xff] }
 0x7e4   :  { %14871 = vmatpush1.bf16.msra.mxu1 %v17717_v53  ;;  %14994 = vmatpush1.bf16.msra.mxu0 %v17591_v41  ;;  %v11762_v53 = vld [vmem:[#allocation12 + $0x6e8] sm:$0xff]  ;;  %v11631_v41 = vld [vmem:[#allocation12 + $0x2d0] sm:$0xff] }
 0x7e5   :  { %14872 = vmatprep.subr.bf16.mxu1 %v17710_v15  ;;  %14995 = vmatprep.subr.bf16.mxu0 %v17584_v56  ;;  %v11635_v15 = vld [vmem:[#allocation12 + $0x2f0] sm:$0xff]  ;;  %v17797_v56 = vcombine.low %v11766_v40, %v11770_v60  ;;  %v17790_v6 = vcombine.high %v11758_v63, %v11762_v53 }
 0x7e6   :  { %v17664_v62 = vcombine.high %v11631_v41, %v11635_v15  ;;  %v17663_v43 = vcombine.low %v11631_v41, %v11635_v15  ;;  %v11859_v17 = vld [vmem:[#allocation12 + $0x9f0] sm:$0xff]  ;;  %v11974_v41 = vld [vmem:[#allocation12 + $0xd88] sm:$0xff] }
 0x7e8   :  { %14873 = vmatpush1.bf16.msra.mxu1 %v17709_v26  ;;  %14996 = vmatpush1.bf16.msra.mxu0 %v17583_v57  ;;  %v11754_v26 = vld [vmem:[#allocation12 + $0x6a8] sm:$0xff]  ;;  %v11623_v57 = vld [vmem:[#allocation12 + $0x290] sm:$0xff] }
 0x7e9   :  { %14874 = vmatprep.subr.bf16.mxu1 %v17702_v59  ;;  %14997 = vmatprep.subr.bf16.mxu0 %v17576_v16  ;;  %v11627_v59 = vld [vmem:[#allocation12 + $0x2b0] sm:$0xff]  ;;  %v17789_v16 = vcombine.low %v11758_v63, %v11762_v53  ;;  %v17782_v32 = vcombine.high %v11750_v18, %v11754_v26  ;;  %v17781_v50 = vcombine.low %v11750_v18, %v11754_v26 }
 0x7ea   :  { %v17656_v45 = vcombine.high %v11623_v57, %v11627_v59  ;;  %v17655_v20 = vcombine.low %v11623_v57, %v11627_v59  ;;  %v11966_v57 = vld [vmem:[#allocation12 + $0xd48] sm:$0xff] }
 0x7eb   :  { %v11970_v59 = vld [vmem:[#allocation12 + $0xd68] sm:$0xff] }
 0x7ec   :  { %14875 = vmatpush1.bf16.msra.mxu1 %v17701_v29  ;;  %14998 = vmatpush1.bf16.msra.mxu0 %v17575_v3  ;;  %v11742_v29 = vld [vmem:[#allocation12 + $0x648] sm:$0xff] }
 0x7ed   :  { %14876 = vmatprep.subr.bf16.mxu1 %v17822_v46  ;;  %14999 = vmatprep.subr.bf16.mxu0 %v17696_v38  ;;  %v11746_v3 = vld [vmem:[#allocation12 + $0x668] sm:$0xff]  ;;  %v11615_v46 = vld [vmem:[#allocation12 + $0x250] sm:$0xff] }
 0x7ee   :  { %v11619_v38 = vld [vmem:[#allocation12 + $0x270] sm:$0xff]  ;;  %v17774_v21 = vcombine.high %v11742_v29, %v11746_v3  ;;  %v17773_v4 = vcombine.low %v11742_v29, %v11746_v3 }
 0x7ef   :  { %v17647_v5 = vcombine.low %v11615_v46, %v11619_v38 }
 0x7f0   :  { %14877 = vmatpush2.bf16.msra.mxu1 %v17821_v19  ;;  %15000 = vmatpush2.bf16.msra.mxu0 %v17695_v51  ;;  %v17648_v19 = vcombine.high %v11615_v46, %v11619_v38  ;;  %v11734_v51 = vld [vmem:[#allocation12 + $0x608] sm:$0xff]  ;;  %v17998_v46 = vcombine.high %v11966_v57, %v11970_v59 }
 0x7f1   :  { %14878 = vmatprep.subr.bf16.mxu1 %v17814_v2  ;;  %15001 = vmatprep.subr.bf16.mxu0 %v17688_v49  ;;  %v12062_v2 = vrot.slane %v12053_v36, %v18706_v10  ;;  %v11738_v49 = vld [vmem:[#allocation12 + $0x628] sm:$0xff]  ;;  %v11855_v10 = vld [vmem:[#allocation12 + $0x9d0] sm:$0xff] }
 0x7f2   :  { %v17765_v14 = vcombine.low %v11734_v51, %v11738_v49  ;;  %v17888_v53 = vcombine.high %v11855_v10, %v11859_v17  ;;  %v11843_v36 = vld [vmem:[#allocation12 + $0x970] sm:$0xff] }
 0x7f3   :  { %v14692_v40 = vadd.f32 %v19144_v8, %v12062_v2  ;;  %v11851_v8 = vld [vmem:[#allocation12 + $0x9b0] sm:$0xff]  ;;  %v17997_v2 = vcombine.low %v11966_v57, %v11970_v59 }
 0x7f4   :  { %14879 = vmatpush2.bf16.msra.mxu1 %v17813_v25  ;;  %15002 = vmatpush2.bf16.msra.mxu0 %v17687_v55  ;;  %v17766_v55 = vcombine.high %v11734_v51, %v11738_v49  ;;  %v11835_v51 = vld [vmem:[#allocation12 + $0x930] sm:$0xff] }
 0x7f5   :  { %14880 = vmatprep.subr.bf16.mxu1 %v17806_v23  ;;  %15003 = vmatprep.subr.bf16.mxu0 %v17680_v58  ;;  %v17640_v23 = vcombine.high %v11607_v7, %v11611_v12  ;;  %v11982_v58 = vld [vmem:[#allocation12 + $0xdc8] sm:$0xff]  ;;  %v11803_v57 = vld [vmem:[#allocation12 + $0x830] sm:$0xff] }
 0x7f6   :  { %v18014_v63 = vcombine.high %v11982_v58, %v11986_v47 }
 0x7f8   :  { %14881 = vmatpush2.bf16.msra.mxu1 %v17805_v24  ;;  %15004 = vmatpush2.bf16.msra.mxu0 %v17679_v33 }
 0x7f9   :  { %14882 = vmatprep.subr.bf16.mxu1 %v17798_v34  ;;  %15005 = vmatprep.subr.bf16.mxu0 %v17672_v1  ;;  %v17639_v34 = vcombine.low %v11607_v7, %v11611_v12 }
 0x7fc   :  { %14883 = vmatpush2.bf16.msra.mxu1 %v17797_v56  ;;  %15006 = vmatpush2.bf16.msra.mxu0 %v17671_v35  ;;  %v11978_v56 = vld [vmem:[#allocation12 + $0xda8] sm:$0xff]  ;;  %v11847_v35 = vld [vmem:[#allocation12 + $0x990] sm:$0xff] }
 0x7fd   :  { %14884 = vmatprep.subr.bf16.mxu1 %v17790_v6  ;;  %15007 = vmatprep.subr.bf16.mxu0 %v17664_v62  ;;  %v18013_v6 = vcombine.low %v11982_v58, %v11986_v47  ;;  %v17887_v62 = vcombine.low %v11855_v10, %v11859_v17  ;;  %v18006_v18 = vcombine.high %v11974_v41, %v11978_v56  ;;  %v11942_v47 = vld [vmem:[#allocation12 + $0xc88] sm:$0xff]  ;;  %v11815_v17 = vld [vmem:[#allocation12 + $0x890] sm:$0xff] }
 0x7fe   :  { %v17880_v26 = vcombine.high %v11847_v35, %v11851_v8  ;;  %v17879_v3 = vcombine.low %v11847_v35, %v11851_v8  ;;  %v11946_v10 = vld [vmem:[#allocation12 + $0xca8] sm:$0xff] }
 0x800   :  { %14885 = vmatpush2.bf16.msra.mxu1 %v17789_v16  ;;  %15008 = vmatpush2.bf16.msra.mxu0 %v17663_v43  ;;  %v11839_v43 = vld [vmem:[#allocation12 + $0x950] sm:$0xff] }
 0x801   :  { %14886 = vmatprep.subr.bf16.mxu1 %v17782_v32  ;;  %15009 = vmatprep.subr.bf16.mxu0 %v17656_v45  ;;  %v18005_v45 = vcombine.low %v11974_v41, %v11978_v56  ;;  %v17872_v13 = vcombine.high %v11839_v43, %v11843_v36  ;;  %v17871_v7 = vcombine.low %v11839_v43, %v11843_v36  ;;  %v11807_v41 = vld [vmem:[#allocation12 + $0x850] sm:$0xff] }
 0x802   :  { %v17973_v56 = vcombine.low %v11942_v47, %v11946_v10 }
 0x804   :  { %14887 = vmatpush2.bf16.msra.mxu1 %v17781_v50  ;;  %15010 = vmatpush2.bf16.msra.mxu0 %v17655_v20  ;;  %v11958_v50 = vld [vmem:[#allocation12 + $0xd08] sm:$0xff] }
 0x805   :  { %v14730_v25 = vpop.f32.mrf.mxu1  ;;  %14888 = vmatprep.subr.bf16.mxu1 %v17774_v21  ;;  %15011 = vmatprep.subr.bf16.mxu0 %v17648_v19  ;;  %v11962_v20 = vld [vmem:[#allocation12 + $0xd28] sm:$0xff]  ;;  %v11831_v19 = vld [vmem:[#allocation12 + $0x910] sm:$0xff] }
 0x806   :  { %v14731_v60 = vadd.f32 %v14730_v25, %v14690_v28  ;;  %v17990_v12 = vcombine.high %v11958_v50, %v11962_v20  ;;  %v17864_v28 = vcombine.high %v11831_v19, %v11835_v51  ;;  %v11823_v25 = vld [vmem:[#allocation12 + $0x8d0] sm:$0xff]  ;;  %v17863_v58 = vcombine.low %v11831_v19, %v11835_v51  ;;  %v12038_v19 = vld [vmem:[#allocation12 + $0xf88] sm:$0xff] }
 0x807   :  { %v14732_v24 = vpop.f32.mrf.mxu1  ;;  %v12042_v51 = vld [vmem:[#allocation12 + $0xfa8] sm:$0xff] }
 0x808   :  { %v14733_v33 = vadd.f32 %v14732_v24, %v14692_v40  ;;  %14889 = vmatpush2.bf16.msra.mxu1 %v17773_v4  ;;  %15012 = vmatpush2.bf16.msra.mxu0 %v17647_v5  ;;  %v11950_v4 = vld [vmem:[#allocation12 + $0xcc8] sm:$0xff]  ;;  %v11819_v24 = vld [vmem:[#allocation12 + $0x8b0] sm:$0xff] }
 0x809   :  { %v14734_v1 = vpop.f32.mrf.mxu1  ;;  %14890 = vmatprep.subr.bf16.mxu1 %v17766_v55  ;;  %15013 = vmatprep.subr.bf16.mxu0 %v17640_v23  ;;  %v11954_v5 = vld [vmem:[#allocation12 + $0xce8] sm:$0xff]  ;;  %v11827_v55 = vld [vmem:[#allocation12 + $0x8f0] sm:$0xff]  ;;  %v17989_v23 = vcombine.low %v11958_v50, %v11962_v20  ;;  %v17847_v35 = vcombine.low %v11815_v17, %v11819_v24 }
 0x80a   :  { %v17982_v40 = vcombine.high %v11950_v4, %v11954_v5  ;;  %v17848_v1 = vcombine.high %v11815_v17, %v11819_v24  ;;  %v12026_v17 = vld [vmem:[#allocation12 + $0xf28] sm:$0xff]  ;;  %v11895_v24 = vld [vmem:[#allocation12 + $0xb10] sm:$0xff] }
 0x80b   :  { %v14735_v15 = vpop.f32.mrf.mxu1 }
 0x80c   :  { %14891 = vmatpush2.bf16.msra.mxu1 %v17765_v14  ;;  %15014 = vmatpush2.bf16.msra.mxu0 %v17639_v34  ;;  %v17855_v14 = vcombine.low %v11823_v25, %v11827_v55  ;;  %v17974_v34 = vcombine.high %v11942_v47, %v11946_v10  ;;  %v11811_v15 = vld [vmem:[#allocation12 + $0x870] sm:$0xff]  ;;  %v12022_v10 = vld [vmem:[#allocation12 + $0xf08] sm:$0xff] }
 0x80d   :  { %14942 = vmatprep.subr.bf16.mxu1 %v18014_v63  ;;  %15065 = vmatprep.subr.bf16.mxu0 %v17888_v53  ;;  %v11934_v63 = vld [vmem:[#allocation12 + $0xc48] sm:$0xff] }
 0x80e   :  { %v11938_v53 = vld [vmem:[#allocation12 + $0xc68] sm:$0xff] }
 0x80f   :  { %14893 = vmatmul.mubr.bf16.vlgmr.msra.gmra.mxu1 %v19111_v30  ;;  %15016 = vmatmul.mubr.bf16.vlgmr.msra.gmra.mxu0 %v19064_v44  ;;  %v14771_v16 = vpop.f32.mrf.mxu0  ;;  %v17966_v8 = vcombine.high %v11934_v63, %v11938_v53  ;;  %v17965_v59 = vcombine.low %v11934_v63, %v11938_v53  ;;  %v12014_v53 = vld [vmem:[#allocation12 + $0xec8] sm:$0xff] }
 0x810   :  { %v19174_v32 = vadd.f32 %v14771_v16, %v14731_v60  ;;  %14943 = vmatpush1.bf16.msra.mxu1 %v18013_v6  ;;  %14974 = vmatprep.mubr.bf16.mxu1 %v19156_v42  ;;  %v17856_v60 = vcombine.high %v11823_v25, %v11827_v55  ;;  %v17840_v6 = vcombine.high %v11807_v41, %v11811_v15  ;;  %v12034_v25 = vld [vmem:[#allocation12 + $0xf68] sm:$0xff]  ;;  %v11903_v55 = vld [vmem:[#allocation12 + $0xb50] sm:$0xff] }
 0x811   :  { %15066 = vmatpush1.bf16.msra.mxu0 %v17887_v62  ;;  %15097 = vmatprep.mubr.bf16.mxu0 %v19120_v37  ;;  %v14773_v29 = vpop.f32.mrf.mxu0  ;;  %v11926_v62 = vld [vmem:[#allocation12 + $0xc08] sm:$0xff]  ;;  %v17839_v16 = vcombine.low %v11807_v41, %v11811_v15  ;;  %v11887_v15 = vld [vmem:[#allocation12 + $0xad0] sm:$0xff] }
 0x812   :  { %v19178_v38 = vadd.f32 %v14773_v29, %v14733_v33  ;;  %14944 = vmatprep.subr.bf16.mxu1 %v18006_v18  ;;  %15067 = vmatprep.subr.bf16.mxu0 %v17880_v26  ;;  %v17981_v33 = vcombine.low %v11950_v4, %v11954_v5  ;;  %v11930_v18 = vld [vmem:[#allocation12 + $0xc28] sm:$0xff]  ;;  %v11799_v26 = vld [vmem:[#allocation12 + $0x810] sm:$0xff] }
 0x813   :  { %v14775_v21 = vpop.f32.mrf.mxu0  ;;  %v17958_v43 = vcombine.high %v11926_v62, %v11930_v18  ;;  %v17832_v36 = vcombine.high %v11799_v26, %v11803_v57  ;;  %v12050_v29 = vld [vmem:[#allocation12 + $0xfe8] sm:$0xff]  ;;  %v17831_v50 = vcombine.low %v11799_v26, %v11803_v57  ;;  %v11879_v57 = vld [vmem:[#allocation12 + $0xa90] sm:$0xff] }
 0x814   :  { %14945 = vmatpush1.bf16.msra.mxu1 %v18005_v45  ;;  %v12046_v45 = vld [vmem:[#allocation12 + $0xfc8] sm:$0xff] }
 0x815   :  { %15068 = vmatpush1.bf16.msra.mxu0 %v17879_v3  ;;  %v14776_v49 = vpop.f32.mrf.mxu0  ;;  %14946 = vmatprep.subr.bf16.mxu1 %v17998_v46  ;;  %v11919_v3 = vld [vmem:[#allocation12 + $0xbd0] sm:$0xff]  ;;  %v18078_v20 = vcombine.high %v12046_v45, %v12050_v29  ;;  %v12030_v5 = vld [vmem:[#allocation12 + $0xf48] sm:$0xff] }
 0x816   :  { %15069 = vmatprep.subr.bf16.mxu0 %v17872_v13  ;;  %v11923_v46 = vld [vmem:[#allocation12 + $0xbf0] sm:$0xff]  ;;  %v17957_v13 = vcombine.low %v11926_v62, %v11930_v18  ;;  %v12018_v41 = vld [vmem:[#allocation12 + $0xee8] sm:$0xff] }
 0x817   :  { %v17952_v21 = vcombine.high %v11919_v3, %v11923_v46  ;;  %v11915_v49 = vld [vmem:[#allocation12 + $0xbb0] sm:$0xff]  ;;  %v12006_v18 = vld [vmem:[#allocation12 + $0xe88] sm:$0xff] }
 0x818   :  { %14947 = vmatpush1.bf16.msra.mxu1 %v17997_v2  ;;  %v11911_v2 = vld [vmem:[#allocation12 + $0xb90] sm:$0xff]  ;;  %v12010_v26 = vld [vmem:[#allocation12 + $0xea8] sm:$0xff] }
 0x819   :  { %15070 = vmatpush1.bf16.msra.mxu0 %v17871_v7  ;;  %14948 = vmatprep.subr.bf16.mxu1 %v17990_v12  ;;  %v18077_v7 = vcombine.low %v12046_v45, %v12050_v29  ;;  %v17951_v12 = vcombine.low %v11919_v3, %v11923_v46  ;;  %v17944_v4 = vcombine.high %v11911_v2, %v11915_v49  ;;  %v11998_v29 = vld [vmem:[#allocation12 + $0xe48] sm:$0xff]  ;;  %v11871_v46 = vld [vmem:[#allocation12 + $0xa50] sm:$0xff] }
 0x81a   :  { %15071 = vmatprep.subr.bf16.mxu0 %v17864_v28  ;;  %v18070_v28 = vcombine.high %v12038_v19, %v12042_v51  ;;  %v12002_v3 = vld [vmem:[#allocation12 + $0xe68] sm:$0xff] }
 0x81c   :  { %14949 = vmatpush1.bf16.msra.mxu1 %v17989_v23  ;;  %v11907_v23 = vld [vmem:[#allocation12 + $0xb70] sm:$0xff] }
 0x81d   :  { %15072 = vmatpush1.bf16.msra.mxu0 %v17863_v58  ;;  %14950 = vmatprep.subr.bf16.mxu1 %v17982_v40  ;;  %v18069_v58 = vcombine.low %v12038_v19, %v12042_v51  ;;  %v17943_v40 = vcombine.low %v11911_v2, %v11915_v49  ;;  %v17936_v47 = vcombine.high %v11903_v55, %v11907_v23  ;;  %v11990_v51 = vld [vmem:[#allocation12 + $0xe08] sm:$0xff]  ;;  %v11863_v49 = vld [vmem:[#allocation12 + $0xa10] sm:$0xff] }
 0x81e   :  { %15073 = vmatprep.subr.bf16.mxu0 %v17856_v60  ;;  %v18062_v60 = vcombine.high %v12030_v5, %v12034_v25  ;;  %v11994_v2 = vld [vmem:[#allocation12 + $0xe28] sm:$0xff] }
 0x820   :  { %14951 = vmatpush1.bf16.msra.mxu1 %v17981_v33  ;;  %v11899_v33 = vld [vmem:[#allocation12 + $0xb30] sm:$0xff] }
 0x821   :  { %15074 = vmatpush1.bf16.msra.mxu0 %v17855_v14  ;;  %14952 = vmatprep.subr.bf16.mxu1 %v17974_v34  ;;  %v18061_v14 = vcombine.low %v12030_v5, %v12034_v25  ;;  %v17935_v34 = vcombine.low %v11903_v55, %v11907_v23  ;;  %v17928_v63 = vcombine.high %v11895_v24, %v11899_v33  ;;  %v11727_v25 = vld [vmem:[#allocation12 + $0x5d0] sm:$0xff]  ;;  %v11600_v23 = vld [vmem:[#allocation12 + $0x1d8] sm:$0xff] }
 0x822   :  { %15075 = vmatprep.subr.bf16.mxu0 %v17848_v1  ;;  %v18054_v1 = vcombine.high %v12022_v10, %v12026_v17  ;;  %v11731_v55 = vld [vmem:[#allocation12 + $0x5f0] sm:$0xff] }
 0x824   :  { %14953 = vmatpush1.bf16.msra.mxu1 %v17973_v56  ;;  %v11891_v56 = vld [vmem:[#allocation12 + $0xaf0] sm:$0xff] }
 0x825   :  { %15076 = vmatpush1.bf16.msra.mxu0 %v17847_v35  ;;  %14954 = vmatprep.subr.bf16.mxu1 %v17966_v8  ;;  %v18053_v35 = vcombine.low %v12022_v10, %v12026_v17  ;;  %v17927_v8 = vcombine.low %v11895_v24, %v11899_v33  ;;  %v17920_v62 = vcombine.high %v11887_v15, %v11891_v56  ;;  %v11719_v17 = vld [vmem:[#allocation12 + $0x590] sm:$0xff] }
 0x826   :  { %15077 = vmatprep.subr.bf16.mxu0 %v17840_v6  ;;  %v18046_v6 = vcombine.high %v12014_v53, %v12018_v41  ;;  %v11723_v24 = vld [vmem:[#allocation12 + $0x5b0] sm:$0xff]  ;;  %v17759_v33 = vcombine.low %v11727_v25, %v11731_v55 }
 0x828   :  { %14955 = vmatpush1.bf16.msra.mxu1 %v17965_v59  ;;  %v11883_v59 = vld [vmem:[#allocation12 + $0xab0] sm:$0xff] }
 0x829   :  { %15078 = vmatpush1.bf16.msra.mxu0 %v17839_v16  ;;  %14956 = vmatprep.subr.bf16.mxu1 %v17958_v43  ;;  %v18045_v16 = vcombine.low %v12014_v53, %v12018_v41  ;;  %v17919_v43 = vcombine.low %v11887_v15, %v11891_v56  ;;  %v17912_v45 = vcombine.high %v11879_v57, %v11883_v59  ;;  %v11711_v53 = vld [vmem:[#allocation12 + $0x550] sm:$0xff] }
 0x82a   :  { %15079 = vmatprep.subr.bf16.mxu0 %v17832_v36  ;;  %v18038_v36 = vcombine.high %v12006_v18, %v12010_v26  ;;  %v11715_v41 = vld [vmem:[#allocation12 + $0x570] sm:$0xff] }
 0x82c   :  { %14957 = vmatpush1.bf16.msra.mxu1 %v17957_v13  ;;  %v11875_v13 = vld [vmem:[#allocation12 + $0xa70] sm:$0xff] }
 0x82d   :  { %15080 = vmatpush1.bf16.msra.mxu0 %v17831_v50  ;;  %14958 = vmatprep.subr.bf16.mxu1 %v18078_v20  ;;  %v18037_v50 = vcombine.low %v12006_v18, %v12010_v26  ;;  %v17911_v20 = vcombine.low %v11879_v57, %v11883_v59  ;;  %v17904_v19 = vcombine.high %v11871_v46, %v11875_v13  ;;  %v11703_v59 = vld [vmem:[#allocation12 + $0x510] sm:$0xff] }
 0x82e   :  { %15081 = vmatprep.subr.bf16.mxu0 %v17952_v21  ;;  %v18030_v21 = vcombine.high %v11998_v29, %v12002_v3  ;;  %v17744_v26 = vcombine.high %v11711_v53, %v11715_v41 }
 0x830   :  { %14959 = vmatpush2.bf16.msra.mxu1 %v18077_v7  ;;  %v11867_v7 = vld [vmem:[#allocation12 + $0xa30] sm:$0xff] }
 0x831   :  { %15082 = vmatpush2.bf16.msra.mxu0 %v17951_v12  ;;  %14960 = vmatprep.subr.bf16.mxu1 %v18070_v28  ;;  %v18029_v12 = vcombine.low %v11998_v29, %v12002_v3  ;;  %v17903_v28 = vcombine.low %v11871_v46, %v11875_v13  ;;  %v17896_v5 = vcombine.high %v11863_v49, %v11867_v7 }
 0x832   :  { %15083 = vmatprep.subr.bf16.mxu0 %v17944_v4  ;;  %v18022_v4 = vcombine.high %v11990_v51, %v11994_v2  ;;  %v17743_v29 = vcombine.low %v11711_v53, %v11715_v41  ;;  %v11548_v53 = vld [vmem:[#allocation12 + $0x38] sm:$0xff] }
 0x834   :  { %14961 = vmatpush2.bf16.msra.mxu1 %v18069_v58  ;;  %v11604_v58 = vld [vmem:[#allocation12 + $0x1f8] sm:$0xff] }
 0x835   :  { %15084 = vmatpush2.bf16.msra.mxu0 %v17943_v40  ;;  %14962 = vmatprep.subr.bf16.mxu1 %v18062_v60  ;;  %v18021_v40 = vcombine.low %v11990_v51, %v11994_v2  ;;  %v17895_v60 = vcombine.low %v11863_v49, %v11867_v7  ;;  %v17634_v10 = vcombine.high %v11600_v23, %v11604_v58 }
 0x836   :  { %15085 = vmatprep.subr.bf16.mxu0 %v17936_v47  ;;  %v17760_v47 = vcombine.high %v11727_v25, %v11731_v55 }
 0x838   :  { %14963 = vmatpush2.bf16.msra.mxu1 %v18061_v14  ;;  %v11592_v14 = vld [vmem:[#allocation12 + $0x198] sm:$0xff] }
 0x839   :  { %15086 = vmatpush2.bf16.msra.mxu0 %v17935_v34  ;;  %14964 = vmatprep.subr.bf16.mxu1 %v18054_v1  ;;  %v11596_v34 = vld [vmem:[#allocation12 + $0x1b8] sm:$0xff]  ;;  %v17633_v1 = vcombine.low %v11600_v23, %v11604_v58 }
 0x83a   :  { %15087 = vmatprep.subr.bf16.mxu0 %v17928_v63  ;;  %v17752_v63 = vcombine.high %v11719_v17, %v11723_v24  ;;  %v17626_v56 = vcombine.high %v11592_v14, %v11596_v34  ;;  %v17625_v18 = vcombine.low %v11592_v14, %v11596_v34  ;;  %v11671_v34 = vld [vmem:[#allocation12 + $0x410] sm:$0xff] }
 0x83c   :  { %14965 = vmatpush2.bf16.msra.mxu1 %v18053_v35  ;;  %v11584_v35 = vld [vmem:[#allocation12 + $0x158] sm:$0xff] }
 0x83d   :  { %15088 = vmatpush2.bf16.msra.mxu0 %v17927_v8  ;;  %14966 = vmatprep.subr.bf16.mxu1 %v18046_v6  ;;  %v11588_v8 = vld [vmem:[#allocation12 + $0x178] sm:$0xff]  ;;  %v17751_v6 = vcombine.low %v11719_v17, %v11723_v24 }
 0x83e   :  { %15089 = vmatprep.subr.bf16.mxu0 %v17920_v62  ;;  %v17618_v57 = vcombine.high %v11584_v35, %v11588_v8  ;;  %v17617_v46 = vcombine.low %v11584_v35, %v11588_v8 }
 0x840   :  { %14967 = vmatpush2.bf16.msra.mxu1 %v18045_v16  ;;  %v11707_v16 = vld [vmem:[#allocation12 + $0x530] sm:$0xff] }
 0x841   :  { %15090 = vmatpush2.bf16.msra.mxu0 %v17919_v43  ;;  %14968 = vmatprep.subr.bf16.mxu1 %v18038_v36  ;;  %v11576_v36 = vld [vmem:[#allocation12 + $0x118] sm:$0xff]  ;;  %v17736_v13 = vcombine.high %v11703_v59, %v11707_v16  ;;  %v17735_v51 = vcombine.low %v11703_v59, %v11707_v16 }
 0x842   :  { %15091 = vmatprep.subr.bf16.mxu0 %v17912_v45  ;;  %v11580_v45 = vld [vmem:[#allocation12 + $0x138] sm:$0xff] }
 0x843   :  { %v17609_v2 = vcombine.low %v11576_v36, %v11580_v45 }
 0x844   :  { %14969 = vmatpush2.bf16.msra.mxu1 %v18037_v50  ;;  %v17610_v50 = vcombine.high %v11576_v36, %v11580_v45  ;;  %v11783_v45 = vld [vmem:[#allocation12 + $0x790] sm:$0xff] }
 0x845   :  { %15092 = vmatpush2.bf16.msra.mxu0 %v17911_v20  ;;  %14970 = vmatprep.subr.bf16.mxu1 %v18030_v21  ;;  %v11695_v20 = vld [vmem:[#allocation12 + $0x4d0] sm:$0xff] }
 0x846   :  { %15093 = vmatprep.subr.bf16.mxu0 %v17904_v19  ;;  %v11699_v21 = vld [vmem:[#allocation12 + $0x4f0] sm:$0xff]  ;;  %v11572_v19 = vld [vmem:[#allocation12 + $0xf8] sm:$0xff] }
 0x847   :  { %v17728_v49 = vcombine.high %v11695_v20, %v11699_v21  ;;  %v17727_v25 = vcombine.low %v11695_v20, %v11699_v21 }
 0x848   :  { %14971 = vmatpush2.bf16.msra.mxu1 %v18029_v12  ;;  %v11687_v12 = vld [vmem:[#allocation12 + $0x490] sm:$0xff] }
 0x849   :  { %15094 = vmatpush2.bf16.msra.mxu0 %v17903_v28  ;;  %14972 = vmatprep.subr.bf16.mxu1 %v18022_v4  ;;  %v11691_v28 = vld [vmem:[#allocation12 + $0x4b0] sm:$0xff]  ;;  %v11560_v4 = vld [vmem:[#allocation12 + $0x98] sm:$0xff] }
 0x84a   :  { %15095 = vmatprep.subr.bf16.mxu0 %v17896_v5  ;;  %v11564_v5 = vld [vmem:[#allocation12 + $0xb8] sm:$0xff]  ;;  %v17720_v23 = vcombine.high %v11687_v12, %v11691_v28  ;;  %v17719_v17 = vcombine.low %v11687_v12, %v11691_v28 }
 0x84b   :  { %v17594_v58 = vcombine.high %v11560_v4, %v11564_v5  ;;  %v17593_v24 = vcombine.low %v11560_v4, %v11564_v5  ;;  %v11767_v4 = vld [vmem:[#allocation12 + $0x710] sm:$0xff] }
 0x84c   :  { %14973 = vmatpush2.bf16.msra.mxu1 %v18021_v40  ;;  %v11679_v40 = vld [vmem:[#allocation12 + $0x450] sm:$0xff] }
 0x84d   :  { %15096 = vmatpush2.bf16.msra.mxu0 %v17895_v60  ;;  %15024 = vmatprep.subr.bf16.mxu1 %v17760_v47  ;;  %v11683_v60 = vld [vmem:[#allocation12 + $0x470] sm:$0xff]  ;;  %v11552_v47 = vld [vmem:[#allocation12 + $0x58] sm:$0xff] }
 0x84e   :  { %15147 = vmatprep.subr.bf16.mxu0 %v17634_v10  ;;  %v11556_v10 = vld [vmem:[#allocation12 + $0x78] sm:$0xff]  ;;  %v17711_v41 = vcombine.low %v11679_v40, %v11683_v60  ;;  %v11771_v5 = vld [vmem:[#allocation12 + $0x730] sm:$0xff] }
 0x84f   :  { %v19180_v15 = vpop.f32.mrf.mxu0  ;;  %14975 = vmatmul.mubr.bf16.vlgmr.msra.gmra.mxu1 %v19158_v39  ;;  %v17586_v14 = vcombine.high %v11552_v47, %v11556_v10 }
 0x850   :  { %15098 = vmatmul.mubr.bf16.vlgmr.msra.gmra.mxu0 %v19122_v31  ;;  %15025 = vmatpush1.bf16.msra.mxu1 %v17759_v33  ;;  %v17712_v33 = vcombine.high %v11679_v40, %v11683_v60  ;;  %v17800_v40 = vcombine.high %v11767_v4, %v11771_v5 }
 0x851   :  { %15056 = vmatprep.mubr.bf16.mxu1 %v19095_v27  ;;  %15148 = vmatpush1.bf16.msra.mxu0 %v17633_v1  ;;  %v19185_v62 = vpop.f32.mrf.mxu0  ;;  %v11675_v1 = vld [vmem:[#allocation12 + $0x430] sm:$0xff] }
 0x852   :  { %15179 = vmatprep.mubr.bf16.mxu0 %v19052_v11  ;;  %15026 = vmatprep.subr.bf16.mxu1 %v17752_v63  ;;  %v11568_v11 = vld [vmem:[#allocation12 + $0xd8] sm:$0xff]  ;;  %v17704_v35 = vcombine.high %v11671_v34, %v11675_v1  ;;  %v17703_v59 = vcombine.low %v11671_v34, %v11675_v1 }
 0x853   :  { %v14857_v43 = vpop.f32.mrf.mxu0  ;;  %15149 = vmatprep.subr.bf16.mxu0 %v17626_v56  ;;  %v17602_v7 = vcombine.high %v11568_v11, %v11572_v19  ;;  %v17601_v55 = vcombine.low %v11568_v11, %v11572_v19  ;;  %v11544_v63 = vld [vmem:[#allocation12 + $0x18] sm:$0xff]  ;;  %v17585_v56 = vcombine.low %v11552_v47, %v11556_v10  ;;  %v11775_v11 = vld [vmem:[#allocation12 + $0x750] sm:$0xff] }
 0x854   :  { %15027 = vmatpush1.bf16.msra.mxu1 %v17751_v6  ;;  %v17578_v8 = vcombine.high %v11544_v63, %v11548_v53  ;;  %v11791_v6 = vld [vmem:[#allocation12 + $0x7d0] sm:$0xff]  ;;  %v17577_v16 = vcombine.low %v11544_v63, %v11548_v53 }
 0x855   :  { %15150 = vmatpush1.bf16.msra.mxu0 %v17625_v18  ;;  %v14858_v3 = vpop.f32.mrf.mxu0  ;;  %15028 = vmatprep.subr.bf16.mxu1 %v17744_v26  ;;  %v11795_v18 = vld [vmem:[#allocation12 + $0x7f0] sm:$0xff]  ;;  %v11664_v26 = vld [vmem:[#allocation12 + $0x3d8] sm:$0xff] }
 0x856   :  { %15151 = vmatprep.subr.bf16.mxu0 %v17618_v57  ;;  %v11668_v57 = vld [vmem:[#allocation12 + $0x3f8] sm:$0xff]  ;;  %v17824_v43 = vcombine.high %v11791_v6, %v11795_v18  ;;  %v11779_v19 = vld [vmem:[#allocation12 + $0x770] sm:$0xff] }
 0x857   :  { %v17698_v36 = vcombine.high %v11664_v26, %v11668_v57  ;;  %v11656_v3 = vld [vmem:[#allocation12 + $0x398] sm:$0xff]  ;;  %v17808_v12 = vcombine.high %v11775_v11, %v11779_v19  ;;  %v11759_v47 = vld [vmem:[#allocation12 + $0x6d0] sm:$0xff] }
 0x858   :  { %15029 = vmatpush1.bf16.msra.mxu1 %v17743_v29  ;;  %v11787_v29 = vld [vmem:[#allocation12 + $0x7b0] sm:$0xff] }
 0x859   :  { %15152 = vmatpush1.bf16.msra.mxu0 %v17617_v46  ;;  %15030 = vmatprep.subr.bf16.mxu1 %v17736_v13  ;;  %v11660_v46 = vld [vmem:[#allocation12 + $0x3b8] sm:$0xff]  ;;  %v17823_v13 = vcombine.low %v11791_v6, %v11795_v18  ;;  %v17816_v20 = vcombine.high %v11783_v45, %v11787_v29  ;;  %v11763_v10 = vld [vmem:[#allocation12 + $0x6f0] sm:$0xff] }
 0x85a   :  { %15153 = vmatprep.subr.bf16.mxu0 %v17610_v50  ;;  %v17697_v50 = vcombine.low %v11664_v26, %v11668_v57  ;;  %v17690_v21 = vcombine.high %v11656_v3, %v11660_v46  ;;  %v17792_v34 = vcombine.high %v11759_v47, %v11763_v10  ;;  %v11751_v63 = vld [vmem:[#allocation12 + $0x690] sm:$0xff] }
 0x85b   :  { %v11755_v53 = vld [vmem:[#allocation12 + $0x6b0] sm:$0xff] }
 0x85c   :  { %15031 = vmatpush1.bf16.msra.mxu1 %v17735_v51  ;;  %v11648_v51 = vld [vmem:[#allocation12 + $0x358] sm:$0xff]  ;;  %v17784_v6 = vcombine.high %v11751_v63, %v11755_v53  ;;  %v11743_v26 = vld [vmem:[#allocation12 + $0x650] sm:$0xff] }
 0x85d   :  { %15154 = vmatpush1.bf16.msra.mxu0 %v17609_v2  ;;  %15032 = vmatprep.subr.bf16.mxu1 %v17728_v49  ;;  %v11652_v2 = vld [vmem:[#allocation12 + $0x378] sm:$0xff]  ;;  %v17815_v49 = vcombine.low %v11783_v45, %v11787_v29  ;;  %v11747_v57 = vld [vmem:[#allocation12 + $0x670] sm:$0xff] }
 0x85e   :  { %15155 = vmatprep.subr.bf16.mxu0 %v17602_v7  ;;  %v17689_v7 = vcombine.low %v11656_v3, %v11660_v46  ;;  %v17682_v28 = vcombine.high %v11648_v51, %v11652_v2  ;;  %v17776_v45 = vcombine.high %v11743_v26, %v11747_v57  ;;  %v11735_v3 = vld [vmem:[#allocation12 + $0x610] sm:$0xff] }
 0x85f   :  { %v11739_v46 = vld [vmem:[#allocation12 + $0x630] sm:$0xff] }
 0x860   :  { %15033 = vmatpush1.bf16.msra.mxu1 %v17727_v25  ;;  %v11640_v25 = vld [vmem:[#allocation12 + $0x318] sm:$0xff] }
 0x861   :  { %15156 = vmatpush1.bf16.msra.mxu0 %v17601_v55  ;;  %15034 = vmatprep.subr.bf16.mxu1 %v17720_v23  ;;  %v11644_v55 = vld [vmem:[#allocation12 + $0x338] sm:$0xff]  ;;  %v17807_v23 = vcombine.low %v11775_v11, %v11779_v19  ;;  %v17768_v11 = vcombine.high %v11735_v3, %v11739_v46 }
 0x862   :  { %15157 = vmatprep.subr.bf16.mxu0 %v17594_v58  ;;  %v17681_v58 = vcombine.low %v11648_v51, %v11652_v2  ;;  %v17674_v60 = vcombine.high %v11640_v25, %v11644_v55  ;;  %v11983_v51 = vld [vmem:[#allocation12 + $0xdd0] sm:$0xff] }
 0x863   :  { %v11987_v2 = vld [vmem:[#allocation12 + $0xdf0] sm:$0xff] }
 0x864   :  { %15035 = vmatpush1.bf16.msra.mxu1 %v17719_v17  ;;  %v11632_v17 = vld [vmem:[#allocation12 + $0x2d8] sm:$0xff] }
 0x865   :  { %15158 = vmatpush1.bf16.msra.mxu0 %v17593_v24  ;;  %15036 = vmatprep.subr.bf16.mxu1 %v17712_v33  ;;  %v11636_v24 = vld [vmem:[#allocation12 + $0x2f8] sm:$0xff]  ;;  %v17799_v33 = vcombine.low %v11767_v4, %v11771_v5  ;;  %v18016_v4 = vcombine.high %v11983_v51, %v11987_v2 }
 0x866   :  { %15159 = vmatprep.subr.bf16.mxu0 %v17586_v14  ;;  %v17673_v14 = vcombine.low %v11640_v25, %v11644_v55  ;;  %v17666_v1 = vcombine.high %v11632_v17, %v11636_v24  ;;  %v11975_v25 = vld [vmem:[#allocation12 + $0xd90] sm:$0xff] }
 0x867   :  { %v11979_v55 = vld [vmem:[#allocation12 + $0xdb0] sm:$0xff] }
 0x868   :  { %15037 = vmatpush1.bf16.msra.mxu1 %v17711_v41  ;;  %v11624_v41 = vld [vmem:[#allocation12 + $0x298] sm:$0xff] }
 0x869   :  { %15160 = vmatpush1.bf16.msra.mxu0 %v17585_v56  ;;  %15038 = vmatprep.subr.bf16.mxu1 %v17704_v35  ;;  %v11628_v56 = vld [vmem:[#allocation12 + $0x2b8] sm:$0xff]  ;;  %v17791_v35 = vcombine.low %v11759_v47, %v11763_v10  ;;  %v18008_v47 = vcombine.high %v11975_v25, %v11979_v55  ;;  %v11967_v10 = vld [vmem:[#allocation12 + $0xd50] sm:$0xff] }
 0x86a   :  { %15161 = vmatprep.subr.bf16.mxu0 %v17578_v8  ;;  %v17665_v8 = vcombine.low %v11632_v17, %v11636_v24  ;;  %v17658_v18 = vcombine.high %v11624_v41, %v11628_v56  ;;  %v11971_v17 = vld [vmem:[#allocation12 + $0xd70] sm:$0xff] }
 0x86c   :  { %15039 = vmatpush1.bf16.msra.mxu1 %v17703_v59  ;;  %v11616_v59 = vld [vmem:[#allocation12 + $0x258] sm:$0xff] }
 0x86d   :  { %15162 = vmatpush1.bf16.msra.mxu0 %v17577_v16  ;;  %15040 = vmatprep.subr.bf16.mxu1 %v17824_v43  ;;  %v11620_v16 = vld [vmem:[#allocation12 + $0x278] sm:$0xff]  ;;  %v17783_v43 = vcombine.low %v11751_v63, %v11755_v53  ;;  %v18007_v53 = vcombine.low %v11975_v25, %v11979_v55  ;;  %v11935_v25 = vld [vmem:[#allocation12 + $0xc50] sm:$0xff] }
 0x86e   :  { %15163 = vmatprep.subr.bf16.mxu0 %v17698_v36  ;;  %v17657_v36 = vcombine.low %v11624_v41, %v11628_v56  ;;  %v17650_v29 = vcombine.high %v11616_v59, %v11620_v16  ;;  %v11939_v55 = vld [vmem:[#allocation12 + $0xc70] sm:$0xff] }
 0x870   :  { %15041 = vmatpush2.bf16.msra.mxu1 %v17823_v13  ;;  %v11608_v13 = vld [vmem:[#allocation12 + $0x218] sm:$0xff] }
 0x871   :  { %15164 = vmatpush2.bf16.msra.mxu0 %v17697_v50  ;;  %15042 = vmatprep.subr.bf16.mxu1 %v17816_v20  ;;  %v11612_v50 = vld [vmem:[#allocation12 + $0x238] sm:$0xff]  ;;  %v17775_v20 = vcombine.low %v11743_v26, %v11747_v57 }
 0x872   :  { %15165 = vmatprep.subr.bf16.mxu0 %v17690_v21  ;;  %v17649_v21 = vcombine.low %v11616_v59, %v11620_v16  ;;  %v17642_v19 = vcombine.high %v11608_v13, %v11612_v50  ;;  %v11832_v57 = vld [vmem:[#allocation12 + $0x918] sm:$0xff]  ;;  %v17999_v16 = vcombine.low %v11967_v10, %v11971_v17 }
 0x873   :  { %v11836_v59 = vld [vmem:[#allocation12 + $0x938] sm:$0xff] }
 0x874   :  { %15043 = vmatpush2.bf16.msra.mxu1 %v17815_v49  ;;  %v11856_v49 = vld [vmem:[#allocation12 + $0x9d8] sm:$0xff] }
 0x875   :  { %15166 = vmatpush2.bf16.msra.mxu0 %v17689_v7  ;;  %15044 = vmatprep.subr.bf16.mxu1 %v17808_v12  ;;  %v11860_v7 = vld [vmem:[#allocation12 + $0x9f8] sm:$0xff]  ;;  %v17767_v12 = vcombine.low %v11735_v3, %v11739_v46  ;;  %v17866_v3 = vcombine.high %v11832_v57, %v11836_v59  ;;  %v11955_v46 = vld [vmem:[#allocation12 + $0xcf0] sm:$0xff] }
 0x876   :  { %15167 = vmatprep.subr.bf16.mxu0 %v17682_v28  ;;  %v17641_v28 = vcombine.low %v11608_v13, %v11612_v50  ;;  %v17890_v5 = vcombine.high %v11856_v49, %v11860_v7  ;;  %v11824_v13 = vld [vmem:[#allocation12 + $0x8d8] sm:$0xff] }
 0x877   :  { %v11828_v50 = vld [vmem:[#allocation12 + $0x8f8] sm:$0xff] }
 0x878   :  { %15045 = vmatpush2.bf16.msra.mxu1 %v17807_v23  ;;  %v18015_v23 = vcombine.low %v11983_v51, %v11987_v2  ;;  %v11943_v51 = vld [vmem:[#allocation12 + $0xc90] sm:$0xff] }
 0x879   :  { %15168 = vmatpush2.bf16.msra.mxu0 %v17681_v58  ;;  %15046 = vmatprep.subr.bf16.mxu1 %v17800_v40  ;;  %v11848_v58 = vld [vmem:[#allocation12 + $0x998] sm:$0xff]  ;;  %v11947_v2 = vld [vmem:[#allocation12 + $0xcb0] sm:$0xff] }
 0x87a   :  { %15169 = vmatprep.subr.bf16.mxu0 %v17674_v60  ;;  %v11852_v40 = vld [vmem:[#allocation12 + $0x9b8] sm:$0xff]  ;;  %v17889_v60 = vcombine.low %v11856_v49, %v11860_v7 }
 0x87b   :  { %v11816_v49 = vld [vmem:[#allocation12 + $0x898] sm:$0xff] }
 0x87c   :  { %15047 = vmatpush2.bf16.msra.mxu1 %v17799_v33  ;;  %v11820_v7 = vld [vmem:[#allocation12 + $0x8b8] sm:$0xff] }
 0x87d   :  { %15170 = vmatpush2.bf16.msra.mxu0 %v17673_v14  ;;  %15048 = vmatprep.subr.bf16.mxu1 %v17792_v34  ;;  %v17882_v14 = vcombine.high %v11848_v58, %v11852_v40  ;;  %v11840_v34 = vld [vmem:[#allocation12 + $0x958] sm:$0xff] }
 0x87e   :  { %15171 = vmatprep.subr.bf16.mxu0 %v17666_v1  ;;  %v11844_v1 = vld [vmem:[#allocation12 + $0x978] sm:$0xff] }
 0x880   :  { %15049 = vmatpush2.bf16.msra.mxu1 %v17791_v35  ;;  %v17881_v35 = vcombine.low %v11848_v58, %v11852_v40  ;;  %v11812_v58 = vld [vmem:[#allocation12 + $0x878] sm:$0xff]  ;;  %v17975_v40 = vcombine.low %v11943_v51, %v11947_v2 }
 0x881   :  { %15172 = vmatpush2.bf16.msra.mxu0 %v17665_v8  ;;  %15050 = vmatprep.subr.bf16.mxu1 %v17784_v6  ;;  %v18000_v8 = vcombine.high %v11967_v10, %v11971_v17  ;;  %v17874_v6 = vcombine.high %v11840_v34, %v11844_v1  ;;  %v11927_v17 = vld [vmem:[#allocation12 + $0xc10] sm:$0xff] }
 0x882   :  { %15173 = vmatprep.subr.bf16.mxu0 %v17658_v18  ;;  %v11959_v18 = vld [vmem:[#allocation12 + $0xd10] sm:$0xff] }
 0x884   :  { %15051 = vmatpush2.bf16.msra.mxu1 %v17783_v43 }
 0x885   :  { %15174 = vmatpush2.bf16.msra.mxu0 %v17657_v36  ;;  %15052 = vmatprep.subr.bf16.mxu1 %v17776_v45  ;;  %v17873_v45 = vcombine.low %v11840_v34, %v11844_v1  ;;  %v11804_v34 = vld [vmem:[#allocation12 + $0x838] sm:$0xff]  ;;  %v17967_v1 = vcombine.low %v11935_v25, %v11939_v55 }
 0x886   :  { %15175 = vmatprep.subr.bf16.mxu0 %v17650_v29 }
 0x888   :  { %15053 = vmatpush2.bf16.msra.mxu1 %v17775_v20 }
 0x889   :  { %15176 = vmatpush2.bf16.msra.mxu0 %v17649_v21  ;;  %15054 = vmatprep.subr.bf16.mxu1 %v17768_v11  ;;  %v17865_v21 = vcombine.low %v11832_v57, %v11836_v59 }
 0x88a   :  { %15177 = vmatprep.subr.bf16.mxu0 %v17642_v19  ;;  %v17858_v19 = vcombine.high %v11824_v13, %v11828_v50 }
 0x88c   :  { %15055 = vmatpush2.bf16.msra.mxu1 %v17767_v12 }
 0x88d   :  { %15178 = vmatpush2.bf16.msra.mxu0 %v17641_v28  ;;  %15106 = vmatprep.subr.bf16.mxu1 %v18016_v4  ;;  %v17857_v28 = vcombine.low %v11824_v13, %v11828_v50  ;;  %v17976_v4 = vcombine.high %v11943_v51, %v11947_v2  ;;  %v12031_v50 = vld [vmem:[#allocation12 + $0xf50] sm:$0xff] }
 0x88e   :  { %15229 = vmatprep.subr.bf16.mxu0 %v17890_v5  ;;  %v17850_v5 = vcombine.high %v11816_v49, %v11820_v7 }
 0x88f   :  { %v19188_v24 = vpop.f32.mrf.mxu0  ;;  %15057 = vmatmul.mubr.bf16.vlgmr.msra.gmra.mxu1 %v19111_v30  ;;  %v14812_v33 = vpop.f32.mrf.mxu1 }
 0x890   :  { %15180 = vmatmul.mubr.bf16.vlgmr.msra.gmra.mxu0 %v19064_v44  ;;  %v19193_v63 = vadd.f32 %v14812_v33, %v19174_v32  ;;  %15107 = vmatpush1.bf16.msra.mxu1 %v18015_v23  ;;  %v11963_v44 = vld [vmem:[#allocation12 + $0xd30] sm:$0xff]  ;;  %v11808_v23 = vld [vmem:[#allocation12 + $0x858] sm:$0xff] }
 0x891   :  { %15138 = vmatprep.mubr.bf16.mxu1 %v19156_v42  ;;  %15230 = vmatpush1.bf16.msra.mxu0 %v17889_v60  ;;  %v19196_v41 = vpop.f32.mrf.mxu0  ;;  %v19198_v56 = vpop.f32.mrf.mxu1  ;;  %v17992_v29 = vcombine.high %v11959_v18, %v11963_v44  ;;  %v17991_v20 = vcombine.low %v11959_v18, %v11963_v44  ;;  %v17849_v60 = vcombine.low %v11816_v49, %v11820_v7  ;;  %v11931_v33 = vld [vmem:[#allocation12 + $0xc30] sm:$0xff]  ;;  %v11920_v44 = vld [vmem:[#allocation12 + $0xbd8] sm:$0xff] }
 0x892   :  { %15261 = vmatprep.mubr.bf16.mxu0 %v19120_v37  ;;  %15108 = vmatprep.subr.bf16.mxu1 %v18008_v47  ;;  %v11951_v37 = vld [vmem:[#allocation12 + $0xcd0] sm:$0xff]  ;;  %v17968_v47 = vcombine.high %v11935_v25, %v11939_v55  ;;  %v17842_v10 = vcombine.high %v11808_v23, %v11812_v58 }
 0x893   :  { %v14939_v26 = vpop.f32.mrf.mxu0  ;;  %15231 = vmatprep.subr.bf16.mxu0 %v17882_v14  ;;  %v14816_v32 = vpop.f32.mrf.mxu1  ;;  %v17984_v11 = vcombine.high %v11951_v37, %v11955_v46  ;;  %v17983_v12 = vcombine.low %v11951_v37, %v11955_v46  ;;  %v11800_v14 = vld [vmem:[#allocation12 + $0x818] sm:$0xff]  ;;  %v12051_v18 = vld [vmem:[#allocation12 + $0xff0] sm:$0xff] }
 0x894   :  { %15109 = vmatpush1.bf16.msra.mxu1 %v18007_v53  ;;  %v17841_v53 = vcombine.low %v11808_v23, %v11812_v58  ;;  %v11924_v26 = vld [vmem:[#allocation12 + $0xbf8] sm:$0xff]  ;;  %v17959_v32 = vcombine.low %v11927_v17, %v11931_v33  ;;  %v17833_v57 = vcombine.low %v11800_v14, %v11804_v34  ;;  %v12023_v7 = vld [vmem:[#allocation12 + $0xf10] sm:$0xff] }
 0x895   :  { %15232 = vmatpush1.bf16.msra.mxu0 %v17881_v35  ;;  %v14940_v43 = vpop.f32.mrf.mxu0  ;;  %v14817_v36 = vpop.f32.mrf.mxu1  ;;  %15110 = vmatprep.subr.bf16.mxu1 %v18000_v8  ;;  %v17960_v35 = vcombine.high %v11927_v17, %v11931_v33  ;;  %v17834_v8 = vcombine.high %v11800_v14, %v11804_v34  ;;  %v17953_v37 = vcombine.low %v11920_v44, %v11924_v26  ;;  %v12015_v58 = vld [vmem:[#allocation12 + $0xed0] sm:$0xff] }
 0x896   :  { %15233 = vmatprep.subr.bf16.mxu0 %v17874_v6  ;;  %v12047_v6 = vld [vmem:[#allocation12 + $0xfd0] sm:$0xff] }
 0x897   :  { %v18080_v59 = vcombine.high %v12047_v6, %v12051_v18  ;;  %v12039_v43 = vld [vmem:[#allocation12 + $0xf90] sm:$0xff] }
 0x898   :  { %15111 = vmatpush1.bf16.msra.mxu1 %v17999_v16  ;;  %v17954_v16 = vcombine.high %v11920_v44, %v11924_v26  ;;  %v12043_v36 = vld [vmem:[#allocation12 + $0xfb0] sm:$0xff] }
 0x899   :  { %15234 = vmatpush1.bf16.msra.mxu0 %v17873_v45  ;;  %15112 = vmatprep.subr.bf16.mxu1 %v17992_v29  ;;  %v11912_v45 = vld [vmem:[#allocation12 + $0xb98] sm:$0xff]  ;;  %v18072_v46 = vcombine.high %v12039_v43, %v12043_v36  ;;  %v12007_v34 = vld [vmem:[#allocation12 + $0xe90] sm:$0xff] }
 0x89a   :  { %15235 = vmatprep.subr.bf16.mxu0 %v17866_v3  ;;  %v11916_v29 = vld [vmem:[#allocation12 + $0xbb8] sm:$0xff]  ;;  %v18079_v3 = vcombine.low %v12047_v6, %v12051_v18  ;;  %v11999_v26 = vld [vmem:[#allocation12 + $0xe50] sm:$0xff] }
 0x89b   :  { %v17946_v13 = vcombine.high %v11912_v45, %v11916_v29  ;;  %v17945_v51 = vcombine.low %v11912_v45, %v11916_v29  ;;  %v11991_v29 = vld [vmem:[#allocation12 + $0xe10] sm:$0xff] }
 0x89c   :  { %15113 = vmatpush1.bf16.msra.mxu1 %v17991_v20  ;;  %v12035_v20 = vld [vmem:[#allocation12 + $0xf70] sm:$0xff] }
 0x89d   :  { %15236 = vmatpush1.bf16.msra.mxu0 %v17865_v21  ;;  %15114 = vmatprep.subr.bf16.mxu1 %v17984_v11  ;;  %v11904_v21 = vld [vmem:[#allocation12 + $0xb58] sm:$0xff]  ;;  %v18064_v2 = vcombine.high %v12031_v50, %v12035_v20 }
 0x89e   :  { %15237 = vmatprep.subr.bf16.mxu0 %v17858_v19  ;;  %v11908_v11 = vld [vmem:[#allocation12 + $0xb78] sm:$0xff]  ;;  %v18071_v19 = vcombine.low %v12039_v43, %v12043_v36 }
 0x89f   :  { %v17938_v49 = vcombine.high %v11904_v21, %v11908_v11  ;;  %v17937_v25 = vcombine.low %v11904_v21, %v11908_v11  ;;  %v11728_v11 = vld [vmem:[#allocation12 + $0x5d8] sm:$0xff] }
 0x8a0   :  { %15115 = vmatpush1.bf16.msra.mxu1 %v17983_v12  ;;  %v12027_v12 = vld [vmem:[#allocation12 + $0xf30] sm:$0xff] }
 0x8a1   :  { %15238 = vmatpush1.bf16.msra.mxu0 %v17857_v28  ;;  %15116 = vmatprep.subr.bf16.mxu1 %v17976_v4  ;;  %v11896_v28 = vld [vmem:[#allocation12 + $0xb18] sm:$0xff]  ;;  %v18056_v55 = vcombine.high %v12023_v7, %v12027_v12 }
 0x8a2   :  { %15239 = vmatprep.subr.bf16.mxu0 %v17850_v5  ;;  %v11900_v4 = vld [vmem:[#allocation12 + $0xb38] sm:$0xff]  ;;  %v18063_v5 = vcombine.low %v12031_v50, %v12035_v20 }
 0x8a3   :  { %v17930_v23 = vcombine.high %v11896_v28, %v11900_v4  ;;  %v17929_v17 = vcombine.low %v11896_v28, %v11900_v4  ;;  %v18256_v4 = vld [vmem:[%s19463_s9 + $0x78] sm:$0xff]  }
 0x8a4   :  { %15117 = vmatpush1.bf16.msra.mxu1 %v17975_v40  ;;  %v12019_v40 = vld [vmem:[#allocation12 + $0xef0] sm:$0xff] }
 0x8a5   :  { %15240 = vmatpush1.bf16.msra.mxu0 %v17849_v60  ;;  %15118 = vmatprep.subr.bf16.mxu1 %v17968_v47  ;;  %v11888_v60 = vld [vmem:[#allocation12 + $0xad8] sm:$0xff]  ;;  %v18048_v33 = vcombine.high %v12015_v58, %v12019_v40 }
 0x8a6   :  { %15241 = vmatprep.subr.bf16.mxu0 %v17842_v10  ;;  %v11892_v47 = vld [vmem:[#allocation12 + $0xaf8] sm:$0xff]  ;;  %v18055_v10 = vcombine.low %v12023_v7, %v12027_v12  ;;  %v19203_v12 = vld [vmem:[#allocation13] sm:$0xff] }
 0x8a7   :  { %v17922_v14 = vcombine.high %v11888_v60, %v11892_v47  ;;  %v17921_v6 = vcombine.low %v11888_v60, %v11892_v47  ;;  %v12066_v28 = vrot.slane %v19203_v12, %v18731_v48  ;;  %v11716_v60 = vld [vmem:[#allocation12 + $0x578] sm:$0xff] }
 0x8a8   :  { %15119 = vmatpush1.bf16.msra.mxu1 %v17967_v1  ;;  %v12011_v1 = vld [vmem:[#allocation12 + $0xeb0] sm:$0xff] }
 0x8a9   :  { %15242 = vmatpush1.bf16.msra.mxu0 %v17841_v53  ;;  %15120 = vmatprep.subr.bf16.mxu1 %v17960_v35  ;;  %v11880_v53 = vld [vmem:[#allocation12 + $0xa98] sm:$0xff]  ;;  %v18040_v18 = vcombine.high %v12007_v34, %v12011_v1  ;;  %v14854_v48 = vadd.f32 %v19180_v15, %v12066_v28  ;;  %v18268_v28 = vld [vmem:[%s19463_s9 + $0x48] sm:$0xff]  }
 0x8aa   :  { %15243 = vmatprep.subr.bf16.mxu0 %v17834_v8  ;;  %v11884_v35 = vld [vmem:[#allocation12 + $0xab8] sm:$0xff]  ;;  %v18047_v8 = vcombine.low %v12015_v58, %v12019_v40 }
 0x8ab   :  { %v17914_v44 = vcombine.high %v11880_v53, %v11884_v35  ;;  %v17913_v43 = vcombine.low %v11880_v53, %v11884_v35  ;;  %v11712_v40 = vld [vmem:[#allocation12 + $0x558] sm:$0xff] }
 0x8ac   :  { %15121 = vmatpush1.bf16.msra.mxu1 %v17959_v32  ;;  %v12003_v32 = vld [vmem:[#allocation12 + $0xe70] sm:$0xff]  ;;  %v17746_v53 = vcombine.high %v11712_v40, %v11716_v60 }
 0x8ad   :  { %15244 = vmatpush1.bf16.msra.mxu0 %v17833_v57  ;;  %15122 = vmatprep.subr.bf16.mxu1 %v18080_v59  ;;  %v11872_v57 = vld [vmem:[#allocation12 + $0xa58] sm:$0xff]  ;;  %v18032_v36 = vcombine.high %v11999_v26, %v12003_v32 }
 0x8ae   :  { %15245 = vmatprep.subr.bf16.mxu0 %v17954_v16  ;;  %v11876_v59 = vld [vmem:[#allocation12 + $0xa78] sm:$0xff]  ;;  %v18039_v16 = vcombine.low %v12007_v34, %v12011_v1 }
 0x8af   :  { %v17906_v45 = vcombine.high %v11872_v57, %v11876_v59  ;;  %v17905_v50 = vcombine.low %v11872_v57, %v11876_v59  ;;  %v18259_v1 = vld [vmem:[%s19463_s9 + $0x30] sm:$0xff]   ;;  %v18261_v57 = vld [vmem:[%s19463_s9 + $0x28] sm:$0xff]  }
 0x8b0   :  { %15123 = vmatpush2.bf16.msra.mxu1 %v18079_v3  ;;  %v11995_v3 = vld [vmem:[#allocation12 + $0xe30] sm:$0xff] }
 0x8b1   :  { %15246 = vmatpush2.bf16.msra.mxu0 %v17953_v37  ;;  %15124 = vmatprep.subr.bf16.mxu1 %v18072_v46  ;;  %v11864_v37 = vld [vmem:[#allocation12 + $0xa18] sm:$0xff]  ;;  %v18024_v20 = vcombine.high %v11991_v29, %v11995_v3 }
 0x8b2   :  { %15247 = vmatprep.subr.bf16.mxu0 %v17946_v13  ;;  %v11868_v46 = vld [vmem:[#allocation12 + $0xa38] sm:$0xff]  ;;  %v18031_v13 = vcombine.low %v11999_v26, %v12003_v32 }
 0x8b3   :  { %v17898_v21 = vcombine.high %v11864_v37, %v11868_v46 }
 0x8b4   :  { %15125 = vmatpush2.bf16.msra.mxu1 %v18071_v19  ;;  %v11732_v19 = vld [vmem:[#allocation12 + $0x5f8] sm:$0xff] }
 0x8b5   :  { %15248 = vmatpush2.bf16.msra.mxu0 %v17945_v51  ;;  %15126 = vmatprep.subr.bf16.mxu1 %v18064_v2  ;;  %v14815_v51 = vadd.f32 %v19198_v56, %v19178_v38  ;;  %v18023_v2 = vcombine.low %v11991_v29, %v11995_v3  ;;  %v17762_v7 = vcombine.high %v11728_v11, %v11732_v19  ;;  %v11720_v38 = vld [vmem:[#allocation12 + $0x598] sm:$0xff]  ;;  %v18263_v29 = vld [vmem:[%s19463_s9 + $0x20] sm:$0xff]  }
 0x8b6   :  { %15249 = vmatprep.subr.bf16.mxu0 %v17938_v49  ;;  %v17897_v49 = vcombine.low %v11864_v37, %v11868_v46  ;;  %v11724_v56 = vld [vmem:[#allocation12 + $0x5b8] sm:$0xff]  ;;  %v18264_v37 = vld [vmem:[%s19463_s9 + $0x58] sm:$0xff]  }
 0x8b7   :  { %v17754_v58 = vcombine.high %v11720_v38, %v11724_v56  ;;  %v17753_v15 = vcombine.low %v11720_v38, %v11724_v56  ;;  %v11688_v46 = vld [vmem:[#allocation12 + $0x498] sm:$0xff]  ;;  %v18269_v56 = vld [vmem:[%s19463_s9 + $0x8] sm:$0xff]  }
 0x8b8   :  { %15127 = vmatpush2.bf16.msra.mxu1 %v18063_v5  ;;  %v12070_v5 = vrot.slane %v19203_v12, %v18734_v52 }
 0x8b9   :  { %15250 = vmatpush2.bf16.msra.mxu0 %v17937_v25  ;;  %15128 = vmatprep.subr.bf16.mxu1 %v18056_v55  ;;  %v15312_v25 = vmax.f32 %v14815_v51, 0.0  ;;  %v17761_v55 = vcombine.low %v11728_v11, %v11732_v19  ;;  %v18266_v11 = vld [vmem:[%s19463_s9 + $0x50] sm:$0xff]  }
 0x8ba   :  { %15251 = vmatprep.subr.bf16.mxu0 %v17930_v23  ;;  %v18257_v23 = vld [vmem:[%s19463_s9 + $0x38] sm:$0xff]   ;;  %v14856_v47 = vadd.f32 %v19185_v62, %v12070_v5  ;;  %v11680_v19 = vld [vmem:[#allocation12 + $0x458] sm:$0xff] }
 0x8bb   :  { %v11684_v51 = vld [vmem:[#allocation12 + $0x478] sm:$0xff] }
 0x8bc   :  { %15129 = vmatpush2.bf16.msra.mxu1 %v18055_v10  ;;  %v11676_v5 = vld [vmem:[#allocation12 + $0x438] sm:$0xff]  ;;  %v17713_v38 = vcombine.low %v11680_v19, %v11684_v51 }
 0x8bd   :  { %15252 = vmatpush2.bf16.msra.mxu0 %v17929_v17  ;;  %15130 = vmatprep.subr.bf16.mxu1 %v18048_v33  ;;  %v18258_v17 = vld [vmem:[%s19463_s9 + $0x70] sm:$0xff]   ;;  %v15320_v33 = vpack.c.bf16 %v15312_v25, %v15312_v25 }
 0x8be   :  { %15253 = vmatprep.subr.bf16.mxu0 %v17922_v14 }
 0x8c0   :  { %15131 = vmatpush2.bf16.msra.mxu1 %v18047_v8  ;;  %v11704_v8 = vld [vmem:[#allocation12 + $0x518] sm:$0xff] }
 0x8c1   :  { %15254 = vmatpush2.bf16.msra.mxu0 %v17921_v6  ;;  %15132 = vmatprep.subr.bf16.mxu1 %v18040_v18  ;;  %v11708_v6 = vld [vmem:[#allocation12 + $0x538] sm:$0xff] }
 0x8c2   :  { %15255 = vmatprep.subr.bf16.mxu0 %v17914_v44  ;;  %v17745_v44 = vcombine.low %v11712_v40, %v11716_v60  ;;  %v17738_v59 = vcombine.high %v11704_v8, %v11708_v6  ;;  %v18271_v40 = vld [vmem:[%s19463_s9] sm:$0xff]  }
 0x8c4   :  { %15133 = vmatpush2.bf16.msra.mxu1 %v18039_v16  ;;  %v18262_v16 = vld [vmem:[%s19463_s9 + $0x60] sm:$0xff]  }
 0x8c5   :  { %15256 = vmatpush2.bf16.msra.mxu0 %v17913_v43  ;;  %15134 = vmatprep.subr.bf16.mxu1 %v18032_v36  ;;  %v11696_v43 = vld [vmem:[#allocation12 + $0x4d8] sm:$0xff] }
 0x8c6   :  { %15257 = vmatprep.subr.bf16.mxu0 %v17906_v45  ;;  %v11700_v36 = vld [vmem:[#allocation12 + $0x4f8] sm:$0xff]  ;;  %v17737_v45 = vcombine.low %v11704_v8, %v11708_v6  ;;  %v18289_v8 = vld [vmem:[%s19463_s9 + $0x138] sm:$0xff]  }
 0x8c7   :  { %v17730_v3 = vcombine.high %v11696_v43, %v11700_v36 }
 0x8c8   :  { %15135 = vmatpush2.bf16.msra.mxu1 %v18031_v13  ;;  %v11692_v13 = vld [vmem:[#allocation12 + $0x4b8] sm:$0xff] }
 0x8c9   :  { %15258 = vmatpush2.bf16.msra.mxu0 %v17905_v50  ;;  %15136 = vmatprep.subr.bf16.mxu1 %v18024_v20  ;;  %v17729_v50 = vcombine.low %v11696_v43, %v11700_v36  ;;  %v18265_v20 = vld [vmem:[%s19463_s9 + $0x18] sm:$0xff]   ;;  %v11764_v43 = vld [vmem:[#allocation12 + $0x6f8] sm:$0xff]  ;;  %v18293_v36 = vld [vmem:[%s19463_s9 + $0x128] sm:$0xff]  }
 0x8ca   :  { %15259 = vmatprep.subr.bf16.mxu0 %v17898_v21  ;;  %v17722_v21 = vcombine.high %v11688_v46, %v11692_v13 }
 0x8cc   :  { %15137 = vmatpush2.bf16.msra.mxu1 %v18023_v2  ;;  %v17721_v2 = vcombine.low %v11688_v46, %v11692_v13  ;;  %v11756_v46 = vld [vmem:[#allocation12 + $0x6b8] sm:$0xff]  ;;  %v18295_v13 = vld [vmem:[%s19463_s9 + $0x120] sm:$0xff]  }
 0x8cd   :  { %15260 = vmatpush2.bf16.msra.mxu0 %v17897_v49  ;;  %15188 = vmatprep.subr.bf16.mxu1 %v17762_v7  ;;  %v18267_v49 = vld [vmem:[%s19463_s9 + $0x10] sm:$0xff]   ;;  %v17714_v7 = vcombine.high %v11680_v19, %v11684_v51  ;;  %v18297_v51 = vld [vmem:[%s19463_s9 + $0x118] sm:$0xff]  }
 0x8ce   :  { %18149 = vmatprep.subr.bf16.mxu0 %v18256_v4  ;;  %v11672_v4 = vld [vmem:[#allocation12 + $0x418] sm:$0xff] }
 0x8cf   :  { %v14894_v52 = vpop.f32.mrf.mxu1  ;;  %v19217_v10 = vpop.f32.mrf.mxu0  ;;  %15139 = vmatmul.mubr.bf16.vlgmr.msra.gmra.mxu1 %v19158_v39  ;;  %v17706_v25 = vcombine.high %v11672_v4, %v11676_v5  ;;  %v11748_v19 = vld [vmem:[#allocation12 + $0x678] sm:$0xff] }
 0x8d0   :  { %v19223_v14 = vadd.f32 %v14894_v52, %v14854_v48  ;;  %15262 = vmatmul.mubr.bf16.vlgmr.msra.gmra.mxu0 %v19122_v31  ;;  %15189 = vmatpush1.bf16.msra.mxu1 %v17761_v55  ;;  %v18260_v31 = vld [vmem:[%s19463_s9 + $0x68] sm:$0xff]   ;;  %v18270_v55 = vld [vmem:[%s19463_s9 + $0x40] sm:$0xff]   ;;  %v11796_v48 = vld [vmem:[#allocation12 + $0x7f8] sm:$0xff] }
 0x8d1   :  { %15220 = vmatprep.mubr.bf16.mxu1 %v19095_v27  ;;  %18150 = vmatpush3.bf16.msra.mxu0 %v18257_v23  ;;  %v14896_v62 = vpop.f32.mrf.mxu1  ;;  %v19227_v34 = vpop.f32.mrf.mxu0  ;;  %v11792_v23 = vld [vmem:[#allocation12 + $0x7d8] sm:$0xff] }
 0x8d2   :  { %15878 = vmatprep.mubr.bf16.mxu0 %v15320_v33  ;;  %v19232_v35 = vadd.f32 %v14896_v62, %v14856_v47  ;;  %15190 = vmatprep.subr.bf16.mxu1 %v17754_v58  ;;  %v17705_v58 = vcombine.low %v11672_v4, %v11676_v5  ;;  %v17826_v60 = vcombine.high %v11792_v23, %v11796_v48  ;;  %v15311_v47 = vmax.f32 %v19193_v63, 0.0  ;;  %v11784_v52 = vld [vmem:[#allocation12 + $0x798] sm:$0xff] }
 0x8d3   :  { %v14898_v27 = vpop.f32.mrf.mxu1  ;;  %v15021_v18 = vpop.f32.mrf.mxu0  ;;  %18151 = vmatprep.subr.bf16.mxu0 %v18258_v17  ;;  %v11788_v17 = vld [vmem:[#allocation12 + $0x7b8] sm:$0xff]  ;;  %v17825_v33 = vcombine.low %v11792_v23, %v11796_v48 }
 0x8d4   :  { %15191 = vmatpush1.bf16.msra.mxu1 %v17753_v15  ;;  %v17818_v15 = vcombine.high %v11784_v52, %v11788_v17  ;;  %v15319_v62 = vpack.c.bf16 %v15311_v47, %v15311_v47  ;;  %v18290_v63 = vld [vmem:[%s19463_s9 + $0x170] sm:$0xff]   ;;  %v17817_v6 = vcombine.low %v11784_v52, %v11788_v17  ;;  %v14936_v52 = vadd.f32 %v19188_v24, %v19223_v14  ;;  %v18300_v24 = vld [vmem:[%s19463_s9 + $0x148] sm:$0xff]  }
 0x8d5   :  { %18152 = vmatpush3.bf16.msra.mxu0 %v18259_v1  ;;  %v14899_v26 = vpop.f32.mrf.mxu1  ;;  %v15022_v32 = vpop.f32.mrf.mxu0  ;;  %15192 = vmatprep.subr.bf16.mxu1 %v17746_v53  ;;  %v11776_v1 = vld [vmem:[#allocation12 + $0x758] sm:$0xff] }
 0x8d6   :  { %18153 = vmatprep.subr.bf16.mxu0 %v18260_v31  ;;  %v11780_v53 = vld [vmem:[#allocation12 + $0x778] sm:$0xff]  ;;  %v18288_v31 = vld [vmem:[%s19463_s9 + $0x178] sm:$0xff]   ;;  %v18292_v32 = vld [vmem:[%s19463_s9 + $0x168] sm:$0xff]  }
 0x8d7   :  { %v17810_v27 = vcombine.high %v11776_v1, %v11780_v53  ;;  %v11768_v18 = vld [vmem:[#allocation12 + $0x718] sm:$0xff] }
 0x8d8   :  { %15193 = vmatpush1.bf16.msra.mxu1 %v17745_v44  ;;  %v11772_v44 = vld [vmem:[#allocation12 + $0x738] sm:$0xff] }
 0x8d9   :  { %18154 = vmatpush3.bf16.msra.mxu0 %v18261_v57  ;;  %15194 = vmatprep.subr.bf16.mxu1 %v17738_v59  ;;  %v18291_v26 = vld [vmem:[%s19463_s9 + $0x130] sm:$0xff]   ;;  %v17809_v57 = vcombine.low %v11776_v1, %v11780_v53  ;;  %v17802_v59 = vcombine.high %v11768_v18, %v11772_v44 }
 0x8da   :  { %18155 = vmatprep.subr.bf16.mxu0 %v18262_v16  ;;  %v11760_v16 = vld [vmem:[#allocation12 + $0x6d8] sm:$0xff] }
 0x8db   :  { %v11740_v4 = vld [vmem:[#allocation12 + $0x638] sm:$0xff] }
 0x8dc   :  { %15195 = vmatpush1.bf16.msra.mxu1 %v17737_v45  ;;  %v18294_v45 = vld [vmem:[%s19463_s9 + $0x160] sm:$0xff]   ;;  %v18299_v5 = vld [vmem:[%s19463_s9 + $0x110] sm:$0xff]  }
 0x8dd   :  { %18156 = vmatpush3.bf16.msra.mxu0 %v18263_v29  ;;  %15196 = vmatprep.subr.bf16.mxu1 %v17730_v3  ;;  %v17801_v29 = vcombine.low %v11768_v18, %v11772_v44  ;;  %v17794_v3 = vcombine.high %v11760_v16, %v11764_v43  ;;  %v11968_v17 = vld [vmem:[#allocation12 + $0xd58] sm:$0xff] }
 0x8de   :  { %18157 = vmatprep.subr.bf16.mxu0 %v18264_v37  ;;  %v11752_v37 = vld [vmem:[#allocation12 + $0x698] sm:$0xff] }
 0x8e0   :  { %15197 = vmatpush1.bf16.msra.mxu1 %v17729_v50  ;;  %v18296_v50 = vld [vmem:[%s19463_s9 + $0x158] sm:$0xff]  }
 0x8e1   :  { %18158 = vmatpush3.bf16.msra.mxu0 %v18265_v20  ;;  %15198 = vmatprep.subr.bf16.mxu1 %v17722_v21  ;;  %v17793_v20 = vcombine.low %v11760_v16, %v11764_v43  ;;  %v17786_v21 = vcombine.high %v11752_v37, %v11756_v46  ;;  %v11956_v16 = vld [vmem:[#allocation12 + $0xcf8] sm:$0xff]  ;;  %v18303_v43 = vld [vmem:[%s19463_s9 + $0x100] sm:$0xff]  }
 0x8e2   :  { %18159 = vmatprep.subr.bf16.mxu0 %v18266_v11  ;;  %v11744_v11 = vld [vmem:[#allocation12 + $0x658] sm:$0xff] }
 0x8e4   :  { %15199 = vmatpush1.bf16.msra.mxu1 %v17721_v2  ;;  %v18298_v2 = vld [vmem:[%s19463_s9 + $0x150] sm:$0xff]  }
 0x8e5   :  { %18160 = vmatpush3.bf16.msra.mxu0 %v18267_v49  ;;  %15200 = vmatprep.subr.bf16.mxu1 %v17714_v7  ;;  %v17785_v49 = vcombine.low %v11752_v37, %v11756_v46  ;;  %v17778_v7 = vcombine.high %v11744_v11, %v11748_v19 }
 0x8e6   :  { %18161 = vmatprep.subr.bf16.mxu0 %v18268_v28  ;;  %v11736_v28 = vld [vmem:[#allocation12 + $0x618] sm:$0xff] }
 0x8e7   :  { %v17769_v23 = vcombine.low %v11736_v28, %v11740_v4 }
 0x8e8   :  { %15201 = vmatpush1.bf16.msra.mxu1 %v17713_v38  ;;  %v17777_v38 = vcombine.low %v11744_v11, %v11748_v19  ;;  %v11928_v11 = vld [vmem:[#allocation12 + $0xc18] sm:$0xff] }
 0x8e9   :  { %18162 = vmatpush3.bf16.msra.mxu0 %v18269_v56  ;;  %15202 = vmatprep.subr.bf16.mxu1 %v17706_v25  ;;  %v17770_v56 = vcombine.high %v11736_v28, %v11740_v4  ;;  %v11984_v25 = vld [vmem:[#allocation12 + $0xdd8] sm:$0xff] }
 0x8ea   :  { %18163 = vmatprep.subr.bf16.mxu0 %v18270_v55  ;;  %v11988_v55 = vld [vmem:[#allocation12 + $0xdf8] sm:$0xff] }
 0x8eb   :  { %v18018_v48 = vcombine.high %v11984_v25, %v11988_v55  ;;  %v11932_v19 = vld [vmem:[#allocation12 + $0xc38] sm:$0xff] }
 0x8ec   :  { %15203 = vmatpush1.bf16.msra.mxu1 %v17705_v58  ;;  %v11976_v58 = vld [vmem:[#allocation12 + $0xd98] sm:$0xff]  ;;  %v17961_v28 = vcombine.low %v11928_v11, %v11932_v19 }
 0x8ed   :  { %18164 = vmatpush3.bf16.msra.mxu0 %v18271_v40  ;;  %15204 = vmatprep.subr.bf16.mxu1 %v17826_v60  ;;  %v11980_v40 = vld [vmem:[#allocation12 + $0xdb8] sm:$0xff]  ;;  %v18017_v60 = vcombine.low %v11984_v25, %v11988_v55 }
 0x8ee   :  { %18193 = vmatprep.subr.bf16.mxu0 %v18288_v31  ;;  %v18010_v47 = vcombine.high %v11976_v58, %v11980_v40  ;;  %v18009_v53 = vcombine.low %v11976_v58, %v11980_v40  ;;  %v12032_v55 = vld [vmem:[#allocation12 + $0xf58] sm:$0xff] }
 0x8ef   :  { %v12024_v40 = vld [vmem:[#allocation12 + $0xf18] sm:$0xff] }
 0x8f0   :  { %15879 = vmatmul.mubr.bf16.vlgmr.msra.gmra.mxu0 %v15319_v62  ;;  %15205 = vmatpush2.bf16.msra.mxu1 %v17825_v33  ;;  %v11972_v33 = vld [vmem:[#allocation12 + $0xd78] sm:$0xff] }
 0x8f1   :  { %15206 = vmatprep.subr.bf16.mxu1 %v17818_v15  ;;  %18194 = vmatpush3.bf16.msra.mxu0 %v18289_v8  ;;  %v18002_v8 = vcombine.high %v11968_v17, %v11972_v33  ;;  %v18001_v18 = vcombine.low %v11968_v17, %v11972_v33  ;;  %v12016_v17 = vld [vmem:[#allocation12 + $0xed8] sm:$0xff] }
 0x8f2   :  { %18195 = vmatprep.subr.bf16.mxu0 %v18290_v63  ;;  %v11960_v63 = vld [vmem:[#allocation12 + $0xd18] sm:$0xff] }
 0x8f3   :  { %v12020_v33 = vld [vmem:[#allocation12 + $0xef8] sm:$0xff] }
 0x8f4   :  { %15207 = vmatpush2.bf16.msra.mxu1 %v17817_v6  ;;  %v18301_v6 = vld [vmem:[%s19463_s9 + $0x108] sm:$0xff]  }
 0x8f5   :  { %15208 = vmatprep.subr.bf16.mxu1 %v17810_v27  ;;  %18196 = vmatpush3.bf16.msra.mxu0 %v18291_v26 }
 0x8f6   :  { %18197 = vmatprep.subr.bf16.mxu0 %v18292_v32  ;;  %v18302_v32 = vld [vmem:[%s19463_s9 + $0x140] sm:$0xff]  }
 0x8f8   :  { %15209 = vmatpush2.bf16.msra.mxu1 %v17809_v57 }
 0x8f9   :  { %15210 = vmatprep.subr.bf16.mxu1 %v17802_v59  ;;  %18198 = vmatpush3.bf16.msra.mxu0 %v18293_v36  ;;  %v11952_v59 = vld [vmem:[#allocation12 + $0xcd8] sm:$0xff] }
 0x8fa   :  { %18199 = vmatprep.subr.bf16.mxu0 %v18294_v45  ;;  %v17986_v45 = vcombine.high %v11952_v59, %v11956_v16  ;;  %v17985_v37 = vcombine.low %v11952_v59, %v11956_v16 }
 0x8fc   :  { %15211 = vmatpush2.bf16.msra.mxu1 %v17801_v29  ;;  %v11944_v29 = vld [vmem:[#allocation12 + $0xc98] sm:$0xff] }
 0x8fd   :  { %15212 = vmatprep.subr.bf16.mxu1 %v17794_v3  ;;  %18200 = vmatpush3.bf16.msra.mxu0 %v18295_v13  ;;  %v11948_v3 = vld [vmem:[#allocation12 + $0xcb8] sm:$0xff] }
 0x8fe   :  { %18201 = vmatprep.subr.bf16.mxu0 %v18296_v50  ;;  %v17978_v46 = vcombine.high %v11944_v29, %v11948_v3  ;;  %v11936_v13 = vld [vmem:[#allocation12 + $0xc58] sm:$0xff] }
 0x8ff   :  { %v11940_v50 = vld [vmem:[#allocation12 + $0xc78] sm:$0xff] }
 0x900   :  { %15213 = vmatpush2.bf16.msra.mxu1 %v17793_v20  ;;  %v17977_v20 = vcombine.low %v11944_v29, %v11948_v3 }
 0x901   :  { %15214 = vmatprep.subr.bf16.mxu1 %v17786_v21  ;;  %18202 = vmatpush3.bf16.msra.mxu0 %v18297_v51  ;;  %v17970_v21 = vcombine.high %v11936_v13, %v11940_v50  ;;  %v17969_v51 = vcombine.low %v11936_v13, %v11940_v50  ;;  %v18275_v50 = vld [vmem:[%s19463_s9 + $0xb0] sm:$0xff]  }
 0x902   :  { %18203 = vmatprep.subr.bf16.mxu0 %v18298_v2  ;;  %v17962_v2 = vcombine.high %v11928_v11, %v11932_v19 }
 0x904   :  { %15215 = vmatpush2.bf16.msra.mxu1 %v17785_v49  ;;  %v12048_v49 = vld [vmem:[#allocation12 + $0xfd8] sm:$0xff] }
 0x905   :  { %15216 = vmatprep.subr.bf16.mxu1 %v17778_v7  ;;  %18204 = vmatpush3.bf16.msra.mxu0 %v18299_v5  ;;  %v12052_v7 = vld [vmem:[#allocation12 + $0xff8] sm:$0xff] }
 0x906   :  { %18205 = vmatprep.subr.bf16.mxu0 %v18300_v24  ;;  %v18082_v4 = vcombine.high %v12048_v49, %v12052_v7  ;;  %v12040_v5 = vld [vmem:[#allocation12 + $0xf98] sm:$0xff] }
 0x907   :  { %v12012_v24 = vld [vmem:[#allocation12 + $0xeb8] sm:$0xff] }
 0x908   :  { %15217 = vmatpush2.bf16.msra.mxu1 %v17777_v38  ;;  %v12044_v38 = vld [vmem:[#allocation12 + $0xfb8] sm:$0xff] }
 0x909   :  { %15218 = vmatprep.subr.bf16.mxu1 %v17770_v56  ;;  %18206 = vmatpush3.bf16.msra.mxu0 %v18301_v6  ;;  %v18081_v56 = vcombine.low %v12048_v49, %v12052_v7  ;;  %v18074_v25 = vcombine.high %v12040_v5, %v12044_v38  ;;  %v12000_v6 = vld [vmem:[#allocation12 + $0xe58] sm:$0xff]  ;;  %v18278_v7 = vld [vmem:[%s19463_s9 + $0xe0] sm:$0xff]  }
 0x90a   :  { %18207 = vmatprep.subr.bf16.mxu0 %v18302_v32  ;;  %v14938_v32 = vadd.f32 %v19196_v41, %v19232_v35  ;;  %v12078_v41 = vrot.slane %v19203_v12, %v18785_v9  ;;  %v18273_v35 = vld [vmem:[%s19463_s9 + $0xb8] sm:$0xff]  }
 0x90c   :  { %15219 = vmatpush2.bf16.msra.mxu1 %v17769_v23  ;;  %v12036_v23 = vld [vmem:[#allocation12 + $0xf78] sm:$0xff] }
 0x90d   :  { %15270 = vmatprep.subr.bf16.mxu1 %v18018_v48  ;;  %18208 = vmatpush3.bf16.msra.mxu0 %v18303_v43  ;;  %v18073_v48 = vcombine.low %v12040_v5, %v12044_v38  ;;  %v18066_v58 = vcombine.high %v12032_v55, %v12036_v23  ;;  %v18282_v5 = vld [vmem:[%s19463_s9 + $0xd0] sm:$0xff]  }
 0x90e   :  { %v18283_v38 = vld [vmem:[%s19463_s9 + $0x90] sm:$0xff]  }
 0x90f   :  { %v14976_v15 = vpop.f32.mrf.mxu1  ;;  %15221 = vmatmul.mubr.bf16.vlgmr.msra.gmra.mxu1 %v19111_v30  ;;  %v11964_v30 = vld [vmem:[#allocation12 + $0xd38] sm:$0xff] }
 0x910   :  { %v19310_v62 = vadd.f32 %v14976_v15, %v14936_v52  ;;  %v19312_v1 = vpop.f32.mrf.mxu0  ;;  %15271 = vmatpush1.bf16.msra.mxu1 %v18017_v60  ;;  %15302 = vmatprep.mubr.bf16.mxu1 %v19156_v42  ;;  %v17994_v26 = vcombine.high %v11960_v63, %v11964_v30  ;;  %v17993_v36 = vcombine.low %v11960_v63, %v11964_v30  ;;  %v12028_v60 = vld [vmem:[#allocation12 + $0xf38] sm:$0xff] }
 0x911   :  { %v19315_v31 = vpop.f32.mrf.mxu1  ;;  %15272 = vmatprep.subr.bf16.mxu1 %v18010_v47  ;;  %v18065_v47 = vcombine.low %v12032_v55, %v12036_v23  ;;  %v18058_v52 = vcombine.high %v12024_v40, %v12028_v60  ;;  %v18057_v15 = vcombine.low %v12024_v40, %v12028_v60  ;;  %v18049_v63 = vcombine.low %v12016_v17, %v12020_v33  ;;  %v18286_v55 = vld [vmem:[%s19463_s9 + $0xc0] sm:$0xff]   ;;  %v18305_v40 = vld [vmem:[%s19463_s9 + $0x1b8] sm:$0xff]  }
 0x912   :  { %v19320_v14 = vpop.f32.mrf.mxu0  ;;  %v14979_v16 = vadd.f32 %v19315_v31, %v14938_v32  ;;  %v18274_v31 = vld [vmem:[%s19463_s9 + $0xf0] sm:$0xff]   ;;  %v18287_v23 = vld [vmem:[%s19463_s9 + $0x80] sm:$0xff]   ;;  %v18317_v32 = vld [vmem:[%s19463_s9 + $0x188] sm:$0xff]  }
 0x913   :  { %v14980_v27 = vpop.f32.mrf.mxu1 }
 0x914   :  { %v15103_v42 = vpop.f32.mrf.mxu0  ;;  %15273 = vmatpush1.bf16.msra.mxu1 %v18009_v53  ;;  %v18050_v53 = vcombine.high %v12016_v17, %v12020_v33  ;;  %v12004_v27 = vld [vmem:[#allocation12 + $0xe78] sm:$0xff]  ;;  %v15314_v29 = vmax.f32 %v14979_v16, 0.0  ;;  %v18309_v17 = vld [vmem:[%s19463_s9 + $0x1a8] sm:$0xff]   ;;  %v18310_v33 = vld [vmem:[%s19463_s9 + $0x1e0] sm:$0xff]  }
 0x915   :  { %v14981_v44 = vpop.f32.mrf.mxu1  ;;  %15274 = vmatprep.subr.bf16.mxu1 %v18002_v8  ;;  %v12008_v8 = vld [vmem:[#allocation12 + $0xe98] sm:$0xff] }
 0x916   :  { %v15104_v57 = vpop.f32.mrf.mxu0  ;;  %v18042_v30 = vcombine.high %v12008_v8, %v12012_v24  ;;  %v18041_v42 = vcombine.low %v12008_v8, %v12012_v24  ;;  %v11992_v44 = vld [vmem:[#allocation12 + $0xe18] sm:$0xff]  ;;  %v18313_v8 = vld [vmem:[%s19463_s9 + $0x198] sm:$0xff]  }
 0x917   :  { %v18033_v57 = vcombine.low %v12000_v6, %v12004_v27  ;;  %v18314_v24 = vld [vmem:[%s19463_s9 + $0x1d0] sm:$0xff]  }
 0x918   :  { %15275 = vmatpush1.bf16.msra.mxu1 %v18001_v18  ;;  %v18034_v18 = vcombine.high %v12000_v6, %v12004_v27 }
 0x919   :  { %15276 = vmatprep.subr.bf16.mxu1 %v17994_v26  ;;  %v11996_v26 = vld [vmem:[#allocation12 + $0xe38] sm:$0xff] }
 0x91a   :  { %v18026_v59 = vcombine.high %v11992_v44, %v11996_v26  ;;  %v18025_v43 = vcombine.low %v11992_v44, %v11996_v26 }
 0x91c   :  { %15277 = vmatpush1.bf16.msra.mxu1 %v17993_v36  ;;  %v18272_v36 = vld [vmem:[%s19463_s9 + $0xf8] sm:$0xff]  }
 0x91d   :  { %15278 = vmatprep.subr.bf16.mxu1 %v17986_v45  ;;  %v12074_v45 = vrot.slane %v19203_v12, %v18763_v54  ;;  %v15020_v54 = vadd.f32 %v19227_v34, %v12078_v41 }
 0x91f   :  { %v15018_v3 = vadd.f32 %v19217_v10, %v12074_v45  ;;  %v18276_v10 = vld [vmem:[%s19463_s9 + $0xe8] sm:$0xff]   ;;  %v18318_v45 = vld [vmem:[%s19463_s9 + $0x1c0] sm:$0xff]  }
 0x920   :  { %15279 = vmatpush1.bf16.msra.mxu1 %v17985_v37  ;;  %v15322_v37 = vpack.c.bf16 %v15314_v29, %v15314_v29 }
 0x921   :  { %15280 = vmatprep.subr.bf16.mxu1 %v17978_v46 }
 0x924   :  { %15281 = vmatpush1.bf16.msra.mxu1 %v17977_v20 }
 0x925   :  { %15282 = vmatprep.subr.bf16.mxu1 %v17970_v21 }
 0x928   :  { %15283 = vmatpush1.bf16.msra.mxu1 %v17969_v51  ;;  %v18277_v51 = vld [vmem:[%s19463_s9 + $0xa8] sm:$0xff]  }
 0x929   :  { %15284 = vmatprep.subr.bf16.mxu1 %v17962_v2 }
 0x92c   :  { %15285 = vmatpush1.bf16.msra.mxu1 %v17961_v28 }
 0x92d   :  { %15286 = vmatprep.subr.bf16.mxu1 %v18082_v4  ;;  %v18280_v4 = vld [vmem:[%s19463_s9 + $0xd8] sm:$0xff]  }
 0x930   :  { %15287 = vmatpush2.bf16.msra.mxu1 %v18081_v56  ;;  %v18284_v56 = vld [vmem:[%s19463_s9 + $0xc8] sm:$0xff]  }
 0x931   :  { %15288 = vmatprep.subr.bf16.mxu1 %v18074_v25  ;;  %v18285_v25 = vld [vmem:[%s19463_s9 + $0x88] sm:$0xff]  }
 0x934   :  { %15289 = vmatpush2.bf16.msra.mxu1 %v18073_v48  ;;  %v15313_v48 = vmax.f32 %v19310_v62, 0.0  ;;  %v18307_v62 = vld [vmem:[%s19463_s9 + $0x1b0] sm:$0xff]  }
 0x935   :  { %15290 = vmatprep.subr.bf16.mxu1 %v18066_v58  ;;  %v18304_v58 = vld [vmem:[%s19463_s9 + $0x1f8] sm:$0xff]  }
 0x936   :  { %v15321_v60 = vpack.c.bf16 %v15313_v48, %v15313_v48 }
 0x938   :  { %15291 = vmatpush2.bf16.msra.mxu1 %v18065_v47  ;;  %v18306_v47 = vld [vmem:[%s19463_s9 + $0x1f0] sm:$0xff]  }
 0x939   :  { %15292 = vmatprep.subr.bf16.mxu1 %v18058_v52  ;;  %v18308_v52 = vld [vmem:[%s19463_s9 + $0x1e8] sm:$0xff]  }
 0x93c   :  { %15293 = vmatpush2.bf16.msra.mxu1 %v18057_v15  ;;  %v18311_v15 = vld [vmem:[%s19463_s9 + $0x1a0] sm:$0xff]  }
 0x93d   :  { %15294 = vmatprep.subr.bf16.mxu1 %v18050_v53  ;;  %v18312_v53 = vld [vmem:[%s19463_s9 + $0x1d8] sm:$0xff]  }
 0x940   :  { %15295 = vmatpush2.bf16.msra.mxu1 %v18049_v63  ;;  %v18315_v63 = vld [vmem:[%s19463_s9 + $0x190] sm:$0xff]  }
 0x941   :  { %15296 = vmatprep.subr.bf16.mxu1 %v18042_v30 }
 0x944   :  { %15297 = vmatpush2.bf16.msra.mxu1 %v18041_v42 }
 0x945   :  { %15298 = vmatprep.subr.bf16.mxu1 %v18034_v18  ;;  %v18316_v18 = vld [vmem:[%s19463_s9 + $0x1c8] sm:$0xff]  }
 0x948   :  { %15299 = vmatpush2.bf16.msra.mxu1 %v18033_v57 }
 0x949   :  { %15300 = vmatprep.subr.bf16.mxu1 %v18026_v59 }
 0x94c   :  { %15301 = vmatpush2.bf16.msra.mxu1 %v18025_v43 }
 0x94d   :  { %18171 = vmatprep.subr.bf16.mxu1 %v18272_v36 }
 0x94f   :  { %v15058_v46 = vpop.f32.mrf.mxu1  ;;  %15303 = vmatmul.mubr.bf16.vlgmr.msra.gmra.mxu1 %v19158_v39 }
 0x950   :  { %v15059_v13 = vadd.f32 %v15058_v46, %v15018_v3  ;;  %v19350_v9 = vpop.f32.mrf.mxu0  ;;  %18172 = vmatpush3.bf16.msra.mxu1 %v18273_v35  ;;  %15918 = vmatprep.mubr.bf16.mxu1 %v15322_v37  ;;  %v18319_v35 = vld [vmem:[%s19463_s9 + $0x180] sm:$0xff]  }
 0x951   :  { %v15060_v20 = vpop.f32.mrf.mxu1  ;;  %18173 = vmatprep.subr.bf16.mxu1 %v18274_v31 }
 0x952   :  { %v15061_v21 = vadd.f32 %v15060_v20, %v15020_v54  ;;  %v19358_v11 = vpop.f32.mrf.mxu0  ;;  %v15100_v39 = vadd.f32 %v19312_v1, %v15059_v13  ;;  %v18279_v1 = vld [vmem:[%s19463_s9 + $0xa0] sm:$0xff]   ;;  %v12086_v20 = vrot.slane %v19203_v12, %v18833_v0 }
 0x953   :  { %v15062_v34 = vpop.f32.mrf.mxu1 }
 0x954   :  { %v15185_v19 = vpop.f32.mrf.mxu0  ;;  %18174 = vmatpush3.bf16.msra.mxu1 %v18275_v50  ;;  %v15102_v2 = vadd.f32 %v19320_v14, %v15061_v21  ;;  %v18281_v14 = vld [vmem:[%s19463_s9 + $0x98] sm:$0xff]   ;;  %v12082_v50 = vrot.slane %v19203_v12, %v18830_v61 }
 0x955   :  { %v15063_v49 = vpop.f32.mrf.mxu1  ;;  %18175 = vmatprep.subr.bf16.mxu1 %v18276_v10 }
 0x956   :  { %v15186_v28 = vpop.f32.mrf.mxu0  ;;  %v15182_v10 = vadd.f32 %v19350_v9, %v12082_v50 }
 0x958   :  { %18176 = vmatpush3.bf16.msra.mxu1 %v18277_v51 }
 0x959   :  { %18177 = vmatprep.subr.bf16.mxu1 %v18278_v7 }
 0x95c   :  { %18178 = vmatpush3.bf16.msra.mxu1 %v18279_v1 }
 0x95d   :  { %18179 = vmatprep.subr.bf16.mxu1 %v18280_v4 }
 0x960   :  { %18180 = vmatpush3.bf16.msra.mxu1 %v18281_v14 }
 0x961   :  { %18181 = vmatprep.subr.bf16.mxu1 %v18282_v5 }
 0x964   :  { %18182 = vmatpush3.bf16.msra.mxu1 %v18283_v38 }
 0x965   :  { %18183 = vmatprep.subr.bf16.mxu1 %v18284_v56 }
 0x968   :  { %18184 = vmatpush3.bf16.msra.mxu1 %v18285_v25 }
 0x969   :  { %18185 = vmatprep.subr.bf16.mxu1 %v18286_v55 }
 0x96c   :  { %18186 = vmatpush3.bf16.msra.mxu1 %v18287_v23 }
 0x96d   :  { %18215 = vmatprep.subr.bf16.mxu1 %v18304_v58 }
 0x96f   :  { %15919 = vmatmul.mubr.bf16.vlgmr.msra.gmra.mxu1 %v15321_v60 }
 0x970   :  { %18216 = vmatpush3.bf16.msra.mxu1 %v18305_v40 }
 0x971   :  { %18217 = vmatprep.subr.bf16.mxu1 %v18306_v47 }
 0x974   :  { %18218 = vmatpush3.bf16.msra.mxu1 %v18307_v62 }
 0x975   :  { %18219 = vmatprep.subr.bf16.mxu1 %v18308_v52 }
 0x978   :  { %18220 = vmatpush3.bf16.msra.mxu1 %v18309_v17 }
 0x979   :  { %18221 = vmatprep.subr.bf16.mxu1 %v18310_v33 }
 0x97c   :  { %18222 = vmatpush3.bf16.msra.mxu1 %v18311_v15 }
 0x97d   :  { %18223 = vmatprep.subr.bf16.mxu1 %v18312_v53 }
 0x980   :  { %18224 = vmatpush3.bf16.msra.mxu1 %v18313_v8 }
 0x981   :  { %18225 = vmatprep.subr.bf16.mxu1 %v18314_v24 }
 0x984   :  { %18226 = vmatpush3.bf16.msra.mxu1 %v18315_v63 }
 0x985   :  { %18227 = vmatprep.subr.bf16.mxu1 %v18316_v18 }
 0x988   :  { %18228 = vmatpush3.bf16.msra.mxu1 %v18317_v32 }
 0x989   :  { %18229 = vmatprep.subr.bf16.mxu1 %v18318_v45 }
 0x98c   :  { %18230 = vmatpush3.bf16.msra.mxu1 %v18319_v35 }
 0x98f   :  { %v15140_v30 = vpop.f32.mrf.mxu1 }
 0x990   :  { %v15141_v6 = vadd.f32 %v15140_v30, %v15100_v39  ;;  %v15263_v27 = vpop.f32.mrf.mxu0  ;;  %v15184_v39 = vadd.f32 %v19358_v11, %v12086_v20  ;;  %v18083_v11 = vld [vmem:[#allocation15] ss:$0 sm:$0xff] }
 0x991   :  { %v15142_v42 = vpop.f32.mrf.mxu1 }
 0x992   :  { %v15143_v44 = vadd.f32 %v15142_v42, %v15102_v2  ;;  %v15265_v26 = vpop.f32.mrf.mxu0  ;;  %v15315_v57 = vmax.f32 %v15141_v6, 0.0 }
 0x993   :  { %v15144_v59 = vpop.f32.mrf.mxu1 }
 0x994   :  { %v15316_v16 = vmax.f32 %v15143_v44, 0.0  ;;  %v15267_v43 = vpop.f32.mrf.mxu0  ;;  %v15323_v31 = vpack.c.bf16 %v15315_v57, %v15315_v57  ;;  %v16007_v44 = vand.u32 127, %v669_v22 }
 0x995   :  { %v15145_v36 = vpop.f32.mrf.mxu1 }
 0x996   :  { %v15324_v29 = vpack.c.bf16 %v15316_v16, %v15316_v16  ;;  %v15268_v41 = vpop.f32.mrf.mxu0  ;;  %vm16008_vm0 = vcmp.lt.s32.totalorder %v16007_v44, 8 }
 0x998   :  { %15958 = vmatprep.mubr.bf16.mxu0 %v15324_v29 }
 0x999   :  { %15959 = vmatmul.mubr.bf16.vlgmr.msra.gmra.mxu0 %v15323_v31 }
 0x9b0   :  { %v18165_v3 = vpop.f32.mrf.mxu0 }
 0x9b2   :  { %v18166_v37 = vpop.f32.mrf.mxu0 }
 0x9b3   :  { %v18167_v46 = vadd.f32 %v18166_v37, %v18165_v3 }
 0x9b4   :  { %v18168_v54 = vpop.f32.mrf.mxu0 }
 0x9b5   :  { %v15881_v23 = vadd.f32 %v18167_v46, %v18083_v11 }
 0x9b6   :  { %v18169_v13 = vpop.f32.mrf.mxu0 }
 0x9cf   :  { %v15222_v21 = vpop.f32.mrf.mxu1 }
 0x9d0   :  { %v15223_v34 = vadd.f32 %v15222_v21, %v15182_v10 }
 0x9d1   :  { %v15224_v19 = vpop.f32.mrf.mxu1 }
 0x9d2   :  { %v15225_v51 = vadd.f32 %v15224_v19, %v15184_v39  ;;  %v15264_v2 = vadd.f32 %v15263_v27, %v15223_v34 }
 0x9d3   :  { %v15226_v49 = vpop.f32.mrf.mxu1 }
 0x9d4   :  { %v15266_v7 = vadd.f32 %v15265_v26, %v15225_v51 }
 0x9d5   :  { %v15227_v28 = vpop.f32.mrf.mxu1 }
 0xa0f   :  { %v15304_v1 = vpop.f32.mrf.mxu1 }
 0xa10   :  { %v15305_v4 = vadd.f32 %v15304_v1, %v15264_v2 }
 0xa11   :  { %v15306_v14 = vpop.f32.mrf.mxu1 }
 0xa12   :  { %v15307_v5 = vadd.f32 %v15306_v14, %v15266_v7  ;;  %v15317_v61 = vmax.f32 %v15305_v4, 0.0 }
 0xa13   :  { %v15308_v38 = vpop.f32.mrf.mxu1 }
 0xa14   :  { %v15318_v56 = vmax.f32 %v15307_v5, 0.0  ;;  %v15325_v9 = vpack.c.bf16 %v15317_v61, %v15317_v61 }
 0xa15   :  { %v15309_v0 = vpop.f32.mrf.mxu1 }
 0xa16   :  { %v15326_v12 = vpack.c.bf16 %v15318_v56, %v15318_v56 }
 0xa18   :  { %15998 = vmatprep.mubr.bf16.mxu1 %v15326_v12 }
 0xa19   :  { %15999 = vmatmul.mubr.bf16.vlgmr.msra.gmra.mxu1 %v15325_v9 }
 0xa2f   :  { %v18187_v25 = vpop.f32.mrf.mxu1 }
 0xa31   :  { %v18188_v55 = vpop.f32.mrf.mxu1 }
 0xa32   :  { %v18189_v48 = vadd.f32 %v18188_v55, %v18187_v25 }
 0xa33   :  { %v18190_v58 = vpop.f32.mrf.mxu1 }
 0xa34   :  { %v15921_v40 = vadd.f32 %v18189_v48, %v15881_v23 }
 0xa35   :  { %v18191_v60 = vpop.f32.mrf.mxu1 }
 0xa59   :  { %v18209_v47 = vpop.f32.mrf.mxu0 }
 0xa5b   :  { %v18210_v62 = vpop.f32.mrf.mxu0 }
 0xa5c   :  { %v18211_v52 = vadd.f32 %v18210_v62, %v18209_v47 }
 0xa5d   :  { %v18212_v17 = vpop.f32.mrf.mxu0 }
 0xa5e   :  { %v15961_v33 = vadd.f32 %v18211_v52, %v15921_v40 }
 0xa5f   :  { %v18213_v15 = vpop.f32.mrf.mxu0 }
 0xad9   :  { %v18231_v53 = vpop.f32.mrf.mxu1 }
 0xadb   :  { %v18232_v8 = vpop.f32.mrf.mxu1 }
 0xadc   :  { %v18233_v24 = vadd.f32 %v18232_v8, %v18231_v53 }
 0xadd   :  { %v18234_v63 = vpop.f32.mrf.mxu1 }
 0xade   :  { %v16001_v30 = vadd.f32 %v18233_v24, %v15961_v33 }
 0xadf   :  { %v18235_v6 = vpop.f32.mrf.mxu1 }
 0xae0   :  { %v18148_v27 = vmul.f32 -1.442695, %v16001_v30 }
 0xae2   :  { %18320 = vpow2.f32 %v18148_v27 }
 0xaef   :  { %v18321_v42 = vpop.eup %18320 }
 0xaf0   :  { %v16012_v18 = vadd.f32 1.0, %v18321_v42 }
 0xaf2   :  { %18322 = vrcp.f32 %v16012_v18 }
 0xaff   :  { %v18323_v26 = vpop.eup %18322 }
 0xb00   :  { %v16015_v32 = vsel %vm16008_vm0, %v16001_v30, %v18323_v26 }
 0xb01   :  { %16017 = vst.msk [vmem:[%s19465_s11] sm:$0xff] %vm16016_vm1, %v16015_v32 }
 0xb02   :  { %16022 = vsyncpa [#allocation3], 1 }
 0xb03   :  { %16023 = vsyncpa [#allocation5], 1 }
 0xb04   :  { %16024 = vsyncpa [#allocation8], 1 }
 0xb05   :  { %16025 = vsyncpa [#allocation11], 1 }
 0xb06   :  { %16026 = vsyncpa [#allocation14], 1 }

</bundles_post_ra>
